<compile_context>
chip_gen: v7x
topology: tpu7x:2x2x1
jax: 0.10.0
libtpu: 0.0.40
codegen_flags: <defaults>
</compile_context>

<pallas_src>
import jax
import jax.numpy as jnp
from jax.experimental import pallas as pl
from jax.experimental.pallas import tpu as pltpu

LAYER_WIDTH = [5, 512, 512, 512, 512, 512, 512, 512, 1]
N_LAYERS = len(LAYER_WIDTH) - 1   # 8 linear layers
K0_PAD = 8                        # pad 5 input features -> 8
OUT_PAD = 128                     # pad final 1-wide projection -> 128 lanes


def mlp_kernel(x_ref, *refs):
    """refs = [w0, b0, w1, b1, ..., w7, b7, out_ref] (all VMEM refs)."""
    out_ref = refs[-1]
    params = refs[:-1]
    h = x_ref[...].astype(jnp.float32)                      # (tn, K0_PAD)
    for i in range(N_LAYERS):
        w = params[2 * i][...]                              # bf16 (in_pad, out_pad)
        b = params[2 * i + 1][...]                          # f32  (1, out_pad)
        h = jnp.dot(h.astype(jnp.bfloat16), w,
                    preferred_element_type=jnp.float32) + b
        h = jnp.maximum(h, 0.0)   # ReLU after every Linear (spec includes the last one)
        # TODO(synk): nn.Dropout(p=0.2) is identity here (eval mode); training-mode
        # dropout would need pltpu.prng_random_bits masking + 1/(1-p) rescale.
    # Lane-dense (tn, 128) store; only column 0 carries the real output.
    out_ref[...] = jnp.tanh(h).astype(out_ref.dtype)


def mlp_forward(x, weights, biases, *, tn=256):
    """x: (N, 5) float32. weights[i]: (in_i, out_i) f32. biases[i]: (out_i,) f32."""
    n, f_in = x.shape
    assert f_in == LAYER_WIDTH[0]

    # Pad batch to a multiple of tn and features 5 -> K0_PAD (zeros hit zero weight rows).
    n_pad = pl.cdiv(n, tn) * tn
    x_p = jnp.zeros((n_pad, K0_PAD), jnp.float32).at[:n, :f_in].set(
        x.astype(jnp.float32))

    # Fold padding + bf16 cast into the parameters (host-side layout plumbing).
    ws, bs = [], []
    for i, (w, b) in enumerate(zip(weights, biases)):
        k, m = w.shape
        k_pad = K0_PAD if i == 0 else k
        m_pad = OUT_PAD if i == N_LAYERS - 1 else m
        w_p = jnp.zeros((k_pad, m_pad), jnp.float32).at[:k, :m].set(w)
        b_p = jnp.zeros((1, m_pad), jnp.float32).at[:, :m].set(b.reshape(1, m))
        ws.append(w_p.astype(jnp.bfloat16))   # MXU-native operand dtype
        bs.append(b_p)                        # keep bias f32 (added to f32 accumulator)

    grid = (n_pad // tn,)

    in_specs = [pl.BlockSpec((tn, K0_PAD), lambda i: (i, 0))]
    flat_params = []
    for w, b in zip(ws, bs):
        # Constant index_map => block never changes; Mosaic DMAs these once and
        # they stay resident across the whole grid.
        in_specs.append(pl.BlockSpec(w.shape, lambda i: (0, 0)))
        in_specs.append(pl.BlockSpec(b.shape, lambda i: (0, 0)))
        flat_params.extend([w, b])

    out_spec = pl.BlockSpec((tn, OUT_PAD), lambda i: (i, 0))

    flops = 2 * n_pad * sum(a * b for a, b in zip(LAYER_WIDTH[:-1], LAYER_WIDTH[1:]))
    bytes_accessed = (sum(w.size * 2 + b.size * 4 for w, b in zip(ws, bs))
                      + x_p.size * 4 + n_pad * OUT_PAD * 4)
    cost = pl.CostEstimate(flops=flops,
                           transcendentals=n_pad * OUT_PAD,   # tanh
                           bytes_accessed=bytes_accessed)

    out = pl.pallas_call(
        mlp_kernel,
        out_shape=jax.ShapeDtypeStruct((n_pad, OUT_PAD), jnp.float32),
        grid_spec=pltpu.PrefetchScalarGridSpec(
            num_scalar_prefetch=0,
            grid=grid,
            in_specs=in_specs,
            out_specs=out_spec,
        ),
        compiler_params=pltpu.CompilerParams(
            dimension_semantics=("parallel",),
            vmem_limit_bytes=32 * 1024 * 1024,
        ),
        cost_estimate=cost,
    )(x_p, *flat_params)

    # Un-pad: drop batch padding and keep only the real output column.
    return out[:n, :1]


def init_params(key):
    """Deterministic init mirroring nn.utils.weight_norm(nn.Linear(i, o)).

    PyTorch Linear weight v has shape (out, in), U(-1/sqrt(in), 1/sqrt(in));
    weight_norm(dim=0): effective W[o, :] = g[o] * v[o, :] / ||v[o, :]||, with
    g initialized to ||v[o, :]|| (so W == v at init). For trained checkpoints,
    substitute the trained g into the same fold. Transposed to (in, out) for
    the kernel's h @ W convention.
    """
    weights, biases = [], []
    for li in range(N_LAYERS):
        fan_in, fan_out = LAYER_WIDTH[li], LAYER_WIDTH[li + 1]
        key, kv, kb = jax.random.split(key, 3)
        bound = 1.0 / jnp.sqrt(fan_in)
        v = jax.random.uniform(kv, (fan_out, fan_in), jnp.float32, -bound, bound)
        norm = jnp.linalg.norm(v, axis=1, keepdims=True)
        g = norm                               # weight_norm init: g = ||v||
        w_eff = (g / norm) * v                 # == v at init; general fold for trained g
        b = jax.random.uniform(kb, (fan_out,), jnp.float32, -bound, bound)
        weights.append(jnp.asarray(w_eff.T))   # (in, out)
        biases.append(b)                       # (out,)
    return weights, biases


if __name__ == "__main__":
    key = jax.random.PRNGKey(0)
    weights, biases = init_params(key)

    # Deterministic input: 512 points x 5 features -> grid of 2 tiles (tn=256),
    # so the batch axis can also shard across both TensorCores on v7x.
    x = jax.random.normal(jax.random.fold_in(key, 123), (512, 5), jnp.float32)

    out = mlp_forward(x, weights, biases, tn=256)
    out = jax.block_until_ready(out)
    assert out.shape == (512, 1) and out.dtype == jnp.float32
    assert bool(jnp.all(jnp.isfinite(out)))
    print("KERNEL_OK")
</pallas_src>

<mosaic_0001>
module attributes {stable_mosaic.version = 11 : i64} {
  func.func @mlp_kernel(%arg0: i32, %arg1: memref<256x8xf32, #tpu.memory_space<vmem>>, %arg2: memref<8x512xbf16, #tpu.memory_space<vmem>>, %arg3: memref<1x512xf32, #tpu.memory_space<vmem>>, %arg4: memref<512x512xbf16, #tpu.memory_space<vmem>>, %arg5: memref<1x512xf32, #tpu.memory_space<vmem>>, %arg6: memref<512x512xbf16, #tpu.memory_space<vmem>>, %arg7: memref<1x512xf32, #tpu.memory_space<vmem>>, %arg8: memref<512x512xbf16, #tpu.memory_space<vmem>>, %arg9: memref<1x512xf32, #tpu.memory_space<vmem>>, %arg10: memref<512x512xbf16, #tpu.memory_space<vmem>>, %arg11: memref<1x512xf32, #tpu.memory_space<vmem>>, %arg12: memref<512x512xbf16, #tpu.memory_space<vmem>>, %arg13: memref<1x512xf32, #tpu.memory_space<vmem>>, %arg14: memref<512x512xbf16, #tpu.memory_space<vmem>>, %arg15: memref<1x512xf32, #tpu.memory_space<vmem>>, %arg16: memref<512x128xbf16, #tpu.memory_space<vmem>>, %arg17: memref<1x128xf32, #tpu.memory_space<vmem>>, %arg18: memref<256x128xf32, #tpu.memory_space<vmem>>) attributes {dimension_semantics = [#tpu.dimension_semantics<parallel>], iteration_bounds = array<i64: 2>, scalar_prefetch = 0 : i64, scratch_operands = 0 : i64, tpu.core_type = #tpu.core_type<tc>, window_params = [{transform_indices = @transform_0, window_bounds = array<i64: 256, 8>}, {pipeline_mode = #tpu.pipeline_mode<synchronous>, transform_indices = @transform_1, window_bounds = array<i64: 8, 512>}, {pipeline_mode = #tpu.pipeline_mode<synchronous>, transform_indices = @transform_2, window_bounds = array<i64: 1, 512>}, {pipeline_mode = #tpu.pipeline_mode<synchronous>, transform_indices = @transform_3, window_bounds = array<i64: 512, 512>}, {pipeline_mode = #tpu.pipeline_mode<synchronous>, transform_indices = @transform_4, window_bounds = array<i64: 1, 512>}, {pipeline_mode = #tpu.pipeline_mode<synchronous>, transform_indices = @transform_5, window_bounds = array<i64: 512, 512>}, {pipeline_mode = #tpu.pipeline_mode<synchronous>, transform_indices = @transform_6, window_bounds = array<i64: 1, 512>}, {pipeline_mode = #tpu.pipeline_mode<synchronous>, transform_indices = @transform_7, window_bounds = array<i64: 512, 512>}, {pipeline_mode = #tpu.pipeline_mode<synchronous>, transform_indices = @transform_8, window_bounds = array<i64: 1, 512>}, {pipeline_mode = #tpu.pipeline_mode<synchronous>, transform_indices = @transform_9, window_bounds = array<i64: 512, 512>}, {pipeline_mode = #tpu.pipeline_mode<synchronous>, transform_indices = @transform_10, window_bounds = array<i64: 1, 512>}, {pipeline_mode = #tpu.pipeline_mode<synchronous>, transform_indices = @transform_11, window_bounds = array<i64: 512, 512>}, {pipeline_mode = #tpu.pipeline_mode<synchronous>, transform_indices = @transform_12, window_bounds = array<i64: 1, 512>}, {pipeline_mode = #tpu.pipeline_mode<synchronous>, transform_indices = @transform_13, window_bounds = array<i64: 512, 512>}, {pipeline_mode = #tpu.pipeline_mode<synchronous>, transform_indices = @transform_14, window_bounds = array<i64: 1, 512>}, {pipeline_mode = #tpu.pipeline_mode<synchronous>, transform_indices = @transform_15, window_bounds = array<i64: 512, 128>}, {pipeline_mode = #tpu.pipeline_mode<synchronous>, transform_indices = @transform_16, window_bounds = array<i64: 1, 128>}, {transform_indices = @transform_17, window_bounds = array<i64: 256, 128>}]} {
    %c0 = arith.constant 0 : index
    %c0_0 = arith.constant 0 : index
    %0 = vector.load %arg1[%c0, %c0_0] : memref<256x8xf32, #tpu.memory_space<vmem>>, vector<256x8xf32>
    %c0_1 = arith.constant 0 : index
    %c0_2 = arith.constant 0 : index
    %1 = vector.load %arg2[%c0_1, %c0_2] : memref<8x512xbf16, #tpu.memory_space<vmem>>, vector<8x512xbf16>
    %c0_3 = arith.constant 0 : index
    %c0_4 = arith.constant 0 : index
    %2 = vector.load %arg3[%c0_3, %c0_4] : memref<1x512xf32, #tpu.memory_space<vmem>>, vector<1x512xf32>
    %3 = arith.truncf %0 : vector<256x8xf32> to vector<256x8xbf16>
    %cst = arith.constant dense<0.000000e+00> : vector<256x512xf32>
    %4 = tpu.matmul %3, %1, %cst {dimension_numbers = #tpu.dot_dimension_numbers<[1], [0], [0], [1], [0, 0, 1, 1], [], []>} : vector<256x8xbf16>, vector<8x512xbf16>, vector<256x512xf32> -> vector<256x512xf32>
    %5 = vector.broadcast %2 : vector<1x512xf32> to vector<256x512xf32>
    %6 = arith.addf %4, %5 : vector<256x512xf32>
    %cst_5 = arith.constant 0.000000e+00 : f32
    %7 = vector.broadcast %cst_5 : f32 to vector<256x512xf32>
    %8 = arith.maximumf %6, %7 : vector<256x512xf32>
    %c0_6 = arith.constant 0 : index
    %c0_7 = arith.constant 0 : index
    %9 = vector.load %arg4[%c0_6, %c0_7] : memref<512x512xbf16, #tpu.memory_space<vmem>>, vector<512x512xbf16>
    %c0_8 = arith.constant 0 : index
    %c0_9 = arith.constant 0 : index
    %10 = vector.load %arg5[%c0_8, %c0_9] : memref<1x512xf32, #tpu.memory_space<vmem>>, vector<1x512xf32>
    %11 = arith.truncf %8 : vector<256x512xf32> to vector<256x512xbf16>
    %cst_10 = arith.constant dense<0.000000e+00> : vector<256x512xf32>
    %12 = tpu.matmul %11, %9, %cst_10 {dimension_numbers = #tpu.dot_dimension_numbers<[1], [0], [0], [1], [0, 0, 1, 1], [], []>} : vector<256x512xbf16>, vector<512x512xbf16>, vector<256x512xf32> -> vector<256x512xf32>
    %13 = vector.broadcast %10 : vector<1x512xf32> to vector<256x512xf32>
    %14 = arith.addf %12, %13 : vector<256x512xf32>
    %cst_11 = arith.constant 0.000000e+00 : f32
    %15 = vector.broadcast %cst_11 : f32 to vector<256x512xf32>
    %16 = arith.maximumf %14, %15 : vector<256x512xf32>
    %c0_12 = arith.constant 0 : index
    %c0_13 = arith.constant 0 : index
    %17 = vector.load %arg6[%c0_12, %c0_13] : memref<512x512xbf16, #tpu.memory_space<vmem>>, vector<512x512xbf16>
    %c0_14 = arith.constant 0 : index
    %c0_15 = arith.constant 0 : index
    %18 = vector.load %arg7[%c0_14, %c0_15] : memref<1x512xf32, #tpu.memory_space<vmem>>, vector<1x512xf32>
    %19 = arith.truncf %16 : vector<256x512xf32> to vector<256x512xbf16>
    %cst_16 = arith.constant dense<0.000000e+00> : vector<256x512xf32>
    %20 = tpu.matmul %19, %17, %cst_16 {dimension_numbers = #tpu.dot_dimension_numbers<[1], [0], [0], [1], [0, 0, 1, 1], [], []>} : vector<256x512xbf16>, vector<512x512xbf16>, vector<256x512xf32> -> vector<256x512xf32>
    %21 = vector.broadcast %18 : vector<1x512xf32> to vector<256x512xf32>
    %22 = arith.addf %20, %21 : vector<256x512xf32>
    %cst_17 = arith.constant 0.000000e+00 : f32
    %23 = vector.broadcast %cst_17 : f32 to vector<256x512xf32>
    %24 = arith.maximumf %22, %23 : vector<256x512xf32>
    %c0_18 = arith.constant 0 : index
    %c0_19 = arith.constant 0 : index
    %25 = vector.load %arg8[%c0_18, %c0_19] : memref<512x512xbf16, #tpu.memory_space<vmem>>, vector<512x512xbf16>
    %c0_20 = arith.constant 0 : index
    %c0_21 = arith.constant 0 : index
    %26 = vector.load %arg9[%c0_20, %c0_21] : memref<1x512xf32, #tpu.memory_space<vmem>>, vector<1x512xf32>
    %27 = arith.truncf %24 : vector<256x512xf32> to vector<256x512xbf16>
    %cst_22 = arith.constant dense<0.000000e+00> : vector<256x512xf32>
    %28 = tpu.matmul %27, %25, %cst_22 {dimension_numbers = #tpu.dot_dimension_numbers<[1], [0], [0], [1], [0, 0, 1, 1], [], []>} : vector<256x512xbf16>, vector<512x512xbf16>, vector<256x512xf32> -> vector<256x512xf32>
    %29 = vector.broadcast %26 : vector<1x512xf32> to vector<256x512xf32>
    %30 = arith.addf %28, %29 : vector<256x512xf32>
    %cst_23 = arith.constant 0.000000e+00 : f32
    %31 = vector.broadcast %cst_23 : f32 to vector<256x512xf32>
    %32 = arith.maximumf %30, %31 : vector<256x512xf32>
    %c0_24 = arith.constant 0 : index
    %c0_25 = arith.constant 0 : index
    %33 = vector.load %arg10[%c0_24, %c0_25] : memref<512x512xbf16, #tpu.memory_space<vmem>>, vector<512x512xbf16>
    %c0_26 = arith.constant 0 : index
    %c0_27 = arith.constant 0 : index
    %34 = vector.load %arg11[%c0_26, %c0_27] : memref<1x512xf32, #tpu.memory_space<vmem>>, vector<1x512xf32>
    %35 = arith.truncf %32 : vector<256x512xf32> to vector<256x512xbf16>
    %cst_28 = arith.constant dense<0.000000e+00> : vector<256x512xf32>
    %36 = tpu.matmul %35, %33, %cst_28 {dimension_numbers = #tpu.dot_dimension_numbers<[1], [0], [0], [1], [0, 0, 1, 1], [], []>} : vector<256x512xbf16>, vector<512x512xbf16>, vector<256x512xf32> -> vector<256x512xf32>
    %37 = vector.broadcast %34 : vector<1x512xf32> to vector<256x512xf32>
    %38 = arith.addf %36, %37 : vector<256x512xf32>
    %cst_29 = arith.constant 0.000000e+00 : f32
    %39 = vector.broadcast %cst_29 : f32 to vector<256x512xf32>
    %40 = arith.maximumf %38, %39 : vector<256x512xf32>
    %c0_30 = arith.constant 0 : index
    %c0_31 = arith.constant 0 : index
    %41 = vector.load %arg12[%c0_30, %c0_31] : memref<512x512xbf16, #tpu.memory_space<vmem>>, vector<512x512xbf16>
    %c0_32 = arith.constant 0 : index
    %c0_33 = arith.constant 0 : index
    %42 = vector.load %arg13[%c0_32, %c0_33] : memref<1x512xf32, #tpu.memory_space<vmem>>, vector<1x512xf32>
    %43 = arith.truncf %40 : vector<256x512xf32> to vector<256x512xbf16>
    %cst_34 = arith.constant dense<0.000000e+00> : vector<256x512xf32>
    %44 = tpu.matmul %43, %41, %cst_34 {dimension_numbers = #tpu.dot_dimension_numbers<[1], [0], [0], [1], [0, 0, 1, 1], [], []>} : vector<256x512xbf16>, vector<512x512xbf16>, vector<256x512xf32> -> vector<256x512xf32>
    %45 = vector.broadcast %42 : vector<1x512xf32> to vector<256x512xf32>
    %46 = arith.addf %44, %45 : vector<256x512xf32>
    %cst_35 = arith.constant 0.000000e+00 : f32
    %47 = vector.broadcast %cst_35 : f32 to vector<256x512xf32>
    %48 = arith.maximumf %46, %47 : vector<256x512xf32>
    %c0_36 = arith.constant 0 : index
    %c0_37 = arith.constant 0 : index
    %49 = vector.load %arg14[%c0_36, %c0_37] : memref<512x512xbf16, #tpu.memory_space<vmem>>, vector<512x512xbf16>
    %c0_38 = arith.constant 0 : index
    %c0_39 = arith.constant 0 : index
    %50 = vector.load %arg15[%c0_38, %c0_39] : memref<1x512xf32, #tpu.memory_space<vmem>>, vector<1x512xf32>
    %51 = arith.truncf %48 : vector<256x512xf32> to vector<256x512xbf16>
    %cst_40 = arith.constant dense<0.000000e+00> : vector<256x512xf32>
    %52 = tpu.matmul %51, %49, %cst_40 {dimension_numbers = #tpu.dot_dimension_numbers<[1], [0], [0], [1], [0, 0, 1, 1], [], []>} : vector<256x512xbf16>, vector<512x512xbf16>, vector<256x512xf32> -> vector<256x512xf32>
    %53 = vector.broadcast %50 : vector<1x512xf32> to vector<256x512xf32>
    %54 = arith.addf %52, %53 : vector<256x512xf32>
    %cst_41 = arith.constant 0.000000e+00 : f32
    %55 = vector.broadcast %cst_41 : f32 to vector<256x512xf32>
    %56 = arith.maximumf %54, %55 : vector<256x512xf32>
    %c0_42 = arith.constant 0 : index
    %c0_43 = arith.constant 0 : index
    %57 = vector.load %arg16[%c0_42, %c0_43] : memref<512x128xbf16, #tpu.memory_space<vmem>>, vector<512x128xbf16>
    %c0_44 = arith.constant 0 : index
    %c0_45 = arith.constant 0 : index
    %58 = vector.load %arg17[%c0_44, %c0_45] : memref<1x128xf32, #tpu.memory_space<vmem>>, vector<1x128xf32>
    %59 = arith.truncf %56 : vector<256x512xf32> to vector<256x512xbf16>
    %cst_46 = arith.constant dense<0.000000e+00> : vector<256x128xf32>
    %60 = tpu.matmul %59, %57, %cst_46 {dimension_numbers = #tpu.dot_dimension_numbers<[1], [0], [0], [1], [0, 0, 1, 1], [], []>} : vector<256x512xbf16>, vector<512x128xbf16>, vector<256x128xf32> -> vector<256x128xf32>
    %61 = vector.broadcast %58 : vector<1x128xf32> to vector<256x128xf32>
    %62 = arith.addf %60, %61 : vector<256x128xf32>
    %cst_47 = arith.constant 0.000000e+00 : f32
    %63 = vector.broadcast %cst_47 : f32 to vector<256x128xf32>
    %64 = arith.maximumf %62, %63 : vector<256x128xf32>
    %65 = math.tanh %64 : vector<256x128xf32>
    %c0_48 = arith.constant 0 : index
    %c0_49 = arith.constant 0 : index
    %66 = vector.load %arg18[%c0_48, %c0_49] : memref<256x128xf32, #tpu.memory_space<vmem>>, vector<256x128xf32>
    tpu.vector_store %arg18[%c0_48, %c0_49], %65 {strides = array<i32>} : memref<256x128xf32, #tpu.memory_space<vmem>>, vector<256x128xf32>,
    return
  }
  func.func @transform_0(%arg0: i32) -> (i32, i32) {
    %c0_i32 = arith.constant 0 : i32
    %c0_i32_0 = arith.constant 0 : i32
    return %arg0, %c0_i32 : i32, i32
  }
  func.func @transform_1(%arg0: i32) -> (i32, i32) {
    %c0_i32 = arith.constant 0 : i32
    %c0_i32_0 = arith.constant 0 : i32
    %c0_i32_1 = arith.constant 0 : i32
    return %c0_i32, %c0_i32_0 : i32, i32
  }
  func.func @transform_2(%arg0: i32) -> (i32, i32) {
    %c0_i32 = arith.constant 0 : i32
    %c0_i32_0 = arith.constant 0 : i32
    %c0_i32_1 = arith.constant 0 : i32
    return %c0_i32, %c0_i32_0 : i32, i32
  }
  func.func @transform_3(%arg0: i32) -> (i32, i32) {
    %c0_i32 = arith.constant 0 : i32
    %c0_i32_0 = arith.constant 0 : i32
    %c0_i32_1 = arith.constant 0 : i32
    return %c0_i32, %c0_i32_0 : i32, i32
  }
  func.func @transform_4(%arg0: i32) -> (i32, i32) {
    %c0_i32 = arith.constant 0 : i32
    %c0_i32_0 = arith.constant 0 : i32
    %c0_i32_1 = arith.constant 0 : i32
    return %c0_i32, %c0_i32_0 : i32, i32
  }
  func.func @transform_5(%arg0: i32) -> (i32, i32) {
    %c0_i32 = arith.constant 0 : i32
    %c0_i32_0 = arith.constant 0 : i32
    %c0_i32_1 = arith.constant 0 : i32
    return %c0_i32, %c0_i32_0 : i32, i32
  }
  func.func @transform_6(%arg0: i32) -> (i32, i32) {
    %c0_i32 = arith.constant 0 : i32
    %c0_i32_0 = arith.constant 0 : i32
    %c0_i32_1 = arith.constant 0 : i32
    return %c0_i32, %c0_i32_0 : i32, i32
  }
  func.func @transform_7(%arg0: i32) -> (i32, i32) {
    %c0_i32 = arith.constant 0 : i32
    %c0_i32_0 = arith.constant 0 : i32
    %c0_i32_1 = arith.constant 0 : i32
    return %c0_i32, %c0_i32_0 : i32, i32
  }
  func.func @transform_8(%arg0: i32) -> (i32, i32) {
    %c0_i32 = arith.constant 0 : i32
    %c0_i32_0 = arith.constant 0 : i32
    %c0_i32_1 = arith.constant 0 : i32
    return %c0_i32, %c0_i32_0 : i32, i32
  }
  func.func @transform_9(%arg0: i32) -> (i32, i32) {
    %c0_i32 = arith.constant 0 : i32
    %c0_i32_0 = arith.constant 0 : i32
    %c0_i32_1 = arith.constant 0 : i32
    return %c0_i32, %c0_i32_0 : i32, i32
  }
  func.func @transform_10(%arg0: i32) -> (i32, i32) {
    %c0_i32 = arith.constant 0 : i32
    %c0_i32_0 = arith.constant 0 : i32
    %c0_i32_1 = arith.constant 0 : i32
    return %c0_i32, %c0_i32_0 : i32, i32
  }
  func.func @transform_11(%arg0: i32) -> (i32, i32) {
    %c0_i32 = arith.constant 0 : i32
    %c0_i32_0 = arith.constant 0 : i32
    %c0_i32_1 = arith.constant 0 : i32
    return %c0_i32, %c0_i32_0 : i32, i32
  }
  func.func @transform_12(%arg0: i32) -> (i32, i32) {
    %c0_i32 = arith.constant 0 : i32
    %c0_i32_0 = arith.constant 0 : i32
    %c0_i32_1 = arith.constant 0 : i32
    return %c0_i32, %c0_i32_0 : i32, i32
  }
  func.func @transform_13(%arg0: i32) -> (i32, i32) {
    %c0_i32 = arith.constant 0 : i32
    %c0_i32_0 = arith.constant 0 : i32
    %c0_i32_1 = arith.constant 0 : i32
    return %c0_i32, %c0_i32_0 : i32, i32
  }
  func.func @transform_14(%arg0: i32) -> (i32, i32) {
    %c0_i32 = arith.constant 0 : i32
    %c0_i32_0 = arith.constant 0 : i32
    %c0_i32_1 = arith.constant 0 : i32
    return %c0_i32, %c0_i32_0 : i32, i32
  }
  func.func @transform_15(%arg0: i32) -> (i32, i32) {
    %c0_i32 = arith.constant 0 : i32
    %c0_i32_0 = arith.constant 0 : i32
    %c0_i32_1 = arith.constant 0 : i32
    return %c0_i32, %c0_i32_0 : i32, i32
  }
  func.func @transform_16(%arg0: i32) -> (i32, i32) {
    %c0_i32 = arith.constant 0 : i32
    %c0_i32_0 = arith.constant 0 : i32
    %c0_i32_1 = arith.constant 0 : i32
    return %c0_i32, %c0_i32_0 : i32, i32
  }
  func.func @transform_17(%arg0: i32) -> (i32, i32) {
    %c0_i32 = arith.constant 0 : i32
    %c0_i32_0 = arith.constant 0 : i32
    return %arg0, %c0_i32 : i32, i32
  }
}

</mosaic_0001>

<bundles_post_ra>
// kernel: tpu_custom_call.1
= control target key start
LH: loop header
LB: loop body
LE: loop exit
PB: predicated region body
PF: predicated region fallthrough
CT: control target
= control target key end

     0   :  { %s19372_s0 = inlined_call_operand.vmem [shape: f32[512,8], index: 0, kind: input, shape index: {}]   ;;  %s19373_s1 = inlined_call_operand.vmem [shape: bf16[8,512], index: 1, kind: input, shape index: {}]   ;;  %s19374_s2 = inlined_call_operand.vmem [shape: f32[1,512], index: 2, kind: input, shape index: {}]   ;;  %s19375_s3 = inlined_call_operand.hbm [shape: bf16[512,512], index: 3, kind: input, shape index: {}]   ;;  %s19376_s4 = inlined_call_operand.vmem [shape: f32[1,512], index: 4, kind: input, shape index: {}]   ;;  %s19377_s5 = inlined_call_operand.hbm [shape: bf16[512,512], index: 5, kind: input, shape index: {}]   ;;  %s19378_s6 = inlined_call_operand.vmem [shape: f32[1,512], index: 6, kind: input, shape index: {}]   ;;  %s19379_s7 = inlined_call_operand.hbm [shape: bf16[512,512], index: 7, kind: input, shape index: {}]   ;;  %s19380_s8 = inlined_call_operand.vmem [shape: f32[1,512], index: 8, kind: input, shape index: {}]   ;;  %s19381_s9 = inlined_call_operand.hbm [shape: bf16[512,512], index: 9, kind: input, shape index: {}]   ;;  %s19382_s10 = inlined_call_operand.vmem [shape: f32[1,512], index: 10, kind: input, shape index: {}]   ;;  %s19383_s11 = inlined_call_operand.hbm [shape: bf16[512,512], index: 11, kind: input, shape index: {}]   ;;  %s19384_s12 = inlined_call_operand.vmem [shape: f32[1,512], index: 12, kind: input, shape index: {}]   ;;  %s19385_s13 = inlined_call_operand.hbm [shape: bf16[512,512], index: 13, kind: input, shape index: {}]   ;;  %s19386_s14 = inlined_call_operand.vmem [shape: f32[1,512], index: 14, kind: input, shape index: {}]   ;;  %s19387_s15 = inlined_call_operand.vmem [shape: bf16[512,128], index: 15, kind: input, shape index: {}]   ;;  %s19388_s16 = inlined_call_operand.vmem [shape: f32[1,128], index: 16, kind: input, shape index: {}]   ;;  %s19389_s17 = inlined_call_operand.hbm [shape: f32[512,128], index: 17, kind: output, shape index: {}]  }
   0x1   :  { %19405 = sst [smem:[#allocation27_spill]] %s19372_s0 }
   0x2   :  { %19406 = sst [smem:[#allocation28_spill]] %s19373_s1 }
   0x3   :  { %19407 = sst [smem:[#allocation29_spill]] %s19377_s5 }
   0x4   :  { %19408 = sst [smem:[#allocation30_spill]] %s19386_s14 }
   0x5   :  { %19409 = sst [smem:[#allocation31_spill]] %s19388_s16 }
   0x6   :  { %19410 = sst [smem:[#allocation32_spill]] %s19389_s17 }
   0x7   :  { %22 = vsyncpa [#allocation3], 0 }
   0x8   :  { %23 = vsyncpa [#allocation6], 0 }
   0x9   :  { %24 = vsyncpa [#allocation9], 0 }
   0xa   :  { %25 = vsyncpa [#allocation12], 0 }
   0xb   :  { %26 = vsyncpa [#allocation4], 0 }
   0xc   :  { %28 = vsyncpa [#allocation4 + $0x1], 0  ;;  %s17033_s24 = smov 0   ;;  %s17035_s25 = smov 0  }
   0xd   :  { %s17037_s26 = smov 0   ;;  %s17039_s27 = smov 0  }
   0xe LB: > { %19411 = sst [smem:[#allocation19_spill]] %s16917_s24  ;;  %s17054_s28 = sadd.s32 4294967295, %s16929_s27   ;;  %s16929_s27 = sphi %s17039_s27, %s19447_s27   ;;  %s16925_s26 = sphi %s17037_s26, %s19450_s26   ;;  %s16921_s25 = sphi %s17035_s25, %s19449_s25   ;;  %s16917_s24 = sphi %s17033_s24, %s19448_s24  }
   0xf   : > { %19412 = sst [smem:[#allocation20_spill]] %s16921_s25  ;;  %s12702_s29 = sadd.s32 4294967294, %s16929_s27  }
  0x10   : > { %19413 = sst [smem:[#allocation21_spill]] %s16925_s26  ;;  %s17058_s0 = sadd.s32 1, %s16929_s27  }
  0x11   : > { %19414 = sst [smem:[#allocation22_spill]] %s16929_s27  ;;  %s403_s30 = sadd.s32 1, %s16925_s26 }
  0x12   : > { %19415 = sst [smem:[#allocation23_spill]] %s17058_s0  ;;  %s400_s18 = ssub.s32 %s16929_s27, %s17058_s0 }
  0x13   : > { %p413_p0 = scmp.ne.s32.totalorder %s16925_s26, %s16921_s25  ;;  %p401_p1 = scmp.eq.s32.totalorder %s400_s18, 0 }
  0x14   : > { %p414_p2 = scmp.eq.s32.totalorder %s17054_s28, 1  ;;  %p419_p3 = scmp.ne.s32.totalorder %s16921_s25, %s16917_s24 }
  0x15   : > { %p420_p4 = scmp.eq.s32.totalorder %s12702_s29, 1  ;;  %p12703_p7 = scmp.ge.s32.totalorder %s16929_s27, 1 }
  0x16   : > { %s17069_s19 = scalar_select %p401_p1, %s16925_s26, %s403_s30  }
  0x17   : > { %p17071_p5 = por %p414_p2, %p413_p0  ;;  %p17075_p6 = por %p420_p4, %p419_p3 }
  0x18   : > { %19416 = sst [smem:[#allocation24_spill]] %s17069_s19  ;;  %p427_p8 = scmp.lt.s32.totalorder %s16929_s27, 3 }
  0x19   : > { %s19417_s1 = scalar_select %p17071_p5, 1, 0 }
  0x1a   : > { %s19419_s20 = scalar_select %p17075_p6, 1, 0 }
  0x1b   : > { %19418 = sst [smem:[#allocation25_spill]] %s19417_s1  ;;  %p19398_p9 = scmp.eq.s32.totalorder %s17054_s28, 0 }
  0x1c   : > { %19420 = sst [smem:[#allocation26_spill]] %s19419_s20  ;;  %p17082_p10 = pnand %p12703_p7, %p427_p8 }
  0x1d   : > { %s16931_s22 = smov [#allocation5]   ;;  %s16932_s30 = smov [#allocation8]  }
  0x1e   : > { %s19421_s21 = scalar_select %p17082_p10, 1, 0 }
  0x1f   : > { %p15352_p11 = pneg %p17082_p10  ;;  %s461_s23 = sshll.u32 %s16931_s22, 4  ;;  %s17088_s23 = int_to_ptr.vmem [resolvable:$true] %s461_s23 }
  0x20   : > { %s493_s18 = sshll.u32 %s16932_s30, 4  ;;  %s16933_s19 = smov [#allocation2]   ;;  %s17096_s18 = int_to_ptr.vmem [resolvable:$true] %s493_s18 }
  0x21   : > { %p17092_p12 = pnand %p19398_p9, %p15352_p11  ;;  %s17098_s26 = sshll.u32 %s16933_s19, 4  ;;  %s446_s26 = int_to_ptr.vmem [resolvable:$true] %s17098_s26 }
  0x22   : > { %s19423_s5 = sld [smem:[#allocation29_spill]] }
  0x23   : > { %p17108_p0 = pneg %p17092_p12 }
  0x28   : > { %s16683_s24 = scalar_lea.hbm %s19423_s5, 16384 }
  0x29   : > { %p16684_p13 = scmp.ne.s32.totalorder %s19423_s5, %s16683_s24  ;;  %p16690_p3 = scmp.lt.u32.totalorder %s16683_s24, %s19423_s5 }
  0x2b   : > { %p16686_p1 = pnand %p17108_p0, %p16684_p13 }
  0x2d   : > { %p16687_p2 = pneg %p16686_p1 }
  0x2f   : > { %p16692_p4 = pnand %p16690_p3, %p16687_p2 }
  0x31   : > { %16695 = shalt.err (!%p16692_p4)
}
  0x32   : > { %s16696_s27 = scalar_lea.vmem %s17088_s23, 16384  ;;  %p16704_p9 = scmp.lt.s32.totalorder %s17088_s23, %s17088_s23 }
  0x33   : > { %p16697_p7 = scmp.ne.s32.totalorder %s17088_s23, %s16696_s27  ;;  %p16705_p6 = scmp.lt.s32.totalorder %s16696_s27, %s16696_s27 }
  0x35   : > { %p16699_p8 = pnand %p16697_p7, %p17108_p0  ;;  %p16706_p13 = por %p16705_p6, %p16704_p9 }
  0x37   : > { %p16700_p11 = pneg %p16699_p8 }
  0x39   : > { %p16707_p1 = pnand %p16706_p13, %p16700_p11 }
  0x3b   : > { %16710 = shalt.err (!%p16707_p1)
}
  0x3c   : > { %s16934_s0 = smov 256   ;;  %s16935_s24 = smov 16  }
  0x3d   : > { %15358 = dma.hbm_to_vmem [thread:$0]  (!%p17092_p12), %s19423_s5, 16384, %s17088_s23, [#allocation6], %s16934_s0, %s16934_s0, %s16935_s24  }
  0x3e   : > { %s16711_s27 = scalar_lea.hbm %s19381_s9, 16384 }
  0x3f   : > { %p16712_p6 = scmp.ne.s32.totalorder %s19381_s9, %s16711_s27  ;;  %p16718_p3 = scmp.lt.u32.totalorder %s16711_s27, %s19381_s9 }
  0x41   : > { %p16714_p9 = pnand %p16712_p6, %p17108_p0 }
  0x43   : > { %p16715_p2 = pneg %p16714_p9 }
  0x45   : > { %p16720_p4 = pnand %p16718_p3, %p16715_p2 }
  0x47   : > { %16723 = shalt.err (!%p16720_p4)
}
  0x48   : > { %s16724_s23 = scalar_lea.vmem %s17096_s18, 16384  ;;  %p16732_p13 = scmp.lt.s32.totalorder %s17096_s18, %s17096_s18 }
  0x49   : > { %p16725_p7 = scmp.ne.s32.totalorder %s17096_s18, %s16724_s23  ;;  %p16733_p1 = scmp.lt.s32.totalorder %s16724_s23, %s16724_s23 }
  0x4b   : > { %p16727_p8 = pnand %p16725_p7, %p17108_p0  ;;  %p16734_p6 = por %p16733_p1, %p16732_p13 }
  0x4d   : > { %p16728_p11 = pneg %p16727_p8 }
  0x4f   : > { %p16735_p9 = pnand %p16734_p6, %p16728_p11 }
  0x51   : > { %16738 = shalt.err (!%p16735_p9)
}
  0x52   : > { %15364 = dma.hbm_to_vmem [thread:$0]  (!%p17092_p12), %s19381_s9, 16384, %s17096_s18, [#allocation9], %s16934_s0, %s16934_s0, %s16935_s24  }
  0x53   : > { %s16739_s20 = scalar_lea.hbm %s19375_s3, 16384 }
  0x54   : > { %p16740_p2 = scmp.ne.s32.totalorder %s19375_s3, %s16739_s20  ;;  %p16746_p7 = scmp.lt.u32.totalorder %s16739_s20, %s19375_s3 }
  0x56   : > { %p16742_p3 = pnand %p16740_p2, %p17108_p0 }
  0x58   : > { %p16743_p4 = pneg %p16742_p3 }
  0x5a   : > { %p16748_p8 = pnand %p16746_p7, %p16743_p4 }
  0x5c   : > { %16751 = shalt.err (!%p16748_p8)
}
  0x5d   : > { %s16752_s23 = scalar_lea.vmem %s446_s26, 16384  ;;  %p16760_p6 = scmp.lt.s32.totalorder %s446_s26, %s446_s26 }
  0x5e   : > { %p16753_p11 = scmp.ne.s32.totalorder %s446_s26, %s16752_s23  ;;  %p16761_p9 = scmp.lt.s32.totalorder %s16752_s23, %s16752_s23 }
  0x60   : > { %p16755_p13 = pnand %p16753_p11, %p17108_p0  ;;  %p16762_p5 = por %p16761_p9, %p16760_p6 }
  0x62   : > { %p16756_p1 = pneg %p16755_p13 }
  0x64   : > { %p16763_p10 = pnand %p16762_p5, %p16756_p1 }
  0x66   : > { %16766 = shalt.err (!%p16763_p10)
}
  0x67   : > { %15355 = dma.hbm_to_vmem [thread:$0]  (!%p17092_p12), %s19375_s3, 16384, %s446_s26, [#allocation3], %s16934_s0, %s16934_s0, %s16935_s24  }
  0x68   : > { %s16936_s16 = smov [#allocation7]   ;;  %s16937_s1 = smov [#allocation10]  }
  0x69   : > { %s477_s25 = sshll.u32 %s16936_s16, 4  ;;  %s509_s20 = sshll.u32 %s16937_s1, 4  ;;  %s478_s25 = int_to_ptr.vmem [resolvable:$true] %s477_s25  ;;  %s510_s20 = int_to_ptr.vmem [resolvable:$true] %s509_s20 }
  0x6a   : > { %s16767_s19 = scalar_lea.hbm %s19379_s7, 16384 }
  0x6b   : > { %p16768_p5 = scmp.ne.s32.totalorder %s19379_s7, %s16767_s19  ;;  %p16774_p3 = scmp.lt.u32.totalorder %s16767_s19, %s19379_s7 }
  0x6d   : > { %p16770_p10 = pnand %p16768_p5, %p17108_p0 }
  0x6f   : > { %p16771_p2 = pneg %p16770_p10 }
  0x71   : > { %p16776_p4 = pnand %p16774_p3, %p16771_p2 }
  0x73   : > { %16779 = shalt.err (!%p16776_p4)
}
  0x74   : > { %s16780_s26 = scalar_lea.vmem %s478_s25, 16384  ;;  %p16788_p13 = scmp.lt.s32.totalorder %s478_s25, %s478_s25 }
  0x75   : > { %p16781_p7 = scmp.ne.s32.totalorder %s478_s25, %s16780_s26  ;;  %p16789_p1 = scmp.lt.s32.totalorder %s16780_s26, %s16780_s26 }
  0x77   : > { %p16783_p8 = pnand %p16781_p7, %p17108_p0  ;;  %p16790_p6 = por %p16789_p1, %p16788_p13 }
  0x79   : > { %p16784_p11 = pneg %p16783_p8 }
  0x7b   : > { %p16791_p9 = pnand %p16790_p6, %p16784_p11 }
  0x7d   : > { %16794 = shalt.err (!%p16791_p9)
}
  0x7e   : > { %15361 = dma.hbm_to_vmem [thread:$0]  (!%p17092_p12), %s19379_s7, 16384, %s478_s25, [#allocation6], %s16934_s0, %s16934_s0, %s16935_s24  }
  0x7f   : > { %s16795_s22 = scalar_lea.hbm %s19383_s11, 16384 }
  0x80   : > { %p16796_p5 = scmp.ne.s32.totalorder %s19383_s11, %s16795_s22  ;;  %p16802_p3 = scmp.lt.u32.totalorder %s16795_s22, %s19383_s11 }
  0x82   : > { %p16798_p10 = pnand %p16796_p5, %p17108_p0 }
  0x84   : > { %p16799_p2 = pneg %p16798_p10 }
  0x86   : > { %p16804_p4 = pnand %p16802_p3, %p16799_p2 }
  0x88   : > { %16807 = shalt.err (!%p16804_p4)
}
  0x89   : > { %s16808_s18 = scalar_lea.vmem %s510_s20, 16384  ;;  %p16816_p13 = scmp.lt.s32.totalorder %s510_s20, %s510_s20 }
  0x8a   : > { %p16809_p7 = scmp.ne.s32.totalorder %s510_s20, %s16808_s18  ;;  %p16817_p1 = scmp.lt.s32.totalorder %s16808_s18, %s16808_s18 }
  0x8c   : > { %p16811_p8 = pnand %p16809_p7, %p17108_p0  ;;  %p16818_p6 = por %p16817_p1, %p16816_p13 }
  0x8e   : > { %p16812_p11 = pneg %p16811_p8 }
  0x90   : > { %p16819_p9 = pnand %p16818_p6, %p16812_p11 }
  0x92   : > { %16822 = shalt.err (!%p16819_p9)
}
  0x93   : > { %15367 = dma.hbm_to_vmem [thread:$0]  (!%p17092_p12), %s19383_s11, 16384, %s510_s20, [#allocation9], %s16934_s0, %s16934_s0, %s16935_s24  }
  0x94   : > { %s16938_s5 = smov [#allocation11]   ;;  %s16823_s22 = scalar_lea.hbm %s19385_s13, 16384 }
  0x95   : > { %s525_s14 = sshll.u32 %s16938_s5, 4  ;;  %p16824_p5 = scmp.ne.s32.totalorder %s19385_s13, %s16823_s22  ;;  %s526_s14 = int_to_ptr.vmem [resolvable:$true] %s525_s14 }
  0x96   : > { %p16830_p3 = scmp.lt.u32.totalorder %s16823_s22, %s19385_s13 }
  0x97   : > { %p16826_p10 = pnand %p16824_p5, %p17108_p0 }
  0x99   : > { %p16827_p2 = pneg %p16826_p10 }
  0x9b   : > { %p16832_p4 = pnand %p16830_p3, %p16827_p2 }
  0x9d   : > { %16835 = shalt.err (!%p16832_p4)
}
  0x9e   : > { %s16836_s20 = scalar_lea.vmem %s526_s14, 16384  ;;  %p16844_p13 = scmp.lt.s32.totalorder %s526_s14, %s526_s14 }
  0x9f   : > { %p16837_p7 = scmp.ne.s32.totalorder %s526_s14, %s16836_s20  ;;  %p16845_p1 = scmp.lt.s32.totalorder %s16836_s20, %s16836_s20 }
  0xa1   : > { %p16839_p8 = pnand %p16837_p7, %p17108_p0  ;;  %p16846_p6 = por %p16845_p1, %p16844_p13 }
  0xa3   : > { %p16840_p11 = pneg %p16839_p8 }
  0xa5   : > { %p16847_p9 = pnand %p16846_p6, %p16840_p11 }
  0xa7   : > { %16850 = shalt.err (!%p16847_p9)
}
  0xa8   : > { %15370 = dma.hbm_to_vmem [thread:$0]  (!%p17092_p12), %s19385_s13, 16384, %s526_s14, [#allocation12], %s16934_s0, %s16934_s0, %s16935_s24  }
  0xa9   : > { %p19425_p5 = scmp.ne.s32.totalorder %s19421_s21, 0 }
  0xaa   : > { %p19426_p0 = scmp.eq.s32.totalorder (!%p19425_p5), %s17054_s28, 0 }
  0xab   : > { %559 = sbr.rel (%p19425_p5) target bundleno = 2893 (0xb4d), region = 88 }
  0xb2   : > { %16896 = dma.done.wait (%p19426_p0), [#allocation3], 16384   ;;  %p19427_p10 = pmov %p19426_p0 }
  0xb3   : > { %p19428_p2 = pmov %p19426_p0 }
  0xb4   : > { %16898 = vsyncadd (%p19427_p10), [#allocation3], 4294950912 }
  0xb5   : > { %16900 = dma.done.wait (%p19428_p2), [#allocation6], 32768   ;;  %p19429_p3 = pmov %p19426_p0 }
  0xb6   : > { %p19430_p4 = pmov %p19426_p0 }
  0xb7   : > { %16902 = vsyncadd (%p19429_p3), [#allocation6], 4294934528 }
  0xb8   : > { %16904 = dma.done.wait (%p19430_p4), [#allocation9], 32768   ;;  %p19431_p12 = pmov %p19426_p0 }
  0xb9   : > { %p19432_p7 = pmov %p19426_p0 }
  0xba   : > { %16906 = vsyncadd (%p19431_p12), [#allocation9], 4294934528 }
  0xbb   : > { %16908 = dma.done.wait (%p19432_p7), [#allocation12], 16384   ;;  %p19433_p8 = pmov %p19426_p0 }
  0xbc   : > { %s12719_s17 = sshll.u32 %s17054_s28, 5  ;;  %v16939_v0 = vmov 0   ;;  %s19434_s24 = sld [smem:[#allocation27_spill]]  ;;  %vm770_vm0 = vcmask 1043456   ;;  %vm721_vm1 = vcmask 64512  }
  0xbd   : > { %16910 = vsyncadd (%p19433_p8), [#allocation12], 4294950912  ;;  %815 = vmatprep.mubr.bf16.mxu0 %v16939_v0  ;;  %p632_p11 = scmp.lt.s32.totalorder %s12719_s17, 63  ;;  %1008 = vmatprep.mubr.bf16.mxu1 %v16939_v0  ;;  %s19435_s16 = sld [smem:[#allocation28_spill]]  ;;  %v15435_v13 = vld [vmem:[#allocation2] ss:$16 sps:$4 sm:$0xff]  }
  0xbe   : > { %v15437_v14 = vld [vmem:[#allocation2 + $0x4] ss:$16 sps:$4 sm:$0xff]   ;;  %v15438_v18 = vld [vmem:[#allocation2 + $0x20] ss:$16 sps:$4 sm:$0xff]   ;;  %v15462_v29 = vld [vmem:[#allocation2 + $0x8] ss:$16 sps:$4 sm:$0xff]  }
  0xbf   : > { %s19452_s17 = smov (!%p632_p11, %s12719_s17), 63  ;;  %v15440_v17 = vld [vmem:[#allocation2 + $0x24] ss:$16 sps:$4 sm:$0xff]   ;;  %v15441_v22 = vld [vmem:[#allocation2 + $0x40] ss:$16 sps:$4 sm:$0xff]   ;;  %s19436_s0 = sld [smem:[#allocation30_spill]] }
  0xc0   : > { %s12720_s21 = sshll.u32 %s19452_s17, 3  ;;  %v15443_v19 = vld [vmem:[#allocation2 + $0x44] ss:$16 sps:$4 sm:$0xff]   ;;  %v15444_v25 = vld [vmem:[#allocation2 + $0x60] ss:$16 sps:$4 sm:$0xff]   ;;  %s19437_s5 = sld [smem:[#allocation31_spill]] }
  0xc1   : > { %v15446_v23 = vld [vmem:[#allocation2 + $0x64] ss:$16 sps:$4 sm:$0xff]   ;;  %v15464_v30 = vld [vmem:[#allocation2 + $0xc] ss:$16 sps:$4 sm:$0xff]   ;;  %v15447_v31 = vld [vmem:[#allocation2 + $0x80] ss:$16 sps:$4 sm:$0xff]  }
  0xc2   : > { %s17267_s26 = scalar_lea.vmem %s19434_s24, %s12720_s21  ;;  %v15449_v27 = vld [vmem:[#allocation2 + $0x84] ss:$16 sps:$4 sm:$0xff]   ;;  %v15467_v32 = vld [vmem:[#allocation2 + $0x2c] ss:$16 sps:$4 sm:$0xff]   ;;  %v15450_v35 = vld [vmem:[#allocation2 + $0xa0] ss:$16 sps:$4 sm:$0xff]  }
  0xc3   : > { %v671_v1 = vld [vmem:[%s19435_s16] sm:$0xff]  ;;  %v640_v3 = vld [vmem:[%s17267_s26 + $0x8] sm:$0xff]  ;;  %v641_v8 = vld [vmem:[%s17267_s26 + $0x10] sm:$0xff]  ;;  %s19438_s14 = sld [smem:[#allocation20_spill]]  ;;  %s19439_s19 = sld [smem:[#allocation25_spill]] }
  0xc4   : > { %v639_v2 = vld [vmem:[%s17267_s26] sm:$0xff]  ;;  %v12722_v4 = vcombine.high %v671_v1, %v671_v1  ;;  %v12721_v5 = vcombine.low %v671_v1, %v671_v1  ;;  %v642_v9 = vld [vmem:[%s17267_s26 + $0x18] sm:$0xff]  ;;  %v672_v10 = vld [vmem:[%s19435_s16 + $0x8] sm:$0xff]  ;;  %s13565_s27 = sshll.u32 %s17054_s28, 12  ;;  %s19440_s25 = sld [smem:[#allocation32_spill]] }
  0xc5   : > { %v674_v7 = vpack.c.bf16 %v640_v3, %v639_v2  ;;  %v12724_v11 = vcombine.high %v672_v10, %v672_v10  ;;  %v12723_v12 = vcombine.low %v672_v10, %v672_v10  ;;  %v675_v15 = vpack.c.bf16 %v642_v9, %v641_v8  ;;  %v643_v20 = vld [vmem:[%s17267_s26 + $0x20] sm:$0xff]  ;;  %v644_v21 = vld [vmem:[%s17267_s26 + $0x28] sm:$0xff]  ;;  %v645_v26 = vld [vmem:[%s17267_s26 + $0x30] sm:$0xff]  ;;  %s16940_s28 = smov [#allocation13]  }
  0xc6   : > { %12725 = vmatprep.subr.msk.bf16.mxu0 %vm770_vm0, %v12722_v4  ;;  %v772_v6 = vsel %vm770_vm0, %v12721_v5, 0  ;;  %v676_v24 = vpack.c.bf16 %v644_v21, %v643_v20  ;;  %v646_v28 = vld [vmem:[%s17267_s26 + $0x38] sm:$0xff]  ;;  %v15452_v33 = vld [vmem:[#allocation2 + $0xa4] ss:$16 sps:$4 sm:$0xff]   ;;  %v648_v40 = vld [vmem:[%s17267_s26 + $0x48] sm:$0xff]  ;;  %s16855_s24 = sshll.u32 %s16940_s28, 4  ;;  %s16856_s24 = int_to_ptr.vmem [resolvable:$false] %s16855_s24 }
  0xc7   : > { %784 = vmatpush1.bf16.msra.mxu0 %v772_v6  ;;  %12742 = vmatprep.subr.msk.bf16.mxu1 %vm770_vm0, %v12724_v11  ;;  %v778_v16 = vsel %vm770_vm0, %v12723_v12, 0  ;;  %v677_v34 = vpack.c.bf16 %v646_v28, %v645_v26  ;;  %v15455_v36 = vld [vmem:[#allocation2 + $0xc4] ss:$16 sps:$4 sm:$0xff]   ;;  %v15465_v37 = vld [vmem:[#allocation2 + $0x28] ss:$16 sps:$4 sm:$0xff]  }
  0xc8   : > { %2151 = vmatprep.subr.bf16.mxu0 %v15437_v14  ;;  %977 = vmatpush1.bf16.msra.mxu1 %v778_v16  ;;  %v15473_v38 = vld [vmem:[#allocation2 + $0x4c] ss:$16 sps:$4 sm:$0xff]   ;;  %v647_v39 = vld [vmem:[%s17267_s26 + $0x40] sm:$0xff]  ;;  %v15471_v43 = vld [vmem:[#allocation2 + $0x48] ss:$16 sps:$4 sm:$0xff]  }
  0xc9   : > { %2537 = vmatprep.subr.bf16.mxu1 %v15464_v30  ;;  %v15453_v41 = vld [vmem:[#allocation2 + $0xc0] ss:$16 sps:$4 sm:$0xff]   ;;  %v15458_v42 = vld [vmem:[#allocation2 + $0xe4] ss:$16 sps:$4 sm:$0xff]   ;;  %v15476_v44 = vld [vmem:[#allocation2 + $0x6c] ss:$16 sps:$4 sm:$0xff]   ;;  %v678_v45 = vpack.c.bf16 %v648_v40, %v647_v39 }
  0xca   : > { %12726 = vmatmul.mubr.msk.bf16.vlgmr.msra.gmra.mrb[0].mxu0 %vm721_vm1, %v674_v7  ;;  %v15456_v46 = vld [vmem:[#allocation2 + $0xe0] ss:$16 sps:$4 sm:$0xff]   ;;  %v15461_v47 = vld [vmem:[#allocation2 + $0x104] ss:$16 sps:$4 sm:$0xff]   ;;  %v15474_v48 = vld [vmem:[#allocation2 + $0x68] ss:$16 sps:$4 sm:$0xff]   ;;  %s19441_s17 = smov %s19440_s25  ;;  %s19323_s21 = scalar_lea.hbm %s19440_s25, %s13565_s27 }
  0xcb   : > { %825 = vmatprep.mubr.bf16.mxu0 %v16939_v0  ;;  %2152 = vmatpush1.bf16.msra.mxu0 %v15435_v13  ;;  %v15482_v49 = vld [vmem:[#allocation2 + $0x8c] ss:$16 sps:$4 sm:$0xff]   ;;  %v649_v50 = vld [vmem:[%s17267_s26 + $0x50] sm:$0xff]  ;;  %v15480_v54 = vld [vmem:[#allocation2 + $0x88] ss:$16 sps:$4 sm:$0xff]   ;;  %s628_s1 = sand.u32 1, %s19438_s14  }
  0xcc   : > { %2153 = vmatprep.subr.bf16.mxu0 %v15440_v17  ;;  %12743 = vmatmul.mubr.msk.bf16.vlgmr.msra.gmra.mrb[0].mxu1 %vm721_vm1, %v674_v7  ;;  %v650_v51 = vld [vmem:[%s17267_s26 + $0x58] sm:$0xff]  ;;  %v15459_v52 = vld [vmem:[#allocation2 + $0x100] ss:$16 sps:$4 sm:$0xff]   ;;  %v15470_v53 = vld [vmem:[#allocation2 + $0x124] ss:$16 sps:$4 sm:$0xff]   ;;  %s12718_s22 = sshll.u32 %s628_s1, 8 }
  0xcd   : > { %1018 = vmatprep.mubr.bf16.mxu1 %v16939_v0  ;;  %2538 = vmatpush1.bf16.msra.mxu1 %v15462_v29  ;;  %v15485_v55 = vld [vmem:[#allocation2 + $0xac] ss:$16 sps:$4 sm:$0xff]   ;;  %v679_v56 = vpack.c.bf16 %v650_v51, %v649_v50  ;;  %v15468_v57 = vld [vmem:[#allocation2 + $0x120] ss:$16 sps:$4 sm:$0xff]   ;;  %v15479_v58 = vld [vmem:[#allocation2 + $0x144] ss:$16 sps:$4 sm:$0xff]  }
  0xce   : > { %2539 = vmatprep.subr.bf16.mxu1 %v15467_v32  ;;  %v15483_v59 = vld [vmem:[#allocation2 + $0xa8] ss:$16 sps:$4 sm:$0xff]   ;;  %v15491_v60 = vld [vmem:[#allocation2 + $0xcc] ss:$16 sps:$4 sm:$0xff]   ;;  %v651_v61 = vld [vmem:[%s17267_s26 + $0x60] sm:$0xff]  ;;  %s19259_s30 = scalar_lea.vmem [#allocation13], %s12718_s22 }
  0xcf   : > { %2154 = vmatpush1.bf16.msra.mxu0 %v15438_v18  ;;  %v652_v62 = vld [vmem:[%s17267_s26 + $0x68] sm:$0xff]  ;;  %v15477_v63 = vld [vmem:[#allocation2 + $0x140] ss:$16 sps:$4 sm:$0xff]   ;;  %v15488_v1 = vld [vmem:[#allocation2 + $0x164] ss:$16 sps:$4 sm:$0xff]   ;;  %s12580_s23 = sshll.u32 %s19259_s30, 4  ;;  %s19325_s23 = int_to_ptr.vmem [resolvable:$true] %s12580_s23 }
  0xd0   : > { %2155 = vmatprep.subr.bf16.mxu0 %v15443_v19  ;;  %v15489_v2 = vld [vmem:[#allocation2 + $0xc8] ss:$16 sps:$4 sm:$0xff]   ;;  %v15494_v3 = vld [vmem:[#allocation2 + $0xec] ss:$16 sps:$4 sm:$0xff]   ;;  %v680_v4 = vpack.c.bf16 %v652_v62, %v651_v61  ;;  %v15486_v5 = vld [vmem:[#allocation2 + $0x160] ss:$16 sps:$4 sm:$0xff]   ;;  %p16858_p5 = scmp.lt.s32.totalorder %s19325_s23, %s16856_s24 }
  0xd1   : > { %2540 = vmatpush1.bf16.msra.mxu1 %v15465_v37  ;;  %v15492_v6 = vld [vmem:[#allocation2 + $0xe8] ss:$16 sps:$4 sm:$0xff]   ;;  %v15497_v7 = vld [vmem:[#allocation2 + $0x184] ss:$16 sps:$4 sm:$0xff]   ;;  %v15500_v8 = vld [vmem:[#allocation2 + $0x10c] ss:$16 sps:$4 sm:$0xff]  }
  0xd2   : > { %12727 = vmatmul.mubr.msk.bf16.gmra.mrb[4].mxu0 %vm721_vm1, %v675_v15  ;;  %2541 = vmatprep.subr.bf16.mxu1 %v15473_v38  ;;  %v653_v9 = vld [vmem:[%s17267_s26 + $0x70] sm:$0xff]  ;;  %v654_v10 = vld [vmem:[%s17267_s26 + $0x78] sm:$0xff]  ;;  %v655_v20 = vld [vmem:[%s17267_s26 + $0x80] sm:$0xff]  ;;  %s19331_s29 = scalar_lea.sflag [#allocation4], %s628_s1  ;;  %p19442_p1 = scmp.ne.s32.totalorder %s19439_s19, 0 }
  0xd3   : > { %835 = vmatprep.mubr.bf16.mxu0 %v16939_v0  ;;  %2156 = vmatpush1.bf16.msra.mxu0 %v15441_v22  ;;  %v15495_v11 = vld [vmem:[#allocation2 + $0x180] ss:$16 sps:$4 sm:$0xff]   ;;  %v15498_v12 = vld [vmem:[#allocation2 + $0x108] ss:$16 sps:$4 sm:$0xff]   ;;  %v15503_v13 = vld [vmem:[#allocation2 + $0x12c] ss:$16 sps:$4 sm:$0xff]  }
  0xd4   : > { %2157 = vmatprep.subr.bf16.mxu0 %v15446_v23  ;;  %12744 = vmatmul.mubr.msk.bf16.gmra.mrb[4].mxu1 %vm721_vm1, %v675_v15  ;;  %v15506_v14 = vld [vmem:[#allocation2 + $0x1a4] ss:$16 sps:$4 sm:$0xff]   ;;  %v681_v15 = vpack.c.bf16 %v654_v10, %v653_v9  ;;  %v15501_v16 = vld [vmem:[#allocation2 + $0x128] ss:$16 sps:$4 sm:$0xff]   ;;  %v15504_v17 = vld [vmem:[#allocation2 + $0x1a0] ss:$16 sps:$4 sm:$0xff]  }
  0xd5   : > { %1028 = vmatprep.mubr.bf16.mxu1 %v16939_v0  ;;  %2542 = vmatpush1.bf16.msra.mxu1 %v15471_v43  ;;  %v15509_v18 = vld [vmem:[#allocation2 + $0x14c] ss:$16 sps:$4 sm:$0xff]   ;;  %v15515_v19 = vld [vmem:[#allocation2 + $0x1c4] ss:$16 sps:$4 sm:$0xff]   ;;  %v15507_v22 = vld [vmem:[#allocation2 + $0x148] ss:$16 sps:$4 sm:$0xff]  }
  0xd6   : > { %2543 = vmatprep.subr.bf16.mxu1 %v15476_v44  ;;  %v656_v21 = vld [vmem:[%s17267_s26 + $0x88] sm:$0xff]  ;;  %v15513_v23 = vld [vmem:[#allocation2 + $0x1c0] ss:$16 sps:$4 sm:$0xff]   ;;  %v658_v29 = vld [vmem:[%s17267_s26 + $0x98] sm:$0xff] }
  0xd7   : > { %2158 = vmatpush1.bf16.msra.mxu0 %v15444_v25  ;;  %v682_v25 = vpack.c.bf16 %v656_v21, %v655_v20  ;;  %v15510_v26 = vld [vmem:[#allocation2 + $0x168] ss:$16 sps:$4 sm:$0xff]   ;;  %v657_v28 = vld [vmem:[%s17267_s26 + $0x90] sm:$0xff]  ;;  %v15527_v40 = vld [vmem:[#allocation2 + $0x1cc] ss:$16 sps:$4 sm:$0xff]  }
  0xd8   : > { %2159 = vmatprep.subr.bf16.mxu0 %v15449_v27  ;;  %v15518_v27 = vld [vmem:[#allocation2 + $0x18c] ss:$16 sps:$4 sm:$0xff]   ;;  %v15516_v30 = vld [vmem:[#allocation2 + $0x188] ss:$16 sps:$4 sm:$0xff]   ;;  %v683_v32 = vpack.c.bf16 %v658_v29, %v657_v28  ;;  %v661_v37 = vld [vmem:[%s17267_s26 + $0xb0] sm:$0xff] }
  0xd9   : > { %2544 = vmatpush1.bf16.msra.mxu1 %v15474_v48  ;;  %v662_v38 = vld [vmem:[%s17267_s26 + $0xb8] sm:$0xff]  ;;  %v664_v43 = vld [vmem:[%s17267_s26 + $0xc8] sm:$0xff]  ;;  %v15524_v44 = vld [vmem:[#allocation2 + $0x1e4] ss:$16 sps:$4 sm:$0xff]  }
  0xda   : > { %12728 = vmatmul.mubr.msk.bf16.gmra.mrb[8].mxu0 %vm721_vm1, %v676_v24  ;;  %2545 = vmatprep.subr.bf16.mxu1 %v15482_v49  ;;  %v685_v39 = vpack.c.bf16 %v662_v38, %v661_v37  ;;  %v15533_v49 = vld [vmem:[#allocation2 + $0x204] ss:$16 sps:$4 sm:$0xff]   ;;  %v666_v51 = vld [vmem:[%s17267_s26 + $0xd8] sm:$0xff] }
  0xdb   : > { %845 = vmatprep.mubr.bf16.mxu0 %v16939_v0  ;;  %2160 = vmatpush1.bf16.msra.mxu0 %v15447_v31  ;;  %v15521_v31 = vld [vmem:[#allocation2 + $0x1ac] ss:$16 sps:$4 sm:$0xff]   ;;  %v665_v50 = vld [vmem:[%s17267_s26 + $0xd0] sm:$0xff] }
  0xdc   : > { %2161 = vmatprep.subr.bf16.mxu0 %v15452_v33  ;;  %12745 = vmatmul.mubr.msk.bf16.gmra.mrb[8].mxu1 %vm721_vm1, %v676_v24  ;;  %v15512_v24 = vld [vmem:[#allocation2 + $0x16c] ss:$16 sps:$4 sm:$0xff]   ;;  %v15519_v33 = vld [vmem:[#allocation2 + $0x1a8] ss:$16 sps:$4 sm:$0xff]  }
  0xdd   : > { %1038 = vmatprep.mubr.bf16.mxu1 %v16939_v0  ;;  %2546 = vmatpush1.bf16.msra.mxu1 %v15480_v54  ;;  %v668_v54 = vld [vmem:[%s17267_s26 + $0xe8] sm:$0xff] }
  0xde   : > { %2547 = vmatprep.subr.bf16.mxu1 %v15485_v55 }
  0xdf   : > { %2162 = vmatpush1.bf16.msra.mxu0 %v15450_v35  ;;  %v660_v35 = vld [vmem:[%s17267_s26 + $0xa8] sm:$0xff] }
  0xe0   : > { %2163 = vmatprep.subr.bf16.mxu0 %v15455_v36 }
  0xe1   : > { %2548 = vmatpush1.bf16.msra.mxu1 %v15483_v59  ;;  %v15560_v59 = vld [vmem:[#allocation2 + $0x20c] ss:$16 sps:$4 sm:$0xff]  }
  0xe2   : > { %12729 = vmatmul.mubr.msk.bf16.gmra.mrb[12].mxu0 %vm721_vm1, %v677_v34  ;;  %2549 = vmatprep.subr.bf16.mxu1 %v15491_v60  ;;  %v691_v60 = vlaneseq }
  0xe3   : > { %855 = vmatprep.mubr.bf16.mxu0 %v16939_v0  ;;  %2164 = vmatpush1.bf16.msra.mxu0 %v15453_v41  ;;  %v15525_v41 = vld [vmem:[#allocation2 + $0x1c8] ss:$16 sps:$4 sm:$0xff]  }
  0xe4   : > { %2165 = vmatprep.subr.bf16.mxu0 %v15458_v42  ;;  %12746 = vmatmul.mubr.msk.bf16.gmra.mrb[12].mxu1 %vm721_vm1, %v677_v34  ;;  %v659_v34 = vld [vmem:[%s17267_s26 + $0xa0] sm:$0xff]  ;;  %v692_v61 = vshrl.u32 %v691_v60, 7 }
  0xe5   : > { %1048 = vmatprep.mubr.bf16.mxu1 %v16939_v0  ;;  %2550 = vmatpush1.bf16.msra.mxu1 %v15489_v2  ;;  %v684_v36 = vpack.c.bf16 %v660_v35, %v659_v34  ;;  %v663_v42 = vld [vmem:[%s17267_s26 + $0xc0] sm:$0xff]  ;;  %v15561_v34 = vld [vmem:[#allocation2 + $0x228] ss:$16 sps:$4 sm:$0xff]  }
  0xe6   : > { %2551 = vmatprep.subr.bf16.mxu1 %v15494_v3  ;;  %v686_v48 = vpack.c.bf16 %v664_v43, %v663_v42  ;;  %v17373_v62 = vsub.s32 0, %v692_v61  ;;  %v17390_v9 = vsub.s32 3, %v692_v61 }
  0xe7   : > { %2166 = vmatpush1.bf16.msra.mxu0 %v15456_v46  ;;  %v15522_v46 = vld [vmem:[#allocation2 + $0x1e0] ss:$16 sps:$4 sm:$0xff]  }
  0xe8   : > { %2167 = vmatprep.subr.bf16.mxu0 %v15461_v47  ;;  %v15528_v47 = vld [vmem:[#allocation2 + $0x1e8] ss:$16 sps:$4 sm:$0xff]  }
  0xe9   : > { %2552 = vmatpush1.bf16.msra.mxu1 %v15492_v6  ;;  %v17387_v6 = vsub.s32 2, %v692_v61 }
  0xea   : > { %12730 = vmatmul.mubr.msk.bf16.gmra.mrb[16].mxu0 %vm721_vm1, %v678_v45  ;;  %2553 = vmatprep.subr.bf16.mxu1 %v15500_v8 }
  0xeb   : > { %865 = vmatprep.mubr.bf16.mxu0 %v16939_v0  ;;  %2168 = vmatpush1.bf16.msra.mxu0 %v15459_v52  ;;  %v687_v52 = vpack.c.bf16 %v666_v51, %v665_v50 }
  0xec   : > { %2169 = vmatprep.subr.bf16.mxu0 %v15470_v53  ;;  %12747 = vmatmul.mubr.msk.bf16.gmra.mrb[16].mxu1 %vm721_vm1, %v678_v45  ;;  %v15530_v45 = vld [vmem:[#allocation2 + $0x1ec] ss:$16 sps:$4 sm:$0xff]   ;;  %v667_v53 = vld [vmem:[%s17267_s26 + $0xe0] sm:$0xff] }
  0xed   : > { %1058 = vmatprep.mubr.bf16.mxu1 %v16939_v0  ;;  %2554 = vmatpush1.bf16.msra.mxu1 %v15498_v12  ;;  %v688_v55 = vpack.c.bf16 %v668_v54, %v667_v53  ;;  %v15567_v53 = vld [vmem:[#allocation2 + $0x248] ss:$16 sps:$4 sm:$0xff]  }
  0xee   : > { %2555 = vmatprep.subr.bf16.mxu1 %v15503_v13 }
  0xef   : > { %2170 = vmatpush1.bf16.msra.mxu0 %v15468_v57  ;;  %v670_v57 = vld [vmem:[%s17267_s26 + $0xf8] sm:$0xff] }
  0xf0   : > { %2171 = vmatprep.subr.bf16.mxu0 %v15479_v58 }
  0xf1   : > { %2556 = vmatpush1.bf16.msra.mxu1 %v15501_v16 }
  0xf2   : > { %12731 = vmatmul.mubr.msk.bf16.gmra.mrb[20].mxu0 %vm721_vm1, %v679_v56  ;;  %2557 = vmatprep.subr.bf16.mxu1 %v15509_v18  ;;  %v15531_v18 = vld [vmem:[#allocation2 + $0x200] ss:$16 sps:$4 sm:$0xff]  }
  0xf3   : > { %875 = vmatprep.mubr.bf16.mxu0 %v16939_v0  ;;  %2172 = vmatpush1.bf16.msra.mxu0 %v15477_v63  ;;  %v673_v63 = vld [vmem:[%s19374_s2] sm:$0xf] }
  0xf4   : > { %2173 = vmatprep.subr.bf16.mxu0 %v15488_v1  ;;  %12748 = vmatmul.mubr.msk.bf16.gmra.mrb[20].mxu1 %vm721_vm1, %v679_v56  ;;  %v669_v56 = vld [vmem:[%s17267_s26 + $0xf0] sm:$0xff]  ;;  %v17378_v1 = vsub.s32 1, %v692_v61  ;;  %v17381_v2 = vrot.slane %v673_v63, %v17373_v62  ;;  %v17398_v20 = vrot.slane %v673_v63, %v17390_v9  ;;  %s16857_s26 = scalar_lea.vmem %s16856_s24, 8192 }
  0xf5   : > { %1068 = vmatprep.mubr.bf16.mxu1 %v16939_v0  ;;  %2558 = vmatpush1.bf16.msra.mxu1 %v15507_v22  ;;  %v689_v58 = vpack.c.bf16 %v670_v57, %v669_v56  ;;  %v15536_v22 = vld [vmem:[#allocation2 + $0x224] ss:$16 sps:$4 sm:$0xff]   ;;  %v15572_v57 = vld [vmem:[#allocation2 + $0x26c] ss:$16 sps:$4 sm:$0xff]  }
  0xf6   : > { %2559 = vmatprep.subr.bf16.mxu1 %v15512_v24  ;;  %v17384_v3 = vrot.slane %v673_v63, %v17378_v1  ;;  %v15542_v56 = vld [vmem:[#allocation2 + $0x264] ss:$16 sps:$4 sm:$0xff]  }
  0xf7   : > { %2174 = vmatpush1.bf16.msra.mxu0 %v15486_v5 }
  0xf8   : > { %2175 = vmatprep.subr.bf16.mxu0 %v15497_v7 }
  0xf9   : > { %2560 = vmatpush1.bf16.msra.mxu1 %v15510_v26 }
  0xfa   : > { %12732 = vmatmul.mubr.msk.bf16.gmra.mrb[24].mxu0 %vm721_vm1, %v680_v4  ;;  %2561 = vmatprep.subr.bf16.mxu1 %v15518_v27 }
  0xfb   : > { %885 = vmatprep.mubr.bf16.mxu0 %v16939_v0  ;;  %2176 = vmatpush1.bf16.msra.mxu0 %v15495_v11 }
  0xfc   : > { %2177 = vmatprep.subr.bf16.mxu0 %v15506_v14  ;;  %12749 = vmatmul.mubr.msk.bf16.gmra.mrb[24].mxu1 %vm721_vm1, %v680_v4 }
  0xfd   : > { %1078 = vmatprep.mubr.bf16.mxu1 %v16939_v0  ;;  %2562 = vmatpush1.bf16.msra.mxu1 %v15516_v30 }
  0xfe   : > { %2563 = vmatprep.subr.bf16.mxu1 %v15521_v31 }
  0xff   : > { %2178 = vmatpush1.bf16.msra.mxu0 %v15504_v17 }
 0x100   : > { %2179 = vmatprep.subr.bf16.mxu0 %v15515_v19  ;;  %v15558_v19 = vld [vmem:[#allocation2 + $0x208] ss:$16 sps:$4 sm:$0xff]  }
 0x101   : > { %2564 = vmatpush1.bf16.msra.mxu1 %v15519_v33  ;;  %v15534_v33 = vld [vmem:[#allocation2 + $0x220] ss:$16 sps:$4 sm:$0xff]  }
 0x102   : > { %12733 = vmatmul.mubr.msk.bf16.gmra.mrb[28].mxu0 %vm721_vm1, %v681_v15  ;;  %2565 = vmatprep.subr.bf16.mxu1 %v15527_v40  ;;  %v15569_v40 = vld [vmem:[#allocation2 + $0x24c] ss:$16 sps:$4 sm:$0xff]  }
 0x103   : > { %895 = vmatprep.mubr.bf16.mxu0 %v16939_v0  ;;  %2180 = vmatpush1.bf16.msra.mxu0 %v15513_v23  ;;  %v15563_v23 = vld [vmem:[#allocation2 + $0x22c] ss:$16 sps:$4 sm:$0xff]  }
 0x104   : > { %12750 = vmatmul.mubr.msk.bf16.gmra.mrb[28].mxu1 %vm721_vm1, %v681_v15  ;;  %2181 = vmatprep.subr.bf16.mxu0 %v15524_v44  ;;  %v17395_v15 = vrot.slane %v673_v63, %v17387_v6 }
 0x105   : > { %1088 = vmatprep.mubr.bf16.mxu1 %v16939_v0  ;;  %2566 = vmatpush1.bf16.msra.mxu1 %v15525_v41 }
 0x106   : > { %2567 = vmatprep.subr.bf16.mxu1 %v15530_v45 }
 0x107   : > { %2182 = vmatpush1.bf16.msra.mxu0 %v15522_v46 }
 0x108   : > { %2344 = vmatprep.subr.bf16.mxu0 %v15533_v49 }
 0x109   : > { %2568 = vmatpush1.bf16.msra.mxu1 %v15528_v47 }
 0x10a   : > { %12734 = vmatmul.mubr.msk.bf16.gmra.mrb[32].mxu0 %vm721_vm1, %v682_v25  ;;  %2730 = vmatprep.subr.bf16.mxu1 %v15560_v59 }
 0x10b   : > { %905 = vmatprep.mubr.bf16.mxu0 %v16939_v0 }
 0x10c   : > { %12751 = vmatmul.mubr.msk.bf16.gmra.mrb[32].mxu1 %vm721_vm1, %v682_v25 }
 0x10d   : > { %1098 = vmatprep.mubr.bf16.mxu1 %v16939_v0 }
 0x112   : > { %12735 = vmatmul.mubr.msk.bf16.gmra.mrb[36].mxu0 %vm721_vm1, %v683_v32 }
 0x113   : > { %915 = vmatprep.mubr.bf16.mxu0 %v16939_v0 }
 0x114   : > { %12752 = vmatmul.mubr.msk.bf16.gmra.mrb[36].mxu1 %vm721_vm1, %v683_v32 }
 0x115   : > { %1108 = vmatprep.mubr.bf16.mxu1 %v16939_v0 }
 0x11a   : > { %12736 = vmatmul.mubr.msk.bf16.gmra.mrb[40].mxu0 %vm721_vm1, %v684_v36 }
 0x11b   : > { %925 = vmatprep.mubr.bf16.mxu0 %v16939_v0 }
 0x11c   : > { %12753 = vmatmul.mubr.msk.bf16.gmra.mrb[40].mxu1 %vm721_vm1, %v684_v36 }
 0x11d   : > { %1118 = vmatprep.mubr.bf16.mxu1 %v16939_v0 }
 0x122   : > { %12737 = vmatmul.mubr.msk.bf16.gmra.mrb[44].mxu0 %vm721_vm1, %v685_v39 }
 0x123   : > { %935 = vmatprep.mubr.bf16.mxu0 %v16939_v0 }
 0x124   : > { %12754 = vmatmul.mubr.msk.bf16.gmra.mrb[44].mxu1 %vm721_vm1, %v685_v39  ;;  %v15539_v39 = vld [vmem:[#allocation2 + $0x244] ss:$16 sps:$4 sm:$0xff]  }
 0x125   : > { %1128 = vmatprep.mubr.bf16.mxu1 %v16939_v0 }
 0x12a   : > { %12738 = vmatmul.mubr.msk.bf16.gmra.mrb[48].mxu0 %vm721_vm1, %v686_v48 }
 0x12b   : > { %945 = vmatprep.mubr.bf16.mxu0 %v16939_v0 }
 0x12c   : > { %12755 = vmatmul.mubr.msk.bf16.gmra.mrb[48].mxu1 %vm721_vm1, %v686_v48 }
 0x12d   : > { %1138 = vmatprep.mubr.bf16.mxu1 %v16939_v0 }
 0x132   : > { %12739 = vmatmul.mubr.msk.bf16.gmra.mrb[52].mxu0 %vm721_vm1, %v687_v52 }
 0x133   : > { %955 = vmatprep.mubr.bf16.mxu0 %v16939_v0 }
 0x134   : > { %12756 = vmatmul.mubr.msk.bf16.gmra.mrb[52].mxu1 %vm721_vm1, %v687_v52  ;;  %v15537_v52 = vld [vmem:[#allocation2 + $0x240] ss:$16 sps:$4 sm:$0xff]  }
 0x135   : > { %1148 = vmatprep.mubr.bf16.mxu1 %v16939_v0 }
 0x13a   : > { %12740 = vmatmul.mubr.msk.bf16.gmra.mrb[56].mxu0 %vm721_vm1, %v688_v55 }
 0x13b   : > { %965 = vmatprep.mubr.bf16.mxu0 %v16939_v0 }
 0x13c   : > { %12757 = vmatmul.mubr.msk.bf16.gmra.mrb[56].mxu1 %vm721_vm1, %v688_v55 }
 0x13d   : > { %1158 = vmatprep.mubr.bf16.mxu1 %v16939_v0 }
 0x142   : > { %12741 = vmatmul.mubr.msk.bf16.gmra.mrb[60].mxu0 %vm721_vm1, %v689_v58 }
 0x144   : > { %12758 = vmatmul.mubr.msk.bf16.gmra.mrb[60].mxu1 %vm721_vm1, %v689_v58 }
 0x19d   : > { %v817_v0 = vpop.f32.mrb[0].mxu0 }
 0x19e   : > { %v818_v4 = vadd.f32 %v817_v0, %v17381_v2  ;;  %v819_v5 = vpop.f32.mrb[1].mxu0 }
 0x19f   : > { %v820_v7 = vadd.f32 %v819_v5, %v17384_v3  ;;  %v821_v8 = vpop.f32.mrb[2].mxu0  ;;  %v1010_v26 = vpop.f32.mrb[0].mxu1 }
 0x1a0   : > { %v822_v10 = vadd.f32 %v821_v8, %v17381_v2  ;;  %v823_v11 = vpop.f32.mrb[3].mxu0  ;;  %v1169_v13 = vmax.f32 %v818_v4, 0.0  ;;  %v1011_v29 = vadd.f32 %v1010_v26, %v17395_v15  ;;  %v1012_v30 = vpop.f32.mrb[1].mxu1 }
 0x1a1   : > { %v824_v12 = vadd.f32 %v823_v11, %v17384_v3  ;;  %v1170_v16 = vmax.f32 %v820_v7, 0.0  ;;  %v1013_v35 = vadd.f32 %v1012_v30, %v17398_v20  ;;  %v1014_v36 = vpop.f32.mrb[2].mxu1  ;;  %v15540_v11 = vld [vmem:[#allocation2 + $0x260] ss:$16 sps:$4 sm:$0xff]  }
 0x1a2   : > { %v1173_v14 = vmax.f32 %v822_v10, 0.0  ;;  %v1171_v41 = vmax.f32 %v1011_v29, 0.0  ;;  %v1015_v42 = vadd.f32 %v1014_v36, %v17395_v15  ;;  %v1016_v43 = vpop.f32.mrb[3].mxu1  ;;  %v15548_v36 = vld [vmem:[#allocation2 + $0x2a4] ss:$16 sps:$4 sm:$0xff]  }
 0x1a3   : > { %v1174_v17 = vmax.f32 %v824_v12, 0.0  ;;  %v1017_v45 = vadd.f32 %v1016_v43, %v17398_v20  ;;  %v1172_v46 = vmax.f32 %v1013_v35, 0.0  ;;  %v15570_v12 = vld [vmem:[#allocation2 + $0x268] ss:$16 sps:$4 sm:$0xff]  }
 0x1a4   : > { %v1426_v21 = vpack.c.bf16 %v1173_v14, %v1169_v13  ;;  %v1175_v49 = vmax.f32 %v1015_v42, 0.0 }
 0x1a5   : > { %v827_v24 = vpop.f32.mrb[4].mxu0  ;;  %v1427_v25 = vpack.c.bf16 %v1174_v17, %v1170_v16  ;;  %v1176_v54 = vmax.f32 %v1017_v45, 0.0 }
 0x1a6   : > { %v828_v27 = vadd.f32 %v827_v24, %v17381_v2  ;;  %v829_v28 = vpop.f32.mrb[5].mxu0  ;;  %v17408_v58 = vpack.c.bf16 %v1175_v49, %v1171_v41  ;;  %v15546_v49 = vld [vmem:[#allocation2 + $0x2a0] ss:$16 sps:$4 sm:$0xff]  }
 0x1a7   : > { %v830_v31 = vadd.f32 %v829_v28, %v17384_v3  ;;  %v831_v32 = vpop.f32.mrb[6].mxu0  ;;  %2183 = vmatprep.mubr.bf16.mxu0 %v1427_v25  ;;  %2569 = vmatprep.mubr.bf16.mxu1 %v1427_v25  ;;  %v1020_v61 = vpop.f32.mrb[4].mxu1  ;;  %v17410_v63 = vpack.c.bf16 %v1176_v54, %v1172_v46 }
 0x1a8   : > { %v832_v37 = vadd.f32 %v831_v32, %v17381_v2  ;;  %v833_v38 = vpop.f32.mrb[7].mxu0  ;;  %2184 = vmatmul.mubr.bf16.vlgmr.msra.gmra.mrb[64].mxu0 %v1426_v21  ;;  %2570 = vmatmul.mubr.bf16.vlgmr.msra.gmra.mrb[64].mxu1 %v1426_v21  ;;  %v1177_v47 = vmax.f32 %v828_v27, 0.0  ;;  %v1021_v5 = vadd.f32 %v1020_v61, %v17395_v15  ;;  %v1022_v7 = vpop.f32.mrb[5].mxu1  ;;  %v15543_v32 = vld [vmem:[#allocation2 + $0x280] ss:$16 sps:$4 sm:$0xff]  }
 0x1a9   : > { %v834_v44 = vadd.f32 %v833_v38, %v17384_v3  ;;  %2345 = vmatpush1.bf16.msra.mxu0 %v15531_v18  ;;  %2731 = vmatpush1.bf16.msra.mxu1 %v15558_v19  ;;  %v1178_v50 = vmax.f32 %v830_v31, 0.0  ;;  %v1023_v13 = vadd.f32 %v1022_v7, %v17398_v20  ;;  %v1024_v14 = vpop.f32.mrb[6].mxu1  ;;  %v15545_v18 = vld [vmem:[#allocation2 + $0x284] ss:$16 sps:$4 sm:$0xff]   ;;  %v15578_v19 = vld [vmem:[#allocation2 + $0x28c] ss:$16 sps:$4 sm:$0xff]  }
 0x1aa   : > { %2346 = vmatprep.subr.bf16.mxu0 %v15536_v22  ;;  %v1181_v48 = vmax.f32 %v832_v37, 0.0  ;;  %2732 = vmatprep.subr.bf16.mxu1 %v15563_v23  ;;  %v1025_v21 = vadd.f32 %v1024_v14, %v17395_v15  ;;  %v1026_v22 = vpop.f32.mrb[7].mxu1  ;;  %v1179_v23 = vmax.f32 %v1021_v5, 0.0  ;;  %v15581_v37 = vld [vmem:[#allocation2 + $0x2ac] ss:$16 sps:$4 sm:$0xff]  }
 0x1ab   : > { %v1182_v51 = vmax.f32 %v834_v44, 0.0  ;;  %v1027_v25 = vadd.f32 %v1026_v22, %v17398_v20  ;;  %v1180_v26 = vmax.f32 %v1023_v13, 0.0  ;;  %v15585_v13 = vld [vmem:[#allocation2 + $0x2c8] ss:$16 sps:$4 sm:$0xff]  }
 0x1ac   : > { %v1430_v55 = vpack.c.bf16 %v1181_v48, %v1177_v47  ;;  %v1183_v29 = vmax.f32 %v1025_v21, 0.0 }
 0x1ad   : > { %v837_v59 = vpop.f32.mrb[8].mxu0  ;;  %v1431_v60 = vpack.c.bf16 %v1182_v51, %v1178_v50  ;;  %2347 = vmatpush1.bf16.msra.mxu0 %v15534_v33  ;;  %2733 = vmatpush1.bf16.msra.mxu1 %v15561_v34  ;;  %v15576_v33 = vld [vmem:[#allocation2 + $0x288] ss:$16 sps:$4 sm:$0xff]   ;;  %v1184_v34 = vmax.f32 %v1027_v25, 0.0 }
 0x1ae   : > { %v838_v0 = vadd.f32 %v837_v59, %v17381_v2  ;;  %v839_v4 = vpop.f32.mrb[9].mxu0  ;;  %2348 = vmatprep.subr.bf16.mxu0 %v15539_v39  ;;  %2734 = vmatprep.subr.bf16.mxu1 %v15569_v40  ;;  %v17420_v38 = vpack.c.bf16 %v1183_v29, %v1179_v23  ;;  %v15579_v50 = vld [vmem:[#allocation2 + $0x2a8] ss:$16 sps:$4 sm:$0xff]  }
 0x1af   : > { %v840_v8 = vadd.f32 %v839_v4, %v17384_v3  ;;  %v841_v10 = vpop.f32.mrb[10].mxu0  ;;  %2193 = vmatprep.mubr.bf16.mxu0 %v1431_v60  ;;  %2579 = vmatprep.mubr.bf16.mxu1 %v1431_v60  ;;  %v1030_v41 = vpop.f32.mrb[8].mxu1  ;;  %v17422_v42 = vpack.c.bf16 %v1184_v34, %v1180_v26 }
 0x1b0   : > { %v842_v16 = vadd.f32 %v841_v10, %v17381_v2  ;;  %v843_v17 = vpop.f32.mrb[11].mxu0  ;;  %2194 = vmatmul.mubr.bf16.gmra.mrb[68].mxu0 %v1430_v55  ;;  %2580 = vmatmul.mubr.bf16.gmra.mrb[68].mxu1 %v1430_v55  ;;  %v1185_v27 = vmax.f32 %v838_v0, 0.0  ;;  %v1031_v45 = vadd.f32 %v1030_v41, %v17395_v15  ;;  %v1032_v46 = vpop.f32.mrb[9].mxu1  ;;  %v15551_v55 = vld [vmem:[#allocation2 + $0x2c4] ss:$16 sps:$4 sm:$0xff]  }
 0x1b1   : > { %v844_v24 = vadd.f32 %v843_v17, %v17384_v3  ;;  %2349 = vmatpush1.bf16.msra.mxu0 %v15537_v52  ;;  %2735 = vmatpush1.bf16.msra.mxu1 %v15567_v53  ;;  %v1186_v30 = vmax.f32 %v840_v8, 0.0  ;;  %v1033_v51 = vadd.f32 %v1032_v46, %v17398_v20  ;;  %v1034_v52 = vpop.f32.mrb[10].mxu1  ;;  %v15554_v17 = vld [vmem:[#allocation2 + $0x2e4] ss:$16 sps:$4 sm:$0xff]  }
 0x1b2   : > { %v1189_v28 = vmax.f32 %v842_v16, 0.0  ;;  %2350 = vmatprep.subr.bf16.mxu0 %v15542_v56  ;;  %2736 = vmatprep.subr.bf16.mxu1 %v15572_v57  ;;  %v15587_v56 = vld [vmem:[#allocation2 + $0x2cc] ss:$16 sps:$4 sm:$0xff]   ;;  %v1035_v57 = vadd.f32 %v1034_v52, %v17395_v15  ;;  %v1036_v59 = vpop.f32.mrb[11].mxu1  ;;  %v1187_v60 = vmax.f32 %v1031_v45, 0.0 }
 0x1b3   : > { %v1190_v31 = vmax.f32 %v844_v24, 0.0  ;;  %v1037_v0 = vadd.f32 %v1036_v59, %v17398_v20  ;;  %v1188_v4 = vmax.f32 %v1033_v51, 0.0  ;;  %v15555_v52 = vld [vmem:[#allocation2 + $0x300] ss:$16 sps:$4 sm:$0xff]  }
 0x1b4   : > { %v1434_v35 = vpack.c.bf16 %v1189_v28, %v1185_v27  ;;  %v1191_v8 = vmax.f32 %v1035_v57, 0.0  ;;  %v15599_v57 = vld [vmem:[#allocation2 + $0x32c] ss:$16 sps:$4 sm:$0xff]  }
 0x1b5   : > { %v847_v39 = vpop.f32.mrb[12].mxu0  ;;  %v1435_v40 = vpack.c.bf16 %v1190_v31, %v1186_v30  ;;  %2351 = vmatpush1.bf16.msra.mxu0 %v15540_v11  ;;  %2737 = vmatpush1.bf16.msra.mxu1 %v15570_v12  ;;  %v15549_v12 = vld [vmem:[#allocation2 + $0x2c0] ss:$16 sps:$4 sm:$0xff]   ;;  %v1192_v14 = vmax.f32 %v1037_v0, 0.0 }
 0x1b6   : > { %v848_v43 = vadd.f32 %v847_v39, %v17381_v2  ;;  %v849_v44 = vpop.f32.mrb[13].mxu0  ;;  %2352 = vmatprep.subr.bf16.mxu0 %v15545_v18  ;;  %2738 = vmatprep.subr.bf16.mxu1 %v15578_v19  ;;  %v15590_v18 = vld [vmem:[#allocation2 + $0x2ec] ss:$16 sps:$4 sm:$0xff]   ;;  %v17432_v19 = vpack.c.bf16 %v1191_v8, %v1187_v60  ;;  %v15552_v31 = vld [vmem:[#allocation2 + $0x2e0] ss:$16 sps:$4 sm:$0xff]  }
 0x1b7   : > { %v850_v47 = vadd.f32 %v849_v44, %v17384_v3  ;;  %v851_v48 = vpop.f32.mrb[14].mxu0  ;;  %2203 = vmatprep.mubr.bf16.mxu0 %v1435_v40  ;;  %2589 = vmatprep.mubr.bf16.mxu1 %v1435_v40  ;;  %v1040_v23 = vpop.f32.mrb[12].mxu1  ;;  %v17434_v24 = vpack.c.bf16 %v1192_v14, %v1188_v4  ;;  %v15596_v39 = vld [vmem:[#allocation2 + $0x30c] ss:$16 sps:$4 sm:$0xff]   ;;  %v15597_v14 = vld [vmem:[#allocation2 + $0x328] ss:$16 sps:$4 sm:$0xff]  }
 0x1b8   : > { %v852_v53 = vadd.f32 %v851_v48, %v17381_v2  ;;  %v853_v54 = vpop.f32.mrb[15].mxu0  ;;  %2204 = vmatmul.mubr.bf16.gmra.mrb[72].mxu0 %v1434_v35  ;;  %2590 = vmatmul.mubr.bf16.gmra.mrb[72].mxu1 %v1434_v35  ;;  %v1193_v5 = vmax.f32 %v848_v43, 0.0  ;;  %v1041_v27 = vadd.f32 %v1040_v23, %v17395_v15  ;;  %v1042_v28 = vpop.f32.mrb[13].mxu1  ;;  %v15605_v23 = vld [vmem:[#allocation2 + $0x34c] ss:$16 sps:$4 sm:$0xff]  }
 0x1b9   : > { %v854_v61 = vadd.f32 %v853_v54, %v17384_v3  ;;  %2353 = vmatpush1.bf16.msra.mxu0 %v15543_v32  ;;  %2739 = vmatpush1.bf16.msra.mxu1 %v15576_v33  ;;  %v1194_v10 = vmax.f32 %v850_v47, 0.0  ;;  %v15588_v32 = vld [vmem:[#allocation2 + $0x2e8] ss:$16 sps:$4 sm:$0xff]   ;;  %v1043_v33 = vadd.f32 %v1042_v28, %v17398_v20  ;;  %v1044_v34 = vpop.f32.mrb[14].mxu1 }
 0x1ba   : > { %v1197_v7 = vmax.f32 %v852_v53, 0.0  ;;  %2354 = vmatprep.subr.bf16.mxu0 %v15548_v36  ;;  %2740 = vmatprep.subr.bf16.mxu1 %v15581_v37  ;;  %v15557_v37 = vld [vmem:[#allocation2 + $0x304] ss:$16 sps:$4 sm:$0xff]   ;;  %v1045_v40 = vadd.f32 %v1044_v34, %v17395_v15  ;;  %v1046_v41 = vpop.f32.mrb[15].mxu1  ;;  %v1195_v43 = vmax.f32 %v1041_v27, 0.0 }
 0x1bb   : > { %v1198_v11 = vmax.f32 %v854_v61, 0.0  ;;  %v1047_v45 = vadd.f32 %v1046_v41, %v17398_v20  ;;  %v1196_v46 = vmax.f32 %v1043_v33, 0.0  ;;  %v15594_v53 = vld [vmem:[#allocation2 + $0x308] ss:$16 sps:$4 sm:$0xff]   ;;  %v15584_v41 = vld [vmem:[#allocation2 + $0x364] ss:$16 sps:$4 sm:$0xff]  }
 0x1bc   : > { %v1438_v16 = vpack.c.bf16 %v1197_v7, %v1193_v5 }
 0x1bd   : > { %v857_v21 = vpop.f32.mrb[16].mxu0  ;;  %v1439_v22 = vpack.c.bf16 %v1198_v11, %v1194_v10  ;;  %2355 = vmatpush1.bf16.msra.mxu0 %v15546_v49  ;;  %2741 = vmatpush1.bf16.msra.mxu1 %v15579_v50  ;;  %v1199_v49 = vmax.f32 %v1045_v40, 0.0  ;;  %v1200_v54 = vmax.f32 %v1047_v45, 0.0 }
 0x1be   : > { %v858_v25 = vadd.f32 %v857_v21, %v17381_v2  ;;  %v859_v26 = vpop.f32.mrb[17].mxu0  ;;  %2356 = vmatprep.subr.bf16.mxu0 %v15551_v55  ;;  %2742 = vmatprep.subr.bf16.mxu1 %v15587_v56  ;;  %v15566_v56 = vld [vmem:[#allocation2 + $0x324] ss:$16 sps:$4 sm:$0xff]  }
 0x1bf   : > { %v860_v29 = vadd.f32 %v859_v26, %v17384_v3  ;;  %v861_v30 = vpop.f32.mrb[18].mxu0  ;;  %2213 = vmatprep.mubr.bf16.mxu0 %v1439_v22  ;;  %2599 = vmatprep.mubr.bf16.mxu1 %v1439_v22  ;;  %v17444_v59 = vpack.c.bf16 %v1199_v49, %v1195_v43  ;;  %v1050_v0 = vpop.f32.mrb[16].mxu1  ;;  %v17446_v4 = vpack.c.bf16 %v1200_v54, %v1196_v46  ;;  %v15575_v22 = vld [vmem:[#allocation2 + $0x344] ss:$16 sps:$4 sm:$0xff]   ;;  %v15608_v43 = vld [vmem:[#allocation2 + $0x36c] ss:$16 sps:$4 sm:$0xff]  }
 0x1c0   : > { %v862_v35 = vadd.f32 %v861_v30, %v17381_v2  ;;  %v863_v36 = vpop.f32.mrb[19].mxu0  ;;  %2214 = vmatmul.mubr.bf16.gmra.mrb[76].mxu0 %v1438_v16  ;;  %2600 = vmatmul.mubr.bf16.gmra.mrb[76].mxu1 %v1438_v16  ;;  %v1201_v47 = vmax.f32 %v858_v25, 0.0  ;;  %v1051_v8 = vadd.f32 %v1050_v0, %v17395_v15  ;;  %v1052_v10 = vpop.f32.mrb[17].mxu1 }
 0x1c1   : > { %v864_v44 = vadd.f32 %v863_v36, %v17384_v3  ;;  %2357 = vmatpush1.bf16.msra.mxu0 %v15549_v12  ;;  %2743 = vmatpush1.bf16.msra.mxu1 %v15585_v13  ;;  %v1202_v50 = vmax.f32 %v860_v29, 0.0  ;;  %v15564_v13 = vld [vmem:[#allocation2 + $0x320] ss:$16 sps:$4 sm:$0xff]   ;;  %v1053_v16 = vadd.f32 %v1052_v10, %v17398_v20 }
 0x1c2   : > { %v1205_v48 = vmax.f32 %v862_v35, 0.0  ;;  %2358 = vmatprep.subr.bf16.mxu0 %v15554_v17  ;;  %2744 = vmatprep.subr.bf16.mxu1 %v15590_v18  ;;  %v1054_v17 = vpop.f32.mrb[18].mxu1  ;;  %v1203_v27 = vmax.f32 %v1051_v8, 0.0  ;;  %v15573_v36 = vld [vmem:[#allocation2 + $0x340] ss:$16 sps:$4 sm:$0xff]  }
 0x1c3   : > { %v1206_v51 = vmax.f32 %v864_v44, 0.0  ;;  %v1055_v25 = vadd.f32 %v1054_v17, %v17395_v15  ;;  %v1056_v26 = vpop.f32.mrb[19].mxu1  ;;  %v1204_v30 = vmax.f32 %v1053_v16, 0.0 }
 0x1c4   : > { %v1442_v55 = vpack.c.bf16 %v1205_v48, %v1201_v47  ;;  %v1057_v29 = vadd.f32 %v1056_v26, %v17398_v20 }
 0x1c5   : > { %v867_v60 = vpop.f32.mrb[20].mxu0  ;;  %v1443_v61 = vpack.c.bf16 %v1206_v51, %v1202_v50  ;;  %2359 = vmatpush1.bf16.msra.mxu0 %v15552_v31  ;;  %2745 = vmatpush1.bf16.msra.mxu1 %v15588_v32  ;;  %v1207_v33 = vmax.f32 %v1055_v25, 0.0  ;;  %v15612_v25 = vld [vmem:[#allocation2 + $0x388] ss:$16 sps:$4 sm:$0xff]  }
 0x1c6   : > { %v868_v5 = vadd.f32 %v867_v60, %v17381_v2  ;;  %v869_v7 = vpop.f32.mrb[21].mxu0  ;;  %2360 = vmatprep.subr.bf16.mxu0 %v15557_v37  ;;  %2746 = vmatprep.subr.bf16.mxu1 %v15596_v39  ;;  %v15603_v37 = vld [vmem:[#allocation2 + $0x348] ss:$16 sps:$4 sm:$0xff]   ;;  %v1208_v39 = vmax.f32 %v1057_v29, 0.0  ;;  %v15617_v29 = vld [vmem:[#allocation2 + $0x3ac] ss:$16 sps:$4 sm:$0xff]  }
 0x1c7   : > { %v870_v11 = vadd.f32 %v869_v7, %v17384_v3  ;;  %v871_v12 = vpop.f32.mrb[22].mxu0  ;;  %2223 = vmatprep.mubr.bf16.mxu0 %v1443_v61  ;;  %2609 = vmatprep.mubr.bf16.mxu1 %v1443_v61  ;;  %v17456_v44 = vpack.c.bf16 %v1207_v33, %v1203_v27  ;;  %v1060_v47 = vpop.f32.mrb[20].mxu1  ;;  %v15614_v7 = vld [vmem:[#allocation2 + $0x38c] ss:$16 sps:$4 sm:$0xff]  }
 0x1c8   : > { %v872_v18 = vadd.f32 %v871_v12, %v17381_v2  ;;  %v873_v21 = vpop.f32.mrb[23].mxu0  ;;  %2224 = vmatmul.mubr.bf16.gmra.mrb[80].mxu0 %v1442_v55  ;;  %2610 = vmatmul.mubr.bf16.gmra.mrb[80].mxu1 %v1442_v55  ;;  %v1209_v31 = vmax.f32 %v868_v5, 0.0  ;;  %v17458_v48 = vpack.c.bf16 %v1208_v39, %v1204_v30  ;;  %v1061_v51 = vadd.f32 %v1060_v47, %v17395_v15  ;;  %v15582_v55 = vld [vmem:[#allocation2 + $0x360] ss:$16 sps:$4 sm:$0xff]   ;;  %v15593_v5 = vld [vmem:[#allocation2 + $0x384] ss:$16 sps:$4 sm:$0xff]  }
 0x1c9   : > { %v874_v28 = vadd.f32 %v873_v21, %v17384_v3  ;;  %2361 = vmatpush1.bf16.msra.mxu0 %v15555_v52  ;;  %2747 = vmatpush1.bf16.msra.mxu1 %v15594_v53  ;;  %v1210_v34 = vmax.f32 %v870_v11, 0.0  ;;  %v1062_v52 = vpop.f32.mrb[21].mxu1 }
 0x1ca   : > { %v1213_v32 = vmax.f32 %v872_v18, 0.0  ;;  %2362 = vmatprep.subr.bf16.mxu0 %v15566_v56  ;;  %2748 = vmatprep.subr.bf16.mxu1 %v15599_v57  ;;  %v15606_v56 = vld [vmem:[#allocation2 + $0x368] ss:$16 sps:$4 sm:$0xff]   ;;  %v1063_v57 = vadd.f32 %v1062_v52, %v17398_v20  ;;  %v1064_v60 = vpop.f32.mrb[22].mxu1  ;;  %v1211_v11 = vmax.f32 %v1061_v51, 0.0 }
 0x1cb   : > { %v1214_v35 = vmax.f32 %v874_v28, 0.0  ;;  %v1065_v8 = vadd.f32 %v1064_v60, %v17395_v15  ;;  %v1066_v10 = vpop.f32.mrb[23].mxu1  ;;  %v15602_v28 = vld [vmem:[#allocation2 + $0x3a4] ss:$16 sps:$4 sm:$0xff]   ;;  %v15623_v52 = vld [vmem:[#allocation2 + $0x3cc] ss:$16 sps:$4 sm:$0xff]  }
 0x1cc   : > { %v1446_v40 = vpack.c.bf16 %v1213_v32, %v1209_v31  ;;  %v15611_v51 = vld [vmem:[#allocation2 + $0x3c4] ss:$16 sps:$4 sm:$0xff]  }
 0x1cd   : > { %v877_v45 = vpop.f32.mrb[24].mxu0  ;;  %v1447_v46 = vpack.c.bf16 %v1214_v35, %v1210_v34  ;;  %2363 = vmatpush1.bf16.msra.mxu0 %v15564_v13  ;;  %2749 = vmatpush1.bf16.msra.mxu1 %v15597_v14  ;;  %v1067_v13 = vadd.f32 %v1066_v10, %v17398_v20  ;;  %v1212_v14 = vmax.f32 %v1063_v57, 0.0  ;;  %v1215_v18 = vmax.f32 %v1065_v8, 0.0  ;;  %v15609_v10 = vld [vmem:[#allocation2 + $0x3c0] ss:$16 sps:$4 sm:$0xff]  }
 0x1ce   : > { %v878_v49 = vadd.f32 %v877_v45, %v17381_v2  ;;  %v879_v50 = vpop.f32.mrb[25].mxu0  ;;  %2364 = vmatprep.subr.bf16.mxu0 %v15575_v22  ;;  %2750 = vmatprep.subr.bf16.mxu1 %v15605_v23  ;;  %v15591_v23 = vld [vmem:[#allocation2 + $0x380] ss:$16 sps:$4 sm:$0xff]   ;;  %v15615_v45 = vld [vmem:[#allocation2 + $0x3a8] ss:$16 sps:$4 sm:$0xff]  }
 0x1cf   : > { %v880_v53 = vadd.f32 %v879_v50, %v17384_v3  ;;  %v881_v54 = vpop.f32.mrb[26].mxu0  ;;  %2233 = vmatprep.mubr.bf16.mxu0 %v1447_v46  ;;  %2619 = vmatprep.mubr.bf16.mxu1 %v1447_v46  ;;  %v1216_v26 = vmax.f32 %v1067_v13, 0.0  ;;  %v17468_v30 = vpack.c.bf16 %v1215_v18, %v1211_v11  ;;  %v1070_v33 = vpop.f32.mrb[24].mxu1  ;;  %v15621_v11 = vld [vmem:[#allocation2 + $0x3c8] ss:$16 sps:$4 sm:$0xff]  }
 0x1d0   : > { %v882_v61 = vadd.f32 %v881_v54, %v17381_v2  ;;  %v883_v0 = vpop.f32.mrb[27].mxu0  ;;  %2234 = vmatmul.mubr.bf16.gmra.mrb[84].mxu0 %v1446_v40  ;;  %2620 = vmatmul.mubr.bf16.gmra.mrb[84].mxu1 %v1446_v40  ;;  %v1217_v16 = vmax.f32 %v878_v49, 0.0  ;;  %v1072_v39 = vpop.f32.mrb[25].mxu1 }
 0x1d1   : > { %v884_v12 = vadd.f32 %v883_v0, %v17384_v3  ;;  %2365 = vmatpush1.bf16.msra.mxu0 %v15573_v36  ;;  %2751 = vmatpush1.bf16.msra.mxu1 %v15603_v37  ;;  %v1218_v21 = vmax.f32 %v880_v53, 0.0  ;;  %v17470_v34 = vpack.c.bf16 %v1216_v26, %v1212_v14  ;;  %v1071_v37 = vadd.f32 %v1070_v33, %v17395_v15  ;;  %v1074_v47 = vpop.f32.mrb[26].mxu1  ;;  %v15620_v14 = vld [vmem:[#allocation2 + $0x3e4] ss:$16 sps:$4 sm:$0xff]   ;;  %v15624_v33 = vld [vmem:[#allocation2 + $0x3e8] ss:$16 sps:$4 sm:$0xff]  }
 0x1d2   : > { %v1221_v17 = vmax.f32 %v882_v61, 0.0  ;;  %2366 = vmatprep.subr.bf16.mxu0 %v15584_v41  ;;  %2752 = vmatprep.subr.bf16.mxu1 %v15608_v43  ;;  %v15600_v43 = vld [vmem:[#allocation2 + $0x3a0] ss:$16 sps:$4 sm:$0xff]   ;;  %v1073_v46 = vadd.f32 %v1072_v39, %v17398_v20  ;;  %v1075_v53 = vadd.f32 %v1074_v47, %v17395_v15  ;;  %v1076_v54 = vpop.f32.mrb[27].mxu1 }
 0x1d3   : > { %v1222_v22 = vmax.f32 %v884_v12, 0.0  ;;  %v1077_v57 = vadd.f32 %v1076_v54, %v17398_v20 }
 0x1d4   : > { %v1450_v27 = vpack.c.bf16 %v1221_v17, %v1217_v16  ;;  %v1220_v60 = vmax.f32 %v1073_v46, 0.0  ;;  %v15626_v16 = vld [vmem:[#allocation2 + $0x3ec] ss:$16 sps:$4 sm:$0xff]  }
 0x1d5   : > { %v887_v31 = vpop.f32.mrb[28].mxu0  ;;  %v1451_v32 = vpack.c.bf16 %v1222_v22, %v1218_v21  ;;  %2367 = vmatpush1.bf16.msra.mxu0 %v15582_v55  ;;  %2753 = vmatpush1.bf16.msra.mxu1 %v15606_v56  ;;  %v1219_v55 = vmax.f32 %v1071_v37, 0.0  ;;  %v1224_v12 = vmax.f32 %v1077_v57, 0.0 }
 0x1d6   : > { %v888_v35 = vadd.f32 %v887_v31, %v17381_v2  ;;  %v889_v36 = vpop.f32.mrb[29].mxu0  ;;  %2368 = vmatprep.subr.bf16.mxu0 %v15593_v5  ;;  %2754 = vmatprep.subr.bf16.mxu1 %v15614_v7  ;;  %v1223_v5 = vmax.f32 %v1075_v53, 0.0 }
 0x1d7   : > { %v890_v40 = vadd.f32 %v889_v36, %v17384_v3  ;;  %v891_v41 = vpop.f32.mrb[30].mxu0  ;;  %2243 = vmatprep.mubr.bf16.mxu0 %v1451_v32  ;;  %2629 = vmatprep.mubr.bf16.mxu1 %v1451_v32  ;;  %v1080_v22 = vpop.f32.mrb[28].mxu1  ;;  %v15618_v32 = vld [vmem:[#allocation2 + $0x3e0] ss:$16 sps:$4 sm:$0xff]  }
 0x1d8   : > { %v892_v49 = vadd.f32 %v891_v41, %v17381_v2  ;;  %v893_v50 = vpop.f32.mrb[31].mxu0  ;;  %2244 = vmatmul.mubr.bf16.gmra.mrb[88].mxu0 %v1450_v27  ;;  %2630 = vmatmul.mubr.bf16.gmra.mrb[88].mxu1 %v1450_v27  ;;  %v1225_v61 = vmax.f32 %v888_v35, 0.0  ;;  %v17480_v17 = vpack.c.bf16 %v1223_v5, %v1219_v55  ;;  %v1081_v27 = vadd.f32 %v1080_v22, %v17395_v15 }
 0x1d9   : > { %v894_v56 = vadd.f32 %v893_v50, %v17384_v3  ;;  %2369 = vmatpush1.bf16.msra.mxu0 %v15591_v23  ;;  %2755 = vmatpush1.bf16.msra.mxu1 %v15612_v25  ;;  %v1226_v7 = vmax.f32 %v890_v40, 0.0  ;;  %v17482_v23 = vpack.c.bf16 %v1224_v12, %v1220_v60 }
 0x1da   : > { %v1229_v0 = vmax.f32 %v892_v49, 0.0  ;;  %2370 = vmatprep.subr.bf16.mxu0 %v15602_v28  ;;  %2756 = vmatprep.subr.bf16.mxu1 %v15617_v29  ;;  %v1082_v28 = vpop.f32.mrb[29].mxu1 }
 0x1db   : > { %v1230_v8 = vmax.f32 %v894_v56, 0.0  ;;  %v1083_v35 = vadd.f32 %v1082_v28, %v17398_v20  ;;  %v1084_v36 = vpop.f32.mrb[30].mxu1 }
 0x1dc   : > { %v1454_v13 = vpack.c.bf16 %v1229_v0, %v1225_v61  ;;  %v1085_v40 = vadd.f32 %v1084_v36, %v17395_v15  ;;  %v1086_v41 = vpop.f32.mrb[31].mxu1 }
 0x1dd   : > { %v897_v18 = vpop.f32.mrb[32].mxu0  ;;  %v1455_v21 = vpack.c.bf16 %v1230_v8, %v1226_v7  ;;  %2371 = vmatpush1.bf16.msra.mxu0 %v15600_v43  ;;  %2757 = vmatpush1.bf16.msra.mxu1 %v15615_v45  ;;  %v1227_v43 = vmax.f32 %v1081_v27, 0.0  ;;  %v1087_v46 = vadd.f32 %v1086_v41, %v17398_v20  ;;  %v1228_v47 = vmax.f32 %v1083_v35, 0.0 }
 0x1de   : > { %v898_v25 = vadd.f32 %v897_v18, %v17381_v2  ;;  %v899_v26 = vpop.f32.mrb[33].mxu0  ;;  %2372 = vmatprep.subr.bf16.mxu0 %v15611_v51  ;;  %2758 = vmatprep.subr.bf16.mxu1 %v15623_v52  ;;  %v1231_v51 = vmax.f32 %v1085_v40, 0.0 }
 0x1df   : > { %v900_v29 = vadd.f32 %v899_v26, %v17384_v3  ;;  %v901_v31 = vpop.f32.mrb[34].mxu0  ;;  %2253 = vmatprep.mubr.bf16.mxu0 %v1455_v21  ;;  %2639 = vmatprep.mubr.bf16.mxu1 %v1455_v21  ;;  %v1232_v54 = vmax.f32 %v1087_v46, 0.0  ;;  %v1090_v61 = vpop.f32.mrb[32].mxu1 }
 0x1e0   : > { %v902_v37 = vadd.f32 %v901_v31, %v17381_v2  ;;  %v903_v39 = vpop.f32.mrb[35].mxu0  ;;  %2254 = vmatmul.mubr.bf16.gmra.mrb[92].mxu0 %v1454_v13  ;;  %2640 = vmatmul.mubr.bf16.gmra.mrb[92].mxu1 %v1454_v13  ;;  %v1233_v49 = vmax.f32 %v898_v25, 0.0  ;;  %v17492_v56 = vpack.c.bf16 %v1231_v51, %v1227_v43  ;;  %v1091_v8 = vadd.f32 %v1090_v61, %v17395_v15 }
 0x1e1   : > { %v904_v45 = vadd.f32 %v903_v39, %v17384_v3  ;;  %2373 = vmatpush1.bf16.msra.mxu0 %v15609_v10  ;;  %2759 = vmatpush1.bf16.msra.mxu1 %v15621_v11  ;;  %v1234_v52 = vmax.f32 %v900_v29, 0.0  ;;  %v17494_v0 = vpack.c.bf16 %v1232_v54, %v1228_v47  ;;  %v1092_v10 = vpop.f32.mrb[33].mxu1 }
 0x1e2   : > { %v1237_v50 = vmax.f32 %v902_v37, 0.0  ;;  %2374 = vmatprep.subr.bf16.mxu0 %v15620_v14  ;;  %2760 = vmatprep.subr.bf16.mxu1 %v15626_v16  ;;  %v1093_v13 = vadd.f32 %v1092_v10, %v17398_v20  ;;  %v1094_v14 = vpop.f32.mrb[34].mxu1  ;;  %v1235_v25 = vmax.f32 %v1091_v8, 0.0 }
 0x1e3   : > { %v1238_v53 = vmax.f32 %v904_v45, 0.0  ;;  %v1095_v21 = vadd.f32 %v1094_v14, %v17395_v15  ;;  %v1096_v22 = vpop.f32.mrb[35].mxu1 }
 0x1e4   : > { %v1458_v55 = vpack.c.bf16 %v1237_v50, %v1233_v49  ;;  %v1097_v27 = vadd.f32 %v1096_v22, %v17398_v20  ;;  %v1236_v28 = vmax.f32 %v1093_v13, 0.0 }
 0x1e5   : > { %v907_v57 = vpop.f32.mrb[36].mxu0  ;;  %v1459_v60 = vpack.c.bf16 %v1238_v53, %v1234_v52  ;;  %2375 = vmatpush1.bf16.msra.mxu0 %v15618_v32  ;;  %2761 = vmatpush1.bf16.msra.mxu1 %v15624_v33  ;;  %v1239_v32 = vmax.f32 %v1095_v21, 0.0 }
 0x1e6   : > { %v908_v5 = vadd.f32 %v907_v57, %v17381_v2  ;;  %v909_v7 = vpop.f32.mrb[37].mxu0  ;;  %v1240_v36 = vmax.f32 %v1097_v27, 0.0 }
 0x1e7   : > { %v910_v11 = vadd.f32 %v909_v7, %v17384_v3  ;;  %v911_v12 = vpop.f32.mrb[38].mxu0  ;;  %2263 = vmatprep.mubr.bf16.mxu0 %v1459_v60  ;;  %2649 = vmatprep.mubr.bf16.mxu1 %v1459_v60  ;;  %v17504_v39 = vpack.c.bf16 %v1239_v32, %v1235_v25  ;;  %v1100_v43 = vpop.f32.mrb[36].mxu1 }
 0x1e8   : > { %v912_v16 = vadd.f32 %v911_v12, %v17381_v2  ;;  %v913_v18 = vpop.f32.mrb[39].mxu0  ;;  %2264 = vmatmul.mubr.bf16.gmra.mrb[96].mxu0 %v1458_v55  ;;  %2650 = vmatmul.mubr.bf16.gmra.mrb[96].mxu1 %v1458_v55  ;;  %v1241_v29 = vmax.f32 %v908_v5, 0.0  ;;  %v17506_v45 = vpack.c.bf16 %v1240_v36, %v1236_v28  ;;  %v1101_v49 = vadd.f32 %v1100_v43, %v17395_v15  ;;  %v1102_v50 = vpop.f32.mrb[37].mxu1 }
 0x1e9   : > { %v914_v26 = vadd.f32 %v913_v18, %v17384_v3  ;;  %v1242_v33 = vmax.f32 %v910_v11, 0.0  ;;  %v1103_v53 = vadd.f32 %v1102_v50, %v17398_v20  ;;  %v1104_v54 = vpop.f32.mrb[38].mxu1 }
 0x1ea   : > { %v1245_v31 = vmax.f32 %v912_v16, 0.0  ;;  %v1105_v60 = vadd.f32 %v1104_v54, %v17395_v15  ;;  %v1106_v61 = vpop.f32.mrb[39].mxu1  ;;  %v1243_v5 = vmax.f32 %v1101_v49, 0.0 }
 0x1eb   : > { %v1246_v35 = vmax.f32 %v914_v26, 0.0  ;;  %v1107_v8 = vadd.f32 %v1106_v61, %v17398_v20  ;;  %v1244_v10 = vmax.f32 %v1103_v53, 0.0 }
 0x1ec   : > { %v1462_v37 = vpack.c.bf16 %v1245_v31, %v1241_v29  ;;  %v1247_v13 = vmax.f32 %v1105_v60, 0.0 }
 0x1ed   : > { %v917_v40 = vpop.f32.mrb[40].mxu0  ;;  %v1463_v41 = vpack.c.bf16 %v1246_v35, %v1242_v33  ;;  %v1248_v18 = vmax.f32 %v1107_v8, 0.0 }
 0x1ee   : > { %v918_v46 = vadd.f32 %v917_v40, %v17381_v2  ;;  %v919_v47 = vpop.f32.mrb[41].mxu0  ;;  %v17516_v22 = vpack.c.bf16 %v1247_v13, %v1243_v5 }
 0x1ef   : > { %v920_v51 = vadd.f32 %v919_v47, %v17384_v3  ;;  %v921_v52 = vpop.f32.mrb[42].mxu0  ;;  %2273 = vmatprep.mubr.bf16.mxu0 %v1463_v41  ;;  %2659 = vmatprep.mubr.bf16.mxu1 %v1463_v41  ;;  %v1110_v27 = vpop.f32.mrb[40].mxu1  ;;  %v17518_v28 = vpack.c.bf16 %v1248_v18, %v1244_v10 }
 0x1f0   : > { %v922_v55 = vadd.f32 %v921_v52, %v17381_v2  ;;  %v923_v57 = vpop.f32.mrb[43].mxu0  ;;  %2274 = vmatmul.mubr.bf16.gmra.mrb[100].mxu0 %v1462_v37  ;;  %2660 = vmatmul.mubr.bf16.gmra.mrb[100].mxu1 %v1462_v37  ;;  %v1249_v11 = vmax.f32 %v918_v46, 0.0  ;;  %v1111_v32 = vadd.f32 %v1110_v27, %v17395_v15  ;;  %v1112_v33 = vpop.f32.mrb[41].mxu1 }
 0x1f1   : > { %v924_v7 = vadd.f32 %v923_v57, %v17384_v3  ;;  %v1250_v14 = vmax.f32 %v920_v51, 0.0  ;;  %v1113_v37 = vadd.f32 %v1112_v33, %v17398_v20  ;;  %v1114_v40 = vpop.f32.mrb[42].mxu1 }
 0x1f2   : > { %v1253_v12 = vmax.f32 %v922_v55, 0.0  ;;  %v1115_v46 = vadd.f32 %v1114_v40, %v17395_v15  ;;  %v1116_v47 = vpop.f32.mrb[43].mxu1  ;;  %v1251_v49 = vmax.f32 %v1111_v32, 0.0 }
 0x1f3   : > { %v1254_v16 = vmax.f32 %v924_v7, 0.0  ;;  %v1117_v51 = vadd.f32 %v1116_v47, %v17398_v20  ;;  %v1252_v52 = vmax.f32 %v1113_v37, 0.0 }
 0x1f4   : > { %v1466_v21 = vpack.c.bf16 %v1253_v12, %v1249_v11  ;;  %v1255_v55 = vmax.f32 %v1115_v46, 0.0  ;;  %v15629_v46 = vld [vmem:[#allocation5 + $0x4] ss:$16 sps:$4 sm:$0xff]  }
 0x1f5   : > { %v927_v25 = vpop.f32.mrb[44].mxu0  ;;  %v1467_v26 = vpack.c.bf16 %v1254_v16, %v1250_v14  ;;  %v1256_v61 = vmax.f32 %v1117_v51, 0.0  ;;  %3905 = vmatprep.subr.bf16.mxu0 %v15629_v46 }
 0x1f6   : > { %v928_v29 = vadd.f32 %v927_v25, %v17381_v2  ;;  %v929_v31 = vpop.f32.mrb[45].mxu0  ;;  %v17528_v7 = vpack.c.bf16 %v1255_v55, %v1251_v49 }
 0x1f7   : > { %v930_v35 = vadd.f32 %v929_v31, %v17384_v3  ;;  %v931_v36 = vpop.f32.mrb[46].mxu0  ;;  %2283 = vmatprep.mubr.bf16.mxu0 %v1467_v26  ;;  %2669 = vmatprep.mubr.bf16.mxu1 %v1467_v26  ;;  %v1120_v11 = vpop.f32.mrb[44].mxu1  ;;  %v17530_v12 = vpack.c.bf16 %v1256_v61, %v1252_v52 }
 0x1f8   : > { %v932_v41 = vadd.f32 %v931_v36, %v17381_v2  ;;  %v933_v43 = vpop.f32.mrb[47].mxu0  ;;  %2284 = vmatmul.mubr.bf16.gmra.mrb[104].mxu0 %v1466_v21  ;;  %2670 = vmatmul.mubr.bf16.gmra.mrb[104].mxu1 %v1466_v21  ;;  %v1257_v53 = vmax.f32 %v928_v29, 0.0  ;;  %v1121_v16 = vadd.f32 %v1120_v11, %v17395_v15  ;;  %v1122_v18 = vpop.f32.mrb[45].mxu1 }
 0x1f9   : > { %v934_v50 = vadd.f32 %v933_v43, %v17384_v3  ;;  %v1258_v57 = vmax.f32 %v930_v35, 0.0  ;;  %v1123_v26 = vadd.f32 %v1122_v18, %v17398_v20  ;;  %v1124_v27 = vpop.f32.mrb[46].mxu1 }
 0x1fa   : > { %v1261_v54 = vmax.f32 %v932_v41, 0.0  ;;  %v1125_v33 = vadd.f32 %v1124_v27, %v17395_v15  ;;  %v1126_v35 = vpop.f32.mrb[47].mxu1  ;;  %v1259_v36 = vmax.f32 %v1121_v16, 0.0 }
 0x1fb   : > { %v1262_v60 = vmax.f32 %v934_v50, 0.0  ;;  %v1127_v41 = vadd.f32 %v1126_v35, %v17398_v20  ;;  %v1260_v43 = vmax.f32 %v1123_v26, 0.0 }
 0x1fc   : > { %v1470_v5 = vpack.c.bf16 %v1261_v54, %v1257_v53  ;;  %v1263_v49 = vmax.f32 %v1125_v33, 0.0 }
 0x1fd   : > { %v937_v8 = vpop.f32.mrb[48].mxu0  ;;  %v1471_v10 = vpack.c.bf16 %v1262_v60, %v1258_v57  ;;  %v1264_v51 = vmax.f32 %v1127_v41, 0.0 }
 0x1fe   : > { %v938_v13 = vadd.f32 %v937_v8, %v17381_v2  ;;  %v939_v14 = vpop.f32.mrb[49].mxu0  ;;  %v17540_v53 = vpack.c.bf16 %v1263_v49, %v1259_v36 }
 0x1ff   : > { %v940_v21 = vadd.f32 %v939_v14, %v17384_v3  ;;  %v941_v25 = vpop.f32.mrb[50].mxu0  ;;  %2293 = vmatprep.mubr.bf16.mxu0 %v1471_v10  ;;  %2679 = vmatprep.mubr.bf16.mxu1 %v1471_v10  ;;  %v1130_v57 = vpop.f32.mrb[48].mxu1  ;;  %v17542_v60 = vpack.c.bf16 %v1264_v51, %v1260_v43 }
 0x200   : > { %v942_v29 = vadd.f32 %v941_v25, %v17381_v2  ;;  %v943_v31 = vpop.f32.mrb[51].mxu0  ;;  %2294 = vmatmul.mubr.bf16.gmra.mrb[108].mxu0 %v1470_v5  ;;  %2680 = vmatmul.mubr.bf16.gmra.mrb[108].mxu1 %v1470_v5  ;;  %v1265_v32 = vmax.f32 %v938_v13, 0.0  ;;  %v1131_v8 = vadd.f32 %v1130_v57, %v17395_v15  ;;  %v1132_v10 = vpop.f32.mrb[49].mxu1 }
 0x201   : > { %v944_v37 = vadd.f32 %v943_v31, %v17384_v3  ;;  %v1266_v40 = vmax.f32 %v940_v21, 0.0  ;;  %v1133_v14 = vadd.f32 %v1132_v10, %v17398_v20  ;;  %v1134_v16 = vpop.f32.mrb[50].mxu1 }
 0x202   : > { %v1269_v47 = vmax.f32 %v942_v29, 0.0  ;;  %v1135_v26 = vadd.f32 %v1134_v16, %v17395_v15  ;;  %v1136_v27 = vpop.f32.mrb[51].mxu1  ;;  %v1267_v29 = vmax.f32 %v1131_v8, 0.0 }
 0x203   : > { %v1270_v50 = vmax.f32 %v944_v37, 0.0  ;;  %v1137_v33 = vadd.f32 %v1136_v27, %v17398_v20  ;;  %v1268_v35 = vmax.f32 %v1133_v14, 0.0 }
 0x204   : > { %v1474_v52 = vpack.c.bf16 %v1269_v47, %v1265_v32  ;;  %v1271_v37 = vmax.f32 %v1135_v26, 0.0 }
 0x205   : > { %v947_v54 = vpop.f32.mrb[52].mxu0  ;;  %v1475_v55 = vpack.c.bf16 %v1270_v50, %v1266_v40  ;;  %v1272_v41 = vmax.f32 %v1137_v33, 0.0 }
 0x206   : > { %v948_v61 = vadd.f32 %v947_v54, %v17381_v2  ;;  %v949_v5 = vpop.f32.mrb[53].mxu0  ;;  %v17552_v46 = vpack.c.bf16 %v1271_v37, %v1267_v29 }
 0x207   : > { %v950_v11 = vadd.f32 %v949_v5, %v17384_v3  ;;  %v951_v13 = vpop.f32.mrb[54].mxu0  ;;  %2303 = vmatprep.mubr.bf16.mxu0 %v1475_v55  ;;  %2689 = vmatprep.mubr.bf16.mxu1 %v1475_v55  ;;  %v1140_v50 = vpop.f32.mrb[52].mxu1  ;;  %v17554_v51 = vpack.c.bf16 %v1272_v41, %v1268_v35 }
 0x208   : > { %v952_v18 = vadd.f32 %v951_v13, %v17381_v2  ;;  %v953_v21 = vpop.f32.mrb[55].mxu0  ;;  %2304 = vmatmul.mubr.bf16.gmra.mrb[112].mxu0 %v1474_v52  ;;  %2690 = vmatmul.mubr.bf16.gmra.mrb[112].mxu1 %v1474_v52  ;;  %v1273_v25 = vmax.f32 %v948_v61, 0.0  ;;  %v1141_v55 = vadd.f32 %v1140_v50, %v17395_v15  ;;  %v1142_v57 = vpop.f32.mrb[53].mxu1 }
 0x209   : > { %v954_v31 = vadd.f32 %v953_v21, %v17384_v3  ;;  %v1274_v32 = vmax.f32 %v950_v11, 0.0  ;;  %v1143_v8 = vadd.f32 %v1142_v57, %v17398_v20  ;;  %v1144_v10 = vpop.f32.mrb[54].mxu1 }
 0x20a   : > { %v1277_v36 = vmax.f32 %v952_v18, 0.0  ;;  %v1145_v16 = vadd.f32 %v1144_v10, %v17395_v15  ;;  %v1146_v18 = vpop.f32.mrb[55].mxu1  ;;  %v1275_v21 = vmax.f32 %v1141_v55, 0.0 }
 0x20b   : > { %v1278_v40 = vmax.f32 %v954_v31, 0.0  ;;  %v1147_v27 = vadd.f32 %v1146_v18, %v17398_v20  ;;  %v1276_v29 = vmax.f32 %v1143_v8, 0.0 }
 0x20c   : > { %v1478_v43 = vpack.c.bf16 %v1277_v36, %v1273_v25 }
 0x20d   : > { %v957_v47 = vpop.f32.mrb[56].mxu0  ;;  %v1479_v49 = vpack.c.bf16 %v1278_v40, %v1274_v32  ;;  %v1279_v32 = vmax.f32 %v1145_v16, 0.0  ;;  %v1280_v35 = vmax.f32 %v1147_v27, 0.0 }
 0x20e   : > { %v958_v52 = vadd.f32 %v957_v47, %v17381_v2  ;;  %v959_v54 = vpop.f32.mrb[57].mxu0 }
 0x20f   : > { %v960_v61 = vadd.f32 %v959_v54, %v17384_v3  ;;  %v961_v5 = vpop.f32.mrb[58].mxu0  ;;  %2313 = vmatprep.mubr.bf16.mxu0 %v1479_v49  ;;  %2699 = vmatprep.mubr.bf16.mxu1 %v1479_v49  ;;  %v17564_v37 = vpack.c.bf16 %v1279_v32, %v1275_v21  ;;  %v17566_v47 = vpack.c.bf16 %v1280_v35, %v1276_v29 }
 0x210   : > { %v962_v11 = vadd.f32 %v961_v5, %v17381_v2  ;;  %v963_v13 = vpop.f32.mrb[59].mxu0  ;;  %2314 = vmatmul.mubr.bf16.gmra.mrb[116].mxu0 %v1478_v43  ;;  %2700 = vmatmul.mubr.bf16.gmra.mrb[116].mxu1 %v1478_v43  ;;  %v1281_v14 = vmax.f32 %v958_v52, 0.0  ;;  %v1150_v43 = vpop.f32.mrb[56].mxu1 }
 0x211   : > { %v964_v25 = vadd.f32 %v963_v13, %v17384_v3  ;;  %v1282_v26 = vmax.f32 %v960_v61, 0.0  ;;  %v1151_v52 = vadd.f32 %v1150_v43, %v17395_v15  ;;  %v1152_v54 = vpop.f32.mrb[57].mxu1 }
 0x212   : > { %v1285_v31 = vmax.f32 %v962_v11, 0.0  ;;  %v1153_v61 = vadd.f32 %v1152_v54, %v17398_v20  ;;  %v1154_v5 = vpop.f32.mrb[58].mxu1 }
 0x213   : > { %v1286_v33 = vmax.f32 %v964_v25, 0.0  ;;  %v1155_v13 = vadd.f32 %v1154_v5, %v17395_v15  ;;  %v1283_v16 = vmax.f32 %v1151_v52, 0.0 }
 0x214   : > { %v1482_v36 = vpack.c.bf16 %v1285_v31, %v1281_v14  ;;  %v1156_v14 = vpop.f32.mrb[59].mxu1 }
 0x215   : > { %v967_v40 = vpop.f32.mrb[60].mxu0  ;;  %v1483_v41 = vpack.c.bf16 %v1286_v33, %v1282_v26  ;;  %v1157_v25 = vadd.f32 %v1156_v14, %v17398_v20  ;;  %v1284_v26 = vmax.f32 %v1153_v61, 0.0  ;;  %v1287_v29 = vmax.f32 %v1155_v13, 0.0  ;;  %v15627_v13 = vld [vmem:[#allocation5] ss:$16 sps:$4 sm:$0xff]  }
 0x216   : > { %v968_v49 = vadd.f32 %v967_v40, %v17381_v2  ;;  %v969_v50 = vpop.f32.mrb[61].mxu0  ;;  %v15654_v14 = vld [vmem:[#allocation5 + $0x8] ss:$16 sps:$4 sm:$0xff]  }
 0x217   : > { %v970_v55 = vadd.f32 %v969_v50, %v17384_v3  ;;  %v971_v57 = vpop.f32.mrb[62].mxu0  ;;  %2323 = vmatprep.mubr.bf16.mxu0 %v1483_v41  ;;  %2709 = vmatprep.mubr.bf16.mxu1 %v1483_v41  ;;  %v1288_v32 = vmax.f32 %v1157_v25, 0.0  ;;  %v15633_v25 = vld [vmem:[#allocation5 + $0x40] ss:$16 sps:$4 sm:$0xff]  }
 0x218   : > { %v972_v8 = vadd.f32 %v971_v57, %v17381_v2  ;;  %v973_v10 = vpop.f32.mrb[63].mxu0  ;;  %2324 = vmatmul.mubr.bf16.gmra.mrb[120].mxu0 %v1482_v36  ;;  %2710 = vmatmul.mubr.bf16.gmra.mrb[120].mxu1 %v1482_v36  ;;  %v1289_v11 = vmax.f32 %v968_v49, 0.0  ;;  %v17576_v2 = vpack.c.bf16 %v1287_v29, %v1283_v16  ;;  %v1160_v36 = vpop.f32.mrb[60].mxu1  ;;  %v15632_v16 = vld [vmem:[#allocation5 + $0x24] ss:$16 sps:$4 sm:$0xff]  }
 0x219   : > { %v974_v18 = vadd.f32 %v973_v10, %v17384_v3  ;;  %v1290_v21 = vmax.f32 %v970_v55, 0.0  ;;  %v17578_v40 = vpack.c.bf16 %v1288_v32, %v1284_v26  ;;  %v1161_v41 = vadd.f32 %v1160_v36, %v17395_v15  ;;  %v1162_v43 = vpop.f32.mrb[61].mxu1  ;;  %v15663_v26 = vld [vmem:[#allocation5 + $0x48] ss:$16 sps:$4 sm:$0xff]   ;;  %v15674_v32 = vld [vmem:[#allocation5 + $0x8c] ss:$16 sps:$4 sm:$0xff]  }
 0x21a   : > { %v1293_v27 = vmax.f32 %v972_v8, 0.0  ;;  %v1163_v3 = vadd.f32 %v1162_v43, %v17398_v20  ;;  %v1164_v49 = vpop.f32.mrb[62].mxu1  ;;  %v15666_v29 = vld [vmem:[#allocation5 + $0x68] ss:$16 sps:$4 sm:$0xff]   ;;  %v15644_v36 = vld [vmem:[#allocation5 + $0xa4] ss:$16 sps:$4 sm:$0xff]  }
 0x21b   : > { %v1294_v31 = vmax.f32 %v974_v18, 0.0  ;;  %v1165_v50 = vadd.f32 %v1164_v49, %v17395_v15  ;;  %v1166_v52 = vpop.f32.mrb[63].mxu1  ;;  %v1291_v54 = vmax.f32 %v1161_v41, 0.0  ;;  %v15659_v15 = vld [vmem:[#allocation5 + $0x2c] ss:$16 sps:$4 sm:$0xff]  }
 0x21c   : > { %v1486_v33 = vpack.c.bf16 %v1293_v27, %v1289_v11  ;;  %v1167_v55 = vadd.f32 %v1166_v52, %v17398_v20  ;;  %v1292_v57 = vmax.f32 %v1163_v3, 0.0  ;;  %v15656_v11 = vld [vmem:[#allocation5 + $0xc] ss:$16 sps:$4 sm:$0xff]   ;;  %v15630_v20 = vld [vmem:[#allocation5 + $0x20] ss:$16 sps:$4 sm:$0xff]  }
 0x21d   : > { %v1487_v35 = vpack.c.bf16 %v1294_v31, %v1290_v21  ;;  %v1295_v61 = vmax.f32 %v1165_v50, 0.0  ;;  %4291 = vmatprep.subr.bf16.mxu1 %v15656_v11  ;;  %v15635_v18 = vld [vmem:[#allocation5 + $0x44] ss:$16 sps:$4 sm:$0xff]   ;;  %v15665_v21 = vld [vmem:[#allocation5 + $0x4c] ss:$16 sps:$4 sm:$0xff]  }
 0x21e   : > { %v1296_v5 = vmax.f32 %v1167_v55, 0.0  ;;  %v15638_v27 = vld [vmem:[#allocation5 + $0x64] ss:$16 sps:$4 sm:$0xff]   ;;  %v15675_v41 = vld [vmem:[#allocation5 + $0xa8] ss:$16 sps:$4 sm:$0xff]  }
 0x21f   : > { %2333 = vmatprep.mubr.bf16.mxu0 %v1487_v35  ;;  %2719 = vmatprep.mubr.bf16.mxu1 %v1487_v35  ;;  %v17586_v8 = vpack.c.bf16 %v1295_v61, %v1291_v54  ;;  %v15641_v31 = vld [vmem:[#allocation5 + $0x84] ss:$16 sps:$4 sm:$0xff]   ;;  %v15672_v35 = vld [vmem:[#allocation5 + $0x88] ss:$16 sps:$4 sm:$0xff]   ;;  %v15683_v3 = vld [vmem:[#allocation5 + $0xcc] ss:$16 sps:$4 sm:$0xff]  }
 0x220   : > { %2334 = vmatmul.mubr.bf16.gmra.mrb[124].mxu0 %v1486_v33  ;;  %2720 = vmatmul.mubr.bf16.gmra.mrb[124].mxu1 %v1486_v33  ;;  %v17588_v10 = vpack.c.bf16 %v1296_v5, %v1292_v57  ;;  %v15639_v33 = vld [vmem:[#allocation5 + $0x80] ss:$16 sps:$4 sm:$0xff]   ;;  %v15647_v43 = vld [vmem:[#allocation5 + $0xc4] ss:$16 sps:$4 sm:$0xff]   ;;  %v15681_v50 = vld [vmem:[#allocation5 + $0xc8] ss:$16 sps:$4 sm:$0xff]  }
 0x221   : > { %2376 = vmatprep.mubr.bf16.mxu0 %v17410_v63  ;;  %2762 = vmatprep.mubr.bf16.mxu1 %v17410_v63  ;;  %v15657_v63 = vld [vmem:[#allocation5 + $0x28] ss:$16 sps:$4 sm:$0xff]   ;;  %v15645_v49 = vld [vmem:[#allocation5 + $0xc0] ss:$16 sps:$4 sm:$0xff]   ;;  %v15650_v52 = vld [vmem:[#allocation5 + $0xe4] ss:$16 sps:$4 sm:$0xff]  }
 0x222   : > { %v15684_v54 = vld [vmem:[#allocation5 + $0xe8] ss:$16 sps:$4 sm:$0xff]   ;;  %v15653_v55 = vld [vmem:[#allocation5 + $0x104] ss:$16 sps:$4 sm:$0xff]   ;;  %v15692_v57 = vld [vmem:[#allocation5 + $0x10c] ss:$16 sps:$4 sm:$0xff]  }
 0x223   : > { %v15651_v61 = vld [vmem:[#allocation5 + $0x100] ss:$16 sps:$4 sm:$0xff]   ;;  %v15690_v5 = vld [vmem:[#allocation5 + $0x108] ss:$16 sps:$4 sm:$0xff]   ;;  %v15662_v11 = vld [vmem:[#allocation5 + $0x124] ss:$16 sps:$4 sm:$0xff]  }
 0x228   : > { %2377 = vmatmul.mubr.bf16.vlgmr.msra.gmra.mrb[64].mxu0 %v17408_v58  ;;  %2763 = vmatmul.mubr.bf16.vlgmr.msra.gmra.mrb[64].mxu1 %v17408_v58  ;;  %v15668_v58 = vld [vmem:[#allocation5 + $0x6c] ss:$16 sps:$4 sm:$0xff]  }
 0x229   : > { %2386 = vmatprep.mubr.bf16.mxu0 %v17422_v42  ;;  %2772 = vmatprep.mubr.bf16.mxu1 %v17422_v42  ;;  %v15636_v42 = vld [vmem:[#allocation5 + $0x60] ss:$16 sps:$4 sm:$0xff]  }
 0x22a   : > { %3906 = vmatpush1.bf16.msra.mxu0 %v15627_v13  ;;  %4292 = vmatpush1.bf16.msra.mxu1 %v15654_v14  ;;  %v15693_v13 = vld [vmem:[#allocation5 + $0x128] ss:$16 sps:$4 sm:$0xff]   ;;  %v15671_v14 = vld [vmem:[#allocation5 + $0x144] ss:$16 sps:$4 sm:$0xff]  }
 0x22b   : > { %3907 = vmatprep.subr.bf16.mxu0 %v15632_v16  ;;  %4293 = vmatprep.subr.bf16.mxu1 %v15659_v15  ;;  %v15701_v16 = vld [vmem:[#allocation5 + $0x14c] ss:$16 sps:$4 sm:$0xff]   ;;  %v15669_v15 = vld [vmem:[#allocation5 + $0x140] ss:$16 sps:$4 sm:$0xff]  }
 0x22e   : > { %3908 = vmatpush1.bf16.msra.mxu0 %v15630_v20  ;;  %4294 = vmatpush1.bf16.msra.mxu1 %v15657_v63  ;;  %v15699_v20 = vld [vmem:[#allocation5 + $0x148] ss:$16 sps:$4 sm:$0xff]   ;;  %v15680_v63 = vld [vmem:[#allocation5 + $0x164] ss:$16 sps:$4 sm:$0xff]  }
 0x22f   : > { %3909 = vmatprep.subr.bf16.mxu0 %v15635_v18  ;;  %4295 = vmatprep.subr.bf16.mxu1 %v15665_v21  ;;  %v15702_v18 = vld [vmem:[#allocation5 + $0x168] ss:$16 sps:$4 sm:$0xff]   ;;  %v15689_v21 = vld [vmem:[#allocation5 + $0x184] ss:$16 sps:$4 sm:$0xff]  }
 0x230   : > { %2387 = vmatmul.mubr.bf16.gmra.mrb[68].mxu0 %v17420_v38  ;;  %2773 = vmatmul.mubr.bf16.gmra.mrb[68].mxu1 %v17420_v38  ;;  %v15677_v38 = vld [vmem:[#allocation5 + $0xac] ss:$16 sps:$4 sm:$0xff]  }
 0x231   : > { %2396 = vmatprep.mubr.bf16.mxu0 %v17434_v24  ;;  %2782 = vmatprep.mubr.bf16.mxu1 %v17434_v24  ;;  %v15642_v24 = vld [vmem:[#allocation5 + $0xa0] ss:$16 sps:$4 sm:$0xff]  }
 0x232   : > { %3910 = vmatpush1.bf16.msra.mxu0 %v15633_v25  ;;  %4296 = vmatpush1.bf16.msra.mxu1 %v15663_v26  ;;  %v15710_v25 = vld [vmem:[#allocation5 + $0x18c] ss:$16 sps:$4 sm:$0xff]   ;;  %v15687_v26 = vld [vmem:[#allocation5 + $0x180] ss:$16 sps:$4 sm:$0xff]  }
 0x233   : > { %3911 = vmatprep.subr.bf16.mxu0 %v15638_v27  ;;  %4297 = vmatprep.subr.bf16.mxu1 %v15668_v58  ;;  %v15708_v27 = vld [vmem:[#allocation5 + $0x188] ss:$16 sps:$4 sm:$0xff]   ;;  %v15698_v58 = vld [vmem:[#allocation5 + $0x1a4] ss:$16 sps:$4 sm:$0xff]  }
 0x236   : > { %3912 = vmatpush1.bf16.msra.mxu0 %v15636_v42  ;;  %4298 = vmatpush1.bf16.msra.mxu1 %v15666_v29  ;;  %v15711_v42 = vld [vmem:[#allocation5 + $0x1a8] ss:$16 sps:$4 sm:$0xff]   ;;  %v15707_v29 = vld [vmem:[#allocation5 + $0x1c4] ss:$16 sps:$4 sm:$0xff]  }
 0x237   : > { %3913 = vmatprep.subr.bf16.mxu0 %v15641_v31  ;;  %4299 = vmatprep.subr.bf16.mxu1 %v15674_v32  ;;  %v15705_v31 = vld [vmem:[#allocation5 + $0x1c0] ss:$16 sps:$4 sm:$0xff]  }
 0x238   : > { %2397 = vmatmul.mubr.bf16.gmra.mrb[72].mxu0 %v17432_v19  ;;  %2783 = vmatmul.mubr.bf16.gmra.mrb[72].mxu1 %v17432_v19  ;;  %v15686_v19 = vld [vmem:[#allocation5 + $0xec] ss:$16 sps:$4 sm:$0xff]  }
 0x239   : > { %2406 = vmatprep.mubr.bf16.mxu0 %v17446_v4  ;;  %2792 = vmatprep.mubr.bf16.mxu1 %v17446_v4  ;;  %v15648_v4 = vld [vmem:[#allocation5 + $0xe0] ss:$16 sps:$4 sm:$0xff]  }
 0x23a   : > { %3914 = vmatpush1.bf16.msra.mxu0 %v15639_v33  ;;  %4300 = vmatpush1.bf16.msra.mxu1 %v15672_v35 }
 0x23b   : > { %3915 = vmatprep.subr.bf16.mxu0 %v15644_v36  ;;  %4301 = vmatprep.subr.bf16.mxu1 %v15677_v38 }
 0x23e   : > { %3916 = vmatpush1.bf16.msra.mxu0 %v15642_v24  ;;  %4302 = vmatpush1.bf16.msra.mxu1 %v15675_v41 }
 0x23f   : > { %3917 = vmatprep.subr.bf16.mxu0 %v15647_v43  ;;  %4303 = vmatprep.subr.bf16.mxu1 %v15683_v3 }
 0x240   : > { %2407 = vmatmul.mubr.bf16.gmra.mrb[76].mxu0 %v17444_v59  ;;  %2793 = vmatmul.mubr.bf16.gmra.mrb[76].mxu1 %v17444_v59  ;;  %v15695_v59 = vld [vmem:[#allocation5 + $0x12c] ss:$16 sps:$4 sm:$0xff]  }
 0x241   : > { %2416 = vmatprep.mubr.bf16.mxu0 %v17458_v48  ;;  %2802 = vmatprep.mubr.bf16.mxu1 %v17458_v48  ;;  %v15660_v48 = vld [vmem:[#allocation5 + $0x120] ss:$16 sps:$4 sm:$0xff]  }
 0x242   : > { %3918 = vmatpush1.bf16.msra.mxu0 %v15645_v49  ;;  %4304 = vmatpush1.bf16.msra.mxu1 %v15681_v50 }
 0x243   : > { %3919 = vmatprep.subr.bf16.mxu0 %v15650_v52  ;;  %4305 = vmatprep.subr.bf16.mxu1 %v15686_v19 }
 0x246   : > { %3920 = vmatpush1.bf16.msra.mxu0 %v15648_v4  ;;  %4306 = vmatpush1.bf16.msra.mxu1 %v15684_v54 }
 0x247   : > { %3921 = vmatprep.subr.bf16.mxu0 %v15653_v55  ;;  %4307 = vmatprep.subr.bf16.mxu1 %v15692_v57 }
 0x248   : > { %2417 = vmatmul.mubr.bf16.gmra.mrb[80].mxu0 %v17456_v44  ;;  %2803 = vmatmul.mubr.bf16.gmra.mrb[80].mxu1 %v17456_v44  ;;  %v15704_v44 = vld [vmem:[#allocation5 + $0x16c] ss:$16 sps:$4 sm:$0xff]  }
 0x249   : > { %2426 = vmatprep.mubr.bf16.mxu0 %v17470_v34  ;;  %2812 = vmatprep.mubr.bf16.mxu1 %v17470_v34  ;;  %v15678_v34 = vld [vmem:[#allocation5 + $0x160] ss:$16 sps:$4 sm:$0xff]  }
 0x24a   : > { %3922 = vmatpush1.bf16.msra.mxu0 %v15651_v61  ;;  %4308 = vmatpush1.bf16.msra.mxu1 %v15690_v5 }
 0x24b   : > { %3923 = vmatprep.subr.bf16.mxu0 %v15662_v11  ;;  %4309 = vmatprep.subr.bf16.mxu1 %v15695_v59 }
 0x24e   : > { %3924 = vmatpush1.bf16.msra.mxu0 %v15660_v48  ;;  %4310 = vmatpush1.bf16.msra.mxu1 %v15693_v13 }
 0x24f   : > { %3925 = vmatprep.subr.bf16.mxu0 %v15671_v14  ;;  %4311 = vmatprep.subr.bf16.mxu1 %v15701_v16  ;;  %v15723_v14 = vld [vmem:[#allocation5 + $0x200] ss:$16 sps:$4 sm:$0xff]   ;;  %v15750_v16 = vld [vmem:[#allocation5 + $0x208] ss:$16 sps:$4 sm:$0xff]  }
 0x250   : > { %2427 = vmatmul.mubr.bf16.gmra.mrb[84].mxu0 %v17468_v30  ;;  %2813 = vmatmul.mubr.bf16.gmra.mrb[84].mxu1 %v17468_v30  ;;  %v15713_v30 = vld [vmem:[#allocation5 + $0x1ac] ss:$16 sps:$4 sm:$0xff]  }
 0x251   : > { %2436 = vmatprep.mubr.bf16.mxu0 %v17482_v23  ;;  %2822 = vmatprep.mubr.bf16.mxu1 %v17482_v23  ;;  %v15696_v23 = vld [vmem:[#allocation5 + $0x1a0] ss:$16 sps:$4 sm:$0xff]  }
 0x252   : > { %3926 = vmatpush1.bf16.msra.mxu0 %v15669_v15  ;;  %4312 = vmatpush1.bf16.msra.mxu1 %v15699_v20 }
 0x253   : > { %3927 = vmatprep.subr.bf16.mxu0 %v15680_v63  ;;  %4313 = vmatprep.subr.bf16.mxu1 %v15704_v44 }
 0x256   : > { %3928 = vmatpush1.bf16.msra.mxu0 %v15678_v34  ;;  %4314 = vmatpush1.bf16.msra.mxu1 %v15702_v18  ;;  %v15728_v18 = vld [vmem:[#allocation5 + $0x224] ss:$16 sps:$4 sm:$0xff]  }
 0x257   : > { %3929 = vmatprep.subr.bf16.mxu0 %v15689_v21  ;;  %4315 = vmatprep.subr.bf16.mxu1 %v15710_v25  ;;  %v15755_v21 = vld [vmem:[#allocation5 + $0x22c] ss:$16 sps:$4 sm:$0xff]  }
 0x258   : > { %2437 = vmatmul.mubr.bf16.gmra.mrb[88].mxu0 %v17480_v17  ;;  %2823 = vmatmul.mubr.bf16.gmra.mrb[88].mxu1 %v17480_v17  ;;  %v15719_v17 = vld [vmem:[#allocation5 + $0x1cc] ss:$16 sps:$4 sm:$0xff]  }
 0x259   : > { %2446 = vmatprep.mubr.bf16.mxu0 %v17494_v0  ;;  %2832 = vmatprep.mubr.bf16.mxu1 %v17494_v0  ;;  %v15716_v0 = vld [vmem:[#allocation5 + $0x1e4] ss:$16 sps:$4 sm:$0xff]  }
 0x25a   : > { %3930 = vmatpush1.bf16.msra.mxu0 %v15687_v26  ;;  %4316 = vmatpush1.bf16.msra.mxu1 %v15708_v27 }
 0x25b   : > { %3931 = vmatprep.subr.bf16.mxu0 %v15698_v58  ;;  %4317 = vmatprep.subr.bf16.mxu1 %v15713_v30 }
 0x25e   : > { %3932 = vmatpush1.bf16.msra.mxu0 %v15696_v23  ;;  %4318 = vmatpush1.bf16.msra.mxu1 %v15711_v42 }
 0x25f   : > { %3933 = vmatprep.subr.bf16.mxu0 %v15707_v29  ;;  %4319 = vmatprep.subr.bf16.mxu1 %v15719_v17 }
 0x260   : > { %2447 = vmatmul.mubr.bf16.gmra.mrb[92].mxu0 %v17492_v56  ;;  %2833 = vmatmul.mubr.bf16.gmra.mrb[92].mxu1 %v17492_v56  ;;  %v15717_v56 = vld [vmem:[#allocation5 + $0x1c8] ss:$16 sps:$4 sm:$0xff]  }
 0x261   : > { %2456 = vmatprep.mubr.bf16.mxu0 %v17506_v45  ;;  %2842 = vmatprep.mubr.bf16.mxu1 %v17506_v45  ;;  %v15714_v45 = vld [vmem:[#allocation5 + $0x1e0] ss:$16 sps:$4 sm:$0xff]  }
 0x262   : > { %3934 = vmatpush1.bf16.msra.mxu0 %v15705_v31  ;;  %4320 = vmatpush1.bf16.msra.mxu1 %v15717_v56  ;;  %v15726_v56 = vld [vmem:[#allocation5 + $0x220] ss:$16 sps:$4 sm:$0xff]  }
 0x263   : > { %3935 = vmatprep.subr.bf16.mxu0 %v15716_v0  ;;  %v15731_v0 = vld [vmem:[#allocation5 + $0x244] ss:$16 sps:$4 sm:$0xff]  }
 0x266   : > { %3936 = vmatpush1.bf16.msra.mxu0 %v15714_v45 }
 0x268   : > { %2457 = vmatmul.mubr.bf16.gmra.mrb[96].mxu0 %v17504_v39  ;;  %2843 = vmatmul.mubr.bf16.gmra.mrb[96].mxu1 %v17504_v39  ;;  %v15722_v39 = vld [vmem:[#allocation5 + $0x1ec] ss:$16 sps:$4 sm:$0xff]  }
 0x269   : > { %2466 = vmatprep.mubr.bf16.mxu0 %v17518_v28  ;;  %2852 = vmatprep.mubr.bf16.mxu1 %v17518_v28  ;;  %v15725_v28 = vld [vmem:[#allocation5 + $0x204] ss:$16 sps:$4 sm:$0xff]  }
 0x26a   : > { %4321 = vmatprep.subr.bf16.mxu1 %v15722_v39  ;;  %4098 = vmatprep.subr.bf16.mxu0 %v15725_v28  ;;  %v15753_v39 = vld [vmem:[#allocation5 + $0x228] ss:$16 sps:$4 sm:$0xff]   ;;  %v15761_v28 = vld [vmem:[#allocation5 + $0x24c] ss:$16 sps:$4 sm:$0xff]  }
 0x270   : > { %2467 = vmatmul.mubr.bf16.gmra.mrb[100].mxu0 %v17516_v22  ;;  %2853 = vmatmul.mubr.bf16.gmra.mrb[100].mxu1 %v17516_v22  ;;  %v15720_v22 = vld [vmem:[#allocation5 + $0x1e8] ss:$16 sps:$4 sm:$0xff]  }
 0x271   : > { %2476 = vmatprep.mubr.bf16.mxu0 %v17530_v12  ;;  %2862 = vmatprep.mubr.bf16.mxu1 %v17530_v12  ;;  %v1425_v12 = vld [vmem:[%s19376_s4] sm:$0xf] }
 0x272   : > { %4322 = vmatpush1.bf16.msra.mxu1 %v15720_v22 }
 0x278   : > { %2477 = vmatmul.mubr.bf16.gmra.mrb[104].mxu0 %v17528_v7  ;;  %2863 = vmatmul.mubr.bf16.gmra.mrb[104].mxu1 %v17528_v7  ;;  %v15752_v7 = vld [vmem:[#allocation5 + $0x20c] ss:$16 sps:$4 sm:$0xff]  }
 0x279   : > { %2486 = vmatprep.mubr.bf16.mxu0 %v17542_v60  ;;  %2872 = vmatprep.mubr.bf16.mxu1 %v17542_v60  ;;  %v17659_v60 = vrot.slane %v1425_v12, %v17387_v6 }
 0x27a   : > { %4484 = vmatprep.subr.bf16.mxu1 %v15752_v7 }
 0x280   : > { %2487 = vmatmul.mubr.bf16.gmra.mrb[108].mxu0 %v17540_v53  ;;  %2873 = vmatmul.mubr.bf16.gmra.mrb[108].mxu1 %v17540_v53  ;;  %v17656_v53 = vrot.slane %v1425_v12, %v17373_v62 }
 0x281   : > { %2496 = vmatprep.mubr.bf16.mxu0 %v17554_v51  ;;  %2882 = vmatprep.mubr.bf16.mxu1 %v17554_v51  ;;  %v17665_v51 = vrot.slane %v1425_v12, %v17390_v9 }
 0x288   : > { %2497 = vmatmul.mubr.bf16.gmra.mrb[112].mxu0 %v17552_v46  ;;  %2883 = vmatmul.mubr.bf16.gmra.mrb[112].mxu1 %v17552_v46  ;;  %v17662_v46 = vrot.slane %v1425_v12, %v17378_v1 }
 0x289   : > { %2506 = vmatprep.mubr.bf16.mxu0 %v17566_v47  ;;  %2892 = vmatprep.mubr.bf16.mxu1 %v17566_v47 }
 0x290   : > { %2507 = vmatmul.mubr.bf16.gmra.mrb[116].mxu0 %v17564_v37  ;;  %2893 = vmatmul.mubr.bf16.gmra.mrb[116].mxu1 %v17564_v37 }
 0x291   : > { %2516 = vmatprep.mubr.bf16.mxu0 %v17578_v40  ;;  %2902 = vmatprep.mubr.bf16.mxu1 %v17578_v40 }
 0x298   : > { %2517 = vmatmul.mubr.bf16.gmra.mrb[120].mxu0 %v17576_v2  ;;  %2903 = vmatmul.mubr.bf16.gmra.mrb[120].mxu1 %v17576_v2 }
 0x299   : > { %2526 = vmatprep.mubr.bf16.mxu0 %v17588_v10  ;;  %2912 = vmatprep.mubr.bf16.mxu1 %v17588_v10 }
 0x2a0   : > { %2527 = vmatmul.mubr.bf16.gmra.mrb[124].mxu0 %v17586_v8  ;;  %2913 = vmatmul.mubr.bf16.gmra.mrb[124].mxu1 %v17586_v8 }
 0x2fb   : > { %v2378_v37 = vpop.f32.mrb[64].mxu0  ;;  %v2764_v47 = vpop.f32.mrb[64].mxu1 }
 0x2fc   : > { %v13790_v2 = vadd.f32 %v2378_v37, %v17656_v53  ;;  %v13854_v40 = vadd.f32 %v2764_v47, %v17659_v60  ;;  %v2380_v8 = vpop.f32.mrb[65].mxu0  ;;  %v2766_v10 = vpop.f32.mrb[65].mxu1 }
 0x2fd   : > { %v13791_v32 = vadd.f32 %v2380_v8, %v17662_v46  ;;  %v13855_v33 = vadd.f32 %v2766_v10, %v17665_v51  ;;  %v2382_v35 = vpop.f32.mrb[66].mxu0  ;;  %v2768_v36 = vpop.f32.mrb[66].mxu1 }
 0x2fe   : > { %v13792_v38 = vadd.f32 %v2382_v35, %v17656_v53  ;;  %v13856_v24 = vadd.f32 %v2768_v36, %v17659_v60  ;;  %v2384_v41 = vpop.f32.mrb[67].mxu0  ;;  %v2770_v43 = vpop.f32.mrb[67].mxu1  ;;  %v2923_v50 = vmax.f32 %v13790_v2, 0.0  ;;  %v2925_v52 = vmax.f32 %v13854_v40, 0.0  ;;  %v15729_v36 = vld [vmem:[#allocation5 + $0x240] ss:$16 sps:$4 sm:$0xff]  }
 0x2ff   : > { %v13793_v3 = vadd.f32 %v2384_v41, %v17662_v46  ;;  %v13857_v49 = vadd.f32 %v2770_v43, %v17665_v51  ;;  %v2924_v54 = vmax.f32 %v13791_v32, 0.0  ;;  %v2926_v57 = vmax.f32 %v13855_v33, 0.0 }
 0x300   : > { %v2927_v19 = vmax.f32 %v13792_v38, 0.0  ;;  %v2929_v4 = vmax.f32 %v13856_v24, 0.0  ;;  %v15759_v38 = vld [vmem:[#allocation5 + $0x248] ss:$16 sps:$4 sm:$0xff]  }
 0x301   : > { %v2928_v55 = vmax.f32 %v13793_v3, 0.0  ;;  %v2930_v61 = vmax.f32 %v13857_v49, 0.0 }
 0x302   : > { %v3180_v5 = vpack.c.bf16 %v2927_v19, %v2923_v50  ;;  %v17675_v11 = vpack.c.bf16 %v2929_v4, %v2925_v52  ;;  %v15734_v50 = vld [vmem:[#allocation5 + $0x264] ss:$16 sps:$4 sm:$0xff]   ;;  %v15764_v52 = vld [vmem:[#allocation5 + $0x26c] ss:$16 sps:$4 sm:$0xff]  }
 0x303   : > { %v2388_v59 = vpop.f32.mrb[68].mxu0  ;;  %v2774_v48 = vpop.f32.mrb[68].mxu1  ;;  %v3181_v13 = vpack.c.bf16 %v2928_v55, %v2924_v54  ;;  %v17677_v15 = vpack.c.bf16 %v2930_v61, %v2926_v57 }
 0x304   : > { %v13794_v20 = vadd.f32 %v2388_v59, %v17656_v53  ;;  %v13858_v63 = vadd.f32 %v2774_v48, %v17659_v60  ;;  %v2390_v44 = vpop.f32.mrb[69].mxu0  ;;  %v2776_v34 = vpop.f32.mrb[69].mxu1 }
 0x305   : > { %v13795_v25 = vadd.f32 %v2390_v44, %v17662_v46  ;;  %v13859_v26 = vadd.f32 %v2776_v34, %v17665_v51  ;;  %v2392_v27 = vpop.f32.mrb[70].mxu0  ;;  %v2778_v58 = vpop.f32.mrb[70].mxu1  ;;  %3937 = vmatprep.mubr.bf16.mxu0 %v3181_v13  ;;  %4323 = vmatprep.mubr.bf16.mxu1 %v3181_v13  ;;  %v15770_v34 = vld [vmem:[#allocation5 + $0x28c] ss:$16 sps:$4 sm:$0xff]  }
 0x306   : > { %v13796_v30 = vadd.f32 %v2392_v27, %v17656_v53  ;;  %v13860_v23 = vadd.f32 %v2778_v58, %v17659_v60  ;;  %v2394_v42 = vpop.f32.mrb[71].mxu0  ;;  %v2780_v29 = vpop.f32.mrb[71].mxu1  ;;  %3938 = vmatmul.mubr.bf16.vlgmr.msra.gmra.mrb[128].mxu0 %v3180_v5  ;;  %4324 = vmatmul.mubr.bf16.vlgmr.msra.gmra.mrb[128].mxu1 %v3180_v5  ;;  %v2931_v45 = vmax.f32 %v13794_v20, 0.0  ;;  %v2933_v7 = vmax.f32 %v13858_v63, 0.0  ;;  %v15762_v20 = vld [vmem:[#allocation5 + $0x268] ss:$16 sps:$4 sm:$0xff]  }
 0x307   : > { %v13797_v31 = vadd.f32 %v2394_v42, %v17662_v46  ;;  %v13861_v17 = vadd.f32 %v2780_v29, %v17665_v51  ;;  %4099 = vmatpush1.bf16.msra.mxu0 %v15723_v14  ;;  %4485 = vmatpush1.bf16.msra.mxu1 %v15750_v16  ;;  %v2932_v37 = vmax.f32 %v13795_v25, 0.0  ;;  %v2934_v2 = vmax.f32 %v13859_v26, 0.0  ;;  %v15732_v14 = vld [vmem:[#allocation5 + $0x260] ss:$16 sps:$4 sm:$0xff]   ;;  %v15737_v16 = vld [vmem:[#allocation5 + $0x284] ss:$16 sps:$4 sm:$0xff]  }
 0x308   : > { %4100 = vmatprep.subr.bf16.mxu0 %v15728_v18  ;;  %v2935_v22 = vmax.f32 %v13796_v30, 0.0  ;;  %4486 = vmatprep.subr.bf16.mxu1 %v15755_v21  ;;  %v2937_v12 = vmax.f32 %v13860_v23, 0.0 }
 0x309   : > { %v2936_v47 = vmax.f32 %v13797_v31, 0.0  ;;  %v2938_v40 = vmax.f32 %v13861_v17, 0.0  ;;  %v15735_v17 = vld [vmem:[#allocation5 + $0x280] ss:$16 sps:$4 sm:$0xff]  }
 0x30a   : > { %v3184_v8 = vpack.c.bf16 %v2935_v22, %v2931_v45  ;;  %v17687_v10 = vpack.c.bf16 %v2937_v12, %v2933_v7  ;;  %v15740_v7 = vld [vmem:[#allocation5 + $0x2a4] ss:$16 sps:$4 sm:$0xff]   ;;  %v15773_v12 = vld [vmem:[#allocation5 + $0x2ac] ss:$16 sps:$4 sm:$0xff]  }
 0x30b   : > { %v2398_v32 = vpop.f32.mrb[72].mxu0  ;;  %v2784_v33 = vpop.f32.mrb[72].mxu1  ;;  %v3185_v35 = vpack.c.bf16 %v2936_v47, %v2932_v37  ;;  %4101 = vmatpush1.bf16.msra.mxu0 %v15726_v56  ;;  %4487 = vmatpush1.bf16.msra.mxu1 %v15753_v39  ;;  %v17689_v24 = vpack.c.bf16 %v2938_v40, %v2934_v2  ;;  %v15768_v56 = vld [vmem:[#allocation5 + $0x288] ss:$16 sps:$4 sm:$0xff]  }
 0x30c   : > { %v13798_v41 = vadd.f32 %v2398_v32, %v17656_v53  ;;  %v13862_v43 = vadd.f32 %v2784_v33, %v17659_v60  ;;  %v2400_v3 = vpop.f32.mrb[73].mxu0  ;;  %v2786_v49 = vpop.f32.mrb[73].mxu1  ;;  %4102 = vmatprep.subr.bf16.mxu0 %v15731_v0  ;;  %4488 = vmatprep.subr.bf16.mxu1 %v15761_v28 }
 0x30d   : > { %v13799_v19 = vadd.f32 %v2400_v3, %v17662_v46  ;;  %v13863_v4 = vadd.f32 %v2786_v49, %v17665_v51  ;;  %v2402_v54 = vpop.f32.mrb[74].mxu0  ;;  %v2788_v55 = vpop.f32.mrb[74].mxu1  ;;  %3947 = vmatprep.mubr.bf16.mxu0 %v3185_v35  ;;  %4333 = vmatprep.mubr.bf16.mxu1 %v3185_v35  ;;  %v15771_v3 = vld [vmem:[#allocation5 + $0x2a8] ss:$16 sps:$4 sm:$0xff]  }
 0x30e   : > { %v13800_v57 = vadd.f32 %v2402_v54, %v17656_v53  ;;  %v13864_v61 = vadd.f32 %v2788_v55, %v17659_v60  ;;  %v2404_v5 = vpop.f32.mrb[75].mxu0  ;;  %v2790_v59 = vpop.f32.mrb[75].mxu1  ;;  %3948 = vmatmul.mubr.bf16.gmra.mrb[132].mxu0 %v3184_v8  ;;  %4334 = vmatmul.mubr.bf16.gmra.mrb[132].mxu1 %v3184_v8  ;;  %v2939_v63 = vmax.f32 %v13798_v41, 0.0  ;;  %v2941_v18 = vmax.f32 %v13862_v43, 0.0  ;;  %v15738_v41 = vld [vmem:[#allocation5 + $0x2a0] ss:$16 sps:$4 sm:$0xff]  }
 0x30f   : > { %v13801_v48 = vadd.f32 %v2404_v5, %v17662_v46  ;;  %v13865_v13 = vadd.f32 %v2790_v59, %v17665_v51  ;;  %4103 = vmatpush1.bf16.msra.mxu0 %v15729_v36  ;;  %4489 = vmatpush1.bf16.msra.mxu1 %v15759_v38  ;;  %v2940_v25 = vmax.f32 %v13799_v19, 0.0  ;;  %v2942_v27 = vmax.f32 %v13863_v4, 0.0  ;;  %v15743_v43 = vld [vmem:[#allocation5 + $0x2c4] ss:$16 sps:$4 sm:$0xff]  }
 0x310   : > { %v2943_v44 = vmax.f32 %v13800_v57, 0.0  ;;  %4104 = vmatprep.subr.bf16.mxu0 %v15734_v50  ;;  %4490 = vmatprep.subr.bf16.mxu1 %v15764_v52  ;;  %v2945_v21 = vmax.f32 %v13864_v61, 0.0  ;;  %v15779_v52 = vld [vmem:[#allocation5 + $0x2cc] ss:$16 sps:$4 sm:$0xff]  }
 0x311   : > { %v2944_v26 = vmax.f32 %v13801_v48, 0.0  ;;  %v2946_v58 = vmax.f32 %v13865_v13, 0.0 }
 0x312   : > { %v3188_v30 = vpack.c.bf16 %v2943_v44, %v2939_v63  ;;  %v17699_v23 = vpack.c.bf16 %v2945_v21, %v2941_v18 }
 0x313   : > { %v2408_v42 = vpop.f32.mrb[76].mxu0  ;;  %v2794_v29 = vpop.f32.mrb[76].mxu1  ;;  %v3189_v31 = vpack.c.bf16 %v2944_v26, %v2940_v25  ;;  %4105 = vmatpush1.bf16.msra.mxu0 %v15732_v14  ;;  %4491 = vmatpush1.bf16.msra.mxu1 %v15762_v20  ;;  %v17701_v0 = vpack.c.bf16 %v2946_v58, %v2942_v27  ;;  %v15777_v20 = vld [vmem:[#allocation5 + $0x2c8] ss:$16 sps:$4 sm:$0xff]   ;;  %v15746_v25 = vld [vmem:[#allocation5 + $0x2e4] ss:$16 sps:$4 sm:$0xff]  }
 0x314   : > { %v13802_v39 = vadd.f32 %v2408_v42, %v17656_v53  ;;  %v13866_v45 = vadd.f32 %v2794_v29, %v17659_v60  ;;  %v2410_v22 = vpop.f32.mrb[77].mxu0  ;;  %v2796_v28 = vpop.f32.mrb[77].mxu1  ;;  %4106 = vmatprep.subr.bf16.mxu0 %v15737_v16  ;;  %4492 = vmatprep.subr.bf16.mxu1 %v15770_v34  ;;  %v15741_v16 = vld [vmem:[#allocation5 + $0x2c0] ss:$16 sps:$4 sm:$0xff]   ;;  %v15782_v26 = vld [vmem:[#allocation5 + $0x2ec] ss:$16 sps:$4 sm:$0xff]  }
 0x315   : > { %v13803_v37 = vadd.f32 %v2410_v22, %v17662_v46  ;;  %v13867_v47 = vadd.f32 %v2796_v28, %v17665_v51  ;;  %v2412_v2 = vpop.f32.mrb[78].mxu0  ;;  %v2798_v40 = vpop.f32.mrb[78].mxu1  ;;  %3957 = vmatprep.mubr.bf16.mxu0 %v3189_v31  ;;  %4343 = vmatprep.mubr.bf16.mxu1 %v3189_v31  ;;  %v15744_v22 = vld [vmem:[#allocation5 + $0x2e0] ss:$16 sps:$4 sm:$0xff]   ;;  %v15749_v28 = vld [vmem:[#allocation5 + $0x304] ss:$16 sps:$4 sm:$0xff]  }
 0x316   : > { %v13804_v8 = vadd.f32 %v2412_v2, %v17656_v53  ;;  %v13868_v32 = vadd.f32 %v2798_v40, %v17659_v60  ;;  %v2414_v33 = vpop.f32.mrb[79].mxu0  ;;  %v2800_v35 = vpop.f32.mrb[79].mxu1  ;;  %3958 = vmatmul.mubr.bf16.gmra.mrb[136].mxu0 %v3188_v30  ;;  %4344 = vmatmul.mubr.bf16.gmra.mrb[136].mxu1 %v3188_v30  ;;  %v2947_v49 = vmax.f32 %v13802_v39, 0.0  ;;  %v2949_v19 = vmax.f32 %v13866_v45, 0.0 }
 0x317   : > { %v13805_v36 = vadd.f32 %v2414_v33, %v17662_v46  ;;  %v13869_v38 = vadd.f32 %v2800_v35, %v17665_v51  ;;  %4107 = vmatpush1.bf16.msra.mxu0 %v15735_v17  ;;  %4493 = vmatpush1.bf16.msra.mxu1 %v15768_v56  ;;  %v2948_v54 = vmax.f32 %v13803_v37, 0.0  ;;  %v2950_v57 = vmax.f32 %v13867_v47, 0.0  ;;  %v15788_v47 = vld [vmem:[#allocation5 + $0x30c] ss:$16 sps:$4 sm:$0xff]  }
 0x318   : > { %v2951_v50 = vmax.f32 %v13804_v8, 0.0  ;;  %4108 = vmatprep.subr.bf16.mxu0 %v15740_v7  ;;  %4494 = vmatprep.subr.bf16.mxu1 %v15773_v12  ;;  %v2953_v4 = vmax.f32 %v13868_v32, 0.0  ;;  %v15780_v7 = vld [vmem:[#allocation5 + $0x2e8] ss:$16 sps:$4 sm:$0xff]  }
 0x319   : > { %v2952_v55 = vmax.f32 %v13805_v36, 0.0  ;;  %v2954_v61 = vmax.f32 %v13869_v38, 0.0 }
 0x31a   : > { %v3192_v5 = vpack.c.bf16 %v2951_v50, %v2947_v49  ;;  %v17711_v59 = vpack.c.bf16 %v2953_v4, %v2949_v19  ;;  %v15747_v49 = vld [vmem:[#allocation5 + $0x300] ss:$16 sps:$4 sm:$0xff]   ;;  %v15786_v50 = vld [vmem:[#allocation5 + $0x308] ss:$16 sps:$4 sm:$0xff]  }
 0x31b   : > { %v2418_v48 = vpop.f32.mrb[80].mxu0  ;;  %v2804_v13 = vpop.f32.mrb[80].mxu1  ;;  %v3193_v14 = vpack.c.bf16 %v2952_v55, %v2948_v54  ;;  %4109 = vmatpush1.bf16.msra.mxu0 %v15738_v41  ;;  %4495 = vmatpush1.bf16.msra.mxu1 %v15771_v3  ;;  %v17713_v63 = vpack.c.bf16 %v2954_v61, %v2950_v57  ;;  %v15758_v57 = vld [vmem:[#allocation5 + $0x324] ss:$16 sps:$4 sm:$0xff]   ;;  %v15791_v61 = vld [vmem:[#allocation5 + $0x32c] ss:$16 sps:$4 sm:$0xff]  }
 0x31c   : > { %v13806_v44 = vadd.f32 %v2418_v48, %v17656_v53  ;;  %v13870_v34 = vadd.f32 %v2804_v13, %v17659_v60  ;;  %v2420_v18 = vpop.f32.mrb[81].mxu0  ;;  %v2806_v21 = vpop.f32.mrb[81].mxu1  ;;  %4110 = vmatprep.subr.bf16.mxu0 %v15743_v43  ;;  %4496 = vmatprep.subr.bf16.mxu1 %v15779_v52 }
 0x31d   : > { %v13807_v27 = vadd.f32 %v2420_v18, %v17662_v46  ;;  %v13871_v58 = vadd.f32 %v2806_v21, %v17665_v51  ;;  %v2422_v30 = vpop.f32.mrb[82].mxu0  ;;  %v2808_v42 = vpop.f32.mrb[82].mxu1  ;;  %3967 = vmatprep.mubr.bf16.mxu0 %v3193_v14  ;;  %4353 = vmatprep.mubr.bf16.mxu1 %v3193_v14 }
 0x31e   : > { %v13808_v29 = vadd.f32 %v2422_v30, %v17656_v53  ;;  %v13872_v31 = vadd.f32 %v2808_v42, %v17659_v60  ;;  %v2424_v17 = vpop.f32.mrb[83].mxu0  ;;  %v2810_v56 = vpop.f32.mrb[83].mxu1  ;;  %3968 = vmatmul.mubr.bf16.gmra.mrb[140].mxu0 %v3192_v5  ;;  %4354 = vmatmul.mubr.bf16.gmra.mrb[140].mxu1 %v3192_v5  ;;  %v2955_v12 = vmax.f32 %v13806_v44, 0.0  ;;  %v2957_v2 = vmax.f32 %v13870_v34, 0.0  ;;  %v15797_v42 = vld [vmem:[#allocation5 + $0x34c] ss:$16 sps:$4 sm:$0xff]  }
 0x31f   : > { %v13809_v39 = vadd.f32 %v2424_v17, %v17662_v46  ;;  %v13873_v45 = vadd.f32 %v2810_v56, %v17665_v51  ;;  %4111 = vmatpush1.bf16.msra.mxu0 %v15741_v16  ;;  %4497 = vmatpush1.bf16.msra.mxu1 %v15777_v20  ;;  %v2956_v8 = vmax.f32 %v13807_v27, 0.0  ;;  %v2958_v33 = vmax.f32 %v13871_v58, 0.0  ;;  %v15789_v27 = vld [vmem:[#allocation5 + $0x328] ss:$16 sps:$4 sm:$0xff]  }
 0x320   : > { %v2959_v37 = vmax.f32 %v13808_v29, 0.0  ;;  %4112 = vmatprep.subr.bf16.mxu0 %v15746_v25  ;;  %4498 = vmatprep.subr.bf16.mxu1 %v15782_v26  ;;  %v2961_v40 = vmax.f32 %v13872_v31, 0.0  ;;  %v15756_v25 = vld [vmem:[#allocation5 + $0x320] ss:$16 sps:$4 sm:$0xff]   ;;  %v15767_v26 = vld [vmem:[#allocation5 + $0x344] ss:$16 sps:$4 sm:$0xff]  }
 0x321   : > { %v2960_v32 = vmax.f32 %v13809_v39, 0.0  ;;  %v2962_v35 = vmax.f32 %v13873_v45, 0.0 }
 0x322   : > { %v3196_v36 = vpack.c.bf16 %v2959_v37, %v2955_v12  ;;  %v17723_v38 = vpack.c.bf16 %v2961_v40, %v2957_v2  ;;  %v15795_v2 = vld [vmem:[#allocation5 + $0x348] ss:$16 sps:$4 sm:$0xff]  }
 0x323   : > { %v2428_v41 = vpop.f32.mrb[84].mxu0  ;;  %v2814_v43 = vpop.f32.mrb[84].mxu1  ;;  %v3197_v3 = vpack.c.bf16 %v2960_v32, %v2956_v8  ;;  %4113 = vmatpush1.bf16.msra.mxu0 %v15744_v22  ;;  %4499 = vmatpush1.bf16.msra.mxu1 %v15780_v7  ;;  %v17725_v52 = vpack.c.bf16 %v2962_v35, %v2958_v33 }
 0x324   : > { %v13810_v19 = vadd.f32 %v2428_v41, %v17656_v53  ;;  %v13874_v4 = vadd.f32 %v2814_v43, %v17659_v60  ;;  %v2430_v54 = vpop.f32.mrb[85].mxu0  ;;  %v2816_v55 = vpop.f32.mrb[85].mxu1  ;;  %4114 = vmatprep.subr.bf16.mxu0 %v15749_v28  ;;  %4500 = vmatprep.subr.bf16.mxu1 %v15788_v47  ;;  %v15765_v47 = vld [vmem:[#allocation5 + $0x340] ss:$16 sps:$4 sm:$0xff]   ;;  %v15800_v41 = vld [vmem:[#allocation5 + $0x36c] ss:$16 sps:$4 sm:$0xff]  }
 0x325   : > { %v13811_v5 = vadd.f32 %v2430_v54, %v17662_v46  ;;  %v13875_v48 = vadd.f32 %v2816_v55, %v17665_v51  ;;  %v2432_v13 = vpop.f32.mrb[86].mxu0  ;;  %v2818_v14 = vpop.f32.mrb[86].mxu1  ;;  %3977 = vmatprep.mubr.bf16.mxu0 %v3197_v3  ;;  %4363 = vmatprep.mubr.bf16.mxu1 %v3197_v3 }
 0x326   : > { %v13812_v16 = vadd.f32 %v2432_v13, %v17656_v53  ;;  %v13876_v20 = vadd.f32 %v2818_v14, %v17659_v60  ;;  %v2434_v44 = vpop.f32.mrb[87].mxu0  ;;  %v2820_v34 = vpop.f32.mrb[87].mxu1  ;;  %3978 = vmatmul.mubr.bf16.gmra.mrb[144].mxu0 %v3196_v36  ;;  %4364 = vmatmul.mubr.bf16.gmra.mrb[144].mxu1 %v3196_v36  ;;  %v2963_v58 = vmax.f32 %v13810_v19, 0.0  ;;  %v2965_v29 = vmax.f32 %v13874_v4, 0.0  ;;  %v15776_v36 = vld [vmem:[#allocation5 + $0x364] ss:$16 sps:$4 sm:$0xff]  }
 0x327   : > { %v13813_v18 = vadd.f32 %v2434_v44, %v17662_v46  ;;  %v13877_v21 = vadd.f32 %v2820_v34, %v17665_v51  ;;  %4115 = vmatpush1.bf16.msra.mxu0 %v15747_v49  ;;  %4501 = vmatpush1.bf16.msra.mxu1 %v15786_v50  ;;  %v2964_v17 = vmax.f32 %v13811_v5, 0.0  ;;  %v2966_v39 = vmax.f32 %v13875_v48, 0.0  ;;  %v15774_v5 = vld [vmem:[#allocation5 + $0x360] ss:$16 sps:$4 sm:$0xff]   ;;  %v15785_v48 = vld [vmem:[#allocation5 + $0x384] ss:$16 sps:$4 sm:$0xff]  }
 0x328   : > { %v2967_v30 = vmax.f32 %v13812_v16, 0.0  ;;  %4116 = vmatprep.subr.bf16.mxu0 %v15758_v57  ;;  %4502 = vmatprep.subr.bf16.mxu1 %v15791_v61  ;;  %v2969_v31 = vmax.f32 %v13876_v20, 0.0  ;;  %v15798_v13 = vld [vmem:[#allocation5 + $0x368] ss:$16 sps:$4 sm:$0xff]   ;;  %v15806_v20 = vld [vmem:[#allocation5 + $0x38c] ss:$16 sps:$4 sm:$0xff]  }
 0x329   : > { %v2968_v56 = vmax.f32 %v13813_v18, 0.0  ;;  %v2970_v45 = vmax.f32 %v13877_v21, 0.0 }
 0x32a   : > { %v3200_v22 = vpack.c.bf16 %v2967_v30, %v2963_v58  ;;  %v17735_v28 = vpack.c.bf16 %v2969_v31, %v2965_v29  ;;  %v15783_v31 = vld [vmem:[#allocation5 + $0x380] ss:$16 sps:$4 sm:$0xff]  }
 0x32b   : > { %v2438_v7 = vpop.f32.mrb[88].mxu0  ;;  %v2824_v12 = vpop.f32.mrb[88].mxu1  ;;  %v3201_v37 = vpack.c.bf16 %v2968_v56, %v2964_v17  ;;  %4117 = vmatpush1.bf16.msra.mxu0 %v15756_v25  ;;  %4503 = vmatpush1.bf16.msra.mxu1 %v15789_v27  ;;  %v17737_v40 = vpack.c.bf16 %v2970_v45, %v2966_v39  ;;  %v15804_v17 = vld [vmem:[#allocation5 + $0x388] ss:$16 sps:$4 sm:$0xff]  }
 0x32c   : > { %v13814_v8 = vadd.f32 %v2438_v7, %v17656_v53  ;;  %v13878_v32 = vadd.f32 %v2824_v12, %v17659_v60  ;;  %v2440_v33 = vpop.f32.mrb[89].mxu0  ;;  %v2826_v35 = vpop.f32.mrb[89].mxu1  ;;  %4118 = vmatprep.subr.bf16.mxu0 %v15767_v26  ;;  %4504 = vmatprep.subr.bf16.mxu1 %v15797_v42  ;;  %v15794_v12 = vld [vmem:[#allocation5 + $0x3a4] ss:$16 sps:$4 sm:$0xff]  }
 0x32d   : > { %v13815_v43 = vadd.f32 %v2440_v33, %v17662_v46  ;;  %v13879_v3 = vadd.f32 %v2826_v35, %v17665_v51  ;;  %v2442_v49 = vpop.f32.mrb[90].mxu0  ;;  %v2828_v50 = vpop.f32.mrb[90].mxu1  ;;  %3987 = vmatprep.mubr.bf16.mxu0 %v3201_v37  ;;  %4373 = vmatprep.mubr.bf16.mxu1 %v3201_v37  ;;  %v15809_v37 = vld [vmem:[#allocation5 + $0x3ac] ss:$16 sps:$4 sm:$0xff]  }
 0x32e   : > { %v13816_v19 = vadd.f32 %v2442_v49, %v17656_v53  ;;  %v13880_v4 = vadd.f32 %v2828_v50, %v17659_v60  ;;  %v2444_v54 = vpop.f32.mrb[91].mxu0  ;;  %v2830_v55 = vpop.f32.mrb[91].mxu1  ;;  %3988 = vmatmul.mubr.bf16.gmra.mrb[148].mxu0 %v3200_v22  ;;  %4374 = vmatmul.mubr.bf16.gmra.mrb[148].mxu1 %v3200_v22  ;;  %v2971_v14 = vmax.f32 %v13814_v8, 0.0  ;;  %v2973_v44 = vmax.f32 %v13878_v32, 0.0  ;;  %v15792_v49 = vld [vmem:[#allocation5 + $0x3a0] ss:$16 sps:$4 sm:$0xff]  }
 0x32f   : > { %v13817_v57 = vadd.f32 %v2444_v54, %v17662_v46  ;;  %v13881_v61 = vadd.f32 %v2830_v55, %v17665_v51  ;;  %4119 = vmatpush1.bf16.msra.mxu0 %v15765_v47  ;;  %4505 = vmatpush1.bf16.msra.mxu1 %v15795_v2  ;;  %v2972_v18 = vmax.f32 %v13815_v43, 0.0  ;;  %v2974_v25 = vmax.f32 %v13879_v3, 0.0  ;;  %v15803_v50 = vld [vmem:[#allocation5 + $0x3c4] ss:$16 sps:$4 sm:$0xff]   ;;  %v15815_v55 = vld [vmem:[#allocation5 + $0x3cc] ss:$16 sps:$4 sm:$0xff]  }
 0x330   : > { %v2975_v16 = vmax.f32 %v13816_v19, 0.0  ;;  %4120 = vmatprep.subr.bf16.mxu0 %v15776_v36  ;;  %4506 = vmatprep.subr.bf16.mxu1 %v15800_v41  ;;  %v2977_v34 = vmax.f32 %v13880_v4, 0.0  ;;  %v15807_v19 = vld [vmem:[#allocation5 + $0x3a8] ss:$16 sps:$4 sm:$0xff]  }
 0x331   : > { %v2976_v21 = vmax.f32 %v13817_v57, 0.0  ;;  %v2978_v26 = vmax.f32 %v13881_v61, 0.0 }
 0x332   : > { %v3204_v27 = vpack.c.bf16 %v2975_v16, %v2971_v14  ;;  %v17747_v58 = vpack.c.bf16 %v2977_v34, %v2973_v44 }
 0x333   : > { %v2448_v30 = vpop.f32.mrb[92].mxu0  ;;  %v2834_v42 = vpop.f32.mrb[92].mxu1  ;;  %v3205_v29 = vpack.c.bf16 %v2976_v21, %v2972_v18  ;;  %4121 = vmatpush1.bf16.msra.mxu0 %v15774_v5  ;;  %4507 = vmatpush1.bf16.msra.mxu1 %v15798_v13  ;;  %v17749_v56 = vpack.c.bf16 %v2978_v26, %v2974_v25  ;;  %v15801_v21 = vld [vmem:[#allocation5 + $0x3c0] ss:$16 sps:$4 sm:$0xff]   ;;  %v15813_v25 = vld [vmem:[#allocation5 + $0x3c8] ss:$16 sps:$4 sm:$0xff]  }
 0x334   : > { %v13818_v39 = vadd.f32 %v2448_v30, %v17656_v53  ;;  %v13882_v45 = vadd.f32 %v2834_v42, %v17659_v60  ;;  %v2450_v22 = vpop.f32.mrb[93].mxu0  ;;  %v2836_v7 = vpop.f32.mrb[93].mxu1  ;;  %4122 = vmatprep.subr.bf16.mxu0 %v15785_v48  ;;  %4508 = vmatprep.subr.bf16.mxu1 %v15806_v20 }
 0x335   : > { %v13819_v47 = vadd.f32 %v2450_v22, %v17662_v46  ;;  %v13883_v2 = vadd.f32 %v2836_v7, %v17665_v51  ;;  %v2452_v8 = vpop.f32.mrb[94].mxu0  ;;  %v2838_v32 = vpop.f32.mrb[94].mxu1  ;;  %3997 = vmatprep.mubr.bf16.mxu0 %v3205_v29  ;;  %4383 = vmatprep.mubr.bf16.mxu1 %v3205_v29 }
 0x336   : > { %v13820_v33 = vadd.f32 %v2452_v8, %v17656_v53  ;;  %v13884_v35 = vadd.f32 %v2838_v32, %v17659_v60  ;;  %v2454_v36 = vpop.f32.mrb[95].mxu0  ;;  %v2840_v41 = vpop.f32.mrb[95].mxu1  ;;  %3998 = vmatmul.mubr.bf16.gmra.mrb[152].mxu0 %v3204_v27  ;;  %4384 = vmatmul.mubr.bf16.gmra.mrb[152].mxu1 %v3204_v27  ;;  %v2979_v4 = vmax.f32 %v13818_v39, 0.0  ;;  %v2981_v57 = vmax.f32 %v13882_v45, 0.0 }
 0x337   : > { %v13821_v43 = vadd.f32 %v2454_v36, %v17662_v46  ;;  %v13885_v3 = vadd.f32 %v2840_v41, %v17665_v51  ;;  %4123 = vmatpush1.bf16.msra.mxu0 %v15783_v31  ;;  %4509 = vmatpush1.bf16.msra.mxu1 %v15804_v17  ;;  %v2980_v5 = vmax.f32 %v13819_v47, 0.0  ;;  %v2982_v13 = vmax.f32 %v13883_v2, 0.0  ;;  %v15812_v31 = vld [vmem:[#allocation5 + $0x3e4] ss:$16 sps:$4 sm:$0xff]   ;;  %v15818_v17 = vld [vmem:[#allocation5 + $0x3ec] ss:$16 sps:$4 sm:$0xff]  }
 0x338   : > { %v2983_v54 = vmax.f32 %v13820_v33, 0.0  ;;  %4124 = vmatprep.subr.bf16.mxu0 %v15794_v12  ;;  %4510 = vmatprep.subr.bf16.mxu1 %v15809_v37  ;;  %v2985_v61 = vmax.f32 %v13884_v35, 0.0  ;;  %v15810_v33 = vld [vmem:[#allocation5 + $0x3e0] ss:$16 sps:$4 sm:$0xff]   ;;  %v15816_v35 = vld [vmem:[#allocation5 + $0x3e8] ss:$16 sps:$4 sm:$0xff]  }
 0x339   : > { %v2984_v48 = vmax.f32 %v13821_v43, 0.0  ;;  %v2986_v14 = vmax.f32 %v13885_v3, 0.0 }
 0x33a   : > { %v3208_v16 = vpack.c.bf16 %v2983_v54, %v2979_v4  ;;  %v17759_v20 = vpack.c.bf16 %v2985_v61, %v2981_v57 }
 0x33b   : > { %v2458_v44 = vpop.f32.mrb[96].mxu0  ;;  %v2844_v34 = vpop.f32.mrb[96].mxu1  ;;  %v3209_v18 = vpack.c.bf16 %v2984_v48, %v2980_v5  ;;  %4125 = vmatpush1.bf16.msra.mxu0 %v15792_v49  ;;  %4511 = vmatpush1.bf16.msra.mxu1 %v15807_v19  ;;  %v17761_v26 = vpack.c.bf16 %v2986_v14, %v2982_v13 }
 0x33c   : > { %v13822_v27 = vadd.f32 %v2458_v44, %v17656_v53  ;;  %v13886_v30 = vadd.f32 %v2844_v34, %v17659_v60  ;;  %v2460_v42 = vpop.f32.mrb[97].mxu0  ;;  %v2846_v29 = vpop.f32.mrb[97].mxu1  ;;  %4126 = vmatprep.subr.bf16.mxu0 %v15803_v50  ;;  %4512 = vmatprep.subr.bf16.mxu1 %v15815_v55 }
 0x33d   : > { %v13823_v39 = vadd.f32 %v2460_v42, %v17662_v46  ;;  %v13887_v45 = vadd.f32 %v2846_v29, %v17665_v51  ;;  %v2462_v22 = vpop.f32.mrb[98].mxu0  ;;  %v2848_v7 = vpop.f32.mrb[98].mxu1  ;;  %4007 = vmatprep.mubr.bf16.mxu0 %v3209_v18  ;;  %4393 = vmatprep.mubr.bf16.mxu1 %v3209_v18 }
 0x33e   : > { %v13824_v12 = vadd.f32 %v2462_v22, %v17656_v53  ;;  %v13888_v37 = vadd.f32 %v2848_v7, %v17659_v60  ;;  %v2464_v47 = vpop.f32.mrb[99].mxu0  ;;  %v2850_v2 = vpop.f32.mrb[99].mxu1  ;;  %4008 = vmatmul.mubr.bf16.gmra.mrb[156].mxu0 %v3208_v16  ;;  %4394 = vmatmul.mubr.bf16.gmra.mrb[156].mxu1 %v3208_v16  ;;  %v2987_v36 = vmax.f32 %v13822_v27, 0.0  ;;  %v2989_v43 = vmax.f32 %v13886_v30, 0.0 }
 0x33f   : > { %v13825_v8 = vadd.f32 %v2464_v47, %v17662_v46  ;;  %v13889_v32 = vadd.f32 %v2850_v2, %v17665_v51  ;;  %4127 = vmatpush1.bf16.msra.mxu0 %v15801_v21  ;;  %4513 = vmatpush1.bf16.msra.mxu1 %v15813_v25  ;;  %v2988_v49 = vmax.f32 %v13823_v39, 0.0  ;;  %v2990_v19 = vmax.f32 %v13887_v45, 0.0 }
 0x340   : > { %v2991_v41 = vmax.f32 %v13824_v12, 0.0  ;;  %4128 = vmatprep.subr.bf16.mxu0 %v15812_v31  ;;  %4514 = vmatprep.subr.bf16.mxu1 %v15818_v17  ;;  %v2993_v3 = vmax.f32 %v13888_v37, 0.0 }
 0x341   : > { %v2992_v50 = vmax.f32 %v13825_v8, 0.0  ;;  %v2994_v4 = vmax.f32 %v13889_v32, 0.0 }
 0x342   : > { %v3212_v54 = vpack.c.bf16 %v2991_v41, %v2987_v36  ;;  %v17771_v55 = vpack.c.bf16 %v2993_v3, %v2989_v43 }
 0x343   : > { %v2468_v57 = vpop.f32.mrb[100].mxu0  ;;  %v2854_v61 = vpop.f32.mrb[100].mxu1  ;;  %v3213_v5 = vpack.c.bf16 %v2992_v50, %v2988_v49  ;;  %4129 = vmatpush1.bf16.msra.mxu0 %v15810_v33  ;;  %4515 = vmatpush1.bf16.msra.mxu1 %v15816_v35  ;;  %v17773_v48 = vpack.c.bf16 %v2994_v4, %v2990_v19 }
 0x344   : > { %v13826_v13 = vadd.f32 %v2468_v57, %v17656_v53  ;;  %v13890_v14 = vadd.f32 %v2854_v61, %v17659_v60  ;;  %v2470_v16 = vpop.f32.mrb[101].mxu0  ;;  %v2856_v44 = vpop.f32.mrb[101].mxu1 }
 0x345   : > { %v13827_v34 = vadd.f32 %v2470_v16, %v17662_v46  ;;  %v13891_v18 = vadd.f32 %v2856_v44, %v17665_v51  ;;  %v2472_v21 = vpop.f32.mrb[102].mxu0  ;;  %v2858_v25 = vpop.f32.mrb[102].mxu1  ;;  %4017 = vmatprep.mubr.bf16.mxu0 %v3213_v5  ;;  %4403 = vmatprep.mubr.bf16.mxu1 %v3213_v5 }
 0x346   : > { %v13828_v27 = vadd.f32 %v2472_v21, %v17656_v53  ;;  %v13892_v30 = vadd.f32 %v2858_v25, %v17659_v60  ;;  %v2474_v42 = vpop.f32.mrb[103].mxu0  ;;  %v2860_v29 = vpop.f32.mrb[103].mxu1  ;;  %4018 = vmatmul.mubr.bf16.gmra.mrb[160].mxu0 %v3212_v54  ;;  %4404 = vmatmul.mubr.bf16.gmra.mrb[160].mxu1 %v3212_v54  ;;  %v2995_v39 = vmax.f32 %v13826_v13, 0.0  ;;  %v2997_v22 = vmax.f32 %v13890_v14, 0.0 }
 0x347   : > { %v13829_v31 = vadd.f32 %v2474_v42, %v17662_v46  ;;  %v13893_v17 = vadd.f32 %v2860_v29, %v17665_v51  ;;  %v2996_v12 = vmax.f32 %v13827_v34, 0.0  ;;  %v2998_v47 = vmax.f32 %v13891_v18, 0.0 }
 0x348   : > { %v2999_v45 = vmax.f32 %v13828_v27, 0.0  ;;  %v3001_v7 = vmax.f32 %v13892_v30, 0.0 }
 0x349   : > { %v3000_v37 = vmax.f32 %v13829_v31, 0.0  ;;  %v3002_v2 = vmax.f32 %v13893_v17, 0.0 }
 0x34a   : > { %v3216_v8 = vpack.c.bf16 %v2999_v45, %v2995_v39  ;;  %v17783_v32 = vpack.c.bf16 %v3001_v7, %v2997_v22 }
 0x34b   : > { %v2478_v33 = vpop.f32.mrb[104].mxu0  ;;  %v2864_v35 = vpop.f32.mrb[104].mxu1  ;;  %v3217_v36 = vpack.c.bf16 %v3000_v37, %v2996_v12  ;;  %v17785_v41 = vpack.c.bf16 %v3002_v2, %v2998_v47 }
 0x34c   : > { %v13830_v43 = vadd.f32 %v2478_v33, %v17656_v53  ;;  %v13894_v3 = vadd.f32 %v2864_v35, %v17659_v60  ;;  %v2480_v49 = vpop.f32.mrb[105].mxu0  ;;  %v2866_v50 = vpop.f32.mrb[105].mxu1 }
 0x34d   : > { %v13831_v19 = vadd.f32 %v2480_v49, %v17662_v46  ;;  %v13895_v4 = vadd.f32 %v2866_v50, %v17665_v51  ;;  %v2482_v54 = vpop.f32.mrb[106].mxu0  ;;  %v2868_v57 = vpop.f32.mrb[106].mxu1  ;;  %4027 = vmatprep.mubr.bf16.mxu0 %v3217_v36  ;;  %4413 = vmatprep.mubr.bf16.mxu1 %v3217_v36 }
 0x34e   : > { %v13832_v61 = vadd.f32 %v2482_v54, %v17656_v53  ;;  %v13896_v5 = vadd.f32 %v2868_v57, %v17659_v60  ;;  %v2484_v13 = vpop.f32.mrb[107].mxu0  ;;  %v2870_v14 = vpop.f32.mrb[107].mxu1  ;;  %4028 = vmatmul.mubr.bf16.gmra.mrb[164].mxu0 %v3216_v8  ;;  %4414 = vmatmul.mubr.bf16.gmra.mrb[164].mxu1 %v3216_v8  ;;  %v3003_v34 = vmax.f32 %v13830_v43, 0.0  ;;  %v3005_v21 = vmax.f32 %v13894_v3, 0.0 }
 0x34f   : > { %v13833_v16 = vadd.f32 %v2484_v13, %v17662_v46  ;;  %v13897_v44 = vadd.f32 %v2870_v14, %v17665_v51  ;;  %v3004_v27 = vmax.f32 %v13831_v19, 0.0  ;;  %v3006_v42 = vmax.f32 %v13895_v4, 0.0 }
 0x350   : > { %v3007_v18 = vmax.f32 %v13832_v61, 0.0  ;;  %v3009_v25 = vmax.f32 %v13896_v5, 0.0 }
 0x351   : > { %v3008_v30 = vmax.f32 %v13833_v16, 0.0  ;;  %v3010_v29 = vmax.f32 %v13897_v44, 0.0 }
 0x352   : > { %v3220_v31 = vpack.c.bf16 %v3007_v18, %v3003_v34  ;;  %v17795_v17 = vpack.c.bf16 %v3009_v25, %v3005_v21 }
 0x353   : > { %v2488_v39 = vpop.f32.mrb[108].mxu0  ;;  %v2874_v45 = vpop.f32.mrb[108].mxu1  ;;  %v3221_v22 = vpack.c.bf16 %v3008_v30, %v3004_v27  ;;  %v17797_v7 = vpack.c.bf16 %v3010_v29, %v3006_v42 }
 0x354   : > { %v13834_v12 = vadd.f32 %v2488_v39, %v17656_v53  ;;  %v13898_v37 = vadd.f32 %v2874_v45, %v17659_v60  ;;  %v2490_v47 = vpop.f32.mrb[109].mxu0  ;;  %v2876_v2 = vpop.f32.mrb[109].mxu1 }
 0x355   : > { %v13835_v8 = vadd.f32 %v2490_v47, %v17662_v46  ;;  %v13899_v33 = vadd.f32 %v2876_v2, %v17665_v51  ;;  %v2492_v35 = vpop.f32.mrb[110].mxu0  ;;  %v2878_v36 = vpop.f32.mrb[110].mxu1  ;;  %4037 = vmatprep.mubr.bf16.mxu0 %v3221_v22  ;;  %4423 = vmatprep.mubr.bf16.mxu1 %v3221_v22 }
 0x356   : > { %v13836_v43 = vadd.f32 %v2492_v35, %v17656_v53  ;;  %v13900_v3 = vadd.f32 %v2878_v36, %v17659_v60  ;;  %v2494_v49 = vpop.f32.mrb[111].mxu0  ;;  %v2880_v50 = vpop.f32.mrb[111].mxu1  ;;  %4038 = vmatmul.mubr.bf16.gmra.mrb[168].mxu0 %v3220_v31  ;;  %4424 = vmatmul.mubr.bf16.gmra.mrb[168].mxu1 %v3220_v31  ;;  %v3011_v54 = vmax.f32 %v13834_v12, 0.0  ;;  %v3013_v61 = vmax.f32 %v13898_v37, 0.0 }
 0x357   : > { %v13837_v19 = vadd.f32 %v2494_v49, %v17662_v46  ;;  %v13901_v4 = vadd.f32 %v2880_v50, %v17665_v51  ;;  %v3012_v13 = vmax.f32 %v13835_v8, 0.0  ;;  %v3014_v16 = vmax.f32 %v13899_v33, 0.0 }
 0x358   : > { %v3015_v57 = vmax.f32 %v13836_v43, 0.0  ;;  %v3017_v5 = vmax.f32 %v13900_v3, 0.0  ;;  %v15821_v43 = vld [vmem:[#allocation7 + $0x4] ss:$16 sps:$4 sm:$0xff]  }
 0x359   : > { %v3016_v14 = vmax.f32 %v13837_v19, 0.0  ;;  %v3018_v44 = vmax.f32 %v13901_v4, 0.0  ;;  %5659 = vmatprep.subr.bf16.mxu0 %v15821_v43 }
 0x35a   : > { %v3224_v34 = vpack.c.bf16 %v3015_v57, %v3011_v54  ;;  %v17807_v18 = vpack.c.bf16 %v3017_v5, %v3013_v61 }
 0x35b   : > { %v2498_v21 = vpop.f32.mrb[112].mxu0  ;;  %v2884_v25 = vpop.f32.mrb[112].mxu1  ;;  %v3225_v27 = vpack.c.bf16 %v3016_v14, %v3012_v13  ;;  %v17809_v30 = vpack.c.bf16 %v3018_v44, %v3014_v16 }
 0x35c   : > { %v13838_v42 = vadd.f32 %v2498_v21, %v17656_v53  ;;  %v13902_v29 = vadd.f32 %v2884_v25, %v17659_v60  ;;  %v2500_v31 = vpop.f32.mrb[113].mxu0  ;;  %v2886_v39 = vpop.f32.mrb[113].mxu1 }
 0x35d   : > { %v13839_v45 = vadd.f32 %v2500_v31, %v17662_v46  ;;  %v13903_v22 = vadd.f32 %v2886_v39, %v17665_v51  ;;  %v2502_v12 = vpop.f32.mrb[114].mxu0  ;;  %v2888_v37 = vpop.f32.mrb[114].mxu1  ;;  %4047 = vmatprep.mubr.bf16.mxu0 %v3225_v27  ;;  %4433 = vmatprep.mubr.bf16.mxu1 %v3225_v27 }
 0x35e   : > { %v13840_v47 = vadd.f32 %v2502_v12, %v17656_v53  ;;  %v13904_v2 = vadd.f32 %v2888_v37, %v17659_v60  ;;  %v2504_v8 = vpop.f32.mrb[115].mxu0  ;;  %v2890_v33 = vpop.f32.mrb[115].mxu1  ;;  %4048 = vmatmul.mubr.bf16.gmra.mrb[172].mxu0 %v3224_v34  ;;  %4434 = vmatmul.mubr.bf16.gmra.mrb[172].mxu1 %v3224_v34  ;;  %v3019_v3 = vmax.f32 %v13838_v42, 0.0  ;;  %v3021_v50 = vmax.f32 %v13902_v29, 0.0 }
 0x35f   : > { %v13841_v35 = vadd.f32 %v2504_v8, %v17662_v46  ;;  %v13905_v36 = vadd.f32 %v2890_v33, %v17665_v51  ;;  %v3020_v4 = vmax.f32 %v13839_v45, 0.0  ;;  %v3022_v57 = vmax.f32 %v13903_v22, 0.0 }
 0x360   : > { %v3023_v49 = vmax.f32 %v13840_v47, 0.0  ;;  %v3025_v19 = vmax.f32 %v13904_v2, 0.0 }
 0x361   : > { %v3024_v54 = vmax.f32 %v13841_v35, 0.0  ;;  %v3026_v61 = vmax.f32 %v13905_v36, 0.0 }
 0x362   : > { %v3228_v5 = vpack.c.bf16 %v3023_v49, %v3019_v3  ;;  %v17819_v13 = vpack.c.bf16 %v3025_v19, %v3021_v50 }
 0x363   : > { %v2508_v14 = vpop.f32.mrb[116].mxu0  ;;  %v2894_v16 = vpop.f32.mrb[116].mxu1  ;;  %v3229_v44 = vpack.c.bf16 %v3024_v54, %v3020_v4  ;;  %v17821_v34 = vpack.c.bf16 %v3026_v61, %v3022_v57 }
 0x364   : > { %v13842_v21 = vadd.f32 %v2508_v14, %v17656_v53  ;;  %v13906_v25 = vadd.f32 %v2894_v16, %v17659_v60  ;;  %v2510_v27 = vpop.f32.mrb[117].mxu0  ;;  %v2896_v42 = vpop.f32.mrb[117].mxu1 }
 0x365   : > { %v13843_v29 = vadd.f32 %v2510_v27, %v17662_v46  ;;  %v13907_v31 = vadd.f32 %v2896_v42, %v17665_v51  ;;  %v2512_v39 = vpop.f32.mrb[118].mxu0  ;;  %v2898_v45 = vpop.f32.mrb[118].mxu1  ;;  %4057 = vmatprep.mubr.bf16.mxu0 %v3229_v44  ;;  %4443 = vmatprep.mubr.bf16.mxu1 %v3229_v44 }
 0x366   : > { %v13844_v22 = vadd.f32 %v2512_v39, %v17656_v53  ;;  %v13908_v12 = vadd.f32 %v2898_v45, %v17659_v60  ;;  %v2514_v37 = vpop.f32.mrb[119].mxu0  ;;  %v2900_v47 = vpop.f32.mrb[119].mxu1  ;;  %4058 = vmatmul.mubr.bf16.gmra.mrb[176].mxu0 %v3228_v5  ;;  %4444 = vmatmul.mubr.bf16.gmra.mrb[176].mxu1 %v3228_v5  ;;  %v3027_v33 = vmax.f32 %v13842_v21, 0.0  ;;  %v3029_v36 = vmax.f32 %v13906_v25, 0.0 }
 0x367   : > { %v13845_v2 = vadd.f32 %v2514_v37, %v17662_v46  ;;  %v13909_v8 = vadd.f32 %v2900_v47, %v17665_v51  ;;  %v3028_v3 = vmax.f32 %v13843_v29, 0.0  ;;  %v3030_v50 = vmax.f32 %v13907_v31, 0.0 }
 0x368   : > { %v3031_v35 = vmax.f32 %v13844_v22, 0.0  ;;  %v3033_v43 = vmax.f32 %v13908_v12, 0.0 }
 0x369   : > { %v3032_v49 = vmax.f32 %v13845_v2, 0.0  ;;  %v3034_v19 = vmax.f32 %v13909_v8, 0.0 }
 0x36a   : > { %v3232_v4 = vpack.c.bf16 %v3031_v35, %v3027_v33  ;;  %v17831_v54 = vpack.c.bf16 %v3033_v43, %v3029_v36 }
 0x36b   : > { %v2518_v57 = vpop.f32.mrb[120].mxu0  ;;  %v2904_v61 = vpop.f32.mrb[120].mxu1  ;;  %v3233_v14 = vpack.c.bf16 %v3032_v49, %v3028_v3  ;;  %v17833_v16 = vpack.c.bf16 %v3034_v19, %v3030_v50 }
 0x36c   : > { %v13846_v5 = vadd.f32 %v2518_v57, %v17656_v53  ;;  %v13910_v44 = vadd.f32 %v2904_v61, %v17659_v60  ;;  %v2520_v21 = vpop.f32.mrb[121].mxu0  ;;  %v2906_v27 = vpop.f32.mrb[121].mxu1 }
 0x36d   : > { %v13847_v25 = vadd.f32 %v2520_v21, %v17662_v46  ;;  %v13911_v42 = vadd.f32 %v2906_v27, %v17665_v51  ;;  %v2522_v29 = vpop.f32.mrb[122].mxu0  ;;  %v2908_v31 = vpop.f32.mrb[122].mxu1  ;;  %4067 = vmatprep.mubr.bf16.mxu0 %v3233_v14  ;;  %4453 = vmatprep.mubr.bf16.mxu1 %v3233_v14 }
 0x36e   : > { %v13848_v39 = vadd.f32 %v2522_v29, %v17656_v53  ;;  %v13912_v45 = vadd.f32 %v2908_v31, %v17659_v60  ;;  %v2524_v22 = vpop.f32.mrb[123].mxu0  ;;  %v2910_v12 = vpop.f32.mrb[123].mxu1  ;;  %4068 = vmatmul.mubr.bf16.gmra.mrb[180].mxu0 %v3232_v4  ;;  %4454 = vmatmul.mubr.bf16.gmra.mrb[180].mxu1 %v3232_v4  ;;  %v3035_v2 = vmax.f32 %v13846_v5, 0.0  ;;  %v3037_v33 = vmax.f32 %v13910_v44, 0.0 }
 0x36f   : > { %v13849_v37 = vadd.f32 %v2524_v22, %v17662_v46  ;;  %v13913_v47 = vadd.f32 %v2910_v12, %v17665_v51  ;;  %v3036_v36 = vmax.f32 %v13847_v25, 0.0  ;;  %v3038_v3 = vmax.f32 %v13911_v42, 0.0 }
 0x370   : > { %v3039_v8 = vmax.f32 %v13848_v39, 0.0  ;;  %v3041_v35 = vmax.f32 %v13912_v45, 0.0 }
 0x371   : > { %v3040_v43 = vmax.f32 %v13849_v37, 0.0  ;;  %v3042_v49 = vmax.f32 %v13913_v47, 0.0 }
 0x372   : > { %v3236_v50 = vpack.c.bf16 %v3039_v8, %v3035_v2  ;;  %v17843_v19 = vpack.c.bf16 %v3041_v35, %v3037_v33 }
 0x373   : > { %v2528_v57 = vpop.f32.mrb[124].mxu0  ;;  %v2914_v61 = vpop.f32.mrb[124].mxu1  ;;  %v3237_v14 = vpack.c.bf16 %v3040_v43, %v3036_v36  ;;  %v17845_v21 = vpack.c.bf16 %v3042_v49, %v3038_v3 }
 0x374   : > { %v13850_v4 = vadd.f32 %v2528_v57, %v17656_v53  ;;  %v13914_v27 = vadd.f32 %v2914_v61, %v17659_v60  ;;  %v2530_v5 = vpop.f32.mrb[125].mxu0  ;;  %v2916_v29 = vpop.f32.mrb[125].mxu1 }
 0x375   : > { %v13851_v44 = vadd.f32 %v2530_v5, %v17662_v46  ;;  %v13915_v25 = vadd.f32 %v2916_v29, %v17665_v51  ;;  %v2532_v42 = vpop.f32.mrb[126].mxu0  ;;  %v2918_v31 = vpop.f32.mrb[126].mxu1  ;;  %4077 = vmatprep.mubr.bf16.mxu0 %v3237_v14  ;;  %4463 = vmatprep.mubr.bf16.mxu1 %v3237_v14  ;;  %v15824_v14 = vld [vmem:[#allocation7 + $0x24] ss:$16 sps:$4 sm:$0xff]   ;;  %v15849_v5 = vld [vmem:[#allocation7 + $0x28] ss:$16 sps:$4 sm:$0xff]  }
 0x376   : > { %v13852_v39 = vadd.f32 %v2532_v42, %v17656_v53  ;;  %v13916_v45 = vadd.f32 %v2918_v31, %v17659_v60  ;;  %v2534_v22 = vpop.f32.mrb[127].mxu0  ;;  %v2920_v12 = vpop.f32.mrb[127].mxu1  ;;  %4078 = vmatmul.mubr.bf16.gmra.mrb[184].mxu0 %v3236_v50  ;;  %4464 = vmatmul.mubr.bf16.gmra.mrb[184].mxu1 %v3236_v50  ;;  %v3043_v2 = vmax.f32 %v13850_v4, 0.0  ;;  %v3045_v33 = vmax.f32 %v13914_v27, 0.0  ;;  %v15846_v50 = vld [vmem:[#allocation7 + $0x8] ss:$16 sps:$4 sm:$0xff]  }
 0x377   : > { %v13853_v37 = vadd.f32 %v2534_v22, %v17662_v46  ;;  %v13917_v47 = vadd.f32 %v2920_v12, %v17665_v51  ;;  %v3044_v36 = vmax.f32 %v13851_v44, 0.0  ;;  %v3046_v3 = vmax.f32 %v13915_v25, 0.0  ;;  %v15848_v46 = vld [vmem:[#allocation7 + $0xc] ss:$16 sps:$4 sm:$0xff]   ;;  %v15819_v51 = vld [vmem:[#allocation7] ss:$16 sps:$4 sm:$0xff]  }
 0x378   : > { %v3047_v8 = vmax.f32 %v13852_v39, 0.0  ;;  %v3049_v35 = vmax.f32 %v13916_v45, 0.0  ;;  %6045 = vmatprep.subr.bf16.mxu1 %v15848_v46  ;;  %v15851_v4 = vld [vmem:[#allocation7 + $0x2c] ss:$16 sps:$4 sm:$0xff]   ;;  %v15822_v27 = vld [vmem:[#allocation7 + $0x20] ss:$16 sps:$4 sm:$0xff]  }
 0x379   : > { %v3048_v43 = vmax.f32 %v13853_v37, 0.0  ;;  %v3050_v49 = vmax.f32 %v13917_v47, 0.0  ;;  %v15857_v29 = vld [vmem:[#allocation7 + $0x4c] ss:$16 sps:$4 sm:$0xff]   ;;  %v15825_v44 = vld [vmem:[#allocation7 + $0x40] ss:$16 sps:$4 sm:$0xff]  }
 0x37a   : > { %v3240_v57 = vpack.c.bf16 %v3047_v8, %v3043_v2  ;;  %v17855_v53 = vpack.c.bf16 %v3049_v35, %v3045_v33  ;;  %v15855_v25 = vld [vmem:[#allocation7 + $0x48] ss:$16 sps:$4 sm:$0xff]   ;;  %v15830_v42 = vld [vmem:[#allocation7 + $0x64] ss:$16 sps:$4 sm:$0xff]   ;;  %v15866_v45 = vld [vmem:[#allocation7 + $0x8c] ss:$16 sps:$4 sm:$0xff]  }
 0x37b   : > { %v3241_v60 = vpack.c.bf16 %v3048_v43, %v3044_v36  ;;  %v17857_v61 = vpack.c.bf16 %v3050_v49, %v3046_v3  ;;  %v15858_v31 = vld [vmem:[#allocation7 + $0x68] ss:$16 sps:$4 sm:$0xff]   ;;  %v15833_v39 = vld [vmem:[#allocation7 + $0x84] ss:$16 sps:$4 sm:$0xff]   ;;  %v15831_v22 = vld [vmem:[#allocation7 + $0x80] ss:$16 sps:$4 sm:$0xff]  }
 0x37c   : > { %v15864_v12 = vld [vmem:[#allocation7 + $0x88] ss:$16 sps:$4 sm:$0xff]   ;;  %v15836_v37 = vld [vmem:[#allocation7 + $0xa4] ss:$16 sps:$4 sm:$0xff]   ;;  %v15875_v8 = vld [vmem:[#allocation7 + $0xcc] ss:$16 sps:$4 sm:$0xff]  }
 0x37d   : > { %4087 = vmatprep.mubr.bf16.mxu0 %v3241_v60  ;;  %4473 = vmatprep.mubr.bf16.mxu1 %v3241_v60  ;;  %v15867_v47 = vld [vmem:[#allocation7 + $0xa8] ss:$16 sps:$4 sm:$0xff]   ;;  %v15839_v2 = vld [vmem:[#allocation7 + $0xc4] ss:$16 sps:$4 sm:$0xff]   ;;  %v15837_v33 = vld [vmem:[#allocation7 + $0xc0] ss:$16 sps:$4 sm:$0xff]  }
 0x37e   : > { %4088 = vmatmul.mubr.bf16.gmra.mrb[188].mxu0 %v3240_v57  ;;  %4474 = vmatmul.mubr.bf16.gmra.mrb[188].mxu1 %v3240_v57  ;;  %v15873_v35 = vld [vmem:[#allocation7 + $0xc8] ss:$16 sps:$4 sm:$0xff]   ;;  %v15842_v36 = vld [vmem:[#allocation7 + $0xe4] ss:$16 sps:$4 sm:$0xff]   ;;  %v15884_v49 = vld [vmem:[#allocation7 + $0x10c] ss:$16 sps:$4 sm:$0xff]  }
 0x37f   : > { %4130 = vmatprep.mubr.bf16.mxu0 %v17677_v15  ;;  %4516 = vmatprep.mubr.bf16.mxu1 %v17677_v15  ;;  %v15827_v15 = vld [vmem:[#allocation7 + $0x44] ss:$16 sps:$4 sm:$0xff]   ;;  %v15876_v43 = vld [vmem:[#allocation7 + $0xe8] ss:$16 sps:$4 sm:$0xff]   ;;  %v15843_v57 = vld [vmem:[#allocation7 + $0x100] ss:$16 sps:$4 sm:$0xff]  }
 0x380   : > { %v15845_v3 = vld [vmem:[#allocation7 + $0x104] ss:$16 sps:$4 sm:$0xff]   ;;  %v15882_v60 = vld [vmem:[#allocation7 + $0x108] ss:$16 sps:$4 sm:$0xff]  }
 0x381   : > { %v15854_v46 = vld [vmem:[#allocation7 + $0x124] ss:$16 sps:$4 sm:$0xff]  }
 0x386   : > { %4131 = vmatmul.mubr.bf16.vlgmr.msra.gmra.mrb[128].mxu0 %v17675_v11  ;;  %4517 = vmatmul.mubr.bf16.vlgmr.msra.gmra.mrb[128].mxu1 %v17675_v11  ;;  %v15860_v11 = vld [vmem:[#allocation7 + $0x6c] ss:$16 sps:$4 sm:$0xff]  }
 0x387   : > { %4140 = vmatprep.mubr.bf16.mxu0 %v17689_v24  ;;  %4526 = vmatprep.mubr.bf16.mxu1 %v17689_v24  ;;  %v15828_v24 = vld [vmem:[#allocation7 + $0x60] ss:$16 sps:$4 sm:$0xff]  }
 0x388   : > { %5660 = vmatpush1.bf16.msra.mxu0 %v15819_v51  ;;  %6046 = vmatpush1.bf16.msra.mxu1 %v15846_v50  ;;  %v15885_v51 = vld [vmem:[#allocation7 + $0x128] ss:$16 sps:$4 sm:$0xff]   ;;  %v15863_v50 = vld [vmem:[#allocation7 + $0x144] ss:$16 sps:$4 sm:$0xff]  }
 0x389   : > { %5661 = vmatprep.subr.bf16.mxu0 %v15824_v14  ;;  %6047 = vmatprep.subr.bf16.mxu1 %v15851_v4  ;;  %v15893_v14 = vld [vmem:[#allocation7 + $0x14c] ss:$16 sps:$4 sm:$0xff]   ;;  %v15861_v4 = vld [vmem:[#allocation7 + $0x140] ss:$16 sps:$4 sm:$0xff]  }
 0x38c   : > { %5662 = vmatpush1.bf16.msra.mxu0 %v15822_v27  ;;  %6048 = vmatpush1.bf16.msra.mxu1 %v15849_v5  ;;  %v15891_v27 = vld [vmem:[#allocation7 + $0x148] ss:$16 sps:$4 sm:$0xff]   ;;  %v15872_v5 = vld [vmem:[#allocation7 + $0x164] ss:$16 sps:$4 sm:$0xff]  }
 0x38d   : > { %5663 = vmatprep.subr.bf16.mxu0 %v15827_v15  ;;  %6049 = vmatprep.subr.bf16.mxu1 %v15857_v29  ;;  %v15894_v15 = vld [vmem:[#allocation7 + $0x168] ss:$16 sps:$4 sm:$0xff]   ;;  %v15881_v29 = vld [vmem:[#allocation7 + $0x184] ss:$16 sps:$4 sm:$0xff]  }
 0x38e   : > { %4141 = vmatmul.mubr.bf16.gmra.mrb[132].mxu0 %v17687_v10  ;;  %4527 = vmatmul.mubr.bf16.gmra.mrb[132].mxu1 %v17687_v10  ;;  %v15869_v10 = vld [vmem:[#allocation7 + $0xac] ss:$16 sps:$4 sm:$0xff]  }
 0x38f   : > { %4150 = vmatprep.mubr.bf16.mxu0 %v17701_v0  ;;  %4536 = vmatprep.mubr.bf16.mxu1 %v17701_v0  ;;  %v15834_v0 = vld [vmem:[#allocation7 + $0xa0] ss:$16 sps:$4 sm:$0xff]  }
 0x390   : > { %5664 = vmatpush1.bf16.msra.mxu0 %v15825_v44  ;;  %6050 = vmatpush1.bf16.msra.mxu1 %v15855_v25  ;;  %v15902_v44 = vld [vmem:[#allocation7 + $0x18c] ss:$16 sps:$4 sm:$0xff]   ;;  %v15879_v25 = vld [vmem:[#allocation7 + $0x180] ss:$16 sps:$4 sm:$0xff]  }
 0x391   : > { %5665 = vmatprep.subr.bf16.mxu0 %v15830_v42  ;;  %6051 = vmatprep.subr.bf16.mxu1 %v15860_v11  ;;  %v15900_v42 = vld [vmem:[#allocation7 + $0x188] ss:$16 sps:$4 sm:$0xff]   ;;  %v15890_v11 = vld [vmem:[#allocation7 + $0x1a4] ss:$16 sps:$4 sm:$0xff]  }
 0x394   : > { %5666 = vmatpush1.bf16.msra.mxu0 %v15828_v24  ;;  %6052 = vmatpush1.bf16.msra.mxu1 %v15858_v31  ;;  %v15903_v24 = vld [vmem:[#allocation7 + $0x1a8] ss:$16 sps:$4 sm:$0xff]   ;;  %v15899_v31 = vld [vmem:[#allocation7 + $0x1c4] ss:$16 sps:$4 sm:$0xff]  }
 0x395   : > { %5667 = vmatprep.subr.bf16.mxu0 %v15833_v39  ;;  %6053 = vmatprep.subr.bf16.mxu1 %v15866_v45  ;;  %v15897_v39 = vld [vmem:[#allocation7 + $0x1c0] ss:$16 sps:$4 sm:$0xff]  }
 0x396   : > { %4151 = vmatmul.mubr.bf16.gmra.mrb[136].mxu0 %v17699_v23  ;;  %4537 = vmatmul.mubr.bf16.gmra.mrb[136].mxu1 %v17699_v23  ;;  %v15878_v23 = vld [vmem:[#allocation7 + $0xec] ss:$16 sps:$4 sm:$0xff]  }
 0x397   : > { %4160 = vmatprep.mubr.bf16.mxu0 %v17713_v63  ;;  %4546 = vmatprep.mubr.bf16.mxu1 %v17713_v63  ;;  %v15840_v63 = vld [vmem:[#allocation7 + $0xe0] ss:$16 sps:$4 sm:$0xff]  }
 0x398   : > { %5668 = vmatpush1.bf16.msra.mxu0 %v15831_v22  ;;  %6054 = vmatpush1.bf16.msra.mxu1 %v15864_v12 }
 0x399   : > { %5669 = vmatprep.subr.bf16.mxu0 %v15836_v37  ;;  %6055 = vmatprep.subr.bf16.mxu1 %v15869_v10 }
 0x39c   : > { %5670 = vmatpush1.bf16.msra.mxu0 %v15834_v0  ;;  %6056 = vmatpush1.bf16.msra.mxu1 %v15867_v47 }
 0x39d   : > { %5671 = vmatprep.subr.bf16.mxu0 %v15839_v2  ;;  %6057 = vmatprep.subr.bf16.mxu1 %v15875_v8 }
 0x39e   : > { %4161 = vmatmul.mubr.bf16.gmra.mrb[140].mxu0 %v17711_v59  ;;  %4547 = vmatmul.mubr.bf16.gmra.mrb[140].mxu1 %v17711_v59  ;;  %v15887_v59 = vld [vmem:[#allocation7 + $0x12c] ss:$16 sps:$4 sm:$0xff]  }
 0x39f   : > { %4170 = vmatprep.mubr.bf16.mxu0 %v17725_v52  ;;  %4556 = vmatprep.mubr.bf16.mxu1 %v17725_v52  ;;  %v15852_v52 = vld [vmem:[#allocation7 + $0x120] ss:$16 sps:$4 sm:$0xff]  }
 0x3a0   : > { %5672 = vmatpush1.bf16.msra.mxu0 %v15837_v33  ;;  %6058 = vmatpush1.bf16.msra.mxu1 %v15873_v35 }
 0x3a1   : > { %5673 = vmatprep.subr.bf16.mxu0 %v15842_v36  ;;  %6059 = vmatprep.subr.bf16.mxu1 %v15878_v23 }
 0x3a4   : > { %5674 = vmatpush1.bf16.msra.mxu0 %v15840_v63  ;;  %6060 = vmatpush1.bf16.msra.mxu1 %v15876_v43 }
 0x3a5   : > { %5675 = vmatprep.subr.bf16.mxu0 %v15845_v3  ;;  %6061 = vmatprep.subr.bf16.mxu1 %v15884_v49 }
 0x3a6   : > { %4171 = vmatmul.mubr.bf16.gmra.mrb[144].mxu0 %v17723_v38  ;;  %4557 = vmatmul.mubr.bf16.gmra.mrb[144].mxu1 %v17723_v38  ;;  %v15896_v38 = vld [vmem:[#allocation7 + $0x16c] ss:$16 sps:$4 sm:$0xff]  }
 0x3a7   : > { %4180 = vmatprep.mubr.bf16.mxu0 %v17737_v40  ;;  %4566 = vmatprep.mubr.bf16.mxu1 %v17737_v40  ;;  %v15870_v40 = vld [vmem:[#allocation7 + $0x160] ss:$16 sps:$4 sm:$0xff]  }
 0x3a8   : > { %5676 = vmatpush1.bf16.msra.mxu0 %v15843_v57  ;;  %6062 = vmatpush1.bf16.msra.mxu1 %v15882_v60 }
 0x3a9   : > { %5677 = vmatprep.subr.bf16.mxu0 %v15854_v46  ;;  %6063 = vmatprep.subr.bf16.mxu1 %v15887_v59 }
 0x3ac   : > { %5678 = vmatpush1.bf16.msra.mxu0 %v15852_v52  ;;  %6064 = vmatpush1.bf16.msra.mxu1 %v15885_v51 }
 0x3ad   : > { %5679 = vmatprep.subr.bf16.mxu0 %v15863_v50  ;;  %6065 = vmatprep.subr.bf16.mxu1 %v15893_v14  ;;  %v15915_v50 = vld [vmem:[#allocation7 + $0x200] ss:$16 sps:$4 sm:$0xff]   ;;  %v15942_v14 = vld [vmem:[#allocation7 + $0x208] ss:$16 sps:$4 sm:$0xff]  }
 0x3ae   : > { %4181 = vmatmul.mubr.bf16.gmra.mrb[148].mxu0 %v17735_v28  ;;  %4567 = vmatmul.mubr.bf16.gmra.mrb[148].mxu1 %v17735_v28  ;;  %v15905_v28 = vld [vmem:[#allocation7 + $0x1ac] ss:$16 sps:$4 sm:$0xff]  }
 0x3af   : > { %4190 = vmatprep.mubr.bf16.mxu0 %v17749_v56  ;;  %4576 = vmatprep.mubr.bf16.mxu1 %v17749_v56  ;;  %v15888_v56 = vld [vmem:[#allocation7 + $0x1a0] ss:$16 sps:$4 sm:$0xff]  }
 0x3b0   : > { %5680 = vmatpush1.bf16.msra.mxu0 %v15861_v4  ;;  %6066 = vmatpush1.bf16.msra.mxu1 %v15891_v27 }
 0x3b1   : > { %5681 = vmatprep.subr.bf16.mxu0 %v15872_v5  ;;  %6067 = vmatprep.subr.bf16.mxu1 %v15896_v38 }
 0x3b4   : > { %5682 = vmatpush1.bf16.msra.mxu0 %v15870_v40  ;;  %6068 = vmatpush1.bf16.msra.mxu1 %v15894_v15  ;;  %v15920_v15 = vld [vmem:[#allocation7 + $0x224] ss:$16 sps:$4 sm:$0xff]  }
 0x3b5   : > { %5683 = vmatprep.subr.bf16.mxu0 %v15881_v29  ;;  %6069 = vmatprep.subr.bf16.mxu1 %v15902_v44  ;;  %v15947_v29 = vld [vmem:[#allocation7 + $0x22c] ss:$16 sps:$4 sm:$0xff]  }
 0x3b6   : > { %4191 = vmatmul.mubr.bf16.gmra.mrb[152].mxu0 %v17747_v58  ;;  %4577 = vmatmul.mubr.bf16.gmra.mrb[152].mxu1 %v17747_v58  ;;  %v15911_v58 = vld [vmem:[#allocation7 + $0x1cc] ss:$16 sps:$4 sm:$0xff]  }
 0x3b7   : > { %4200 = vmatprep.mubr.bf16.mxu0 %v17761_v26  ;;  %4586 = vmatprep.mubr.bf16.mxu1 %v17761_v26  ;;  %v15908_v26 = vld [vmem:[#allocation7 + $0x1e4] ss:$16 sps:$4 sm:$0xff]  }
 0x3b8   : > { %5684 = vmatpush1.bf16.msra.mxu0 %v15879_v25  ;;  %6070 = vmatpush1.bf16.msra.mxu1 %v15900_v42 }
 0x3b9   : > { %5685 = vmatprep.subr.bf16.mxu0 %v15890_v11  ;;  %6071 = vmatprep.subr.bf16.mxu1 %v15905_v28 }
 0x3bc   : > { %5686 = vmatpush1.bf16.msra.mxu0 %v15888_v56  ;;  %6072 = vmatpush1.bf16.msra.mxu1 %v15903_v24 }
 0x3bd   : > { %5687 = vmatprep.subr.bf16.mxu0 %v15899_v31  ;;  %6073 = vmatprep.subr.bf16.mxu1 %v15911_v58 }
 0x3be   : > { %4201 = vmatmul.mubr.bf16.gmra.mrb[156].mxu0 %v17759_v20  ;;  %4587 = vmatmul.mubr.bf16.gmra.mrb[156].mxu1 %v17759_v20  ;;  %v15909_v20 = vld [vmem:[#allocation7 + $0x1c8] ss:$16 sps:$4 sm:$0xff]  }
 0x3bf   : > { %4210 = vmatprep.mubr.bf16.mxu0 %v17773_v48  ;;  %4596 = vmatprep.mubr.bf16.mxu1 %v17773_v48  ;;  %v15906_v48 = vld [vmem:[#allocation7 + $0x1e0] ss:$16 sps:$4 sm:$0xff]  }
 0x3c0   : > { %5688 = vmatpush1.bf16.msra.mxu0 %v15897_v39  ;;  %6074 = vmatpush1.bf16.msra.mxu1 %v15909_v20  ;;  %v15918_v20 = vld [vmem:[#allocation7 + $0x220] ss:$16 sps:$4 sm:$0xff]  }
 0x3c1   : > { %5689 = vmatprep.subr.bf16.mxu0 %v15908_v26  ;;  %v15923_v26 = vld [vmem:[#allocation7 + $0x244] ss:$16 sps:$4 sm:$0xff]  }
 0x3c4   : > { %5690 = vmatpush1.bf16.msra.mxu0 %v15906_v48 }
 0x3c6   : > { %4211 = vmatmul.mubr.bf16.gmra.mrb[160].mxu0 %v17771_v55  ;;  %4597 = vmatmul.mubr.bf16.gmra.mrb[160].mxu1 %v17771_v55  ;;  %v15914_v55 = vld [vmem:[#allocation7 + $0x1ec] ss:$16 sps:$4 sm:$0xff]  }
 0x3c7   : > { %4220 = vmatprep.mubr.bf16.mxu0 %v17785_v41  ;;  %4606 = vmatprep.mubr.bf16.mxu1 %v17785_v41  ;;  %v15917_v41 = vld [vmem:[#allocation7 + $0x204] ss:$16 sps:$4 sm:$0xff]  }
 0x3c8   : > { %6075 = vmatprep.subr.bf16.mxu1 %v15914_v55  ;;  %5852 = vmatprep.subr.bf16.mxu0 %v15917_v41  ;;  %v15945_v55 = vld [vmem:[#allocation7 + $0x228] ss:$16 sps:$4 sm:$0xff]   ;;  %v15953_v41 = vld [vmem:[#allocation7 + $0x24c] ss:$16 sps:$4 sm:$0xff]  }
 0x3ce   : > { %4221 = vmatmul.mubr.bf16.gmra.mrb[164].mxu0 %v17783_v32  ;;  %4607 = vmatmul.mubr.bf16.gmra.mrb[164].mxu1 %v17783_v32  ;;  %v15912_v32 = vld [vmem:[#allocation7 + $0x1e8] ss:$16 sps:$4 sm:$0xff]  }
 0x3cf   : > { %4230 = vmatprep.mubr.bf16.mxu0 %v17797_v7  ;;  %4616 = vmatprep.mubr.bf16.mxu1 %v17797_v7  ;;  %v3179_v7 = vld [vmem:[%s19378_s6] sm:$0xf] }
 0x3d0   : > { %6076 = vmatpush1.bf16.msra.mxu1 %v15912_v32 }
 0x3d6   : > { %4231 = vmatmul.mubr.bf16.gmra.mrb[168].mxu0 %v17795_v17  ;;  %4617 = vmatmul.mubr.bf16.gmra.mrb[168].mxu1 %v17795_v17  ;;  %v15944_v17 = vld [vmem:[#allocation7 + $0x20c] ss:$16 sps:$4 sm:$0xff]  }
 0x3d7   : > { %4240 = vmatprep.mubr.bf16.mxu0 %v17809_v30  ;;  %4626 = vmatprep.mubr.bf16.mxu1 %v17809_v30  ;;  %v17930_v30 = vrot.slane %v3179_v7, %v17387_v6 }
 0x3d8   : > { %6238 = vmatprep.subr.bf16.mxu1 %v15944_v17 }
 0x3de   : > { %4241 = vmatmul.mubr.bf16.gmra.mrb[172].mxu0 %v17807_v18  ;;  %4627 = vmatmul.mubr.bf16.gmra.mrb[172].mxu1 %v17807_v18  ;;  %v17927_v18 = vrot.slane %v3179_v7, %v17373_v62 }
 0x3df   : > { %4250 = vmatprep.mubr.bf16.mxu0 %v17821_v34  ;;  %4636 = vmatprep.mubr.bf16.mxu1 %v17821_v34  ;;  %v17936_v34 = vrot.slane %v3179_v7, %v17390_v9 }
 0x3e6   : > { %4251 = vmatmul.mubr.bf16.gmra.mrb[176].mxu0 %v17819_v13  ;;  %4637 = vmatmul.mubr.bf16.gmra.mrb[176].mxu1 %v17819_v13  ;;  %v17933_v13 = vrot.slane %v3179_v7, %v17378_v1 }
 0x3e7   : > { %4260 = vmatprep.mubr.bf16.mxu0 %v17833_v16  ;;  %4646 = vmatprep.mubr.bf16.mxu1 %v17833_v16 }
 0x3ee   : > { %4261 = vmatmul.mubr.bf16.gmra.mrb[180].mxu0 %v17831_v54  ;;  %4647 = vmatmul.mubr.bf16.gmra.mrb[180].mxu1 %v17831_v54 }
 0x3ef   : > { %4270 = vmatprep.mubr.bf16.mxu0 %v17845_v21  ;;  %4656 = vmatprep.mubr.bf16.mxu1 %v17845_v21 }
 0x3f6   : > { %4271 = vmatmul.mubr.bf16.gmra.mrb[184].mxu0 %v17843_v19  ;;  %4657 = vmatmul.mubr.bf16.gmra.mrb[184].mxu1 %v17843_v19 }
 0x3f7   : > { %4280 = vmatprep.mubr.bf16.mxu0 %v17857_v61  ;;  %4666 = vmatprep.mubr.bf16.mxu1 %v17857_v61 }
 0x3fe   : > { %4281 = vmatmul.mubr.bf16.gmra.mrb[188].mxu0 %v17855_v53  ;;  %4667 = vmatmul.mubr.bf16.gmra.mrb[188].mxu1 %v17855_v53 }
 0x459   : > { %v4132_v54 = vpop.f32.mrb[128].mxu0  ;;  %v4518_v16 = vpop.f32.mrb[128].mxu1 }
 0x45a   : > { %v13918_v19 = vadd.f32 %v4132_v54, %v17927_v18  ;;  %v13982_v21 = vadd.f32 %v4518_v16, %v17930_v30  ;;  %v4134_v53 = vpop.f32.mrb[129].mxu0  ;;  %v4520_v61 = vpop.f32.mrb[129].mxu1 }
 0x45b   : > { %v13919_v45 = vadd.f32 %v4134_v53, %v17933_v13  ;;  %v13983_v22 = vadd.f32 %v4520_v61, %v17936_v34  ;;  %v4136_v12 = vpop.f32.mrb[130].mxu0  ;;  %v4522_v37 = vpop.f32.mrb[130].mxu1 }
 0x45c   : > { %v13920_v10 = vadd.f32 %v4136_v12, %v17927_v18  ;;  %v13984_v0 = vadd.f32 %v4522_v37, %v17930_v30  ;;  %v4138_v47 = vpop.f32.mrb[131].mxu0  ;;  %v4524_v2 = vpop.f32.mrb[131].mxu1  ;;  %v4677_v35 = vmax.f32 %v13918_v19, 0.0  ;;  %v4679_v36 = vmax.f32 %v13982_v21, 0.0  ;;  %v15921_v37 = vld [vmem:[#allocation7 + $0x240] ss:$16 sps:$4 sm:$0xff]  }
 0x45d   : > { %v13921_v8 = vadd.f32 %v4138_v47, %v17933_v13  ;;  %v13985_v33 = vadd.f32 %v4524_v2, %v17936_v34  ;;  %v4678_v43 = vmax.f32 %v13919_v45, 0.0  ;;  %v4680_v49 = vmax.f32 %v13983_v22, 0.0 }
 0x45e   : > { %v4681_v23 = vmax.f32 %v13920_v10, 0.0  ;;  %v4683_v63 = vmax.f32 %v13984_v0, 0.0  ;;  %v15951_v10 = vld [vmem:[#allocation7 + $0x248] ss:$16 sps:$4 sm:$0xff]  }
 0x45f   : > { %v4682_v3 = vmax.f32 %v13921_v8, 0.0  ;;  %v4684_v57 = vmax.f32 %v13985_v33, 0.0 }
 0x460   : > { %v4934_v60 = vpack.c.bf16 %v4681_v23, %v4677_v35  ;;  %v17946_v46 = vpack.c.bf16 %v4683_v63, %v4679_v36  ;;  %v15926_v35 = vld [vmem:[#allocation7 + $0x264] ss:$16 sps:$4 sm:$0xff]   ;;  %v15956_v36 = vld [vmem:[#allocation7 + $0x26c] ss:$16 sps:$4 sm:$0xff]  }
 0x461   : > { %v4142_v59 = vpop.f32.mrb[132].mxu0  ;;  %v4528_v52 = vpop.f32.mrb[132].mxu1  ;;  %v4935_v51 = vpack.c.bf16 %v4682_v3, %v4678_v43  ;;  %v17948_v4 = vpack.c.bf16 %v4684_v57, %v4680_v49 }
 0x462   : > { %v13922_v27 = vadd.f32 %v4142_v59, %v17927_v18  ;;  %v13986_v5 = vadd.f32 %v4528_v52, %v17930_v30  ;;  %v4144_v38 = vpop.f32.mrb[133].mxu0  ;;  %v4530_v40 = vpop.f32.mrb[133].mxu1 }
 0x463   : > { %v13923_v44 = vadd.f32 %v4144_v38, %v17933_v13  ;;  %v13987_v25 = vadd.f32 %v4530_v40, %v17936_v34  ;;  %v4146_v42 = vpop.f32.mrb[134].mxu0  ;;  %v4532_v11 = vpop.f32.mrb[134].mxu1  ;;  %5691 = vmatprep.mubr.bf16.mxu0 %v4935_v51  ;;  %6077 = vmatprep.mubr.bf16.mxu1 %v4935_v51  ;;  %v15962_v40 = vld [vmem:[#allocation7 + $0x28c] ss:$16 sps:$4 sm:$0xff]  }
 0x464   : > { %v13924_v28 = vadd.f32 %v4146_v42, %v17927_v18  ;;  %v13988_v56 = vadd.f32 %v4532_v11, %v17930_v30  ;;  %v4148_v24 = vpop.f32.mrb[135].mxu0  ;;  %v4534_v31 = vpop.f32.mrb[135].mxu1  ;;  %5692 = vmatmul.mubr.bf16.vlgmr.msra.gmra.mrb[192].mxu0 %v4934_v60  ;;  %6078 = vmatmul.mubr.bf16.vlgmr.msra.gmra.mrb[192].mxu1 %v4934_v60  ;;  %v4685_v48 = vmax.f32 %v13922_v27, 0.0  ;;  %v4687_v17 = vmax.f32 %v13986_v5, 0.0  ;;  %v15954_v27 = vld [vmem:[#allocation7 + $0x268] ss:$16 sps:$4 sm:$0xff]  }
 0x465   : > { %v13925_v39 = vadd.f32 %v4148_v24, %v17933_v13  ;;  %v13989_v58 = vadd.f32 %v4534_v31, %v17936_v34  ;;  %5853 = vmatpush1.bf16.msra.mxu0 %v15915_v50  ;;  %6239 = vmatpush1.bf16.msra.mxu1 %v15942_v14  ;;  %v4686_v54 = vmax.f32 %v13923_v44, 0.0  ;;  %v4688_v19 = vmax.f32 %v13987_v25, 0.0  ;;  %v15924_v50 = vld [vmem:[#allocation7 + $0x260] ss:$16 sps:$4 sm:$0xff]   ;;  %v15929_v14 = vld [vmem:[#allocation7 + $0x284] ss:$16 sps:$4 sm:$0xff]  }
 0x466   : > { %5854 = vmatprep.subr.bf16.mxu0 %v15920_v15  ;;  %v4689_v32 = vmax.f32 %v13924_v28, 0.0  ;;  %6240 = vmatprep.subr.bf16.mxu1 %v15947_v29  ;;  %v4691_v7 = vmax.f32 %v13988_v56, 0.0 }
 0x467   : > { %v4690_v16 = vmax.f32 %v13925_v39, 0.0  ;;  %v4692_v21 = vmax.f32 %v13989_v58, 0.0  ;;  %v15927_v58 = vld [vmem:[#allocation7 + $0x280] ss:$16 sps:$4 sm:$0xff]  }
 0x468   : > { %v4938_v53 = vpack.c.bf16 %v4689_v32, %v4685_v48  ;;  %v17958_v61 = vpack.c.bf16 %v4691_v7, %v4687_v17  ;;  %v15932_v17 = vld [vmem:[#allocation7 + $0x2a4] ss:$16 sps:$4 sm:$0xff]   ;;  %v15965_v7 = vld [vmem:[#allocation7 + $0x2ac] ss:$16 sps:$4 sm:$0xff]  }
 0x469   : > { %v4152_v45 = vpop.f32.mrb[136].mxu0  ;;  %v4538_v22 = vpop.f32.mrb[136].mxu1  ;;  %v4939_v12 = vpack.c.bf16 %v4690_v16, %v4686_v54  ;;  %5855 = vmatpush1.bf16.msra.mxu0 %v15918_v20  ;;  %6241 = vmatpush1.bf16.msra.mxu1 %v15945_v55  ;;  %v17960_v0 = vpack.c.bf16 %v4692_v21, %v4688_v19  ;;  %v15960_v20 = vld [vmem:[#allocation7 + $0x288] ss:$16 sps:$4 sm:$0xff]  }
 0x46a   : > { %v13926_v47 = vadd.f32 %v4152_v45, %v17927_v18  ;;  %v13990_v2 = vadd.f32 %v4538_v22, %v17930_v30  ;;  %v4154_v8 = vpop.f32.mrb[137].mxu0  ;;  %v4540_v33 = vpop.f32.mrb[137].mxu1  ;;  %5856 = vmatprep.subr.bf16.mxu0 %v15923_v26  ;;  %6242 = vmatprep.subr.bf16.mxu1 %v15953_v41 }
 0x46b   : > { %v13927_v23 = vadd.f32 %v4154_v8, %v17933_v13  ;;  %v13991_v63 = vadd.f32 %v4540_v33, %v17936_v34  ;;  %v4156_v43 = vpop.f32.mrb[138].mxu0  ;;  %v4542_v3 = vpop.f32.mrb[138].mxu1  ;;  %5701 = vmatprep.mubr.bf16.mxu0 %v4939_v12  ;;  %6087 = vmatprep.mubr.bf16.mxu1 %v4939_v12  ;;  %v15963_v8 = vld [vmem:[#allocation7 + $0x2a8] ss:$16 sps:$4 sm:$0xff]  }
 0x46c   : > { %v13928_v49 = vadd.f32 %v4156_v43, %v17927_v18  ;;  %v13992_v57 = vadd.f32 %v4542_v3, %v17930_v30  ;;  %v4158_v60 = vpop.f32.mrb[139].mxu0  ;;  %v4544_v59 = vpop.f32.mrb[139].mxu1  ;;  %5702 = vmatmul.mubr.bf16.gmra.mrb[196].mxu0 %v4938_v53  ;;  %6088 = vmatmul.mubr.bf16.gmra.mrb[196].mxu1 %v4938_v53  ;;  %v4693_v5 = vmax.f32 %v13926_v47, 0.0  ;;  %v4695_v15 = vmax.f32 %v13990_v2, 0.0  ;;  %v15930_v47 = vld [vmem:[#allocation7 + $0x2a0] ss:$16 sps:$4 sm:$0xff]  }
 0x46d   : > { %v13929_v52 = vadd.f32 %v4158_v60, %v17933_v13  ;;  %v13993_v51 = vadd.f32 %v4544_v59, %v17936_v34  ;;  %5857 = vmatpush1.bf16.msra.mxu0 %v15921_v37  ;;  %6243 = vmatpush1.bf16.msra.mxu1 %v15951_v10  ;;  %v4694_v44 = vmax.f32 %v13927_v23, 0.0  ;;  %v4696_v42 = vmax.f32 %v13991_v63, 0.0  ;;  %v15935_v2 = vld [vmem:[#allocation7 + $0x2c4] ss:$16 sps:$4 sm:$0xff]  }
 0x46e   : > { %v4697_v38 = vmax.f32 %v13928_v49, 0.0  ;;  %5858 = vmatprep.subr.bf16.mxu0 %v15926_v35  ;;  %6244 = vmatprep.subr.bf16.mxu1 %v15956_v36  ;;  %v4699_v29 = vmax.f32 %v13992_v57, 0.0  ;;  %v15971_v36 = vld [vmem:[#allocation7 + $0x2cc] ss:$16 sps:$4 sm:$0xff]  }
 0x46f   : > { %v4698_v25 = vmax.f32 %v13929_v52, 0.0  ;;  %v4700_v11 = vmax.f32 %v13993_v51, 0.0 }
 0x470   : > { %v4942_v28 = vpack.c.bf16 %v4697_v38, %v4693_v5  ;;  %v17970_v56 = vpack.c.bf16 %v4699_v29, %v4695_v15 }
 0x471   : > { %v4162_v24 = vpop.f32.mrb[140].mxu0  ;;  %v4548_v31 = vpop.f32.mrb[140].mxu1  ;;  %v4943_v39 = vpack.c.bf16 %v4698_v25, %v4694_v44  ;;  %5859 = vmatpush1.bf16.msra.mxu0 %v15924_v50  ;;  %6245 = vmatpush1.bf16.msra.mxu1 %v15954_v27  ;;  %v17972_v26 = vpack.c.bf16 %v4700_v11, %v4696_v42  ;;  %v15969_v27 = vld [vmem:[#allocation7 + $0x2c8] ss:$16 sps:$4 sm:$0xff]   ;;  %v15938_v44 = vld [vmem:[#allocation7 + $0x2e4] ss:$16 sps:$4 sm:$0xff]  }
 0x472   : > { %v13930_v55 = vadd.f32 %v4162_v24, %v17927_v18  ;;  %v13994_v48 = vadd.f32 %v4548_v31, %v17930_v30  ;;  %v4164_v32 = vpop.f32.mrb[141].mxu0  ;;  %v4550_v41 = vpop.f32.mrb[141].mxu1  ;;  %5860 = vmatprep.subr.bf16.mxu0 %v15929_v14  ;;  %6246 = vmatprep.subr.bf16.mxu1 %v15962_v40  ;;  %v15933_v14 = vld [vmem:[#allocation7 + $0x2c0] ss:$16 sps:$4 sm:$0xff]   ;;  %v15974_v25 = vld [vmem:[#allocation7 + $0x2ec] ss:$16 sps:$4 sm:$0xff]  }
 0x473   : > { %v13931_v54 = vadd.f32 %v4164_v32, %v17933_v13  ;;  %v13995_v16 = vadd.f32 %v4550_v41, %v17936_v34  ;;  %v4166_v19 = vpop.f32.mrb[142].mxu0  ;;  %v4552_v21 = vpop.f32.mrb[142].mxu1  ;;  %5711 = vmatprep.mubr.bf16.mxu0 %v4943_v39  ;;  %6097 = vmatprep.mubr.bf16.mxu1 %v4943_v39  ;;  %v15936_v32 = vld [vmem:[#allocation7 + $0x2e0] ss:$16 sps:$4 sm:$0xff]   ;;  %v15941_v41 = vld [vmem:[#allocation7 + $0x304] ss:$16 sps:$4 sm:$0xff]  }
 0x474   : > { %v13932_v53 = vadd.f32 %v4166_v19, %v17927_v18  ;;  %v13996_v45 = vadd.f32 %v4552_v21, %v17930_v30  ;;  %v4168_v22 = vpop.f32.mrb[143].mxu0  ;;  %v4554_v12 = vpop.f32.mrb[143].mxu1  ;;  %5712 = vmatmul.mubr.bf16.gmra.mrb[200].mxu0 %v4942_v28  ;;  %6098 = vmatmul.mubr.bf16.gmra.mrb[200].mxu1 %v4942_v28  ;;  %v4701_v33 = vmax.f32 %v13930_v55, 0.0  ;;  %v4703_v23 = vmax.f32 %v13994_v48, 0.0 }
 0x475   : > { %v13933_v37 = vadd.f32 %v4168_v22, %v17933_v13  ;;  %v13997_v10 = vadd.f32 %v4554_v12, %v17936_v34  ;;  %5861 = vmatpush1.bf16.msra.mxu0 %v15927_v58  ;;  %6247 = vmatpush1.bf16.msra.mxu1 %v15960_v20  ;;  %v4702_v43 = vmax.f32 %v13931_v54, 0.0  ;;  %v4704_v49 = vmax.f32 %v13995_v16, 0.0  ;;  %v15980_v16 = vld [vmem:[#allocation7 + $0x30c] ss:$16 sps:$4 sm:$0xff]  }
 0x476   : > { %v4705_v35 = vmax.f32 %v13932_v53, 0.0  ;;  %5862 = vmatprep.subr.bf16.mxu0 %v15932_v17  ;;  %6248 = vmatprep.subr.bf16.mxu1 %v15965_v7  ;;  %v4707_v63 = vmax.f32 %v13996_v45, 0.0  ;;  %v15972_v17 = vld [vmem:[#allocation7 + $0x2e8] ss:$16 sps:$4 sm:$0xff]  }
 0x477   : > { %v4706_v3 = vmax.f32 %v13933_v37, 0.0  ;;  %v4708_v57 = vmax.f32 %v13997_v10, 0.0 }
 0x478   : > { %v4946_v60 = vpack.c.bf16 %v4705_v35, %v4701_v33  ;;  %v17982_v59 = vpack.c.bf16 %v4707_v63, %v4703_v23  ;;  %v15939_v33 = vld [vmem:[#allocation7 + $0x300] ss:$16 sps:$4 sm:$0xff]   ;;  %v15978_v35 = vld [vmem:[#allocation7 + $0x308] ss:$16 sps:$4 sm:$0xff]  }
 0x479   : > { %v4172_v52 = vpop.f32.mrb[144].mxu0  ;;  %v4558_v51 = vpop.f32.mrb[144].mxu1  ;;  %v4947_v50 = vpack.c.bf16 %v4706_v3, %v4702_v43  ;;  %5863 = vmatpush1.bf16.msra.mxu0 %v15930_v47  ;;  %6249 = vmatpush1.bf16.msra.mxu1 %v15963_v8  ;;  %v17984_v5 = vpack.c.bf16 %v4708_v57, %v4704_v49  ;;  %v15950_v49 = vld [vmem:[#allocation7 + $0x324] ss:$16 sps:$4 sm:$0xff]   ;;  %v15983_v57 = vld [vmem:[#allocation7 + $0x32c] ss:$16 sps:$4 sm:$0xff]  }
 0x47a   : > { %v13934_v38 = vadd.f32 %v4172_v52, %v17927_v18  ;;  %v13998_v40 = vadd.f32 %v4558_v51, %v17930_v30  ;;  %v4174_v15 = vpop.f32.mrb[145].mxu0  ;;  %v4560_v29 = vpop.f32.mrb[145].mxu1  ;;  %5864 = vmatprep.subr.bf16.mxu0 %v15935_v2  ;;  %6250 = vmatprep.subr.bf16.mxu1 %v15971_v36 }
 0x47b   : > { %v13935_v42 = vadd.f32 %v4174_v15, %v17933_v13  ;;  %v13999_v11 = vadd.f32 %v4560_v29, %v17936_v34  ;;  %v4176_v28 = vpop.f32.mrb[146].mxu0  ;;  %v4562_v24 = vpop.f32.mrb[146].mxu1  ;;  %5721 = vmatprep.mubr.bf16.mxu0 %v4947_v50  ;;  %6107 = vmatprep.mubr.bf16.mxu1 %v4947_v50 }
 0x47c   : > { %v13936_v31 = vadd.f32 %v4176_v28, %v17927_v18  ;;  %v14000_v39 = vadd.f32 %v4562_v24, %v17930_v30  ;;  %v4178_v58 = vpop.f32.mrb[147].mxu0  ;;  %v4564_v20 = vpop.f32.mrb[147].mxu1  ;;  %5722 = vmatmul.mubr.bf16.gmra.mrb[204].mxu0 %v4946_v60  ;;  %6108 = vmatmul.mubr.bf16.gmra.mrb[204].mxu1 %v4946_v60  ;;  %v4709_v7 = vmax.f32 %v13934_v38, 0.0  ;;  %v4711_v19 = vmax.f32 %v13998_v40, 0.0  ;;  %v15989_v24 = vld [vmem:[#allocation7 + $0x34c] ss:$16 sps:$4 sm:$0xff]  }
 0x47d   : > { %v13937_v55 = vadd.f32 %v4178_v58, %v17933_v13  ;;  %v14001_v48 = vadd.f32 %v4564_v20, %v17936_v34  ;;  %5865 = vmatpush1.bf16.msra.mxu0 %v15933_v14  ;;  %6251 = vmatpush1.bf16.msra.mxu1 %v15969_v27  ;;  %v4710_v53 = vmax.f32 %v13935_v42, 0.0  ;;  %v4712_v22 = vmax.f32 %v13999_v11, 0.0  ;;  %v15981_v42 = vld [vmem:[#allocation7 + $0x328] ss:$16 sps:$4 sm:$0xff]  }
 0x47e   : > { %v4713_v54 = vmax.f32 %v13936_v31, 0.0  ;;  %5866 = vmatprep.subr.bf16.mxu0 %v15938_v44  ;;  %6252 = vmatprep.subr.bf16.mxu1 %v15974_v25  ;;  %v4715_v21 = vmax.f32 %v14000_v39, 0.0  ;;  %v15948_v44 = vld [vmem:[#allocation7 + $0x320] ss:$16 sps:$4 sm:$0xff]   ;;  %v15959_v25 = vld [vmem:[#allocation7 + $0x344] ss:$16 sps:$4 sm:$0xff]  }
 0x47f   : > { %v4714_v45 = vmax.f32 %v13937_v55, 0.0  ;;  %v4716_v12 = vmax.f32 %v14001_v48, 0.0 }
 0x480   : > { %v4950_v37 = vpack.c.bf16 %v4713_v54, %v4709_v7  ;;  %v17994_v10 = vpack.c.bf16 %v4715_v21, %v4711_v19  ;;  %v15987_v19 = vld [vmem:[#allocation7 + $0x348] ss:$16 sps:$4 sm:$0xff]  }
 0x481   : > { %v4182_v47 = vpop.f32.mrb[148].mxu0  ;;  %v4568_v2 = vpop.f32.mrb[148].mxu1  ;;  %v4951_v8 = vpack.c.bf16 %v4714_v45, %v4710_v53  ;;  %5867 = vmatpush1.bf16.msra.mxu0 %v15936_v32  ;;  %6253 = vmatpush1.bf16.msra.mxu1 %v15972_v17  ;;  %v17996_v36 = vpack.c.bf16 %v4716_v12, %v4712_v22 }
 0x482   : > { %v13938_v23 = vadd.f32 %v4182_v47, %v17927_v18  ;;  %v14002_v63 = vadd.f32 %v4568_v2, %v17930_v30  ;;  %v4184_v43 = vpop.f32.mrb[149].mxu0  ;;  %v4570_v3 = vpop.f32.mrb[149].mxu1  ;;  %5868 = vmatprep.subr.bf16.mxu0 %v15941_v41  ;;  %6254 = vmatprep.subr.bf16.mxu1 %v15980_v16  ;;  %v15957_v16 = vld [vmem:[#allocation7 + $0x340] ss:$16 sps:$4 sm:$0xff]   ;;  %v15992_v47 = vld [vmem:[#allocation7 + $0x36c] ss:$16 sps:$4 sm:$0xff]  }
 0x483   : > { %v13939_v60 = vadd.f32 %v4184_v43, %v17933_v13  ;;  %v14003_v52 = vadd.f32 %v4570_v3, %v17936_v34  ;;  %v4186_v51 = vpop.f32.mrb[150].mxu0  ;;  %v4572_v50 = vpop.f32.mrb[150].mxu1  ;;  %5731 = vmatprep.mubr.bf16.mxu0 %v4951_v8  ;;  %6117 = vmatprep.mubr.bf16.mxu1 %v4951_v8 }
 0x484   : > { %v13940_v14 = vadd.f32 %v4186_v51, %v17927_v18  ;;  %v14004_v27 = vadd.f32 %v4572_v50, %v17930_v30  ;;  %v4188_v38 = vpop.f32.mrb[151].mxu0  ;;  %v4574_v40 = vpop.f32.mrb[151].mxu1  ;;  %5732 = vmatmul.mubr.bf16.gmra.mrb[208].mxu0 %v4950_v37  ;;  %6118 = vmatmul.mubr.bf16.gmra.mrb[208].mxu1 %v4950_v37  ;;  %v4717_v11 = vmax.f32 %v13938_v23, 0.0  ;;  %v4719_v31 = vmax.f32 %v14002_v63, 0.0  ;;  %v15968_v37 = vld [vmem:[#allocation7 + $0x364] ss:$16 sps:$4 sm:$0xff]  }
 0x485   : > { %v13941_v15 = vadd.f32 %v4188_v38, %v17933_v13  ;;  %v14005_v29 = vadd.f32 %v4574_v40, %v17936_v34  ;;  %5869 = vmatpush1.bf16.msra.mxu0 %v15939_v33  ;;  %6255 = vmatpush1.bf16.msra.mxu1 %v15978_v35  ;;  %v4718_v58 = vmax.f32 %v13939_v60, 0.0  ;;  %v4720_v55 = vmax.f32 %v14003_v52, 0.0  ;;  %v15966_v60 = vld [vmem:[#allocation7 + $0x360] ss:$16 sps:$4 sm:$0xff]   ;;  %v15977_v52 = vld [vmem:[#allocation7 + $0x384] ss:$16 sps:$4 sm:$0xff]  }
 0x486   : > { %v4721_v28 = vmax.f32 %v13940_v14, 0.0  ;;  %5870 = vmatprep.subr.bf16.mxu0 %v15950_v49  ;;  %6256 = vmatprep.subr.bf16.mxu1 %v15983_v57  ;;  %v4723_v39 = vmax.f32 %v14004_v27, 0.0  ;;  %v15990_v51 = vld [vmem:[#allocation7 + $0x368] ss:$16 sps:$4 sm:$0xff]   ;;  %v15998_v27 = vld [vmem:[#allocation7 + $0x38c] ss:$16 sps:$4 sm:$0xff]  }
 0x487   : > { %v4722_v20 = vmax.f32 %v13941_v15, 0.0  ;;  %v4724_v48 = vmax.f32 %v14005_v29, 0.0 }
 0x488   : > { %v4954_v32 = vpack.c.bf16 %v4721_v28, %v4717_v11  ;;  %v18006_v41 = vpack.c.bf16 %v4723_v39, %v4719_v31  ;;  %v15975_v39 = vld [vmem:[#allocation7 + $0x380] ss:$16 sps:$4 sm:$0xff]  }
 0x489   : > { %v4192_v17 = vpop.f32.mrb[152].mxu0  ;;  %v4578_v7 = vpop.f32.mrb[152].mxu1  ;;  %v4955_v54 = vpack.c.bf16 %v4722_v20, %v4718_v58  ;;  %5871 = vmatpush1.bf16.msra.mxu0 %v15948_v44  ;;  %6257 = vmatpush1.bf16.msra.mxu1 %v15981_v42  ;;  %v18008_v21 = vpack.c.bf16 %v4724_v48, %v4720_v55  ;;  %v15996_v58 = vld [vmem:[#allocation7 + $0x388] ss:$16 sps:$4 sm:$0xff]  }
 0x48a   : > { %v13942_v53 = vadd.f32 %v4192_v17, %v17927_v18  ;;  %v14006_v45 = vadd.f32 %v4578_v7, %v17930_v30  ;;  %v4194_v22 = vpop.f32.mrb[153].mxu0  ;;  %v4580_v12 = vpop.f32.mrb[153].mxu1  ;;  %5872 = vmatprep.subr.bf16.mxu0 %v15959_v25  ;;  %6258 = vmatprep.subr.bf16.mxu1 %v15989_v24  ;;  %v15986_v7 = vld [vmem:[#allocation7 + $0x3a4] ss:$16 sps:$4 sm:$0xff]  }
 0x48b   : > { %v13943_v2 = vadd.f32 %v4194_v22, %v17933_v13  ;;  %v14007_v8 = vadd.f32 %v4580_v12, %v17936_v34  ;;  %v4196_v33 = vpop.f32.mrb[154].mxu0  ;;  %v4582_v35 = vpop.f32.mrb[154].mxu1  ;;  %5741 = vmatprep.mubr.bf16.mxu0 %v4955_v54  ;;  %6127 = vmatprep.mubr.bf16.mxu1 %v4955_v54  ;;  %v16001_v54 = vld [vmem:[#allocation7 + $0x3ac] ss:$16 sps:$4 sm:$0xff]  }
 0x48c   : > { %v13944_v23 = vadd.f32 %v4196_v33, %v17927_v18  ;;  %v14008_v63 = vadd.f32 %v4582_v35, %v17930_v30  ;;  %v4198_v43 = vpop.f32.mrb[155].mxu0  ;;  %v4584_v3 = vpop.f32.mrb[155].mxu1  ;;  %5742 = vmatmul.mubr.bf16.gmra.mrb[212].mxu0 %v4954_v32  ;;  %6128 = vmatmul.mubr.bf16.gmra.mrb[212].mxu1 %v4954_v32  ;;  %v4725_v50 = vmax.f32 %v13942_v53, 0.0  ;;  %v4727_v38 = vmax.f32 %v14006_v45, 0.0  ;;  %v15984_v33 = vld [vmem:[#allocation7 + $0x3a0] ss:$16 sps:$4 sm:$0xff]  }
 0x48d   : > { %v13945_v49 = vadd.f32 %v4198_v43, %v17933_v13  ;;  %v14009_v57 = vadd.f32 %v4584_v3, %v17936_v34  ;;  %5873 = vmatpush1.bf16.msra.mxu0 %v15957_v16  ;;  %6259 = vmatpush1.bf16.msra.mxu1 %v15987_v19  ;;  %v4726_v15 = vmax.f32 %v13943_v2, 0.0  ;;  %v4728_v44 = vmax.f32 %v14007_v8, 0.0  ;;  %v15995_v35 = vld [vmem:[#allocation7 + $0x3c4] ss:$16 sps:$4 sm:$0xff]   ;;  %v16007_v3 = vld [vmem:[#allocation7 + $0x3cc] ss:$16 sps:$4 sm:$0xff]  }
 0x48e   : > { %v4729_v14 = vmax.f32 %v13944_v23, 0.0  ;;  %5874 = vmatprep.subr.bf16.mxu0 %v15968_v37  ;;  %6260 = vmatprep.subr.bf16.mxu1 %v15992_v47  ;;  %v4731_v40 = vmax.f32 %v14008_v63, 0.0  ;;  %v15999_v23 = vld [vmem:[#allocation7 + $0x3a8] ss:$16 sps:$4 sm:$0xff]  }
 0x48f   : > { %v4730_v29 = vmax.f32 %v13945_v49, 0.0  ;;  %v4732_v25 = vmax.f32 %v14009_v57, 0.0 }
 0x490   : > { %v4958_v42 = vpack.c.bf16 %v4729_v14, %v4725_v50  ;;  %v18018_v11 = vpack.c.bf16 %v4731_v40, %v4727_v38 }
 0x491   : > { %v4202_v28 = vpop.f32.mrb[156].mxu0  ;;  %v4588_v24 = vpop.f32.mrb[156].mxu1  ;;  %v4959_v31 = vpack.c.bf16 %v4730_v29, %v4726_v15  ;;  %5875 = vmatpush1.bf16.msra.mxu0 %v15966_v60  ;;  %6261 = vmatpush1.bf16.msra.mxu1 %v15990_v51  ;;  %v18020_v20 = vpack.c.bf16 %v4732_v25, %v4728_v44  ;;  %v15993_v29 = vld [vmem:[#allocation7 + $0x3c0] ss:$16 sps:$4 sm:$0xff]   ;;  %v16005_v44 = vld [vmem:[#allocation7 + $0x3c8] ss:$16 sps:$4 sm:$0xff]  }
 0x492   : > { %v13946_v55 = vadd.f32 %v4202_v28, %v17927_v18  ;;  %v14010_v48 = vadd.f32 %v4588_v24, %v17930_v30  ;;  %v4204_v32 = vpop.f32.mrb[157].mxu0  ;;  %v4590_v17 = vpop.f32.mrb[157].mxu1  ;;  %5876 = vmatprep.subr.bf16.mxu0 %v15977_v52  ;;  %6262 = vmatprep.subr.bf16.mxu1 %v15998_v27 }
 0x493   : > { %v13947_v16 = vadd.f32 %v4204_v32, %v17933_v13  ;;  %v14011_v19 = vadd.f32 %v4590_v17, %v17936_v34  ;;  %v4206_v53 = vpop.f32.mrb[158].mxu0  ;;  %v4592_v45 = vpop.f32.mrb[158].mxu1  ;;  %5751 = vmatprep.mubr.bf16.mxu0 %v4959_v31  ;;  %6137 = vmatprep.mubr.bf16.mxu1 %v4959_v31 }
 0x494   : > { %v13948_v22 = vadd.f32 %v4206_v53, %v17927_v18  ;;  %v14012_v12 = vadd.f32 %v4592_v45, %v17930_v30  ;;  %v4208_v37 = vpop.f32.mrb[159].mxu0  ;;  %v4594_v47 = vpop.f32.mrb[159].mxu1  ;;  %5752 = vmatmul.mubr.bf16.gmra.mrb[216].mxu0 %v4958_v42  ;;  %6138 = vmatmul.mubr.bf16.gmra.mrb[216].mxu1 %v4958_v42  ;;  %v4733_v63 = vmax.f32 %v13946_v55, 0.0  ;;  %v4735_v49 = vmax.f32 %v14010_v48, 0.0 }
 0x495   : > { %v13949_v2 = vadd.f32 %v4208_v37, %v17933_v13  ;;  %v14013_v8 = vadd.f32 %v4594_v47, %v17936_v34  ;;  %5877 = vmatpush1.bf16.msra.mxu0 %v15975_v39  ;;  %6263 = vmatpush1.bf16.msra.mxu1 %v15996_v58  ;;  %v4734_v60 = vmax.f32 %v13947_v16, 0.0  ;;  %v4736_v51 = vmax.f32 %v14011_v19, 0.0  ;;  %v16004_v39 = vld [vmem:[#allocation7 + $0x3e4] ss:$16 sps:$4 sm:$0xff]   ;;  %v16010_v58 = vld [vmem:[#allocation7 + $0x3ec] ss:$16 sps:$4 sm:$0xff]  }
 0x496   : > { %v4737_v43 = vmax.f32 %v13948_v22, 0.0  ;;  %5878 = vmatprep.subr.bf16.mxu0 %v15986_v7  ;;  %6264 = vmatprep.subr.bf16.mxu1 %v16001_v54  ;;  %v4739_v57 = vmax.f32 %v14012_v12, 0.0  ;;  %v16002_v22 = vld [vmem:[#allocation7 + $0x3e0] ss:$16 sps:$4 sm:$0xff]   ;;  %v16008_v12 = vld [vmem:[#allocation7 + $0x3e8] ss:$16 sps:$4 sm:$0xff]  }
 0x497   : > { %v4738_v52 = vmax.f32 %v13949_v2, 0.0  ;;  %v4740_v50 = vmax.f32 %v14013_v8, 0.0 }
 0x498   : > { %v4962_v14 = vpack.c.bf16 %v4737_v43, %v4733_v63  ;;  %v18030_v27 = vpack.c.bf16 %v4739_v57, %v4735_v49 }
 0x499   : > { %v4212_v38 = vpop.f32.mrb[160].mxu0  ;;  %v4598_v40 = vpop.f32.mrb[160].mxu1  ;;  %v4963_v15 = vpack.c.bf16 %v4738_v52, %v4734_v60  ;;  %5879 = vmatpush1.bf16.msra.mxu0 %v15984_v33  ;;  %6265 = vmatpush1.bf16.msra.mxu1 %v15999_v23  ;;  %v18032_v25 = vpack.c.bf16 %v4740_v50, %v4736_v51 }
 0x49a   : > { %v13950_v42 = vadd.f32 %v4212_v38, %v17927_v18  ;;  %v14014_v28 = vadd.f32 %v4598_v40, %v17930_v30  ;;  %v4214_v24 = vpop.f32.mrb[161].mxu0  ;;  %v4600_v31 = vpop.f32.mrb[161].mxu1  ;;  %5880 = vmatprep.subr.bf16.mxu0 %v15995_v35  ;;  %6266 = vmatprep.subr.bf16.mxu1 %v16007_v3 }
 0x49b   : > { %v13951_v55 = vadd.f32 %v4214_v24, %v17933_v13  ;;  %v14015_v48 = vadd.f32 %v4600_v31, %v17936_v34  ;;  %v4216_v32 = vpop.f32.mrb[162].mxu0  ;;  %v4602_v17 = vpop.f32.mrb[162].mxu1  ;;  %5761 = vmatprep.mubr.bf16.mxu0 %v4963_v15  ;;  %6147 = vmatprep.mubr.bf16.mxu1 %v4963_v15 }
 0x49c   : > { %v13952_v7 = vadd.f32 %v4216_v32, %v17927_v18  ;;  %v14016_v54 = vadd.f32 %v4602_v17, %v17930_v30  ;;  %v4218_v16 = vpop.f32.mrb[163].mxu0  ;;  %v4604_v19 = vpop.f32.mrb[163].mxu1  ;;  %5762 = vmatmul.mubr.bf16.gmra.mrb[220].mxu0 %v4962_v14  ;;  %6148 = vmatmul.mubr.bf16.gmra.mrb[220].mxu1 %v4962_v14  ;;  %v4741_v37 = vmax.f32 %v13950_v42, 0.0  ;;  %v4743_v2 = vmax.f32 %v14014_v28, 0.0 }
 0x49d   : > { %v13953_v53 = vadd.f32 %v4218_v16, %v17933_v13  ;;  %v14017_v45 = vadd.f32 %v4604_v19, %v17936_v34  ;;  %5881 = vmatpush1.bf16.msra.mxu0 %v15993_v29  ;;  %6267 = vmatpush1.bf16.msra.mxu1 %v16005_v44  ;;  %v4742_v33 = vmax.f32 %v13951_v55, 0.0  ;;  %v4744_v23 = vmax.f32 %v14015_v48, 0.0 }
 0x49e   : > { %v4745_v47 = vmax.f32 %v13952_v7, 0.0  ;;  %5882 = vmatprep.subr.bf16.mxu0 %v16004_v39  ;;  %6268 = vmatprep.subr.bf16.mxu1 %v16010_v58  ;;  %v4747_v8 = vmax.f32 %v14016_v54, 0.0 }
 0x49f   : > { %v4746_v35 = vmax.f32 %v13953_v53, 0.0  ;;  %v4748_v63 = vmax.f32 %v14017_v45, 0.0 }
 0x4a0   : > { %v4966_v43 = vpack.c.bf16 %v4745_v47, %v4741_v37  ;;  %v18042_v3 = vpack.c.bf16 %v4747_v8, %v4743_v2 }
 0x4a1   : > { %v4222_v49 = vpop.f32.mrb[164].mxu0  ;;  %v4608_v57 = vpop.f32.mrb[164].mxu1  ;;  %v4967_v60 = vpack.c.bf16 %v4746_v35, %v4742_v33  ;;  %5883 = vmatpush1.bf16.msra.mxu0 %v16002_v22  ;;  %6269 = vmatpush1.bf16.msra.mxu1 %v16008_v12  ;;  %v18044_v52 = vpack.c.bf16 %v4748_v63, %v4744_v23 }
 0x4a2   : > { %v13954_v51 = vadd.f32 %v4222_v49, %v17927_v18  ;;  %v14018_v50 = vadd.f32 %v4608_v57, %v17930_v30  ;;  %v4224_v14 = vpop.f32.mrb[165].mxu0  ;;  %v4610_v38 = vpop.f32.mrb[165].mxu1 }
 0x4a3   : > { %v13955_v40 = vadd.f32 %v4224_v14, %v17933_v13  ;;  %v14019_v15 = vadd.f32 %v4610_v38, %v17936_v34  ;;  %v4226_v29 = vpop.f32.mrb[166].mxu0  ;;  %v4612_v44 = vpop.f32.mrb[166].mxu1  ;;  %5771 = vmatprep.mubr.bf16.mxu0 %v4967_v60  ;;  %6157 = vmatprep.mubr.bf16.mxu1 %v4967_v60 }
 0x4a4   : > { %v13956_v42 = vadd.f32 %v4226_v29, %v17927_v18  ;;  %v14020_v28 = vadd.f32 %v4612_v44, %v17930_v30  ;;  %v4228_v24 = vpop.f32.mrb[167].mxu0  ;;  %v4614_v31 = vpop.f32.mrb[167].mxu1  ;;  %5772 = vmatmul.mubr.bf16.gmra.mrb[224].mxu0 %v4966_v43  ;;  %6158 = vmatmul.mubr.bf16.gmra.mrb[224].mxu1 %v4966_v43  ;;  %v4749_v55 = vmax.f32 %v13954_v51, 0.0  ;;  %v4751_v32 = vmax.f32 %v14018_v50, 0.0 }
 0x4a5   : > { %v13957_v39 = vadd.f32 %v4228_v24, %v17933_v13  ;;  %v14021_v58 = vadd.f32 %v4614_v31, %v17936_v34  ;;  %v4750_v7 = vmax.f32 %v13955_v40, 0.0  ;;  %v4752_v16 = vmax.f32 %v14019_v15, 0.0 }
 0x4a6   : > { %v4753_v48 = vmax.f32 %v13956_v42, 0.0  ;;  %v4755_v17 = vmax.f32 %v14020_v28, 0.0 }
 0x4a7   : > { %v4754_v54 = vmax.f32 %v13957_v39, 0.0  ;;  %v4756_v19 = vmax.f32 %v14021_v58, 0.0 }
 0x4a8   : > { %v4970_v53 = vpack.c.bf16 %v4753_v48, %v4749_v55  ;;  %v18054_v45 = vpack.c.bf16 %v4755_v17, %v4751_v32 }
 0x4a9   : > { %v4232_v22 = vpop.f32.mrb[168].mxu0  ;;  %v4618_v12 = vpop.f32.mrb[168].mxu1  ;;  %v4971_v37 = vpack.c.bf16 %v4754_v54, %v4750_v7  ;;  %v18056_v47 = vpack.c.bf16 %v4756_v19, %v4752_v16 }
 0x4aa   : > { %v13958_v2 = vadd.f32 %v4232_v22, %v17927_v18  ;;  %v14022_v8 = vadd.f32 %v4618_v12, %v17930_v30  ;;  %v4234_v33 = vpop.f32.mrb[169].mxu0  ;;  %v4620_v35 = vpop.f32.mrb[169].mxu1 }
 0x4ab   : > { %v13959_v23 = vadd.f32 %v4234_v33, %v17933_v13  ;;  %v14023_v63 = vadd.f32 %v4620_v35, %v17936_v34  ;;  %v4236_v43 = vpop.f32.mrb[170].mxu0  ;;  %v4622_v49 = vpop.f32.mrb[170].mxu1  ;;  %5781 = vmatprep.mubr.bf16.mxu0 %v4971_v37  ;;  %6167 = vmatprep.mubr.bf16.mxu1 %v4971_v37 }
 0x4ac   : > { %v13960_v57 = vadd.f32 %v4236_v43, %v17927_v18  ;;  %v14024_v60 = vadd.f32 %v4622_v49, %v17930_v30  ;;  %v4238_v51 = vpop.f32.mrb[171].mxu0  ;;  %v4624_v50 = vpop.f32.mrb[171].mxu1  ;;  %5782 = vmatmul.mubr.bf16.gmra.mrb[228].mxu0 %v4970_v53  ;;  %6168 = vmatmul.mubr.bf16.gmra.mrb[228].mxu1 %v4970_v53  ;;  %v4757_v40 = vmax.f32 %v13958_v2, 0.0  ;;  %v4759_v29 = vmax.f32 %v14022_v8, 0.0 }
 0x4ad   : > { %v13961_v14 = vadd.f32 %v4238_v51, %v17933_v13  ;;  %v14025_v38 = vadd.f32 %v4624_v50, %v17936_v34  ;;  %v4758_v42 = vmax.f32 %v13959_v23, 0.0  ;;  %v4760_v24 = vmax.f32 %v14023_v63, 0.0 }
 0x4ae   : > { %v4761_v15 = vmax.f32 %v13960_v57, 0.0  ;;  %v4763_v44 = vmax.f32 %v14024_v60, 0.0 }
 0x4af   : > { %v4762_v28 = vmax.f32 %v13961_v14, 0.0  ;;  %v4764_v31 = vmax.f32 %v14025_v38, 0.0 }
 0x4b0   : > { %v4974_v39 = vpack.c.bf16 %v4761_v15, %v4757_v40  ;;  %v18066_v58 = vpack.c.bf16 %v4763_v44, %v4759_v29 }
 0x4b1   : > { %v4242_v55 = vpop.f32.mrb[172].mxu0  ;;  %v4628_v48 = vpop.f32.mrb[172].mxu1  ;;  %v4975_v32 = vpack.c.bf16 %v4762_v28, %v4758_v42  ;;  %v18068_v17 = vpack.c.bf16 %v4764_v31, %v4760_v24 }
 0x4b2   : > { %v13962_v7 = vadd.f32 %v4242_v55, %v17927_v18  ;;  %v14026_v54 = vadd.f32 %v4628_v48, %v17930_v30  ;;  %v4244_v16 = vpop.f32.mrb[173].mxu0  ;;  %v4630_v19 = vpop.f32.mrb[173].mxu1 }
 0x4b3   : > { %v13963_v53 = vadd.f32 %v4244_v16, %v17933_v13  ;;  %v14027_v22 = vadd.f32 %v4630_v19, %v17936_v34  ;;  %v4246_v12 = vpop.f32.mrb[174].mxu0  ;;  %v4632_v37 = vpop.f32.mrb[174].mxu1  ;;  %5791 = vmatprep.mubr.bf16.mxu0 %v4975_v32  ;;  %6177 = vmatprep.mubr.bf16.mxu1 %v4975_v32 }
 0x4b4   : > { %v13964_v2 = vadd.f32 %v4246_v12, %v17927_v18  ;;  %v14028_v8 = vadd.f32 %v4632_v37, %v17930_v30  ;;  %v4248_v33 = vpop.f32.mrb[175].mxu0  ;;  %v4634_v35 = vpop.f32.mrb[175].mxu1  ;;  %5792 = vmatmul.mubr.bf16.gmra.mrb[232].mxu0 %v4974_v39  ;;  %6178 = vmatmul.mubr.bf16.gmra.mrb[232].mxu1 %v4974_v39  ;;  %v4765_v43 = vmax.f32 %v13962_v7, 0.0  ;;  %v4767_v57 = vmax.f32 %v14026_v54, 0.0 }
 0x4b5   : > { %v13965_v23 = vadd.f32 %v4248_v33, %v17933_v13  ;;  %v14029_v63 = vadd.f32 %v4634_v35, %v17936_v34  ;;  %v4766_v51 = vmax.f32 %v13963_v53, 0.0  ;;  %v4768_v14 = vmax.f32 %v14027_v22, 0.0 }
 0x4b6   : > { %v4769_v49 = vmax.f32 %v13964_v2, 0.0  ;;  %v4771_v60 = vmax.f32 %v14028_v8, 0.0  ;;  %v16013_v2 = vld [vmem:[#allocation8 + $0x4] ss:$16 sps:$4 sm:$0xff]  }
 0x4b7   : > { %v4770_v50 = vmax.f32 %v13965_v23, 0.0  ;;  %v4772_v38 = vmax.f32 %v14029_v63, 0.0  ;;  %7413 = vmatprep.subr.bf16.mxu0 %v16013_v2 }
 0x4b8   : > { %v4978_v40 = vpack.c.bf16 %v4769_v49, %v4765_v43  ;;  %v18078_v15 = vpack.c.bf16 %v4771_v60, %v4767_v57 }
 0x4b9   : > { %v4252_v29 = vpop.f32.mrb[176].mxu0  ;;  %v4638_v44 = vpop.f32.mrb[176].mxu1  ;;  %v4979_v42 = vpack.c.bf16 %v4770_v50, %v4766_v51  ;;  %v18080_v28 = vpack.c.bf16 %v4772_v38, %v4768_v14 }
 0x4ba   : > { %v13966_v24 = vadd.f32 %v4252_v29, %v17927_v18  ;;  %v14030_v31 = vadd.f32 %v4638_v44, %v17930_v30  ;;  %v4254_v39 = vpop.f32.mrb[177].mxu0  ;;  %v4640_v55 = vpop.f32.mrb[177].mxu1 }
 0x4bb   : > { %v13967_v48 = vadd.f32 %v4254_v39, %v17933_v13  ;;  %v14031_v32 = vadd.f32 %v4640_v55, %v17936_v34  ;;  %v4256_v7 = vpop.f32.mrb[178].mxu0  ;;  %v4642_v54 = vpop.f32.mrb[178].mxu1  ;;  %5801 = vmatprep.mubr.bf16.mxu0 %v4979_v42  ;;  %6187 = vmatprep.mubr.bf16.mxu1 %v4979_v42 }
 0x4bc   : > { %v13968_v16 = vadd.f32 %v4256_v7, %v17927_v18  ;;  %v14032_v19 = vadd.f32 %v4642_v54, %v17930_v30  ;;  %v4258_v53 = vpop.f32.mrb[179].mxu0  ;;  %v4644_v22 = vpop.f32.mrb[179].mxu1  ;;  %5802 = vmatmul.mubr.bf16.gmra.mrb[236].mxu0 %v4978_v40  ;;  %6188 = vmatmul.mubr.bf16.gmra.mrb[236].mxu1 %v4978_v40  ;;  %v4773_v8 = vmax.f32 %v13966_v24, 0.0  ;;  %v4775_v35 = vmax.f32 %v14030_v31, 0.0 }
 0x4bd   : > { %v13969_v12 = vadd.f32 %v4258_v53, %v17933_v13  ;;  %v14033_v37 = vadd.f32 %v4644_v22, %v17936_v34  ;;  %v4774_v63 = vmax.f32 %v13967_v48, 0.0  ;;  %v4776_v49 = vmax.f32 %v14031_v32, 0.0 }
 0x4be   : > { %v4777_v33 = vmax.f32 %v13968_v16, 0.0  ;;  %v4779_v23 = vmax.f32 %v14032_v19, 0.0 }
 0x4bf   : > { %v4778_v43 = vmax.f32 %v13969_v12, 0.0  ;;  %v4780_v57 = vmax.f32 %v14033_v37, 0.0 }
 0x4c0   : > { %v4982_v60 = vpack.c.bf16 %v4777_v33, %v4773_v8  ;;  %v18090_v51 = vpack.c.bf16 %v4779_v23, %v4775_v35 }
 0x4c1   : > { %v4262_v50 = vpop.f32.mrb[180].mxu0  ;;  %v4648_v14 = vpop.f32.mrb[180].mxu1  ;;  %v4983_v38 = vpack.c.bf16 %v4778_v43, %v4774_v63  ;;  %v18092_v40 = vpack.c.bf16 %v4780_v57, %v4776_v49 }
 0x4c2   : > { %v13970_v29 = vadd.f32 %v4262_v50, %v17927_v18  ;;  %v14034_v44 = vadd.f32 %v4648_v14, %v17930_v30  ;;  %v4264_v42 = vpop.f32.mrb[181].mxu0  ;;  %v4650_v24 = vpop.f32.mrb[181].mxu1 }
 0x4c3   : > { %v13971_v31 = vadd.f32 %v4264_v42, %v17933_v13  ;;  %v14035_v39 = vadd.f32 %v4650_v24, %v17936_v34  ;;  %v4266_v55 = vpop.f32.mrb[182].mxu0  ;;  %v4652_v48 = vpop.f32.mrb[182].mxu1  ;;  %5811 = vmatprep.mubr.bf16.mxu0 %v4983_v38  ;;  %6197 = vmatprep.mubr.bf16.mxu1 %v4983_v38 }
 0x4c4   : > { %v13972_v32 = vadd.f32 %v4266_v55, %v17927_v18  ;;  %v14036_v7 = vadd.f32 %v4652_v48, %v17930_v30  ;;  %v4268_v54 = vpop.f32.mrb[183].mxu0  ;;  %v4654_v16 = vpop.f32.mrb[183].mxu1  ;;  %5812 = vmatmul.mubr.bf16.gmra.mrb[240].mxu0 %v4982_v60  ;;  %6198 = vmatmul.mubr.bf16.gmra.mrb[240].mxu1 %v4982_v60  ;;  %v4781_v22 = vmax.f32 %v13970_v29, 0.0  ;;  %v4783_v37 = vmax.f32 %v14034_v44, 0.0 }
 0x4c5   : > { %v13973_v19 = vadd.f32 %v4268_v54, %v17933_v13  ;;  %v14037_v53 = vadd.f32 %v4654_v16, %v17936_v34  ;;  %v4782_v8 = vmax.f32 %v13971_v31, 0.0  ;;  %v4784_v35 = vmax.f32 %v14035_v39, 0.0 }
 0x4c6   : > { %v4785_v12 = vmax.f32 %v13972_v32, 0.0  ;;  %v4787_v2 = vmax.f32 %v14036_v7, 0.0 }
 0x4c7   : > { %v4786_v33 = vmax.f32 %v13973_v19, 0.0  ;;  %v4788_v23 = vmax.f32 %v14037_v53, 0.0 }
 0x4c8   : > { %v4986_v63 = vpack.c.bf16 %v4785_v12, %v4781_v22  ;;  %v18102_v43 = vpack.c.bf16 %v4787_v2, %v4783_v37 }
 0x4c9   : > { %v4272_v49 = vpop.f32.mrb[184].mxu0  ;;  %v4658_v57 = vpop.f32.mrb[184].mxu1  ;;  %v4987_v50 = vpack.c.bf16 %v4786_v33, %v4782_v8  ;;  %v18104_v14 = vpack.c.bf16 %v4788_v23, %v4784_v35 }
 0x4ca   : > { %v13974_v60 = vadd.f32 %v4272_v49, %v17927_v18  ;;  %v14038_v38 = vadd.f32 %v4658_v57, %v17930_v30  ;;  %v4274_v29 = vpop.f32.mrb[185].mxu0  ;;  %v4660_v42 = vpop.f32.mrb[185].mxu1 }
 0x4cb   : > { %v13975_v44 = vadd.f32 %v4274_v29, %v17933_v13  ;;  %v14039_v24 = vadd.f32 %v4660_v42, %v17936_v34  ;;  %v4276_v31 = vpop.f32.mrb[186].mxu0  ;;  %v4662_v39 = vpop.f32.mrb[186].mxu1  ;;  %5821 = vmatprep.mubr.bf16.mxu0 %v4987_v50  ;;  %6207 = vmatprep.mubr.bf16.mxu1 %v4987_v50 }
 0x4cc   : > { %v13976_v55 = vadd.f32 %v4276_v31, %v17927_v18  ;;  %v14040_v48 = vadd.f32 %v4662_v39, %v17930_v30  ;;  %v4278_v32 = vpop.f32.mrb[187].mxu0  ;;  %v4664_v7 = vpop.f32.mrb[187].mxu1  ;;  %5822 = vmatmul.mubr.bf16.gmra.mrb[244].mxu0 %v4986_v63  ;;  %6208 = vmatmul.mubr.bf16.gmra.mrb[244].mxu1 %v4986_v63  ;;  %v4789_v19 = vmax.f32 %v13974_v60, 0.0  ;;  %v4791_v22 = vmax.f32 %v14038_v38, 0.0 }
 0x4cd   : > { %v13977_v54 = vadd.f32 %v4278_v32, %v17933_v13  ;;  %v14041_v16 = vadd.f32 %v4664_v7, %v17936_v34  ;;  %v4790_v37 = vmax.f32 %v13975_v44, 0.0  ;;  %v4792_v8 = vmax.f32 %v14039_v24, 0.0 }
 0x4ce   : > { %v4793_v53 = vmax.f32 %v13976_v55, 0.0  ;;  %v4795_v12 = vmax.f32 %v14040_v48, 0.0 }
 0x4cf   : > { %v4794_v2 = vmax.f32 %v13977_v54, 0.0  ;;  %v4796_v33 = vmax.f32 %v14041_v16, 0.0 }
 0x4d0   : > { %v4990_v35 = vpack.c.bf16 %v4793_v53, %v4789_v19  ;;  %v18114_v23 = vpack.c.bf16 %v4795_v12, %v4791_v22 }
 0x4d1   : > { %v4282_v49 = vpop.f32.mrb[188].mxu0  ;;  %v4668_v57 = vpop.f32.mrb[188].mxu1  ;;  %v4991_v50 = vpack.c.bf16 %v4794_v2, %v4790_v37  ;;  %v18116_v29 = vpack.c.bf16 %v4796_v33, %v4792_v8 }
 0x4d2   : > { %v13978_v63 = vadd.f32 %v4282_v49, %v17927_v18  ;;  %v14042_v42 = vadd.f32 %v4668_v57, %v17930_v30  ;;  %v4284_v60 = vpop.f32.mrb[189].mxu0  ;;  %v4670_v31 = vpop.f32.mrb[189].mxu1 }
 0x4d3   : > { %v13979_v38 = vadd.f32 %v4284_v60, %v17933_v13  ;;  %v14043_v44 = vadd.f32 %v4670_v31, %v17936_v34  ;;  %v4286_v24 = vpop.f32.mrb[190].mxu0  ;;  %v4672_v39 = vpop.f32.mrb[190].mxu1  ;;  %5831 = vmatprep.mubr.bf16.mxu0 %v4991_v50  ;;  %6217 = vmatprep.mubr.bf16.mxu1 %v4991_v50  ;;  %v16016_v50 = vld [vmem:[#allocation8 + $0x24] ss:$16 sps:$4 sm:$0xff]   ;;  %v16041_v60 = vld [vmem:[#allocation8 + $0x28] ss:$16 sps:$4 sm:$0xff]  }
 0x4d4   : > { %v13980_v55 = vadd.f32 %v4286_v24, %v17927_v18  ;;  %v14044_v48 = vadd.f32 %v4672_v39, %v17930_v30  ;;  %v4288_v32 = vpop.f32.mrb[191].mxu0  ;;  %v4674_v7 = vpop.f32.mrb[191].mxu1  ;;  %5832 = vmatmul.mubr.bf16.gmra.mrb[248].mxu0 %v4990_v35  ;;  %6218 = vmatmul.mubr.bf16.gmra.mrb[248].mxu1 %v4990_v35  ;;  %v4797_v19 = vmax.f32 %v13978_v63, 0.0  ;;  %v4799_v22 = vmax.f32 %v14042_v42, 0.0  ;;  %v16038_v35 = vld [vmem:[#allocation8 + $0x8] ss:$16 sps:$4 sm:$0xff]  }
 0x4d5   : > { %v13981_v54 = vadd.f32 %v4288_v32, %v17933_v13  ;;  %v14045_v16 = vadd.f32 %v4674_v7, %v17936_v34  ;;  %v4798_v37 = vmax.f32 %v13979_v38, 0.0  ;;  %v4800_v8 = vmax.f32 %v14043_v44, 0.0  ;;  %v16040_v13 = vld [vmem:[#allocation8 + $0xc] ss:$16 sps:$4 sm:$0xff]   ;;  %v16011_v34 = vld [vmem:[#allocation8] ss:$16 sps:$4 sm:$0xff]  }
 0x4d6   : > { %v4801_v53 = vmax.f32 %v13980_v55, 0.0  ;;  %v4803_v12 = vmax.f32 %v14044_v48, 0.0  ;;  %7799 = vmatprep.subr.bf16.mxu1 %v16040_v13  ;;  %v16043_v63 = vld [vmem:[#allocation8 + $0x2c] ss:$16 sps:$4 sm:$0xff]   ;;  %v16014_v42 = vld [vmem:[#allocation8 + $0x20] ss:$16 sps:$4 sm:$0xff]  }
 0x4d7   : > { %v4802_v2 = vmax.f32 %v13981_v54, 0.0  ;;  %v4804_v33 = vmax.f32 %v14045_v16, 0.0  ;;  %v16049_v31 = vld [vmem:[#allocation8 + $0x4c] ss:$16 sps:$4 sm:$0xff]   ;;  %v16017_v38 = vld [vmem:[#allocation8 + $0x40] ss:$16 sps:$4 sm:$0xff]  }
 0x4d8   : > { %v4994_v49 = vpack.c.bf16 %v4801_v53, %v4797_v19  ;;  %v18126_v18 = vpack.c.bf16 %v4803_v12, %v4799_v22  ;;  %v16047_v44 = vld [vmem:[#allocation8 + $0x48] ss:$16 sps:$4 sm:$0xff]   ;;  %v16022_v24 = vld [vmem:[#allocation8 + $0x64] ss:$16 sps:$4 sm:$0xff]   ;;  %v16058_v48 = vld [vmem:[#allocation8 + $0x8c] ss:$16 sps:$4 sm:$0xff]  }
 0x4d9   : > { %v4995_v30 = vpack.c.bf16 %v4802_v2, %v4798_v37  ;;  %v18128_v57 = vpack.c.bf16 %v4804_v33, %v4800_v8  ;;  %v16050_v39 = vld [vmem:[#allocation8 + $0x68] ss:$16 sps:$4 sm:$0xff]   ;;  %v16025_v55 = vld [vmem:[#allocation8 + $0x84] ss:$16 sps:$4 sm:$0xff]   ;;  %v16023_v32 = vld [vmem:[#allocation8 + $0x80] ss:$16 sps:$4 sm:$0xff]  }
 0x4da   : > { %v16056_v7 = vld [vmem:[#allocation8 + $0x88] ss:$16 sps:$4 sm:$0xff]   ;;  %v16028_v54 = vld [vmem:[#allocation8 + $0xa4] ss:$16 sps:$4 sm:$0xff]   ;;  %v16067_v53 = vld [vmem:[#allocation8 + $0xcc] ss:$16 sps:$4 sm:$0xff]  }
 0x4db   : > { %5841 = vmatprep.mubr.bf16.mxu0 %v4995_v30  ;;  %6227 = vmatprep.mubr.bf16.mxu1 %v4995_v30  ;;  %v16059_v16 = vld [vmem:[#allocation8 + $0xa8] ss:$16 sps:$4 sm:$0xff]   ;;  %v16031_v19 = vld [vmem:[#allocation8 + $0xc4] ss:$16 sps:$4 sm:$0xff]   ;;  %v16029_v22 = vld [vmem:[#allocation8 + $0xc0] ss:$16 sps:$4 sm:$0xff]  }
 0x4dc   : > { %5842 = vmatmul.mubr.bf16.gmra.mrb[252].mxu0 %v4994_v49  ;;  %6228 = vmatmul.mubr.bf16.gmra.mrb[252].mxu1 %v4994_v49  ;;  %v16065_v12 = vld [vmem:[#allocation8 + $0xc8] ss:$16 sps:$4 sm:$0xff]   ;;  %v16034_v37 = vld [vmem:[#allocation8 + $0xe4] ss:$16 sps:$4 sm:$0xff]   ;;  %v16076_v33 = vld [vmem:[#allocation8 + $0x10c] ss:$16 sps:$4 sm:$0xff]  }
 0x4dd   : > { %5884 = vmatprep.mubr.bf16.mxu0 %v17948_v4  ;;  %6270 = vmatprep.mubr.bf16.mxu1 %v17948_v4  ;;  %v16019_v4 = vld [vmem:[#allocation8 + $0x44] ss:$16 sps:$4 sm:$0xff]   ;;  %v16068_v2 = vld [vmem:[#allocation8 + $0xe8] ss:$16 sps:$4 sm:$0xff]   ;;  %v16035_v49 = vld [vmem:[#allocation8 + $0x100] ss:$16 sps:$4 sm:$0xff]  }
 0x4de   : > { %v16037_v8 = vld [vmem:[#allocation8 + $0x104] ss:$16 sps:$4 sm:$0xff]   ;;  %v16074_v30 = vld [vmem:[#allocation8 + $0x108] ss:$16 sps:$4 sm:$0xff]  }
 0x4df   : > { %v16046_v13 = vld [vmem:[#allocation8 + $0x124] ss:$16 sps:$4 sm:$0xff]  }
 0x4e4   : > { %5885 = vmatmul.mubr.bf16.vlgmr.msra.gmra.mrb[192].mxu0 %v17946_v46  ;;  %6271 = vmatmul.mubr.bf16.vlgmr.msra.gmra.mrb[192].mxu1 %v17946_v46  ;;  %v16052_v46 = vld [vmem:[#allocation8 + $0x6c] ss:$16 sps:$4 sm:$0xff]  }
 0x4e5   : > { %5894 = vmatprep.mubr.bf16.mxu0 %v17960_v0  ;;  %6280 = vmatprep.mubr.bf16.mxu1 %v17960_v0  ;;  %v16020_v0 = vld [vmem:[#allocation8 + $0x60] ss:$16 sps:$4 sm:$0xff]  }
 0x4e6   : > { %7414 = vmatpush1.bf16.msra.mxu0 %v16011_v34  ;;  %7800 = vmatpush1.bf16.msra.mxu1 %v16038_v35  ;;  %v16077_v34 = vld [vmem:[#allocation8 + $0x128] ss:$16 sps:$4 sm:$0xff]   ;;  %v16055_v35 = vld [vmem:[#allocation8 + $0x144] ss:$16 sps:$4 sm:$0xff]  }
 0x4e7   : > { %7415 = vmatprep.subr.bf16.mxu0 %v16016_v50  ;;  %7801 = vmatprep.subr.bf16.mxu1 %v16043_v63  ;;  %v16085_v50 = vld [vmem:[#allocation8 + $0x14c] ss:$16 sps:$4 sm:$0xff]   ;;  %v16053_v63 = vld [vmem:[#allocation8 + $0x140] ss:$16 sps:$4 sm:$0xff]  }
 0x4ea   : > { %7416 = vmatpush1.bf16.msra.mxu0 %v16014_v42  ;;  %7802 = vmatpush1.bf16.msra.mxu1 %v16041_v60  ;;  %v16083_v42 = vld [vmem:[#allocation8 + $0x148] ss:$16 sps:$4 sm:$0xff]   ;;  %v16064_v60 = vld [vmem:[#allocation8 + $0x164] ss:$16 sps:$4 sm:$0xff]  }
 0x4eb   : > { %7417 = vmatprep.subr.bf16.mxu0 %v16019_v4  ;;  %7803 = vmatprep.subr.bf16.mxu1 %v16049_v31  ;;  %v16086_v4 = vld [vmem:[#allocation8 + $0x168] ss:$16 sps:$4 sm:$0xff]   ;;  %v16073_v31 = vld [vmem:[#allocation8 + $0x184] ss:$16 sps:$4 sm:$0xff]  }
 0x4ec   : > { %5895 = vmatmul.mubr.bf16.gmra.mrb[196].mxu0 %v17958_v61  ;;  %6281 = vmatmul.mubr.bf16.gmra.mrb[196].mxu1 %v17958_v61  ;;  %v16061_v61 = vld [vmem:[#allocation8 + $0xac] ss:$16 sps:$4 sm:$0xff]  }
 0x4ed   : > { %5904 = vmatprep.mubr.bf16.mxu0 %v17972_v26  ;;  %6290 = vmatprep.mubr.bf16.mxu1 %v17972_v26  ;;  %v16026_v26 = vld [vmem:[#allocation8 + $0xa0] ss:$16 sps:$4 sm:$0xff]  }
 0x4ee   : > { %7418 = vmatpush1.bf16.msra.mxu0 %v16017_v38  ;;  %7804 = vmatpush1.bf16.msra.mxu1 %v16047_v44  ;;  %v16094_v38 = vld [vmem:[#allocation8 + $0x18c] ss:$16 sps:$4 sm:$0xff]   ;;  %v16071_v44 = vld [vmem:[#allocation8 + $0x180] ss:$16 sps:$4 sm:$0xff]  }
 0x4ef   : > { %7419 = vmatprep.subr.bf16.mxu0 %v16022_v24  ;;  %7805 = vmatprep.subr.bf16.mxu1 %v16052_v46  ;;  %v16092_v24 = vld [vmem:[#allocation8 + $0x188] ss:$16 sps:$4 sm:$0xff]   ;;  %v16082_v46 = vld [vmem:[#allocation8 + $0x1a4] ss:$16 sps:$4 sm:$0xff]  }
 0x4f2   : > { %7420 = vmatpush1.bf16.msra.mxu0 %v16020_v0  ;;  %7806 = vmatpush1.bf16.msra.mxu1 %v16050_v39  ;;  %v16095_v0 = vld [vmem:[#allocation8 + $0x1a8] ss:$16 sps:$4 sm:$0xff]   ;;  %v16091_v39 = vld [vmem:[#allocation8 + $0x1c4] ss:$16 sps:$4 sm:$0xff]  }
 0x4f3   : > { %7421 = vmatprep.subr.bf16.mxu0 %v16025_v55  ;;  %7807 = vmatprep.subr.bf16.mxu1 %v16058_v48  ;;  %v16089_v55 = vld [vmem:[#allocation8 + $0x1c0] ss:$16 sps:$4 sm:$0xff]  }
 0x4f4   : > { %5905 = vmatmul.mubr.bf16.gmra.mrb[200].mxu0 %v17970_v56  ;;  %6291 = vmatmul.mubr.bf16.gmra.mrb[200].mxu1 %v17970_v56  ;;  %v16070_v56 = vld [vmem:[#allocation8 + $0xec] ss:$16 sps:$4 sm:$0xff]  }
 0x4f5   : > { %5914 = vmatprep.mubr.bf16.mxu0 %v17984_v5  ;;  %6300 = vmatprep.mubr.bf16.mxu1 %v17984_v5  ;;  %v16032_v5 = vld [vmem:[#allocation8 + $0xe0] ss:$16 sps:$4 sm:$0xff]  }
 0x4f6   : > { %7422 = vmatpush1.bf16.msra.mxu0 %v16023_v32  ;;  %7808 = vmatpush1.bf16.msra.mxu1 %v16056_v7 }
 0x4f7   : > { %7423 = vmatprep.subr.bf16.mxu0 %v16028_v54  ;;  %7809 = vmatprep.subr.bf16.mxu1 %v16061_v61 }
 0x4fa   : > { %7424 = vmatpush1.bf16.msra.mxu0 %v16026_v26  ;;  %7810 = vmatpush1.bf16.msra.mxu1 %v16059_v16 }
 0x4fb   : > { %7425 = vmatprep.subr.bf16.mxu0 %v16031_v19  ;;  %7811 = vmatprep.subr.bf16.mxu1 %v16067_v53 }
 0x4fc   : > { %5915 = vmatmul.mubr.bf16.gmra.mrb[204].mxu0 %v17982_v59  ;;  %6301 = vmatmul.mubr.bf16.gmra.mrb[204].mxu1 %v17982_v59  ;;  %v16079_v59 = vld [vmem:[#allocation8 + $0x12c] ss:$16 sps:$4 sm:$0xff]  }
 0x4fd   : > { %5924 = vmatprep.mubr.bf16.mxu0 %v17996_v36  ;;  %6310 = vmatprep.mubr.bf16.mxu1 %v17996_v36  ;;  %v16044_v36 = vld [vmem:[#allocation8 + $0x120] ss:$16 sps:$4 sm:$0xff]  }
 0x4fe   : > { %7426 = vmatpush1.bf16.msra.mxu0 %v16029_v22  ;;  %7812 = vmatpush1.bf16.msra.mxu1 %v16065_v12 }
 0x4ff   : > { %7427 = vmatprep.subr.bf16.mxu0 %v16034_v37  ;;  %7813 = vmatprep.subr.bf16.mxu1 %v16070_v56 }
 0x502   : > { %7428 = vmatpush1.bf16.msra.mxu0 %v16032_v5  ;;  %7814 = vmatpush1.bf16.msra.mxu1 %v16068_v2 }
 0x503   : > { %7429 = vmatprep.subr.bf16.mxu0 %v16037_v8  ;;  %7815 = vmatprep.subr.bf16.mxu1 %v16076_v33 }
 0x504   : > { %5925 = vmatmul.mubr.bf16.gmra.mrb[208].mxu0 %v17994_v10  ;;  %6311 = vmatmul.mubr.bf16.gmra.mrb[208].mxu1 %v17994_v10  ;;  %v16088_v10 = vld [vmem:[#allocation8 + $0x16c] ss:$16 sps:$4 sm:$0xff]  }
 0x505   : > { %5934 = vmatprep.mubr.bf16.mxu0 %v18008_v21  ;;  %6320 = vmatprep.mubr.bf16.mxu1 %v18008_v21  ;;  %v16062_v21 = vld [vmem:[#allocation8 + $0x160] ss:$16 sps:$4 sm:$0xff]  }
 0x506   : > { %7430 = vmatpush1.bf16.msra.mxu0 %v16035_v49  ;;  %7816 = vmatpush1.bf16.msra.mxu1 %v16074_v30 }
 0x507   : > { %7431 = vmatprep.subr.bf16.mxu0 %v16046_v13  ;;  %7817 = vmatprep.subr.bf16.mxu1 %v16079_v59 }
 0x50a   : > { %7432 = vmatpush1.bf16.msra.mxu0 %v16044_v36  ;;  %7818 = vmatpush1.bf16.msra.mxu1 %v16077_v34 }
 0x50b   : > { %7433 = vmatprep.subr.bf16.mxu0 %v16055_v35  ;;  %7819 = vmatprep.subr.bf16.mxu1 %v16085_v50  ;;  %v16107_v35 = vld [vmem:[#allocation8 + $0x200] ss:$16 sps:$4 sm:$0xff]   ;;  %v16134_v50 = vld [vmem:[#allocation8 + $0x208] ss:$16 sps:$4 sm:$0xff]  }
 0x50c   : > { %5935 = vmatmul.mubr.bf16.gmra.mrb[212].mxu0 %v18006_v41  ;;  %6321 = vmatmul.mubr.bf16.gmra.mrb[212].mxu1 %v18006_v41  ;;  %v16097_v41 = vld [vmem:[#allocation8 + $0x1ac] ss:$16 sps:$4 sm:$0xff]  }
 0x50d   : > { %5944 = vmatprep.mubr.bf16.mxu0 %v18020_v20  ;;  %6330 = vmatprep.mubr.bf16.mxu1 %v18020_v20  ;;  %v16080_v20 = vld [vmem:[#allocation8 + $0x1a0] ss:$16 sps:$4 sm:$0xff]  }
 0x50e   : > { %7434 = vmatpush1.bf16.msra.mxu0 %v16053_v63  ;;  %7820 = vmatpush1.bf16.msra.mxu1 %v16083_v42 }
 0x50f   : > { %7435 = vmatprep.subr.bf16.mxu0 %v16064_v60  ;;  %7821 = vmatprep.subr.bf16.mxu1 %v16088_v10 }
 0x512   : > { %7436 = vmatpush1.bf16.msra.mxu0 %v16062_v21  ;;  %7822 = vmatpush1.bf16.msra.mxu1 %v16086_v4  ;;  %v16112_v4 = vld [vmem:[#allocation8 + $0x224] ss:$16 sps:$4 sm:$0xff]  }
 0x513   : > { %7437 = vmatprep.subr.bf16.mxu0 %v16073_v31  ;;  %7823 = vmatprep.subr.bf16.mxu1 %v16094_v38  ;;  %v16139_v31 = vld [vmem:[#allocation8 + $0x22c] ss:$16 sps:$4 sm:$0xff]  }
 0x514   : > { %5945 = vmatmul.mubr.bf16.gmra.mrb[216].mxu0 %v18018_v11  ;;  %6331 = vmatmul.mubr.bf16.gmra.mrb[216].mxu1 %v18018_v11  ;;  %v16103_v11 = vld [vmem:[#allocation8 + $0x1cc] ss:$16 sps:$4 sm:$0xff]  }
 0x515   : > { %5954 = vmatprep.mubr.bf16.mxu0 %v18032_v25  ;;  %6340 = vmatprep.mubr.bf16.mxu1 %v18032_v25  ;;  %v16100_v25 = vld [vmem:[#allocation8 + $0x1e4] ss:$16 sps:$4 sm:$0xff]  }
 0x516   : > { %7438 = vmatpush1.bf16.msra.mxu0 %v16071_v44  ;;  %7824 = vmatpush1.bf16.msra.mxu1 %v16092_v24 }
 0x517   : > { %7439 = vmatprep.subr.bf16.mxu0 %v16082_v46  ;;  %7825 = vmatprep.subr.bf16.mxu1 %v16097_v41 }
 0x51a   : > { %7440 = vmatpush1.bf16.msra.mxu0 %v16080_v20  ;;  %7826 = vmatpush1.bf16.msra.mxu1 %v16095_v0 }
 0x51b   : > { %7441 = vmatprep.subr.bf16.mxu0 %v16091_v39  ;;  %7827 = vmatprep.subr.bf16.mxu1 %v16103_v11 }
 0x51c   : > { %5955 = vmatmul.mubr.bf16.gmra.mrb[220].mxu0 %v18030_v27  ;;  %6341 = vmatmul.mubr.bf16.gmra.mrb[220].mxu1 %v18030_v27  ;;  %v16101_v27 = vld [vmem:[#allocation8 + $0x1c8] ss:$16 sps:$4 sm:$0xff]  }
 0x51d   : > { %5964 = vmatprep.mubr.bf16.mxu0 %v18044_v52  ;;  %6350 = vmatprep.mubr.bf16.mxu1 %v18044_v52  ;;  %v16098_v52 = vld [vmem:[#allocation8 + $0x1e0] ss:$16 sps:$4 sm:$0xff]  }
 0x51e   : > { %7442 = vmatpush1.bf16.msra.mxu0 %v16089_v55  ;;  %7828 = vmatpush1.bf16.msra.mxu1 %v16101_v27  ;;  %v16110_v27 = vld [vmem:[#allocation8 + $0x220] ss:$16 sps:$4 sm:$0xff]  }
 0x51f   : > { %7443 = vmatprep.subr.bf16.mxu0 %v16100_v25  ;;  %v16115_v25 = vld [vmem:[#allocation8 + $0x244] ss:$16 sps:$4 sm:$0xff]  }
 0x522   : > { %7444 = vmatpush1.bf16.msra.mxu0 %v16098_v52 }
 0x524   : > { %5965 = vmatmul.mubr.bf16.gmra.mrb[224].mxu0 %v18042_v3  ;;  %6351 = vmatmul.mubr.bf16.gmra.mrb[224].mxu1 %v18042_v3  ;;  %v16106_v3 = vld [vmem:[#allocation8 + $0x1ec] ss:$16 sps:$4 sm:$0xff]  }
 0x525   : > { %5974 = vmatprep.mubr.bf16.mxu0 %v18056_v47  ;;  %6360 = vmatprep.mubr.bf16.mxu1 %v18056_v47  ;;  %v16109_v47 = vld [vmem:[#allocation8 + $0x204] ss:$16 sps:$4 sm:$0xff]  }
 0x526   : > { %7829 = vmatprep.subr.bf16.mxu1 %v16106_v3  ;;  %7606 = vmatprep.subr.bf16.mxu0 %v16109_v47  ;;  %v16137_v3 = vld [vmem:[#allocation8 + $0x228] ss:$16 sps:$4 sm:$0xff]  }
 0x52c   : > { %5975 = vmatmul.mubr.bf16.gmra.mrb[228].mxu0 %v18054_v45  ;;  %6361 = vmatmul.mubr.bf16.gmra.mrb[228].mxu1 %v18054_v45  ;;  %v16104_v45 = vld [vmem:[#allocation8 + $0x1e8] ss:$16 sps:$4 sm:$0xff]  }
 0x52d   : > { %5984 = vmatprep.mubr.bf16.mxu0 %v18068_v17  ;;  %6370 = vmatprep.mubr.bf16.mxu1 %v18068_v17  ;;  %v4933_v17 = vld [vmem:[%s19380_s8] sm:$0xf] }
 0x52e   : > { %7830 = vmatpush1.bf16.msra.mxu1 %v16104_v45 }
 0x534   : > { %5985 = vmatmul.mubr.bf16.gmra.mrb[232].mxu0 %v18066_v58  ;;  %6371 = vmatmul.mubr.bf16.gmra.mrb[232].mxu1 %v18066_v58  ;;  %v16136_v58 = vld [vmem:[#allocation8 + $0x20c] ss:$16 sps:$4 sm:$0xff]  }
 0x535   : > { %5994 = vmatprep.mubr.bf16.mxu0 %v18080_v28  ;;  %6380 = vmatprep.mubr.bf16.mxu1 %v18080_v28  ;;  %v18201_v28 = vrot.slane %v4933_v17, %v17387_v6 }
 0x536   : > { %7992 = vmatprep.subr.bf16.mxu1 %v16136_v58 }
 0x53c   : > { %5995 = vmatmul.mubr.bf16.gmra.mrb[236].mxu0 %v18078_v15  ;;  %6381 = vmatmul.mubr.bf16.gmra.mrb[236].mxu1 %v18078_v15  ;;  %v18198_v15 = vrot.slane %v4933_v17, %v17373_v62 }
 0x53d   : > { %6004 = vmatprep.mubr.bf16.mxu0 %v18092_v40  ;;  %6390 = vmatprep.mubr.bf16.mxu1 %v18092_v40  ;;  %v18207_v40 = vrot.slane %v4933_v17, %v17390_v9 }
 0x544   : > { %6005 = vmatmul.mubr.bf16.gmra.mrb[240].mxu0 %v18090_v51  ;;  %6391 = vmatmul.mubr.bf16.gmra.mrb[240].mxu1 %v18090_v51  ;;  %v18204_v51 = vrot.slane %v4933_v17, %v17378_v1  ;;  %v16145_v17 = vld [vmem:[#allocation8 + $0x24c] ss:$16 sps:$4 sm:$0xff]  }
 0x545   : > { %6014 = vmatprep.mubr.bf16.mxu0 %v18104_v14  ;;  %6400 = vmatprep.mubr.bf16.mxu1 %v18104_v14 }
 0x54c   : > { %6015 = vmatmul.mubr.bf16.gmra.mrb[244].mxu0 %v18102_v43  ;;  %6401 = vmatmul.mubr.bf16.gmra.mrb[244].mxu1 %v18102_v43 }
 0x54d   : > { %6024 = vmatprep.mubr.bf16.mxu0 %v18116_v29  ;;  %6410 = vmatprep.mubr.bf16.mxu1 %v18116_v29 }
 0x554   : > { %6025 = vmatmul.mubr.bf16.gmra.mrb[248].mxu0 %v18114_v23  ;;  %6411 = vmatmul.mubr.bf16.gmra.mrb[248].mxu1 %v18114_v23 }
 0x555   : > { %6034 = vmatprep.mubr.bf16.mxu0 %v18128_v57  ;;  %6420 = vmatprep.mubr.bf16.mxu1 %v18128_v57 }
 0x55c   : > { %6035 = vmatmul.mubr.bf16.gmra.mrb[252].mxu0 %v18126_v18  ;;  %6421 = vmatmul.mubr.bf16.gmra.mrb[252].mxu1 %v18126_v18 }
 0x5b7   : > { %v5886_v43 = vpop.f32.mrb[192].mxu0  ;;  %v6272_v14 = vpop.f32.mrb[192].mxu1 }
 0x5b8   : > { %v14046_v23 = vadd.f32 %v5886_v43, %v18198_v15  ;;  %v14110_v29 = vadd.f32 %v6272_v14, %v18201_v28  ;;  %v5888_v18 = vpop.f32.mrb[193].mxu0  ;;  %v6274_v57 = vpop.f32.mrb[193].mxu1 }
 0x5b9   : > { %v14047_v48 = vadd.f32 %v5888_v18, %v18204_v51  ;;  %v14111_v32 = vadd.f32 %v6274_v57, %v18207_v40  ;;  %v5890_v7 = vpop.f32.mrb[194].mxu0  ;;  %v6276_v54 = vpop.f32.mrb[194].mxu1 }
 0x5ba   : > { %v14048_v61 = vadd.f32 %v5890_v7, %v18198_v15  ;;  %v14112_v26 = vadd.f32 %v6276_v54, %v18201_v28  ;;  %v5892_v16 = vpop.f32.mrb[195].mxu0  ;;  %v6278_v19 = vpop.f32.mrb[195].mxu1  ;;  %v6431_v12 = vmax.f32 %v14046_v23, 0.0  ;;  %v6433_v37 = vmax.f32 %v14110_v29, 0.0  ;;  %v16113_v54 = vld [vmem:[#allocation8 + $0x240] ss:$16 sps:$4 sm:$0xff]  }
 0x5bb   : > { %v14049_v53 = vadd.f32 %v5892_v16, %v18204_v51  ;;  %v14113_v22 = vadd.f32 %v6278_v19, %v18207_v40  ;;  %v6432_v2 = vmax.f32 %v14047_v48, 0.0  ;;  %v6434_v8 = vmax.f32 %v14111_v32, 0.0 }
 0x5bc   : > { %v6435_v56 = vmax.f32 %v14048_v61, 0.0  ;;  %v6437_v5 = vmax.f32 %v14112_v26, 0.0  ;;  %v16143_v61 = vld [vmem:[#allocation8 + $0x248] ss:$16 sps:$4 sm:$0xff]  }
 0x5bd   : > { %v6436_v33 = vmax.f32 %v14049_v53, 0.0  ;;  %v6438_v49 = vmax.f32 %v14113_v22, 0.0 }
 0x5be   : > { %v6688_v30 = vpack.c.bf16 %v6435_v56, %v6431_v12  ;;  %v18217_v13 = vpack.c.bf16 %v6437_v5, %v6433_v37  ;;  %v16118_v12 = vld [vmem:[#allocation8 + $0x264] ss:$16 sps:$4 sm:$0xff]   ;;  %v16148_v37 = vld [vmem:[#allocation8 + $0x26c] ss:$16 sps:$4 sm:$0xff]  }
 0x5bf   : > { %v5896_v59 = vpop.f32.mrb[196].mxu0  ;;  %v6282_v36 = vpop.f32.mrb[196].mxu1  ;;  %v6689_v34 = vpack.c.bf16 %v6436_v33, %v6432_v2  ;;  %v18219_v63 = vpack.c.bf16 %v6438_v49, %v6434_v8 }
 0x5c0   : > { %v14050_v42 = vadd.f32 %v5896_v59, %v18198_v15  ;;  %v14114_v60 = vadd.f32 %v6282_v36, %v18201_v28  ;;  %v5898_v10 = vpop.f32.mrb[197].mxu0  ;;  %v6284_v21 = vpop.f32.mrb[197].mxu1 }
 0x5c1   : > { %v14051_v38 = vadd.f32 %v5898_v10, %v18204_v51  ;;  %v14115_v44 = vadd.f32 %v6284_v21, %v18207_v40  ;;  %v5900_v24 = vpop.f32.mrb[198].mxu0  ;;  %v6286_v46 = vpop.f32.mrb[198].mxu1  ;;  %7445 = vmatprep.mubr.bf16.mxu0 %v6689_v34  ;;  %7831 = vmatprep.mubr.bf16.mxu1 %v6689_v34 }
 0x5c2   : > { %v14052_v41 = vadd.f32 %v5900_v24, %v18198_v15  ;;  %v14116_v20 = vadd.f32 %v6286_v46, %v18201_v28  ;;  %v5902_v0 = vpop.f32.mrb[199].mxu0  ;;  %v6288_v39 = vpop.f32.mrb[199].mxu1  ;;  %7446 = vmatmul.mubr.bf16.vlgmr.msra.gmra.mrb[0].mxu0 %v6688_v30  ;;  %7832 = vmatmul.mubr.bf16.vlgmr.msra.gmra.mrb[0].mxu1 %v6688_v30  ;;  %v6439_v52 = vmax.f32 %v14050_v42, 0.0  ;;  %v6441_v45 = vmax.f32 %v14114_v60, 0.0  ;;  %v16146_v42 = vld [vmem:[#allocation8 + $0x268] ss:$16 sps:$4 sm:$0xff]  }
 0x5c3   : > { %v14053_v55 = vadd.f32 %v5902_v0, %v18204_v51  ;;  %v14117_v11 = vadd.f32 %v6288_v39, %v18207_v40  ;;  %7607 = vmatpush1.bf16.msra.mxu0 %v16107_v35  ;;  %7993 = vmatpush1.bf16.msra.mxu1 %v16134_v50  ;;  %v6440_v43 = vmax.f32 %v14051_v38, 0.0  ;;  %v6442_v14 = vmax.f32 %v14115_v44, 0.0  ;;  %v16116_v35 = vld [vmem:[#allocation8 + $0x260] ss:$16 sps:$4 sm:$0xff]   ;;  %v16121_v50 = vld [vmem:[#allocation8 + $0x284] ss:$16 sps:$4 sm:$0xff]  }
 0x5c4   : > { %v6443_v47 = vmax.f32 %v14052_v41, 0.0  ;;  %v6445_v58 = vmax.f32 %v14116_v20, 0.0  ;;  %7608 = vmatprep.subr.bf16.mxu0 %v16112_v4  ;;  %7994 = vmatprep.subr.bf16.mxu1 %v16139_v31  ;;  %v16154_v31 = vld [vmem:[#allocation8 + $0x28c] ss:$16 sps:$4 sm:$0xff]  }
 0x5c5   : > { %v6444_v23 = vmax.f32 %v14053_v55, 0.0  ;;  %v6446_v29 = vmax.f32 %v14117_v11, 0.0  ;;  %v16119_v11 = vld [vmem:[#allocation8 + $0x280] ss:$16 sps:$4 sm:$0xff]  }
 0x5c6   : > { %v6692_v18 = vpack.c.bf16 %v6443_v47, %v6439_v52  ;;  %v18229_v57 = vpack.c.bf16 %v6445_v58, %v6441_v45  ;;  %v16124_v58 = vld [vmem:[#allocation8 + $0x2a4] ss:$16 sps:$4 sm:$0xff]  }
 0x5c7   : > { %v5906_v48 = vpop.f32.mrb[200].mxu0  ;;  %v6292_v32 = vpop.f32.mrb[200].mxu1  ;;  %v6693_v7 = vpack.c.bf16 %v6444_v23, %v6440_v43  ;;  %7609 = vmatpush1.bf16.msra.mxu0 %v16110_v27  ;;  %7995 = vmatpush1.bf16.msra.mxu1 %v16137_v3  ;;  %v18231_v26 = vpack.c.bf16 %v6446_v29, %v6442_v14  ;;  %v16152_v27 = vld [vmem:[#allocation8 + $0x288] ss:$16 sps:$4 sm:$0xff]  }
 0x5c8   : > { %v14054_v16 = vadd.f32 %v5906_v48, %v18198_v15  ;;  %v14118_v19 = vadd.f32 %v6292_v32, %v18201_v28  ;;  %v5908_v53 = vpop.f32.mrb[201].mxu0  ;;  %v6294_v22 = vpop.f32.mrb[201].mxu1  ;;  %7610 = vmatprep.subr.bf16.mxu0 %v16115_v25  ;;  %7996 = vmatprep.subr.bf16.mxu1 %v16145_v17  ;;  %v16157_v17 = vld [vmem:[#allocation8 + $0x2ac] ss:$16 sps:$4 sm:$0xff]  }
 0x5c9   : > { %v14055_v56 = vadd.f32 %v5908_v53, %v18204_v51  ;;  %v14119_v5 = vadd.f32 %v6294_v22, %v18207_v40  ;;  %v5910_v2 = vpop.f32.mrb[202].mxu0  ;;  %v6296_v8 = vpop.f32.mrb[202].mxu1  ;;  %7455 = vmatprep.mubr.bf16.mxu0 %v6693_v7  ;;  %7841 = vmatprep.mubr.bf16.mxu1 %v6693_v7  ;;  %v16155_v53 = vld [vmem:[#allocation8 + $0x2a8] ss:$16 sps:$4 sm:$0xff]  }
 0x5ca   : > { %v14056_v33 = vadd.f32 %v5910_v2, %v18198_v15  ;;  %v14120_v49 = vadd.f32 %v6296_v8, %v18201_v28  ;;  %v5912_v30 = vpop.f32.mrb[203].mxu0  ;;  %v6298_v59 = vpop.f32.mrb[203].mxu1  ;;  %7456 = vmatmul.mubr.bf16.gmra.mrb[4].mxu0 %v6692_v18  ;;  %7842 = vmatmul.mubr.bf16.gmra.mrb[4].mxu1 %v6692_v18  ;;  %v6447_v60 = vmax.f32 %v14054_v16, 0.0  ;;  %v6449_v10 = vmax.f32 %v14118_v19, 0.0  ;;  %v16122_v16 = vld [vmem:[#allocation8 + $0x2a0] ss:$16 sps:$4 sm:$0xff]  }
 0x5cb   : > { %v14057_v36 = vadd.f32 %v5912_v30, %v18204_v51  ;;  %v14121_v34 = vadd.f32 %v6298_v59, %v18207_v40  ;;  %7611 = vmatpush1.bf16.msra.mxu0 %v16113_v54  ;;  %7997 = vmatpush1.bf16.msra.mxu1 %v16143_v61  ;;  %v6448_v38 = vmax.f32 %v14055_v56, 0.0  ;;  %v6450_v44 = vmax.f32 %v14119_v5, 0.0  ;;  %v16127_v19 = vld [vmem:[#allocation8 + $0x2c4] ss:$16 sps:$4 sm:$0xff]   ;;  %v16163_v5 = vld [vmem:[#allocation8 + $0x2cc] ss:$16 sps:$4 sm:$0xff]  }
 0x5cc   : > { %v6451_v21 = vmax.f32 %v14056_v33, 0.0  ;;  %v6453_v4 = vmax.f32 %v14120_v49, 0.0  ;;  %7612 = vmatprep.subr.bf16.mxu0 %v16118_v12  ;;  %7998 = vmatprep.subr.bf16.mxu1 %v16148_v37 }
 0x5cd   : > { %v6452_v24 = vmax.f32 %v14057_v36, 0.0  ;;  %v6454_v46 = vmax.f32 %v14121_v34, 0.0 }
 0x5ce   : > { %v6696_v41 = vpack.c.bf16 %v6451_v21, %v6447_v60  ;;  %v18241_v20 = vpack.c.bf16 %v6453_v4, %v6449_v10 }
 0x5cf   : > { %v5916_v0 = vpop.f32.mrb[204].mxu0  ;;  %v6302_v39 = vpop.f32.mrb[204].mxu1  ;;  %v6697_v55 = vpack.c.bf16 %v6452_v24, %v6448_v38  ;;  %7613 = vmatpush1.bf16.msra.mxu0 %v16116_v35  ;;  %7999 = vmatpush1.bf16.msra.mxu1 %v16146_v42  ;;  %v18243_v25 = vpack.c.bf16 %v6454_v46, %v6450_v44  ;;  %v16161_v42 = vld [vmem:[#allocation8 + $0x2c8] ss:$16 sps:$4 sm:$0xff]   ;;  %v16130_v38 = vld [vmem:[#allocation8 + $0x2e4] ss:$16 sps:$4 sm:$0xff]  }
 0x5d0   : > { %v14058_v3 = vadd.f32 %v5916_v0, %v18198_v15  ;;  %v14122_v52 = vadd.f32 %v6302_v39, %v18201_v28  ;;  %v5918_v45 = vpop.f32.mrb[205].mxu0  ;;  %v6304_v47 = vpop.f32.mrb[205].mxu1  ;;  %7614 = vmatprep.subr.bf16.mxu0 %v16121_v50  ;;  %8000 = vmatprep.subr.bf16.mxu1 %v16154_v31  ;;  %v16125_v50 = vld [vmem:[#allocation8 + $0x2c0] ss:$16 sps:$4 sm:$0xff]   ;;  %v16166_v44 = vld [vmem:[#allocation8 + $0x2ec] ss:$16 sps:$4 sm:$0xff]  }
 0x5d1   : > { %v14059_v43 = vadd.f32 %v5918_v45, %v18204_v51  ;;  %v14123_v14 = vadd.f32 %v6304_v47, %v18207_v40  ;;  %v5920_v23 = vpop.f32.mrb[206].mxu0  ;;  %v6306_v29 = vpop.f32.mrb[206].mxu1  ;;  %7465 = vmatprep.mubr.bf16.mxu0 %v6697_v55  ;;  %7851 = vmatprep.mubr.bf16.mxu1 %v6697_v55  ;;  %v16128_v45 = vld [vmem:[#allocation8 + $0x2e0] ss:$16 sps:$4 sm:$0xff]   ;;  %v16133_v47 = vld [vmem:[#allocation8 + $0x304] ss:$16 sps:$4 sm:$0xff]  }
 0x5d2   : > { %v14060_v18 = vadd.f32 %v5920_v23, %v18198_v15  ;;  %v14124_v48 = vadd.f32 %v6306_v29, %v18201_v28  ;;  %v5922_v32 = vpop.f32.mrb[207].mxu0  ;;  %v6308_v7 = vpop.f32.mrb[207].mxu1  ;;  %7466 = vmatmul.mubr.bf16.gmra.mrb[8].mxu0 %v6696_v41  ;;  %7852 = vmatmul.mubr.bf16.gmra.mrb[8].mxu1 %v6696_v41  ;;  %v6455_v22 = vmax.f32 %v14058_v3, 0.0  ;;  %v6457_v12 = vmax.f32 %v14122_v52, 0.0  ;;  %v16172_v29 = vld [vmem:[#allocation8 + $0x30c] ss:$16 sps:$4 sm:$0xff]  }
 0x5d3   : > { %v14061_v54 = vadd.f32 %v5922_v32, %v18204_v51  ;;  %v14125_v61 = vadd.f32 %v6308_v7, %v18207_v40  ;;  %7615 = vmatpush1.bf16.msra.mxu0 %v16119_v11  ;;  %8001 = vmatpush1.bf16.msra.mxu1 %v16152_v27  ;;  %v6456_v2 = vmax.f32 %v14059_v43, 0.0  ;;  %v6458_v8 = vmax.f32 %v14123_v14, 0.0 }
 0x5d4   : > { %v6459_v37 = vmax.f32 %v14060_v18, 0.0  ;;  %v6461_v56 = vmax.f32 %v14124_v48, 0.0  ;;  %7616 = vmatprep.subr.bf16.mxu0 %v16124_v58  ;;  %8002 = vmatprep.subr.bf16.mxu1 %v16157_v17  ;;  %v16164_v58 = vld [vmem:[#allocation8 + $0x2e8] ss:$16 sps:$4 sm:$0xff]  }
 0x5d5   : > { %v6460_v33 = vmax.f32 %v14061_v54, 0.0  ;;  %v6462_v49 = vmax.f32 %v14125_v61, 0.0 }
 0x5d6   : > { %v6700_v30 = vpack.c.bf16 %v6459_v37, %v6455_v22  ;;  %v18253_v59 = vpack.c.bf16 %v6461_v56, %v6457_v12  ;;  %v16131_v22 = vld [vmem:[#allocation8 + $0x300] ss:$16 sps:$4 sm:$0xff]   ;;  %v16170_v12 = vld [vmem:[#allocation8 + $0x308] ss:$16 sps:$4 sm:$0xff]  }
 0x5d7   : > { %v5926_v36 = vpop.f32.mrb[208].mxu0  ;;  %v6312_v34 = vpop.f32.mrb[208].mxu1  ;;  %v6701_v35 = vpack.c.bf16 %v6460_v33, %v6456_v2  ;;  %7617 = vmatpush1.bf16.msra.mxu0 %v16122_v16  ;;  %8003 = vmatpush1.bf16.msra.mxu1 %v16155_v53  ;;  %v18255_v60 = vpack.c.bf16 %v6462_v49, %v6458_v8  ;;  %v16142_v33 = vld [vmem:[#allocation8 + $0x324] ss:$16 sps:$4 sm:$0xff]   ;;  %v16175_v49 = vld [vmem:[#allocation8 + $0x32c] ss:$16 sps:$4 sm:$0xff]  }
 0x5d8   : > { %v14062_v10 = vadd.f32 %v5926_v36, %v18198_v15  ;;  %v14126_v21 = vadd.f32 %v6312_v34, %v18201_v28  ;;  %v5928_v4 = vpop.f32.mrb[209].mxu0  ;;  %v6314_v31 = vpop.f32.mrb[209].mxu1  ;;  %7618 = vmatprep.subr.bf16.mxu0 %v16127_v19  ;;  %8004 = vmatprep.subr.bf16.mxu1 %v16163_v5 }
 0x5d9   : > { %v14063_v24 = vadd.f32 %v5928_v4, %v18204_v51  ;;  %v14127_v46 = vadd.f32 %v6314_v31, %v18207_v40  ;;  %v5930_v41 = vpop.f32.mrb[210].mxu0  ;;  %v6316_v0 = vpop.f32.mrb[210].mxu1  ;;  %7475 = vmatprep.mubr.bf16.mxu0 %v6701_v35  ;;  %7861 = vmatprep.mubr.bf16.mxu1 %v6701_v35 }
 0x5da   : > { %v14064_v39 = vadd.f32 %v5930_v41, %v18198_v15  ;;  %v14128_v55 = vadd.f32 %v6316_v0, %v18201_v28  ;;  %v5932_v11 = vpop.f32.mrb[211].mxu0  ;;  %v6318_v27 = vpop.f32.mrb[211].mxu1  ;;  %7476 = vmatmul.mubr.bf16.gmra.mrb[12].mxu0 %v6700_v30  ;;  %7862 = vmatmul.mubr.bf16.gmra.mrb[12].mxu1 %v6700_v30  ;;  %v6463_v17 = vmax.f32 %v14062_v10, 0.0  ;;  %v6465_v43 = vmax.f32 %v14126_v21, 0.0 }
 0x5db   : > { %v14065_v3 = vadd.f32 %v5932_v11, %v18204_v51  ;;  %v14129_v52 = vadd.f32 %v6318_v27, %v18207_v40  ;;  %7619 = vmatpush1.bf16.msra.mxu0 %v16125_v50  ;;  %8005 = vmatpush1.bf16.msra.mxu1 %v16161_v42  ;;  %v6464_v18 = vmax.f32 %v14063_v24, 0.0  ;;  %v6466_v48 = vmax.f32 %v14127_v46, 0.0  ;;  %v16173_v24 = vld [vmem:[#allocation8 + $0x328] ss:$16 sps:$4 sm:$0xff]  }
 0x5dc   : > { %v6467_v14 = vmax.f32 %v14064_v39, 0.0  ;;  %v6469_v23 = vmax.f32 %v14128_v55, 0.0  ;;  %7620 = vmatprep.subr.bf16.mxu0 %v16130_v38  ;;  %8006 = vmatprep.subr.bf16.mxu1 %v16166_v44  ;;  %v16140_v38 = vld [vmem:[#allocation8 + $0x320] ss:$16 sps:$4 sm:$0xff]   ;;  %v16151_v44 = vld [vmem:[#allocation8 + $0x344] ss:$16 sps:$4 sm:$0xff]  }
 0x5dd   : > { %v6468_v32 = vmax.f32 %v14065_v3, 0.0  ;;  %v6470_v7 = vmax.f32 %v14129_v52, 0.0  ;;  %v16181_v55 = vld [vmem:[#allocation8 + $0x34c] ss:$16 sps:$4 sm:$0xff]  }
 0x5de   : > { %v6704_v54 = vpack.c.bf16 %v6467_v14, %v6463_v17  ;;  %v18265_v61 = vpack.c.bf16 %v6469_v23, %v6465_v43  ;;  %v16149_v14 = vld [vmem:[#allocation8 + $0x340] ss:$16 sps:$4 sm:$0xff]   ;;  %v16179_v23 = vld [vmem:[#allocation8 + $0x348] ss:$16 sps:$4 sm:$0xff]  }
 0x5df   : > { %v5936_v16 = vpop.f32.mrb[212].mxu0  ;;  %v6322_v19 = vpop.f32.mrb[212].mxu1  ;;  %v6705_v53 = vpack.c.bf16 %v6468_v32, %v6464_v18  ;;  %7621 = vmatpush1.bf16.msra.mxu0 %v16128_v45  ;;  %8007 = vmatpush1.bf16.msra.mxu1 %v16164_v58  ;;  %v18267_v37 = vpack.c.bf16 %v6470_v7, %v6466_v48 }
 0x5e0   : > { %v14066_v56 = vadd.f32 %v5936_v16, %v18198_v15  ;;  %v14130_v5 = vadd.f32 %v6322_v19, %v18201_v28  ;;  %v5938_v2 = vpop.f32.mrb[213].mxu0  ;;  %v6324_v8 = vpop.f32.mrb[213].mxu1  ;;  %7622 = vmatprep.subr.bf16.mxu0 %v16133_v47  ;;  %8008 = vmatprep.subr.bf16.mxu1 %v16172_v29  ;;  %v16184_v16 = vld [vmem:[#allocation8 + $0x36c] ss:$16 sps:$4 sm:$0xff]  }
 0x5e1   : > { %v14067_v30 = vadd.f32 %v5938_v2, %v18204_v51  ;;  %v14131_v36 = vadd.f32 %v6324_v8, %v18207_v40  ;;  %v5940_v34 = vpop.f32.mrb[214].mxu0  ;;  %v6326_v35 = vpop.f32.mrb[214].mxu1  ;;  %7485 = vmatprep.mubr.bf16.mxu0 %v6705_v53  ;;  %7871 = vmatprep.mubr.bf16.mxu1 %v6705_v53 }
 0x5e2   : > { %v14068_v50 = vadd.f32 %v5940_v34, %v18198_v15  ;;  %v14132_v42 = vadd.f32 %v6326_v35, %v18201_v28  ;;  %v5942_v10 = vpop.f32.mrb[215].mxu0  ;;  %v6328_v21 = vpop.f32.mrb[215].mxu1  ;;  %7486 = vmatmul.mubr.bf16.gmra.mrb[16].mxu0 %v6704_v54  ;;  %7872 = vmatmul.mubr.bf16.gmra.mrb[16].mxu1 %v6704_v54  ;;  %v6471_v46 = vmax.f32 %v14066_v56, 0.0  ;;  %v6473_v41 = vmax.f32 %v14130_v5, 0.0  ;;  %v16160_v54 = vld [vmem:[#allocation8 + $0x364] ss:$16 sps:$4 sm:$0xff]  }
 0x5e3   : > { %v14069_v4 = vadd.f32 %v5942_v10, %v18204_v51  ;;  %v14133_v31 = vadd.f32 %v6328_v21, %v18207_v40  ;;  %7623 = vmatpush1.bf16.msra.mxu0 %v16131_v22  ;;  %8009 = vmatpush1.bf16.msra.mxu1 %v16170_v12  ;;  %v6472_v11 = vmax.f32 %v14067_v30, 0.0  ;;  %v6474_v27 = vmax.f32 %v14131_v36, 0.0  ;;  %v16158_v30 = vld [vmem:[#allocation8 + $0x360] ss:$16 sps:$4 sm:$0xff]   ;;  %v16169_v36 = vld [vmem:[#allocation8 + $0x384] ss:$16 sps:$4 sm:$0xff]  }
 0x5e4   : > { %v6475_v0 = vmax.f32 %v14068_v50, 0.0  ;;  %v6477_v39 = vmax.f32 %v14132_v42, 0.0  ;;  %7624 = vmatprep.subr.bf16.mxu0 %v16142_v33  ;;  %8010 = vmatprep.subr.bf16.mxu1 %v16175_v49  ;;  %v16182_v34 = vld [vmem:[#allocation8 + $0x368] ss:$16 sps:$4 sm:$0xff]   ;;  %v16190_v21 = vld [vmem:[#allocation8 + $0x38c] ss:$16 sps:$4 sm:$0xff]  }
 0x5e5   : > { %v6476_v3 = vmax.f32 %v14069_v4, 0.0  ;;  %v6478_v52 = vmax.f32 %v14133_v31, 0.0 }
 0x5e6   : > { %v6708_v45 = vpack.c.bf16 %v6475_v0, %v6471_v46  ;;  %v18277_v47 = vpack.c.bf16 %v6477_v39, %v6473_v41 }
 0x5e7   : > { %v5946_v58 = vpop.f32.mrb[216].mxu0  ;;  %v6332_v17 = vpop.f32.mrb[216].mxu1  ;;  %v6709_v43 = vpack.c.bf16 %v6476_v3, %v6472_v11  ;;  %7625 = vmatpush1.bf16.msra.mxu0 %v16140_v38  ;;  %8011 = vmatpush1.bf16.msra.mxu1 %v16173_v24  ;;  %v18279_v29 = vpack.c.bf16 %v6478_v52, %v6474_v27  ;;  %v16188_v11 = vld [vmem:[#allocation8 + $0x388] ss:$16 sps:$4 sm:$0xff]  }
 0x5e8   : > { %v14070_v18 = vadd.f32 %v5946_v58, %v18198_v15  ;;  %v14134_v48 = vadd.f32 %v6332_v17, %v18201_v28  ;;  %v5948_v32 = vpop.f32.mrb[217].mxu0  ;;  %v6334_v7 = vpop.f32.mrb[217].mxu1  ;;  %7626 = vmatprep.subr.bf16.mxu0 %v16151_v44  ;;  %8012 = vmatprep.subr.bf16.mxu1 %v16181_v55  ;;  %v16167_v55 = vld [vmem:[#allocation8 + $0x380] ss:$16 sps:$4 sm:$0xff]   ;;  %v16178_v17 = vld [vmem:[#allocation8 + $0x3a4] ss:$16 sps:$4 sm:$0xff]  }
 0x5e9   : > { %v14071_v19 = vadd.f32 %v5948_v32, %v18204_v51  ;;  %v14135_v53 = vadd.f32 %v6334_v7, %v18207_v40  ;;  %v5950_v22 = vpop.f32.mrb[218].mxu0  ;;  %v6336_v12 = vpop.f32.mrb[218].mxu1  ;;  %7495 = vmatprep.mubr.bf16.mxu0 %v6709_v43  ;;  %7881 = vmatprep.mubr.bf16.mxu1 %v6709_v43  ;;  %v16193_v43 = vld [vmem:[#allocation8 + $0x3ac] ss:$16 sps:$4 sm:$0xff]  }
 0x5ea   : > { %v14072_v56 = vadd.f32 %v5950_v22, %v18198_v15  ;;  %v14136_v5 = vadd.f32 %v6336_v12, %v18201_v28  ;;  %v5952_v2 = vpop.f32.mrb[219].mxu0  ;;  %v6338_v8 = vpop.f32.mrb[219].mxu1  ;;  %7496 = vmatmul.mubr.bf16.gmra.mrb[20].mxu0 %v6708_v45  ;;  %7882 = vmatmul.mubr.bf16.gmra.mrb[20].mxu1 %v6708_v45  ;;  %v6479_v35 = vmax.f32 %v14070_v18, 0.0  ;;  %v6481_v50 = vmax.f32 %v14134_v48, 0.0  ;;  %v16176_v22 = vld [vmem:[#allocation8 + $0x3a0] ss:$16 sps:$4 sm:$0xff]  }
 0x5eb   : > { %v14073_v33 = vadd.f32 %v5952_v2, %v18204_v51  ;;  %v14137_v49 = vadd.f32 %v6338_v8, %v18207_v40  ;;  %7627 = vmatpush1.bf16.msra.mxu0 %v16149_v14  ;;  %8013 = vmatpush1.bf16.msra.mxu1 %v16179_v23  ;;  %v6480_v4 = vmax.f32 %v14071_v19, 0.0  ;;  %v6482_v31 = vmax.f32 %v14135_v53, 0.0  ;;  %v16187_v12 = vld [vmem:[#allocation8 + $0x3c4] ss:$16 sps:$4 sm:$0xff]  }
 0x5ec   : > { %v6483_v42 = vmax.f32 %v14072_v56, 0.0  ;;  %v6485_v10 = vmax.f32 %v14136_v5, 0.0  ;;  %7628 = vmatprep.subr.bf16.mxu0 %v16160_v54  ;;  %8014 = vmatprep.subr.bf16.mxu1 %v16184_v16  ;;  %v16191_v56 = vld [vmem:[#allocation8 + $0x3a8] ss:$16 sps:$4 sm:$0xff]  }
 0x5ed   : > { %v6484_v38 = vmax.f32 %v14073_v33, 0.0  ;;  %v6486_v44 = vmax.f32 %v14137_v49, 0.0  ;;  %v16199_v49 = vld [vmem:[#allocation8 + $0x3cc] ss:$16 sps:$4 sm:$0xff]  }
 0x5ee   : > { %v6712_v24 = vpack.c.bf16 %v6483_v42, %v6479_v35  ;;  %v18289_v46 = vpack.c.bf16 %v6485_v10, %v6481_v50 }
 0x5ef   : > { %v5956_v41 = vpop.f32.mrb[220].mxu0  ;;  %v6342_v0 = vpop.f32.mrb[220].mxu1  ;;  %v6713_v39 = vpack.c.bf16 %v6484_v38, %v6480_v4  ;;  %7629 = vmatpush1.bf16.msra.mxu0 %v16158_v30  ;;  %8015 = vmatpush1.bf16.msra.mxu1 %v16182_v34  ;;  %v18291_v27 = vpack.c.bf16 %v6486_v44, %v6482_v31  ;;  %v16185_v31 = vld [vmem:[#allocation8 + $0x3c0] ss:$16 sps:$4 sm:$0xff]   ;;  %v16197_v38 = vld [vmem:[#allocation8 + $0x3c8] ss:$16 sps:$4 sm:$0xff]  }
 0x5f0   : > { %v14074_v3 = vadd.f32 %v5956_v41, %v18198_v15  ;;  %v14138_v52 = vadd.f32 %v6342_v0, %v18201_v28  ;;  %v5958_v45 = vpop.f32.mrb[221].mxu0  ;;  %v6344_v58 = vpop.f32.mrb[221].mxu1  ;;  %7630 = vmatprep.subr.bf16.mxu0 %v16169_v36  ;;  %8016 = vmatprep.subr.bf16.mxu1 %v16190_v21 }
 0x5f1   : > { %v14075_v14 = vadd.f32 %v5958_v45, %v18204_v51  ;;  %v14139_v23 = vadd.f32 %v6344_v58, %v18207_v40  ;;  %v5960_v18 = vpop.f32.mrb[222].mxu0  ;;  %v6346_v48 = vpop.f32.mrb[222].mxu1  ;;  %7505 = vmatprep.mubr.bf16.mxu0 %v6713_v39  ;;  %7891 = vmatprep.mubr.bf16.mxu1 %v6713_v39 }
 0x5f2   : > { %v14076_v32 = vadd.f32 %v5960_v18, %v18198_v15  ;;  %v14140_v7 = vadd.f32 %v6346_v48, %v18201_v28  ;;  %v5962_v54 = vpop.f32.mrb[223].mxu0  ;;  %v6348_v16 = vpop.f32.mrb[223].mxu1  ;;  %7506 = vmatmul.mubr.bf16.gmra.mrb[24].mxu0 %v6712_v24  ;;  %7892 = vmatmul.mubr.bf16.gmra.mrb[24].mxu1 %v6712_v24  ;;  %v6487_v5 = vmax.f32 %v14074_v3, 0.0  ;;  %v6489_v2 = vmax.f32 %v14138_v52, 0.0 }
 0x5f3   : > { %v14077_v19 = vadd.f32 %v5962_v54, %v18204_v51  ;;  %v14141_v53 = vadd.f32 %v6348_v16, %v18207_v40  ;;  %7631 = vmatpush1.bf16.msra.mxu0 %v16167_v55  ;;  %8017 = vmatpush1.bf16.msra.mxu1 %v16188_v11  ;;  %v6488_v30 = vmax.f32 %v14075_v14, 0.0  ;;  %v6490_v36 = vmax.f32 %v14139_v23, 0.0  ;;  %v16196_v55 = vld [vmem:[#allocation8 + $0x3e4] ss:$16 sps:$4 sm:$0xff]   ;;  %v16202_v11 = vld [vmem:[#allocation8 + $0x3ec] ss:$16 sps:$4 sm:$0xff]  }
 0x5f4   : > { %v6491_v8 = vmax.f32 %v14076_v32, 0.0  ;;  %v6493_v33 = vmax.f32 %v14140_v7, 0.0  ;;  %7632 = vmatprep.subr.bf16.mxu0 %v16178_v17  ;;  %8018 = vmatprep.subr.bf16.mxu1 %v16193_v43  ;;  %v16194_v32 = vld [vmem:[#allocation8 + $0x3e0] ss:$16 sps:$4 sm:$0xff]   ;;  %v16200_v7 = vld [vmem:[#allocation8 + $0x3e8] ss:$16 sps:$4 sm:$0xff]  }
 0x5f5   : > { %v6492_v34 = vmax.f32 %v14077_v19, 0.0  ;;  %v6494_v35 = vmax.f32 %v14141_v53, 0.0 }
 0x5f6   : > { %v6716_v50 = vpack.c.bf16 %v6491_v8, %v6487_v5  ;;  %v18301_v42 = vpack.c.bf16 %v6493_v33, %v6489_v2 }
 0x5f7   : > { %v5966_v10 = vpop.f32.mrb[224].mxu0  ;;  %v6352_v21 = vpop.f32.mrb[224].mxu1  ;;  %v6717_v4 = vpack.c.bf16 %v6492_v34, %v6488_v30  ;;  %7633 = vmatpush1.bf16.msra.mxu0 %v16176_v22  ;;  %8019 = vmatpush1.bf16.msra.mxu1 %v16191_v56  ;;  %v18303_v44 = vpack.c.bf16 %v6494_v35, %v6490_v36 }
 0x5f8   : > { %v14078_v24 = vadd.f32 %v5966_v10, %v18198_v15  ;;  %v14142_v41 = vadd.f32 %v6352_v21, %v18201_v28  ;;  %v5968_v0 = vpop.f32.mrb[225].mxu0  ;;  %v6354_v39 = vpop.f32.mrb[225].mxu1  ;;  %7634 = vmatprep.subr.bf16.mxu0 %v16187_v12  ;;  %8020 = vmatprep.subr.bf16.mxu1 %v16199_v49 }
 0x5f9   : > { %v14079_v3 = vadd.f32 %v5968_v0, %v18204_v51  ;;  %v14143_v52 = vadd.f32 %v6354_v39, %v18207_v40  ;;  %v5970_v45 = vpop.f32.mrb[226].mxu0  ;;  %v6356_v58 = vpop.f32.mrb[226].mxu1  ;;  %7515 = vmatprep.mubr.bf16.mxu0 %v6717_v4  ;;  %7901 = vmatprep.mubr.bf16.mxu1 %v6717_v4 }
 0x5fa   : > { %v14080_v17 = vadd.f32 %v5970_v45, %v18198_v15  ;;  %v14144_v43 = vadd.f32 %v6356_v58, %v18201_v28  ;;  %v5972_v14 = vpop.f32.mrb[227].mxu0  ;;  %v6358_v23 = vpop.f32.mrb[227].mxu1  ;;  %7516 = vmatmul.mubr.bf16.gmra.mrb[28].mxu0 %v6716_v50  ;;  %7902 = vmatmul.mubr.bf16.gmra.mrb[28].mxu1 %v6716_v50  ;;  %v6495_v54 = vmax.f32 %v14078_v24, 0.0  ;;  %v6497_v16 = vmax.f32 %v14142_v41, 0.0 }
 0x5fb   : > { %v14081_v18 = vadd.f32 %v5972_v14, %v18204_v51  ;;  %v14145_v48 = vadd.f32 %v6358_v23, %v18207_v40  ;;  %7635 = vmatpush1.bf16.msra.mxu0 %v16185_v31  ;;  %8021 = vmatpush1.bf16.msra.mxu1 %v16197_v38  ;;  %v6496_v22 = vmax.f32 %v14079_v3, 0.0  ;;  %v6498_v12 = vmax.f32 %v14143_v52, 0.0 }
 0x5fc   : > { %v6499_v19 = vmax.f32 %v14080_v17, 0.0  ;;  %v6501_v53 = vmax.f32 %v14144_v43, 0.0  ;;  %7636 = vmatprep.subr.bf16.mxu0 %v16196_v55  ;;  %8022 = vmatprep.subr.bf16.mxu1 %v16202_v11 }
 0x5fd   : > { %v6500_v56 = vmax.f32 %v14081_v18, 0.0  ;;  %v6502_v5 = vmax.f32 %v14145_v48, 0.0 }
 0x5fe   : > { %v6720_v2 = vpack.c.bf16 %v6499_v19, %v6495_v54  ;;  %v18313_v8 = vpack.c.bf16 %v6501_v53, %v6497_v16 }
 0x5ff   : > { %v5976_v33 = vpop.f32.mrb[228].mxu0  ;;  %v6362_v49 = vpop.f32.mrb[228].mxu1  ;;  %v6721_v30 = vpack.c.bf16 %v6500_v56, %v6496_v22  ;;  %7637 = vmatpush1.bf16.msra.mxu0 %v16194_v32  ;;  %8023 = vmatpush1.bf16.msra.mxu1 %v16200_v7  ;;  %v18315_v36 = vpack.c.bf16 %v6502_v5, %v6498_v12 }
 0x600   : > { %v14082_v34 = vadd.f32 %v5976_v33, %v18198_v15  ;;  %v14146_v35 = vadd.f32 %v6362_v49, %v18201_v28  ;;  %v5978_v50 = vpop.f32.mrb[229].mxu0  ;;  %v6364_v10 = vpop.f32.mrb[229].mxu1 }
 0x601   : > { %v14083_v21 = vadd.f32 %v5978_v50, %v18204_v51  ;;  %v14147_v4 = vadd.f32 %v6364_v10, %v18207_v40  ;;  %v5980_v31 = vpop.f32.mrb[230].mxu0  ;;  %v6366_v38 = vpop.f32.mrb[230].mxu1  ;;  %7525 = vmatprep.mubr.bf16.mxu0 %v6721_v30  ;;  %7911 = vmatprep.mubr.bf16.mxu1 %v6721_v30 }
 0x602   : > { %v14084_v24 = vadd.f32 %v5980_v31, %v18198_v15  ;;  %v14148_v41 = vadd.f32 %v6366_v38, %v18201_v28  ;;  %v5982_v0 = vpop.f32.mrb[231].mxu0  ;;  %v6368_v39 = vpop.f32.mrb[231].mxu1  ;;  %7526 = vmatmul.mubr.bf16.gmra.mrb[32].mxu0 %v6720_v2  ;;  %7912 = vmatmul.mubr.bf16.gmra.mrb[32].mxu1 %v6720_v2  ;;  %v6503_v3 = vmax.f32 %v14082_v34, 0.0  ;;  %v6505_v52 = vmax.f32 %v14146_v35, 0.0 }
 0x603   : > { %v14085_v55 = vadd.f32 %v5982_v0, %v18204_v51  ;;  %v14149_v11 = vadd.f32 %v6368_v39, %v18207_v40  ;;  %v6504_v17 = vmax.f32 %v14083_v21, 0.0  ;;  %v6506_v43 = vmax.f32 %v14147_v4, 0.0 }
 0x604   : > { %v6507_v45 = vmax.f32 %v14084_v24, 0.0  ;;  %v6509_v58 = vmax.f32 %v14148_v41, 0.0 }
 0x605   : > { %v6508_v14 = vmax.f32 %v14085_v55, 0.0  ;;  %v6510_v23 = vmax.f32 %v14149_v11, 0.0 }
 0x606   : > { %v6724_v18 = vpack.c.bf16 %v6507_v45, %v6503_v3  ;;  %v18325_v48 = vpack.c.bf16 %v6509_v58, %v6505_v52 }
 0x607   : > { %v5986_v32 = vpop.f32.mrb[232].mxu0  ;;  %v6372_v7 = vpop.f32.mrb[232].mxu1  ;;  %v6725_v54 = vpack.c.bf16 %v6508_v14, %v6504_v17  ;;  %v18327_v16 = vpack.c.bf16 %v6510_v23, %v6506_v43 }
 0x608   : > { %v14086_v19 = vadd.f32 %v5986_v32, %v18198_v15  ;;  %v14150_v53 = vadd.f32 %v6372_v7, %v18201_v28  ;;  %v5988_v22 = vpop.f32.mrb[233].mxu0  ;;  %v6374_v12 = vpop.f32.mrb[233].mxu1 }
 0x609   : > { %v14087_v56 = vadd.f32 %v5988_v22, %v18204_v51  ;;  %v14151_v5 = vadd.f32 %v6374_v12, %v18207_v40  ;;  %v5990_v2 = vpop.f32.mrb[234].mxu0  ;;  %v6376_v33 = vpop.f32.mrb[234].mxu1  ;;  %7535 = vmatprep.mubr.bf16.mxu0 %v6725_v54  ;;  %7921 = vmatprep.mubr.bf16.mxu1 %v6725_v54 }
 0x60a   : > { %v14088_v49 = vadd.f32 %v5990_v2, %v18198_v15  ;;  %v14152_v30 = vadd.f32 %v6376_v33, %v18201_v28  ;;  %v5992_v34 = vpop.f32.mrb[235].mxu0  ;;  %v6378_v35 = vpop.f32.mrb[235].mxu1  ;;  %7536 = vmatmul.mubr.bf16.gmra.mrb[36].mxu0 %v6724_v18  ;;  %7922 = vmatmul.mubr.bf16.gmra.mrb[36].mxu1 %v6724_v18  ;;  %v6511_v21 = vmax.f32 %v14086_v19, 0.0  ;;  %v6513_v4 = vmax.f32 %v14150_v53, 0.0 }
 0x60b   : > { %v14089_v50 = vadd.f32 %v5992_v34, %v18204_v51  ;;  %v14153_v10 = vadd.f32 %v6378_v35, %v18207_v40  ;;  %v6512_v24 = vmax.f32 %v14087_v56, 0.0  ;;  %v6514_v41 = vmax.f32 %v14151_v5, 0.0 }
 0x60c   : > { %v6515_v31 = vmax.f32 %v14088_v49, 0.0  ;;  %v6517_v38 = vmax.f32 %v14152_v30, 0.0 }
 0x60d   : > { %v6516_v0 = vmax.f32 %v14089_v50, 0.0  ;;  %v6518_v39 = vmax.f32 %v14153_v10, 0.0 }
 0x60e   : > { %v6728_v55 = vpack.c.bf16 %v6515_v31, %v6511_v21  ;;  %v18337_v11 = vpack.c.bf16 %v6517_v38, %v6513_v4 }
 0x60f   : > { %v5996_v3 = vpop.f32.mrb[236].mxu0  ;;  %v6382_v52 = vpop.f32.mrb[236].mxu1  ;;  %v6729_v45 = vpack.c.bf16 %v6516_v0, %v6512_v24  ;;  %v18339_v58 = vpack.c.bf16 %v6518_v39, %v6514_v41 }
 0x610   : > { %v14090_v17 = vadd.f32 %v5996_v3, %v18198_v15  ;;  %v14154_v43 = vadd.f32 %v6382_v52, %v18201_v28  ;;  %v5998_v14 = vpop.f32.mrb[237].mxu0  ;;  %v6384_v23 = vpop.f32.mrb[237].mxu1 }
 0x611   : > { %v14091_v18 = vadd.f32 %v5998_v14, %v18204_v51  ;;  %v14155_v32 = vadd.f32 %v6384_v23, %v18207_v40  ;;  %v6000_v7 = vpop.f32.mrb[238].mxu0  ;;  %v6386_v54 = vpop.f32.mrb[238].mxu1  ;;  %7545 = vmatprep.mubr.bf16.mxu0 %v6729_v45  ;;  %7931 = vmatprep.mubr.bf16.mxu1 %v6729_v45 }
 0x612   : > { %v14092_v19 = vadd.f32 %v6000_v7, %v18198_v15  ;;  %v14156_v53 = vadd.f32 %v6386_v54, %v18201_v28  ;;  %v6002_v22 = vpop.f32.mrb[239].mxu0  ;;  %v6388_v12 = vpop.f32.mrb[239].mxu1  ;;  %7546 = vmatmul.mubr.bf16.gmra.mrb[40].mxu0 %v6728_v55  ;;  %7932 = vmatmul.mubr.bf16.gmra.mrb[40].mxu1 %v6728_v55  ;;  %v6519_v2 = vmax.f32 %v14090_v17, 0.0  ;;  %v6521_v33 = vmax.f32 %v14154_v43, 0.0 }
 0x613   : > { %v14093_v56 = vadd.f32 %v6002_v22, %v18204_v51  ;;  %v14157_v5 = vadd.f32 %v6388_v12, %v18207_v40  ;;  %v6520_v34 = vmax.f32 %v14091_v18, 0.0  ;;  %v6522_v35 = vmax.f32 %v14155_v32, 0.0 }
 0x614   : > { %v6523_v49 = vmax.f32 %v14092_v19, 0.0  ;;  %v6525_v30 = vmax.f32 %v14156_v53, 0.0  ;;  %v16205_v19 = vld [vmem:[#allocation10 + $0x4] ss:$16 sps:$4 sm:$0xff]  }
 0x615   : > { %v6524_v50 = vmax.f32 %v14093_v56, 0.0  ;;  %v6526_v10 = vmax.f32 %v14157_v5, 0.0  ;;  %9167 = vmatprep.subr.bf16.mxu0 %v16205_v19 }
 0x616   : > { %v6732_v21 = vpack.c.bf16 %v6523_v49, %v6519_v2  ;;  %v18349_v4 = vpack.c.bf16 %v6525_v30, %v6521_v33 }
 0x617   : > { %v6006_v31 = vpop.f32.mrb[240].mxu0  ;;  %v6392_v38 = vpop.f32.mrb[240].mxu1  ;;  %v6733_v24 = vpack.c.bf16 %v6524_v50, %v6520_v34  ;;  %v18351_v41 = vpack.c.bf16 %v6526_v10, %v6522_v35 }
 0x618   : > { %v14094_v0 = vadd.f32 %v6006_v31, %v18198_v15  ;;  %v14158_v39 = vadd.f32 %v6392_v38, %v18201_v28  ;;  %v6008_v55 = vpop.f32.mrb[241].mxu0  ;;  %v6394_v3 = vpop.f32.mrb[241].mxu1 }
 0x619   : > { %v14095_v52 = vadd.f32 %v6008_v55, %v18204_v51  ;;  %v14159_v45 = vadd.f32 %v6394_v3, %v18207_v40  ;;  %v6010_v17 = vpop.f32.mrb[242].mxu0  ;;  %v6396_v43 = vpop.f32.mrb[242].mxu1  ;;  %7555 = vmatprep.mubr.bf16.mxu0 %v6733_v24  ;;  %7941 = vmatprep.mubr.bf16.mxu1 %v6733_v24 }
 0x61a   : > { %v14096_v14 = vadd.f32 %v6010_v17, %v18198_v15  ;;  %v14160_v23 = vadd.f32 %v6396_v43, %v18201_v28  ;;  %v6012_v18 = vpop.f32.mrb[243].mxu0  ;;  %v6398_v32 = vpop.f32.mrb[243].mxu1  ;;  %7556 = vmatmul.mubr.bf16.gmra.mrb[44].mxu0 %v6732_v21  ;;  %7942 = vmatmul.mubr.bf16.gmra.mrb[44].mxu1 %v6732_v21  ;;  %v6527_v53 = vmax.f32 %v14094_v0, 0.0  ;;  %v6529_v22 = vmax.f32 %v14158_v39, 0.0 }
 0x61b   : > { %v14097_v7 = vadd.f32 %v6012_v18, %v18204_v51  ;;  %v14161_v54 = vadd.f32 %v6398_v32, %v18207_v40  ;;  %v6528_v5 = vmax.f32 %v14095_v52, 0.0  ;;  %v6530_v2 = vmax.f32 %v14159_v45, 0.0 }
 0x61c   : > { %v6531_v12 = vmax.f32 %v14096_v14, 0.0  ;;  %v6533_v56 = vmax.f32 %v14160_v23, 0.0 }
 0x61d   : > { %v6532_v33 = vmax.f32 %v14097_v7, 0.0  ;;  %v6534_v49 = vmax.f32 %v14161_v54, 0.0 }
 0x61e   : > { %v6736_v30 = vpack.c.bf16 %v6531_v12, %v6527_v53  ;;  %v18361_v34 = vpack.c.bf16 %v6533_v56, %v6529_v22 }
 0x61f   : > { %v6016_v35 = vpop.f32.mrb[244].mxu0  ;;  %v6402_v50 = vpop.f32.mrb[244].mxu1  ;;  %v6737_v10 = vpack.c.bf16 %v6532_v33, %v6528_v5  ;;  %v18363_v21 = vpack.c.bf16 %v6534_v49, %v6530_v2 }
 0x620   : > { %v14098_v31 = vadd.f32 %v6016_v35, %v18198_v15  ;;  %v14162_v38 = vadd.f32 %v6402_v50, %v18201_v28  ;;  %v6018_v24 = vpop.f32.mrb[245].mxu0  ;;  %v6404_v0 = vpop.f32.mrb[245].mxu1 }
 0x621   : > { %v14099_v39 = vadd.f32 %v6018_v24, %v18204_v51  ;;  %v14163_v55 = vadd.f32 %v6404_v0, %v18207_v40  ;;  %v6020_v3 = vpop.f32.mrb[246].mxu0  ;;  %v6406_v52 = vpop.f32.mrb[246].mxu1  ;;  %7565 = vmatprep.mubr.bf16.mxu0 %v6737_v10  ;;  %7951 = vmatprep.mubr.bf16.mxu1 %v6737_v10 }
 0x622   : > { %v14100_v45 = vadd.f32 %v6020_v3, %v18198_v15  ;;  %v14164_v17 = vadd.f32 %v6406_v52, %v18201_v28  ;;  %v6022_v43 = vpop.f32.mrb[247].mxu0  ;;  %v6408_v14 = vpop.f32.mrb[247].mxu1  ;;  %7566 = vmatmul.mubr.bf16.gmra.mrb[48].mxu0 %v6736_v30  ;;  %7952 = vmatmul.mubr.bf16.gmra.mrb[48].mxu1 %v6736_v30  ;;  %v6535_v32 = vmax.f32 %v14098_v31, 0.0  ;;  %v6537_v7 = vmax.f32 %v14162_v38, 0.0 }
 0x623   : > { %v14101_v23 = vadd.f32 %v6022_v43, %v18204_v51  ;;  %v14165_v18 = vadd.f32 %v6408_v14, %v18207_v40  ;;  %v6536_v53 = vmax.f32 %v14099_v39, 0.0  ;;  %v6538_v22 = vmax.f32 %v14163_v55, 0.0 }
 0x624   : > { %v6539_v54 = vmax.f32 %v14100_v45, 0.0  ;;  %v6541_v19 = vmax.f32 %v14164_v17, 0.0 }
 0x625   : > { %v6540_v12 = vmax.f32 %v14101_v23, 0.0  ;;  %v6542_v56 = vmax.f32 %v14165_v18, 0.0 }
 0x626   : > { %v6740_v5 = vpack.c.bf16 %v6539_v54, %v6535_v32  ;;  %v18373_v2 = vpack.c.bf16 %v6541_v19, %v6537_v7 }
 0x627   : > { %v6026_v33 = vpop.f32.mrb[248].mxu0  ;;  %v6412_v49 = vpop.f32.mrb[248].mxu1  ;;  %v6741_v35 = vpack.c.bf16 %v6540_v12, %v6536_v53  ;;  %v18375_v50 = vpack.c.bf16 %v6542_v56, %v6538_v22 }
 0x628   : > { %v14102_v30 = vadd.f32 %v6026_v33, %v18198_v15  ;;  %v14166_v10 = vadd.f32 %v6412_v49, %v18201_v28  ;;  %v6028_v31 = vpop.f32.mrb[249].mxu0  ;;  %v6414_v38 = vpop.f32.mrb[249].mxu1 }
 0x629   : > { %v14103_v24 = vadd.f32 %v6028_v31, %v18204_v51  ;;  %v14167_v0 = vadd.f32 %v6414_v38, %v18207_v40  ;;  %v6030_v39 = vpop.f32.mrb[250].mxu0  ;;  %v6416_v55 = vpop.f32.mrb[250].mxu1  ;;  %7575 = vmatprep.mubr.bf16.mxu0 %v6741_v35  ;;  %7961 = vmatprep.mubr.bf16.mxu1 %v6741_v35 }
 0x62a   : > { %v14104_v3 = vadd.f32 %v6030_v39, %v18198_v15  ;;  %v14168_v52 = vadd.f32 %v6416_v55, %v18201_v28  ;;  %v6032_v45 = vpop.f32.mrb[251].mxu0  ;;  %v6418_v17 = vpop.f32.mrb[251].mxu1  ;;  %7576 = vmatmul.mubr.bf16.gmra.mrb[52].mxu0 %v6740_v5  ;;  %7962 = vmatmul.mubr.bf16.gmra.mrb[52].mxu1 %v6740_v5  ;;  %v6543_v23 = vmax.f32 %v14102_v30, 0.0  ;;  %v6545_v18 = vmax.f32 %v14166_v10, 0.0 }
 0x62b   : > { %v14105_v43 = vadd.f32 %v6032_v45, %v18204_v51  ;;  %v14169_v14 = vadd.f32 %v6418_v17, %v18207_v40  ;;  %v6544_v54 = vmax.f32 %v14103_v24, 0.0  ;;  %v6546_v19 = vmax.f32 %v14167_v0, 0.0 }
 0x62c   : > { %v6547_v32 = vmax.f32 %v14104_v3, 0.0  ;;  %v6549_v7 = vmax.f32 %v14168_v52, 0.0 }
 0x62d   : > { %v6548_v53 = vmax.f32 %v14105_v43, 0.0  ;;  %v6550_v22 = vmax.f32 %v14169_v14, 0.0 }
 0x62e   : > { %v6744_v12 = vpack.c.bf16 %v6547_v32, %v6543_v23  ;;  %v18385_v56 = vpack.c.bf16 %v6549_v7, %v6545_v18 }
 0x62f   : > { %v6036_v33 = vpop.f32.mrb[252].mxu0  ;;  %v6422_v49 = vpop.f32.mrb[252].mxu1  ;;  %v6745_v35 = vpack.c.bf16 %v6548_v53, %v6544_v54  ;;  %v18387_v31 = vpack.c.bf16 %v6550_v22, %v6546_v19 }
 0x630   : > { %v14106_v5 = vadd.f32 %v6036_v33, %v18198_v15  ;;  %v14170_v38 = vadd.f32 %v6422_v49, %v18201_v28  ;;  %v6038_v30 = vpop.f32.mrb[253].mxu0  ;;  %v6424_v10 = vpop.f32.mrb[253].mxu1 }
 0x631   : > { %v14107_v39 = vadd.f32 %v6038_v30, %v18204_v51  ;;  %v14171_v24 = vadd.f32 %v6424_v10, %v18207_v40  ;;  %v6040_v0 = vpop.f32.mrb[254].mxu0  ;;  %v6426_v55 = vpop.f32.mrb[254].mxu1  ;;  %7585 = vmatprep.mubr.bf16.mxu0 %v6745_v35  ;;  %7971 = vmatprep.mubr.bf16.mxu1 %v6745_v35  ;;  %v16208_v35 = vld [vmem:[#allocation10 + $0x24] ss:$16 sps:$4 sm:$0xff]   ;;  %v16233_v30 = vld [vmem:[#allocation10 + $0x28] ss:$16 sps:$4 sm:$0xff]  }
 0x632   : > { %v14108_v3 = vadd.f32 %v6040_v0, %v18198_v15  ;;  %v14172_v52 = vadd.f32 %v6426_v55, %v18201_v28  ;;  %v6042_v45 = vpop.f32.mrb[255].mxu0  ;;  %v6428_v17 = vpop.f32.mrb[255].mxu1  ;;  %7586 = vmatmul.mubr.bf16.gmra.mrb[56].mxu0 %v6744_v12  ;;  %7972 = vmatmul.mubr.bf16.gmra.mrb[56].mxu1 %v6744_v12  ;;  %v6551_v23 = vmax.f32 %v14106_v5, 0.0  ;;  %v6553_v18 = vmax.f32 %v14170_v38, 0.0  ;;  %v16230_v12 = vld [vmem:[#allocation10 + $0x8] ss:$16 sps:$4 sm:$0xff]  }
 0x633   : > { %v14109_v43 = vadd.f32 %v6042_v45, %v18204_v51  ;;  %v14173_v14 = vadd.f32 %v6428_v17, %v18207_v40  ;;  %v6552_v54 = vmax.f32 %v14107_v39, 0.0  ;;  %v6554_v19 = vmax.f32 %v14171_v24, 0.0  ;;  %v16232_v51 = vld [vmem:[#allocation10 + $0xc] ss:$16 sps:$4 sm:$0xff]   ;;  %v16203_v40 = vld [vmem:[#allocation10] ss:$16 sps:$4 sm:$0xff]  }
 0x634   : > { %v6555_v32 = vmax.f32 %v14108_v3, 0.0  ;;  %v6557_v7 = vmax.f32 %v14172_v52, 0.0  ;;  %9553 = vmatprep.subr.bf16.mxu1 %v16232_v51  ;;  %v16235_v5 = vld [vmem:[#allocation10 + $0x2c] ss:$16 sps:$4 sm:$0xff]   ;;  %v16206_v38 = vld [vmem:[#allocation10 + $0x20] ss:$16 sps:$4 sm:$0xff]  }
 0x635   : > { %v6556_v53 = vmax.f32 %v14109_v43, 0.0  ;;  %v6558_v22 = vmax.f32 %v14173_v14, 0.0  ;;  %v16241_v10 = vld [vmem:[#allocation10 + $0x4c] ss:$16 sps:$4 sm:$0xff]   ;;  %v16209_v39 = vld [vmem:[#allocation10 + $0x40] ss:$16 sps:$4 sm:$0xff]  }
 0x636   : > { %v6748_v33 = vpack.c.bf16 %v6555_v32, %v6551_v23  ;;  %v18397_v15 = vpack.c.bf16 %v6557_v7, %v6553_v18  ;;  %v16239_v24 = vld [vmem:[#allocation10 + $0x48] ss:$16 sps:$4 sm:$0xff]   ;;  %v16214_v0 = vld [vmem:[#allocation10 + $0x64] ss:$16 sps:$4 sm:$0xff]   ;;  %v16250_v52 = vld [vmem:[#allocation10 + $0x8c] ss:$16 sps:$4 sm:$0xff]  }
 0x637   : > { %v6749_v28 = vpack.c.bf16 %v6556_v53, %v6552_v54  ;;  %v18399_v49 = vpack.c.bf16 %v6558_v22, %v6554_v19  ;;  %v16242_v55 = vld [vmem:[#allocation10 + $0x68] ss:$16 sps:$4 sm:$0xff]   ;;  %v16217_v3 = vld [vmem:[#allocation10 + $0x84] ss:$16 sps:$4 sm:$0xff]   ;;  %v16215_v45 = vld [vmem:[#allocation10 + $0x80] ss:$16 sps:$4 sm:$0xff]  }
 0x638   : > { %v16248_v17 = vld [vmem:[#allocation10 + $0x88] ss:$16 sps:$4 sm:$0xff]   ;;  %v16220_v43 = vld [vmem:[#allocation10 + $0xa4] ss:$16 sps:$4 sm:$0xff]   ;;  %v16259_v18 = vld [vmem:[#allocation10 + $0xcc] ss:$16 sps:$4 sm:$0xff]  }
 0x639   : > { %7595 = vmatprep.mubr.bf16.mxu0 %v6749_v28  ;;  %7981 = vmatprep.mubr.bf16.mxu1 %v6749_v28  ;;  %v16251_v14 = vld [vmem:[#allocation10 + $0xa8] ss:$16 sps:$4 sm:$0xff]   ;;  %v16223_v23 = vld [vmem:[#allocation10 + $0xc4] ss:$16 sps:$4 sm:$0xff]   ;;  %v16221_v32 = vld [vmem:[#allocation10 + $0xc0] ss:$16 sps:$4 sm:$0xff]  }
 0x63a   : > { %7596 = vmatmul.mubr.bf16.gmra.mrb[60].mxu0 %v6748_v33  ;;  %7982 = vmatmul.mubr.bf16.gmra.mrb[60].mxu1 %v6748_v33  ;;  %v16257_v7 = vld [vmem:[#allocation10 + $0xc8] ss:$16 sps:$4 sm:$0xff]   ;;  %v16226_v54 = vld [vmem:[#allocation10 + $0xe4] ss:$16 sps:$4 sm:$0xff]   ;;  %v16268_v22 = vld [vmem:[#allocation10 + $0x10c] ss:$16 sps:$4 sm:$0xff]  }
 0x63b   : > { %7638 = vmatprep.mubr.bf16.mxu0 %v18219_v63  ;;  %8024 = vmatprep.mubr.bf16.mxu1 %v18219_v63  ;;  %v16211_v63 = vld [vmem:[#allocation10 + $0x44] ss:$16 sps:$4 sm:$0xff]   ;;  %v16260_v19 = vld [vmem:[#allocation10 + $0xe8] ss:$16 sps:$4 sm:$0xff]   ;;  %v16227_v33 = vld [vmem:[#allocation10 + $0x100] ss:$16 sps:$4 sm:$0xff]  }
 0x63c   : > { %v16229_v53 = vld [vmem:[#allocation10 + $0x104] ss:$16 sps:$4 sm:$0xff]   ;;  %v16266_v28 = vld [vmem:[#allocation10 + $0x108] ss:$16 sps:$4 sm:$0xff]  }
 0x63d   : > { %v16238_v51 = vld [vmem:[#allocation10 + $0x124] ss:$16 sps:$4 sm:$0xff]  }
 0x642   : > { %7639 = vmatmul.mubr.bf16.vlgmr.msra.gmra.mrb[0].mxu0 %v18217_v13  ;;  %8025 = vmatmul.mubr.bf16.vlgmr.msra.gmra.mrb[0].mxu1 %v18217_v13  ;;  %v16244_v13 = vld [vmem:[#allocation10 + $0x6c] ss:$16 sps:$4 sm:$0xff]  }
 0x643   : > { %7648 = vmatprep.mubr.bf16.mxu0 %v18231_v26  ;;  %8034 = vmatprep.mubr.bf16.mxu1 %v18231_v26  ;;  %v16212_v26 = vld [vmem:[#allocation10 + $0x60] ss:$16 sps:$4 sm:$0xff]  }
 0x644   : > { %9168 = vmatpush1.bf16.msra.mxu0 %v16203_v40  ;;  %9554 = vmatpush1.bf16.msra.mxu1 %v16230_v12  ;;  %v16269_v40 = vld [vmem:[#allocation10 + $0x128] ss:$16 sps:$4 sm:$0xff]   ;;  %v16247_v12 = vld [vmem:[#allocation10 + $0x144] ss:$16 sps:$4 sm:$0xff]  }
 0x645   : > { %9169 = vmatprep.subr.bf16.mxu0 %v16208_v35  ;;  %9555 = vmatprep.subr.bf16.mxu1 %v16235_v5  ;;  %v16277_v35 = vld [vmem:[#allocation10 + $0x14c] ss:$16 sps:$4 sm:$0xff]   ;;  %v16245_v5 = vld [vmem:[#allocation10 + $0x140] ss:$16 sps:$4 sm:$0xff]  }
 0x648   : > { %9170 = vmatpush1.bf16.msra.mxu0 %v16206_v38  ;;  %9556 = vmatpush1.bf16.msra.mxu1 %v16233_v30  ;;  %v16275_v38 = vld [vmem:[#allocation10 + $0x148] ss:$16 sps:$4 sm:$0xff]   ;;  %v16256_v30 = vld [vmem:[#allocation10 + $0x164] ss:$16 sps:$4 sm:$0xff]  }
 0x649   : > { %9171 = vmatprep.subr.bf16.mxu0 %v16211_v63  ;;  %9557 = vmatprep.subr.bf16.mxu1 %v16241_v10  ;;  %v16278_v63 = vld [vmem:[#allocation10 + $0x168] ss:$16 sps:$4 sm:$0xff]   ;;  %v16265_v10 = vld [vmem:[#allocation10 + $0x184] ss:$16 sps:$4 sm:$0xff]  }
 0x64a   : > { %7649 = vmatmul.mubr.bf16.gmra.mrb[4].mxu0 %v18229_v57  ;;  %8035 = vmatmul.mubr.bf16.gmra.mrb[4].mxu1 %v18229_v57  ;;  %v16253_v57 = vld [vmem:[#allocation10 + $0xac] ss:$16 sps:$4 sm:$0xff]  }
 0x64b   : > { %7658 = vmatprep.mubr.bf16.mxu0 %v18243_v25  ;;  %8044 = vmatprep.mubr.bf16.mxu1 %v18243_v25  ;;  %v16218_v25 = vld [vmem:[#allocation10 + $0xa0] ss:$16 sps:$4 sm:$0xff]  }
 0x64c   : > { %9172 = vmatpush1.bf16.msra.mxu0 %v16209_v39  ;;  %9558 = vmatpush1.bf16.msra.mxu1 %v16239_v24  ;;  %v16286_v39 = vld [vmem:[#allocation10 + $0x18c] ss:$16 sps:$4 sm:$0xff]   ;;  %v16263_v24 = vld [vmem:[#allocation10 + $0x180] ss:$16 sps:$4 sm:$0xff]  }
 0x64d   : > { %9173 = vmatprep.subr.bf16.mxu0 %v16214_v0  ;;  %9559 = vmatprep.subr.bf16.mxu1 %v16244_v13  ;;  %v16284_v0 = vld [vmem:[#allocation10 + $0x188] ss:$16 sps:$4 sm:$0xff]   ;;  %v16274_v13 = vld [vmem:[#allocation10 + $0x1a4] ss:$16 sps:$4 sm:$0xff]  }
 0x650   : > { %9174 = vmatpush1.bf16.msra.mxu0 %v16212_v26  ;;  %9560 = vmatpush1.bf16.msra.mxu1 %v16242_v55  ;;  %v16287_v26 = vld [vmem:[#allocation10 + $0x1a8] ss:$16 sps:$4 sm:$0xff]   ;;  %v16283_v55 = vld [vmem:[#allocation10 + $0x1c4] ss:$16 sps:$4 sm:$0xff]  }
 0x651   : > { %9175 = vmatprep.subr.bf16.mxu0 %v16217_v3  ;;  %9561 = vmatprep.subr.bf16.mxu1 %v16250_v52  ;;  %v16281_v3 = vld [vmem:[#allocation10 + $0x1c0] ss:$16 sps:$4 sm:$0xff]  }
 0x652   : > { %7659 = vmatmul.mubr.bf16.gmra.mrb[8].mxu0 %v18241_v20  ;;  %8045 = vmatmul.mubr.bf16.gmra.mrb[8].mxu1 %v18241_v20  ;;  %v16262_v20 = vld [vmem:[#allocation10 + $0xec] ss:$16 sps:$4 sm:$0xff]  }
 0x653   : > { %7668 = vmatprep.mubr.bf16.mxu0 %v18255_v60  ;;  %8054 = vmatprep.mubr.bf16.mxu1 %v18255_v60  ;;  %v16224_v60 = vld [vmem:[#allocation10 + $0xe0] ss:$16 sps:$4 sm:$0xff]  }
 0x654   : > { %9176 = vmatpush1.bf16.msra.mxu0 %v16215_v45  ;;  %9562 = vmatpush1.bf16.msra.mxu1 %v16248_v17 }
 0x655   : > { %9177 = vmatprep.subr.bf16.mxu0 %v16220_v43  ;;  %9563 = vmatprep.subr.bf16.mxu1 %v16253_v57 }
 0x658   : > { %9178 = vmatpush1.bf16.msra.mxu0 %v16218_v25  ;;  %9564 = vmatpush1.bf16.msra.mxu1 %v16251_v14 }
 0x659   : > { %9179 = vmatprep.subr.bf16.mxu0 %v16223_v23  ;;  %9565 = vmatprep.subr.bf16.mxu1 %v16259_v18 }
 0x65a   : > { %7669 = vmatmul.mubr.bf16.gmra.mrb[12].mxu0 %v18253_v59  ;;  %8055 = vmatmul.mubr.bf16.gmra.mrb[12].mxu1 %v18253_v59  ;;  %v16271_v59 = vld [vmem:[#allocation10 + $0x12c] ss:$16 sps:$4 sm:$0xff]  }
 0x65b   : > { %7678 = vmatprep.mubr.bf16.mxu0 %v18267_v37  ;;  %8064 = vmatprep.mubr.bf16.mxu1 %v18267_v37  ;;  %v16236_v37 = vld [vmem:[#allocation10 + $0x120] ss:$16 sps:$4 sm:$0xff]  }
 0x65c   : > { %9180 = vmatpush1.bf16.msra.mxu0 %v16221_v32  ;;  %9566 = vmatpush1.bf16.msra.mxu1 %v16257_v7 }
 0x65d   : > { %9181 = vmatprep.subr.bf16.mxu0 %v16226_v54  ;;  %9567 = vmatprep.subr.bf16.mxu1 %v16262_v20 }
 0x660   : > { %9182 = vmatpush1.bf16.msra.mxu0 %v16224_v60  ;;  %9568 = vmatpush1.bf16.msra.mxu1 %v16260_v19 }
 0x661   : > { %9183 = vmatprep.subr.bf16.mxu0 %v16229_v53  ;;  %9569 = vmatprep.subr.bf16.mxu1 %v16268_v22 }
 0x662   : > { %7679 = vmatmul.mubr.bf16.gmra.mrb[16].mxu0 %v18265_v61  ;;  %8065 = vmatmul.mubr.bf16.gmra.mrb[16].mxu1 %v18265_v61  ;;  %v16280_v61 = vld [vmem:[#allocation10 + $0x16c] ss:$16 sps:$4 sm:$0xff]  }
 0x663   : > { %7688 = vmatprep.mubr.bf16.mxu0 %v18279_v29  ;;  %8074 = vmatprep.mubr.bf16.mxu1 %v18279_v29  ;;  %v16254_v29 = vld [vmem:[#allocation10 + $0x160] ss:$16 sps:$4 sm:$0xff]  }
 0x664   : > { %9184 = vmatpush1.bf16.msra.mxu0 %v16227_v33  ;;  %9570 = vmatpush1.bf16.msra.mxu1 %v16266_v28 }
 0x665   : > { %9185 = vmatprep.subr.bf16.mxu0 %v16238_v51  ;;  %9571 = vmatprep.subr.bf16.mxu1 %v16271_v59 }
 0x668   : > { %9186 = vmatpush1.bf16.msra.mxu0 %v16236_v37  ;;  %9572 = vmatpush1.bf16.msra.mxu1 %v16269_v40 }
 0x669   : > { %9187 = vmatprep.subr.bf16.mxu0 %v16247_v12  ;;  %9573 = vmatprep.subr.bf16.mxu1 %v16277_v35  ;;  %v16299_v35 = vld [vmem:[#allocation10 + $0x200] ss:$16 sps:$4 sm:$0xff]  }
 0x66a   : > { %7689 = vmatmul.mubr.bf16.gmra.mrb[20].mxu0 %v18277_v47  ;;  %8075 = vmatmul.mubr.bf16.gmra.mrb[20].mxu1 %v18277_v47  ;;  %v16289_v47 = vld [vmem:[#allocation10 + $0x1ac] ss:$16 sps:$4 sm:$0xff]  }
 0x66b   : > { %7698 = vmatprep.mubr.bf16.mxu0 %v18291_v27  ;;  %8084 = vmatprep.mubr.bf16.mxu1 %v18291_v27  ;;  %v16272_v27 = vld [vmem:[#allocation10 + $0x1a0] ss:$16 sps:$4 sm:$0xff]  }
 0x66c   : > { %9188 = vmatpush1.bf16.msra.mxu0 %v16245_v5  ;;  %9574 = vmatpush1.bf16.msra.mxu1 %v16275_v38  ;;  %v16326_v5 = vld [vmem:[#allocation10 + $0x208] ss:$16 sps:$4 sm:$0xff]  }
 0x66d   : > { %9189 = vmatprep.subr.bf16.mxu0 %v16256_v30  ;;  %9575 = vmatprep.subr.bf16.mxu1 %v16280_v61 }
 0x670   : > { %9190 = vmatpush1.bf16.msra.mxu0 %v16254_v29  ;;  %9576 = vmatpush1.bf16.msra.mxu1 %v16278_v63  ;;  %v16304_v63 = vld [vmem:[#allocation10 + $0x224] ss:$16 sps:$4 sm:$0xff]  }
 0x671   : > { %9191 = vmatprep.subr.bf16.mxu0 %v16265_v10  ;;  %9577 = vmatprep.subr.bf16.mxu1 %v16286_v39  ;;  %v16331_v10 = vld [vmem:[#allocation10 + $0x22c] ss:$16 sps:$4 sm:$0xff]  }
 0x672   : > { %7699 = vmatmul.mubr.bf16.gmra.mrb[24].mxu0 %v18289_v46  ;;  %8085 = vmatmul.mubr.bf16.gmra.mrb[24].mxu1 %v18289_v46  ;;  %v16295_v46 = vld [vmem:[#allocation10 + $0x1cc] ss:$16 sps:$4 sm:$0xff]  }
 0x673   : > { %7708 = vmatprep.mubr.bf16.mxu0 %v18303_v44  ;;  %8094 = vmatprep.mubr.bf16.mxu1 %v18303_v44  ;;  %v16292_v44 = vld [vmem:[#allocation10 + $0x1e4] ss:$16 sps:$4 sm:$0xff]  }
 0x674   : > { %9192 = vmatpush1.bf16.msra.mxu0 %v16263_v24  ;;  %9578 = vmatpush1.bf16.msra.mxu1 %v16284_v0 }
 0x675   : > { %9193 = vmatprep.subr.bf16.mxu0 %v16274_v13  ;;  %9579 = vmatprep.subr.bf16.mxu1 %v16289_v47 }
 0x678   : > { %9194 = vmatpush1.bf16.msra.mxu0 %v16272_v27  ;;  %9580 = vmatpush1.bf16.msra.mxu1 %v16287_v26 }
 0x679   : > { %9195 = vmatprep.subr.bf16.mxu0 %v16283_v55  ;;  %9581 = vmatprep.subr.bf16.mxu1 %v16295_v46 }
 0x67a   : > { %7709 = vmatmul.mubr.bf16.gmra.mrb[28].mxu0 %v18301_v42  ;;  %8095 = vmatmul.mubr.bf16.gmra.mrb[28].mxu1 %v18301_v42  ;;  %v16293_v42 = vld [vmem:[#allocation10 + $0x1c8] ss:$16 sps:$4 sm:$0xff]  }
 0x67b   : > { %7718 = vmatprep.mubr.bf16.mxu0 %v18315_v36  ;;  %8104 = vmatprep.mubr.bf16.mxu1 %v18315_v36  ;;  %v16290_v36 = vld [vmem:[#allocation10 + $0x1e0] ss:$16 sps:$4 sm:$0xff]  }
 0x67c   : > { %9196 = vmatpush1.bf16.msra.mxu0 %v16281_v3  ;;  %9582 = vmatpush1.bf16.msra.mxu1 %v16293_v42  ;;  %v16302_v42 = vld [vmem:[#allocation10 + $0x220] ss:$16 sps:$4 sm:$0xff]  }
 0x67d   : > { %9197 = vmatprep.subr.bf16.mxu0 %v16292_v44  ;;  %v16307_v44 = vld [vmem:[#allocation10 + $0x244] ss:$16 sps:$4 sm:$0xff]  }
 0x680   : > { %9198 = vmatpush1.bf16.msra.mxu0 %v16290_v36 }
 0x682   : > { %7719 = vmatmul.mubr.bf16.gmra.mrb[32].mxu0 %v18313_v8  ;;  %8105 = vmatmul.mubr.bf16.gmra.mrb[32].mxu1 %v18313_v8  ;;  %v16298_v8 = vld [vmem:[#allocation10 + $0x1ec] ss:$16 sps:$4 sm:$0xff]  }
 0x683   : > { %7728 = vmatprep.mubr.bf16.mxu0 %v18327_v16  ;;  %8114 = vmatprep.mubr.bf16.mxu1 %v18327_v16  ;;  %v16301_v16 = vld [vmem:[#allocation10 + $0x204] ss:$16 sps:$4 sm:$0xff]  }
 0x684   : > { %9583 = vmatprep.subr.bf16.mxu1 %v16298_v8  ;;  %9360 = vmatprep.subr.bf16.mxu0 %v16301_v16  ;;  %v16329_v8 = vld [vmem:[#allocation10 + $0x228] ss:$16 sps:$4 sm:$0xff]  }
 0x68a   : > { %7729 = vmatmul.mubr.bf16.gmra.mrb[36].mxu0 %v18325_v48  ;;  %8115 = vmatmul.mubr.bf16.gmra.mrb[36].mxu1 %v18325_v48  ;;  %v16296_v48 = vld [vmem:[#allocation10 + $0x1e8] ss:$16 sps:$4 sm:$0xff]  }
 0x68b   : > { %7738 = vmatprep.mubr.bf16.mxu0 %v18339_v58  ;;  %8124 = vmatprep.mubr.bf16.mxu1 %v18339_v58  ;;  %v6687_v58 = vld [vmem:[%s19382_s10] sm:$0xf] }
 0x68c   : > { %9584 = vmatpush1.bf16.msra.mxu1 %v16296_v48 }
 0x692   : > { %7739 = vmatmul.mubr.bf16.gmra.mrb[40].mxu0 %v18337_v11  ;;  %8125 = vmatmul.mubr.bf16.gmra.mrb[40].mxu1 %v18337_v11  ;;  %v16328_v11 = vld [vmem:[#allocation10 + $0x20c] ss:$16 sps:$4 sm:$0xff]  }
 0x693   : > { %7748 = vmatprep.mubr.bf16.mxu0 %v18351_v41  ;;  %8134 = vmatprep.mubr.bf16.mxu1 %v18351_v41  ;;  %v18472_v41 = vrot.slane %v6687_v58, %v17387_v6 }
 0x694   : > { %9746 = vmatprep.subr.bf16.mxu1 %v16328_v11 }
 0x69a   : > { %7749 = vmatmul.mubr.bf16.gmra.mrb[44].mxu0 %v18349_v4  ;;  %8135 = vmatmul.mubr.bf16.gmra.mrb[44].mxu1 %v18349_v4  ;;  %v18469_v4 = vrot.slane %v6687_v58, %v17373_v62 }
 0x69b   : > { %7758 = vmatprep.mubr.bf16.mxu0 %v18363_v21  ;;  %8144 = vmatprep.mubr.bf16.mxu1 %v18363_v21  ;;  %v18478_v21 = vrot.slane %v6687_v58, %v17390_v9 }
 0x6a2   : > { %7759 = vmatmul.mubr.bf16.gmra.mrb[48].mxu0 %v18361_v34  ;;  %8145 = vmatmul.mubr.bf16.gmra.mrb[48].mxu1 %v18361_v34  ;;  %v18475_v34 = vrot.slane %v6687_v58, %v17378_v1  ;;  %v16337_v58 = vld [vmem:[#allocation10 + $0x24c] ss:$16 sps:$4 sm:$0xff]  }
 0x6a3   : > { %7768 = vmatprep.mubr.bf16.mxu0 %v18375_v50  ;;  %8154 = vmatprep.mubr.bf16.mxu1 %v18375_v50 }
 0x6aa   : > { %7769 = vmatmul.mubr.bf16.gmra.mrb[52].mxu0 %v18373_v2  ;;  %8155 = vmatmul.mubr.bf16.gmra.mrb[52].mxu1 %v18373_v2 }
 0x6ab   : > { %7778 = vmatprep.mubr.bf16.mxu0 %v18387_v31  ;;  %8164 = vmatprep.mubr.bf16.mxu1 %v18387_v31 }
 0x6b2   : > { %7779 = vmatmul.mubr.bf16.gmra.mrb[56].mxu0 %v18385_v56  ;;  %8165 = vmatmul.mubr.bf16.gmra.mrb[56].mxu1 %v18385_v56 }
 0x6b3   : > { %7788 = vmatprep.mubr.bf16.mxu0 %v18399_v49  ;;  %8174 = vmatprep.mubr.bf16.mxu1 %v18399_v49 }
 0x6ba   : > { %7789 = vmatmul.mubr.bf16.gmra.mrb[60].mxu0 %v18397_v15  ;;  %8175 = vmatmul.mubr.bf16.gmra.mrb[60].mxu1 %v18397_v15 }
 0x715   : > { %v7640_v2 = vpop.f32.mrb[0].mxu0  ;;  %v8026_v50 = vpop.f32.mrb[0].mxu1 }
 0x716   : > { %v14174_v56 = vadd.f32 %v7640_v2, %v18469_v4  ;;  %v14238_v31 = vadd.f32 %v8026_v50, %v18472_v41  ;;  %v7642_v15 = vpop.f32.mrb[1].mxu0  ;;  %v8028_v49 = vpop.f32.mrb[1].mxu1 }
 0x717   : > { %v14175_v52 = vadd.f32 %v7642_v15, %v18475_v34  ;;  %v14239_v45 = vadd.f32 %v8028_v49, %v18478_v21  ;;  %v7644_v17 = vpop.f32.mrb[2].mxu0  ;;  %v8030_v43 = vpop.f32.mrb[2].mxu1 }
 0x718   : > { %v14176_v57 = vadd.f32 %v7644_v17, %v18469_v4  ;;  %v14240_v25 = vadd.f32 %v8030_v43, %v18472_v41  ;;  %v7646_v14 = vpop.f32.mrb[3].mxu0  ;;  %v8032_v23 = vpop.f32.mrb[3].mxu1  ;;  %v8185_v7 = vmax.f32 %v14174_v56, 0.0  ;;  %v8187_v54 = vmax.f32 %v14238_v31, 0.0 }
 0x719   : > { %v14177_v18 = vadd.f32 %v7646_v14, %v18475_v34  ;;  %v14241_v32 = vadd.f32 %v8032_v23, %v18478_v21  ;;  %v8186_v19 = vmax.f32 %v14175_v52, 0.0  ;;  %v8188_v53 = vmax.f32 %v14239_v45, 0.0 }
 0x71a   : > { %v8189_v20 = vmax.f32 %v14176_v57, 0.0  ;;  %v8191_v60 = vmax.f32 %v14240_v25, 0.0  ;;  %v16305_v57 = vld [vmem:[#allocation10 + $0x240] ss:$16 sps:$4 sm:$0xff]   ;;  %v16335_v25 = vld [vmem:[#allocation10 + $0x248] ss:$16 sps:$4 sm:$0xff]  }
 0x71b   : > { %v8190_v22 = vmax.f32 %v14177_v18, 0.0  ;;  %v8192_v33 = vmax.f32 %v14241_v32, 0.0 }
 0x71c   : > { %v8442_v28 = vpack.c.bf16 %v8189_v20, %v8185_v7  ;;  %v18488_v51 = vpack.c.bf16 %v8191_v60, %v8187_v54  ;;  %v16310_v7 = vld [vmem:[#allocation10 + $0x264] ss:$16 sps:$4 sm:$0xff]   ;;  %v16340_v54 = vld [vmem:[#allocation10 + $0x26c] ss:$16 sps:$4 sm:$0xff]  }
 0x71d   : > { %v8443_v59 = vpack.c.bf16 %v8190_v22, %v8186_v19  ;;  %v18490_v37 = vpack.c.bf16 %v8192_v33, %v8188_v53  ;;  %v7650_v40 = vpop.f32.mrb[4].mxu0  ;;  %v8036_v12 = vpop.f32.mrb[4].mxu1 }
 0x71e   : > { %v14178_v38 = vadd.f32 %v7650_v40, %v18469_v4  ;;  %v14242_v30 = vadd.f32 %v8036_v12, %v18472_v41  ;;  %v7652_v61 = vpop.f32.mrb[5].mxu0  ;;  %v8038_v29 = vpop.f32.mrb[5].mxu1 }
 0x71f   : > { %v14179_v39 = vadd.f32 %v7652_v61, %v18475_v34  ;;  %v14243_v24 = vadd.f32 %v8038_v29, %v18478_v21  ;;  %v7654_v0 = vpop.f32.mrb[6].mxu0  ;;  %v8040_v13 = vpop.f32.mrb[6].mxu1  ;;  %9199 = vmatprep.mubr.bf16.mxu0 %v8443_v59  ;;  %9585 = vmatprep.mubr.bf16.mxu1 %v8443_v59 }
 0x720   : > { %v14180_v47 = vadd.f32 %v7654_v0, %v18469_v4  ;;  %v14244_v27 = vadd.f32 %v8040_v13, %v18472_v41  ;;  %v7656_v26 = vpop.f32.mrb[7].mxu0  ;;  %v8042_v55 = vpop.f32.mrb[7].mxu1  ;;  %9200 = vmatmul.mubr.bf16.vlgmr.msra.gmra.mrb[64].mxu0 %v8442_v28  ;;  %9586 = vmatmul.mubr.bf16.vlgmr.msra.gmra.mrb[64].mxu1 %v8442_v28  ;;  %v8193_v36 = vmax.f32 %v14178_v38, 0.0  ;;  %v8195_v48 = vmax.f32 %v14242_v30, 0.0  ;;  %v16338_v38 = vld [vmem:[#allocation10 + $0x268] ss:$16 sps:$4 sm:$0xff]  }
 0x721   : > { %v14181_v3 = vadd.f32 %v7656_v26, %v18475_v34  ;;  %v14245_v46 = vadd.f32 %v8042_v55, %v18478_v21  ;;  %9361 = vmatpush1.bf16.msra.mxu0 %v16299_v35  ;;  %9747 = vmatpush1.bf16.msra.mxu1 %v16326_v5  ;;  %v8194_v2 = vmax.f32 %v14179_v39, 0.0  ;;  %v8196_v50 = vmax.f32 %v14243_v24, 0.0  ;;  %v16308_v35 = vld [vmem:[#allocation10 + $0x260] ss:$16 sps:$4 sm:$0xff]   ;;  %v16313_v5 = vld [vmem:[#allocation10 + $0x284] ss:$16 sps:$4 sm:$0xff]  }
 0x722   : > { %v8197_v16 = vmax.f32 %v14180_v47, 0.0  ;;  %v8199_v11 = vmax.f32 %v14244_v27, 0.0  ;;  %9362 = vmatprep.subr.bf16.mxu0 %v16304_v63  ;;  %9748 = vmatprep.subr.bf16.mxu1 %v16331_v10  ;;  %v16346_v10 = vld [vmem:[#allocation10 + $0x28c] ss:$16 sps:$4 sm:$0xff]  }
 0x723   : > { %v8198_v56 = vmax.f32 %v14181_v3, 0.0  ;;  %v8200_v31 = vmax.f32 %v14245_v46, 0.0 }
 0x724   : > { %v8446_v15 = vpack.c.bf16 %v8197_v16, %v8193_v36  ;;  %v18500_v49 = vpack.c.bf16 %v8199_v11, %v8195_v48  ;;  %v16316_v11 = vld [vmem:[#allocation10 + $0x2a4] ss:$16 sps:$4 sm:$0xff]  }
 0x725   : > { %v8447_v52 = vpack.c.bf16 %v8198_v56, %v8194_v2  ;;  %v18502_v45 = vpack.c.bf16 %v8200_v31, %v8196_v50  ;;  %v7660_v17 = vpop.f32.mrb[8].mxu0  ;;  %v8046_v43 = vpop.f32.mrb[8].mxu1  ;;  %9363 = vmatpush1.bf16.msra.mxu0 %v16302_v42  ;;  %9749 = vmatpush1.bf16.msra.mxu1 %v16329_v8  ;;  %v16311_v42 = vld [vmem:[#allocation10 + $0x280] ss:$16 sps:$4 sm:$0xff]  }
 0x726   : > { %v14182_v14 = vadd.f32 %v7660_v17, %v18469_v4  ;;  %v14246_v23 = vadd.f32 %v8046_v43, %v18472_v41  ;;  %v7662_v18 = vpop.f32.mrb[9].mxu0  ;;  %v8048_v32 = vpop.f32.mrb[9].mxu1  ;;  %9364 = vmatprep.subr.bf16.mxu0 %v16307_v44  ;;  %9750 = vmatprep.subr.bf16.mxu1 %v16337_v58  ;;  %v16344_v44 = vld [vmem:[#allocation10 + $0x288] ss:$16 sps:$4 sm:$0xff]   ;;  %v16349_v58 = vld [vmem:[#allocation10 + $0x2ac] ss:$16 sps:$4 sm:$0xff]  }
 0x727   : > { %v14183_v20 = vadd.f32 %v7662_v18, %v18475_v34  ;;  %v14247_v60 = vadd.f32 %v8048_v32, %v18478_v21  ;;  %v7664_v19 = vpop.f32.mrb[10].mxu0  ;;  %v8050_v53 = vpop.f32.mrb[10].mxu1  ;;  %9209 = vmatprep.mubr.bf16.mxu0 %v8447_v52  ;;  %9595 = vmatprep.mubr.bf16.mxu1 %v8447_v52  ;;  %v16347_v18 = vld [vmem:[#allocation10 + $0x2a8] ss:$16 sps:$4 sm:$0xff]  }
 0x728   : > { %v14184_v22 = vadd.f32 %v7664_v19, %v18469_v4  ;;  %v14248_v33 = vadd.f32 %v8050_v53, %v18472_v41  ;;  %v7666_v28 = vpop.f32.mrb[11].mxu0  ;;  %v8052_v59 = vpop.f32.mrb[11].mxu1  ;;  %9210 = vmatmul.mubr.bf16.gmra.mrb[68].mxu0 %v8446_v15  ;;  %9596 = vmatmul.mubr.bf16.gmra.mrb[68].mxu1 %v8446_v15  ;;  %v8201_v30 = vmax.f32 %v14182_v14, 0.0  ;;  %v8203_v61 = vmax.f32 %v14246_v23, 0.0  ;;  %v16314_v14 = vld [vmem:[#allocation10 + $0x2a0] ss:$16 sps:$4 sm:$0xff]  }
 0x729   : > { %v14185_v40 = vadd.f32 %v7666_v28, %v18475_v34  ;;  %v14249_v12 = vadd.f32 %v8052_v59, %v18478_v21  ;;  %9365 = vmatpush1.bf16.msra.mxu0 %v16305_v57  ;;  %9751 = vmatpush1.bf16.msra.mxu1 %v16335_v25  ;;  %v8202_v39 = vmax.f32 %v14183_v20, 0.0  ;;  %v8204_v24 = vmax.f32 %v14247_v60, 0.0  ;;  %v16319_v23 = vld [vmem:[#allocation10 + $0x2c4] ss:$16 sps:$4 sm:$0xff]   ;;  %v16355_v60 = vld [vmem:[#allocation10 + $0x2cc] ss:$16 sps:$4 sm:$0xff]  }
 0x72a   : > { %v8205_v29 = vmax.f32 %v14184_v22, 0.0  ;;  %v8207_v63 = vmax.f32 %v14248_v33, 0.0  ;;  %9366 = vmatprep.subr.bf16.mxu0 %v16310_v7  ;;  %9752 = vmatprep.subr.bf16.mxu1 %v16340_v54 }
 0x72b   : > { %v8206_v0 = vmax.f32 %v14185_v40, 0.0  ;;  %v8208_v13 = vmax.f32 %v14249_v12, 0.0 }
 0x72c   : > { %v8450_v47 = vpack.c.bf16 %v8205_v29, %v8201_v30  ;;  %v18512_v27 = vpack.c.bf16 %v8207_v63, %v8203_v61  ;;  %v16353_v30 = vld [vmem:[#allocation10 + $0x2c8] ss:$16 sps:$4 sm:$0xff]  }
 0x72d   : > { %v8451_v26 = vpack.c.bf16 %v8206_v0, %v8202_v39  ;;  %v18514_v55 = vpack.c.bf16 %v8208_v13, %v8204_v24  ;;  %v7670_v3 = vpop.f32.mrb[12].mxu0  ;;  %v8056_v46 = vpop.f32.mrb[12].mxu1  ;;  %9367 = vmatpush1.bf16.msra.mxu0 %v16308_v35  ;;  %9753 = vmatpush1.bf16.msra.mxu1 %v16338_v38  ;;  %v16317_v38 = vld [vmem:[#allocation10 + $0x2c0] ss:$16 sps:$4 sm:$0xff]   ;;  %v16322_v39 = vld [vmem:[#allocation10 + $0x2e4] ss:$16 sps:$4 sm:$0xff]  }
 0x72e   : > { %v14186_v8 = vadd.f32 %v7670_v3, %v18469_v4  ;;  %v14250_v36 = vadd.f32 %v8056_v46, %v18472_v41  ;;  %v7672_v48 = vpop.f32.mrb[13].mxu0  ;;  %v8058_v16 = vpop.f32.mrb[13].mxu1  ;;  %9368 = vmatprep.subr.bf16.mxu0 %v16313_v5  ;;  %9754 = vmatprep.subr.bf16.mxu1 %v16346_v10  ;;  %v16358_v24 = vld [vmem:[#allocation10 + $0x2ec] ss:$16 sps:$4 sm:$0xff]  }
 0x72f   : > { %v14187_v2 = vadd.f32 %v7672_v48, %v18475_v34  ;;  %v14251_v50 = vadd.f32 %v8058_v16, %v18478_v21  ;;  %v7674_v56 = vpop.f32.mrb[14].mxu0  ;;  %v8060_v31 = vpop.f32.mrb[14].mxu1  ;;  %9219 = vmatprep.mubr.bf16.mxu0 %v8451_v26  ;;  %9605 = vmatprep.mubr.bf16.mxu1 %v8451_v26  ;;  %v16320_v48 = vld [vmem:[#allocation10 + $0x2e0] ss:$16 sps:$4 sm:$0xff]   ;;  %v16325_v16 = vld [vmem:[#allocation10 + $0x304] ss:$16 sps:$4 sm:$0xff]  }
 0x730   : > { %v14188_v15 = vadd.f32 %v7674_v56, %v18469_v4  ;;  %v14252_v52 = vadd.f32 %v8060_v31, %v18472_v41  ;;  %v7676_v17 = vpop.f32.mrb[15].mxu0  ;;  %v8062_v43 = vpop.f32.mrb[15].mxu1  ;;  %9220 = vmatmul.mubr.bf16.gmra.mrb[72].mxu0 %v8450_v47  ;;  %9606 = vmatmul.mubr.bf16.gmra.mrb[72].mxu1 %v8450_v47  ;;  %v8209_v32 = vmax.f32 %v14186_v8, 0.0  ;;  %v8211_v7 = vmax.f32 %v14250_v36, 0.0  ;;  %v16364_v31 = vld [vmem:[#allocation10 + $0x30c] ss:$16 sps:$4 sm:$0xff]  }
 0x731   : > { %v14189_v57 = vadd.f32 %v7676_v17, %v18475_v34  ;;  %v14253_v25 = vadd.f32 %v8062_v43, %v18478_v21  ;;  %9369 = vmatpush1.bf16.msra.mxu0 %v16311_v42  ;;  %9755 = vmatpush1.bf16.msra.mxu1 %v16344_v44  ;;  %v8210_v19 = vmax.f32 %v14187_v2, 0.0  ;;  %v8212_v53 = vmax.f32 %v14251_v50, 0.0 }
 0x732   : > { %v8213_v54 = vmax.f32 %v14188_v15, 0.0  ;;  %v8215_v20 = vmax.f32 %v14252_v52, 0.0  ;;  %9370 = vmatprep.subr.bf16.mxu0 %v16316_v11  ;;  %9756 = vmatprep.subr.bf16.mxu1 %v16349_v58  ;;  %v16356_v11 = vld [vmem:[#allocation10 + $0x2e8] ss:$16 sps:$4 sm:$0xff]  }
 0x733   : > { %v8214_v22 = vmax.f32 %v14189_v57, 0.0  ;;  %v8216_v33 = vmax.f32 %v14253_v25, 0.0 }
 0x734   : > { %v8454_v28 = vpack.c.bf16 %v8213_v54, %v8209_v32  ;;  %v18524_v59 = vpack.c.bf16 %v8215_v20, %v8211_v7  ;;  %v16323_v7 = vld [vmem:[#allocation10 + $0x300] ss:$16 sps:$4 sm:$0xff]   ;;  %v16362_v54 = vld [vmem:[#allocation10 + $0x308] ss:$16 sps:$4 sm:$0xff]  }
 0x735   : > { %v8455_v40 = vpack.c.bf16 %v8214_v22, %v8210_v19  ;;  %v18526_v12 = vpack.c.bf16 %v8216_v33, %v8212_v53  ;;  %v7680_v35 = vpop.f32.mrb[16].mxu0  ;;  %v8066_v5 = vpop.f32.mrb[16].mxu1  ;;  %9371 = vmatpush1.bf16.msra.mxu0 %v16314_v14  ;;  %9757 = vmatpush1.bf16.msra.mxu1 %v16347_v18  ;;  %v16334_v22 = vld [vmem:[#allocation10 + $0x324] ss:$16 sps:$4 sm:$0xff]   ;;  %v16367_v33 = vld [vmem:[#allocation10 + $0x32c] ss:$16 sps:$4 sm:$0xff]  }
 0x736   : > { %v14190_v61 = vadd.f32 %v7680_v35, %v18469_v4  ;;  %v14254_v29 = vadd.f32 %v8066_v5, %v18472_v41  ;;  %v7682_v63 = vpop.f32.mrb[17].mxu0  ;;  %v8068_v10 = vpop.f32.mrb[17].mxu1  ;;  %9372 = vmatprep.subr.bf16.mxu0 %v16319_v23  ;;  %9758 = vmatprep.subr.bf16.mxu1 %v16355_v60 }
 0x737   : > { %v14191_v0 = vadd.f32 %v7682_v63, %v18475_v34  ;;  %v14255_v13 = vadd.f32 %v8068_v10, %v18478_v21  ;;  %v7684_v47 = vpop.f32.mrb[18].mxu0  ;;  %v8070_v26 = vpop.f32.mrb[18].mxu1  ;;  %9229 = vmatprep.mubr.bf16.mxu0 %v8455_v40  ;;  %9615 = vmatprep.mubr.bf16.mxu1 %v8455_v40 }
 0x738   : > { %v14192_v3 = vadd.f32 %v7684_v47, %v18469_v4  ;;  %v14256_v46 = vadd.f32 %v8070_v26, %v18472_v41  ;;  %v7686_v42 = vpop.f32.mrb[19].mxu0  ;;  %v8072_v44 = vpop.f32.mrb[19].mxu1  ;;  %9230 = vmatmul.mubr.bf16.gmra.mrb[76].mxu0 %v8454_v28  ;;  %9616 = vmatmul.mubr.bf16.gmra.mrb[76].mxu1 %v8454_v28  ;;  %v8217_v58 = vmax.f32 %v14190_v61, 0.0  ;;  %v8219_v2 = vmax.f32 %v14254_v29, 0.0 }
 0x739   : > { %v14193_v8 = vadd.f32 %v7686_v42, %v18475_v34  ;;  %v14257_v36 = vadd.f32 %v8072_v44, %v18478_v21  ;;  %9373 = vmatpush1.bf16.msra.mxu0 %v16317_v38  ;;  %9759 = vmatpush1.bf16.msra.mxu1 %v16353_v30  ;;  %v8218_v15 = vmax.f32 %v14191_v0, 0.0  ;;  %v8220_v52 = vmax.f32 %v14255_v13, 0.0  ;;  %v16365_v0 = vld [vmem:[#allocation10 + $0x328] ss:$16 sps:$4 sm:$0xff]  }
 0x73a   : > { %v8221_v50 = vmax.f32 %v14192_v3, 0.0  ;;  %v8223_v56 = vmax.f32 %v14256_v46, 0.0  ;;  %9374 = vmatprep.subr.bf16.mxu0 %v16322_v39  ;;  %9760 = vmatprep.subr.bf16.mxu1 %v16358_v24  ;;  %v16332_v39 = vld [vmem:[#allocation10 + $0x320] ss:$16 sps:$4 sm:$0xff]   ;;  %v16343_v24 = vld [vmem:[#allocation10 + $0x344] ss:$16 sps:$4 sm:$0xff]  }
 0x73b   : > { %v8222_v17 = vmax.f32 %v14193_v8, 0.0  ;;  %v8224_v43 = vmax.f32 %v14257_v36, 0.0  ;;  %v16373_v46 = vld [vmem:[#allocation10 + $0x34c] ss:$16 sps:$4 sm:$0xff]  }
 0x73c   : > { %v8458_v57 = vpack.c.bf16 %v8221_v50, %v8217_v58  ;;  %v18536_v25 = vpack.c.bf16 %v8223_v56, %v8219_v2  ;;  %v16341_v56 = vld [vmem:[#allocation10 + $0x340] ss:$16 sps:$4 sm:$0xff]  }
 0x73d   : > { %v8459_v14 = vpack.c.bf16 %v8222_v17, %v8218_v15  ;;  %v18538_v23 = vpack.c.bf16 %v8224_v43, %v8220_v52  ;;  %v7690_v18 = vpop.f32.mrb[20].mxu0  ;;  %v8076_v32 = vpop.f32.mrb[20].mxu1  ;;  %9375 = vmatpush1.bf16.msra.mxu0 %v16320_v48  ;;  %9761 = vmatpush1.bf16.msra.mxu1 %v16356_v11 }
 0x73e   : > { %v14194_v20 = vadd.f32 %v7690_v18, %v18469_v4  ;;  %v14258_v60 = vadd.f32 %v8076_v32, %v18472_v41  ;;  %v7692_v19 = vpop.f32.mrb[21].mxu0  ;;  %v8078_v53 = vpop.f32.mrb[21].mxu1  ;;  %9376 = vmatprep.subr.bf16.mxu0 %v16325_v16  ;;  %9762 = vmatprep.subr.bf16.mxu1 %v16364_v31  ;;  %v16371_v31 = vld [vmem:[#allocation10 + $0x348] ss:$16 sps:$4 sm:$0xff]  }
 0x73f   : > { %v14195_v28 = vadd.f32 %v7692_v19, %v18475_v34  ;;  %v14259_v40 = vadd.f32 %v8078_v53, %v18478_v21  ;;  %v7694_v35 = vpop.f32.mrb[22].mxu0  ;;  %v8080_v5 = vpop.f32.mrb[22].mxu1  ;;  %9239 = vmatprep.mubr.bf16.mxu0 %v8459_v14  ;;  %9625 = vmatprep.mubr.bf16.mxu1 %v8459_v14  ;;  %v16376_v14 = vld [vmem:[#allocation10 + $0x36c] ss:$16 sps:$4 sm:$0xff]  }
 0x740   : > { %v14196_v38 = vadd.f32 %v7694_v35, %v18469_v4  ;;  %v14260_v30 = vadd.f32 %v8080_v5, %v18472_v41  ;;  %v7696_v61 = vpop.f32.mrb[23].mxu0  ;;  %v8082_v29 = vpop.f32.mrb[23].mxu1  ;;  %9240 = vmatmul.mubr.bf16.gmra.mrb[80].mxu0 %v8458_v57  ;;  %9626 = vmatmul.mubr.bf16.gmra.mrb[80].mxu1 %v8458_v57  ;;  %v8225_v13 = vmax.f32 %v14194_v20, 0.0  ;;  %v8227_v47 = vmax.f32 %v14258_v60, 0.0  ;;  %v16352_v57 = vld [vmem:[#allocation10 + $0x364] ss:$16 sps:$4 sm:$0xff]  }
 0x741   : > { %v14197_v63 = vadd.f32 %v7696_v61, %v18475_v34  ;;  %v14261_v10 = vadd.f32 %v8082_v29, %v18478_v21  ;;  %9377 = vmatpush1.bf16.msra.mxu0 %v16323_v7  ;;  %9763 = vmatpush1.bf16.msra.mxu1 %v16362_v54  ;;  %v8226_v42 = vmax.f32 %v14195_v28, 0.0  ;;  %v8228_v44 = vmax.f32 %v14259_v40, 0.0  ;;  %v16350_v28 = vld [vmem:[#allocation10 + $0x360] ss:$16 sps:$4 sm:$0xff]   ;;  %v16361_v40 = vld [vmem:[#allocation10 + $0x384] ss:$16 sps:$4 sm:$0xff]  }
 0x742   : > { %v8229_v26 = vmax.f32 %v14196_v38, 0.0  ;;  %v8231_v3 = vmax.f32 %v14260_v30, 0.0  ;;  %9378 = vmatprep.subr.bf16.mxu0 %v16334_v22  ;;  %9764 = vmatprep.subr.bf16.mxu1 %v16367_v33  ;;  %v16374_v35 = vld [vmem:[#allocation10 + $0x368] ss:$16 sps:$4 sm:$0xff]   ;;  %v16382_v29 = vld [vmem:[#allocation10 + $0x38c] ss:$16 sps:$4 sm:$0xff]  }
 0x743   : > { %v8230_v8 = vmax.f32 %v14197_v63, 0.0  ;;  %v8232_v36 = vmax.f32 %v14261_v10, 0.0 }
 0x744   : > { %v8462_v48 = vpack.c.bf16 %v8229_v26, %v8225_v13  ;;  %v18548_v16 = vpack.c.bf16 %v8231_v3, %v8227_v47 }
 0x745   : > { %v8463_v11 = vpack.c.bf16 %v8230_v8, %v8226_v42  ;;  %v18550_v58 = vpack.c.bf16 %v8232_v36, %v8228_v44  ;;  %v7700_v2 = vpop.f32.mrb[24].mxu0  ;;  %v8086_v50 = vpop.f32.mrb[24].mxu1  ;;  %9379 = vmatpush1.bf16.msra.mxu0 %v16332_v39  ;;  %9765 = vmatpush1.bf16.msra.mxu1 %v16365_v0  ;;  %v16359_v42 = vld [vmem:[#allocation10 + $0x380] ss:$16 sps:$4 sm:$0xff]   ;;  %v16380_v44 = vld [vmem:[#allocation10 + $0x388] ss:$16 sps:$4 sm:$0xff]  }
 0x746   : > { %v14198_v15 = vadd.f32 %v7700_v2, %v18469_v4  ;;  %v14262_v52 = vadd.f32 %v8086_v50, %v18472_v41  ;;  %v7702_v17 = vpop.f32.mrb[25].mxu0  ;;  %v8088_v43 = vpop.f32.mrb[25].mxu1  ;;  %9380 = vmatprep.subr.bf16.mxu0 %v16343_v24  ;;  %9766 = vmatprep.subr.bf16.mxu1 %v16373_v46  ;;  %v16370_v2 = vld [vmem:[#allocation10 + $0x3a4] ss:$16 sps:$4 sm:$0xff]   ;;  %v16385_v50 = vld [vmem:[#allocation10 + $0x3ac] ss:$16 sps:$4 sm:$0xff]  }
 0x747   : > { %v14199_v18 = vadd.f32 %v7702_v17, %v18475_v34  ;;  %v14263_v32 = vadd.f32 %v8088_v43, %v18478_v21  ;;  %v7704_v7 = vpop.f32.mrb[26].mxu0  ;;  %v8090_v54 = vpop.f32.mrb[26].mxu1  ;;  %9249 = vmatprep.mubr.bf16.mxu0 %v8463_v11  ;;  %9635 = vmatprep.mubr.bf16.mxu1 %v8463_v11 }
 0x748   : > { %v14200_v20 = vadd.f32 %v7704_v7, %v18469_v4  ;;  %v14264_v60 = vadd.f32 %v8090_v54, %v18472_v41  ;;  %v7706_v19 = vpop.f32.mrb[27].mxu0  ;;  %v8092_v53 = vpop.f32.mrb[27].mxu1  ;;  %9250 = vmatmul.mubr.bf16.gmra.mrb[84].mxu0 %v8462_v48  ;;  %9636 = vmatmul.mubr.bf16.gmra.mrb[84].mxu1 %v8462_v48  ;;  %v8233_v5 = vmax.f32 %v14198_v15, 0.0  ;;  %v8235_v38 = vmax.f32 %v14262_v52, 0.0  ;;  %v16368_v7 = vld [vmem:[#allocation10 + $0x3a0] ss:$16 sps:$4 sm:$0xff]  }
 0x749   : > { %v14201_v22 = vadd.f32 %v7706_v19, %v18475_v34  ;;  %v14265_v33 = vadd.f32 %v8092_v53, %v18478_v21  ;;  %9381 = vmatpush1.bf16.msra.mxu0 %v16341_v56  ;;  %9767 = vmatpush1.bf16.msra.mxu1 %v16371_v31  ;;  %v8234_v63 = vmax.f32 %v14199_v18, 0.0  ;;  %v8236_v10 = vmax.f32 %v14263_v32, 0.0  ;;  %v16379_v54 = vld [vmem:[#allocation10 + $0x3c4] ss:$16 sps:$4 sm:$0xff]  }
 0x74a   : > { %v8237_v30 = vmax.f32 %v14200_v20, 0.0  ;;  %v8239_v61 = vmax.f32 %v14264_v60, 0.0  ;;  %9382 = vmatprep.subr.bf16.mxu0 %v16352_v57  ;;  %9768 = vmatprep.subr.bf16.mxu1 %v16376_v14  ;;  %v16383_v20 = vld [vmem:[#allocation10 + $0x3a8] ss:$16 sps:$4 sm:$0xff]  }
 0x74b   : > { %v8238_v39 = vmax.f32 %v14201_v22, 0.0  ;;  %v8240_v24 = vmax.f32 %v14265_v33, 0.0  ;;  %v16391_v33 = vld [vmem:[#allocation10 + $0x3cc] ss:$16 sps:$4 sm:$0xff]  }
 0x74c   : > { %v8466_v0 = vpack.c.bf16 %v8237_v30, %v8233_v5  ;;  %v18560_v13 = vpack.c.bf16 %v8239_v61, %v8235_v38 }
 0x74d   : > { %v8467_v47 = vpack.c.bf16 %v8238_v39, %v8234_v63  ;;  %v18562_v26 = vpack.c.bf16 %v8240_v24, %v8236_v10  ;;  %v7710_v3 = vpop.f32.mrb[28].mxu0  ;;  %v8096_v46 = vpop.f32.mrb[28].mxu1  ;;  %9383 = vmatpush1.bf16.msra.mxu0 %v16350_v28  ;;  %9769 = vmatpush1.bf16.msra.mxu1 %v16374_v35  ;;  %v16377_v39 = vld [vmem:[#allocation10 + $0x3c0] ss:$16 sps:$4 sm:$0xff]   ;;  %v16389_v24 = vld [vmem:[#allocation10 + $0x3c8] ss:$16 sps:$4 sm:$0xff]  }
 0x74e   : > { %v14202_v8 = vadd.f32 %v7710_v3, %v18469_v4  ;;  %v14266_v36 = vadd.f32 %v8096_v46, %v18472_v41  ;;  %v7712_v48 = vpop.f32.mrb[29].mxu0  ;;  %v8098_v11 = vpop.f32.mrb[29].mxu1  ;;  %9384 = vmatprep.subr.bf16.mxu0 %v16361_v40  ;;  %9770 = vmatprep.subr.bf16.mxu1 %v16382_v29 }
 0x74f   : > { %v14203_v56 = vadd.f32 %v7712_v48, %v18475_v34  ;;  %v14267_v31 = vadd.f32 %v8098_v11, %v18478_v21  ;;  %v7714_v15 = vpop.f32.mrb[30].mxu0  ;;  %v8100_v52 = vpop.f32.mrb[30].mxu1  ;;  %9259 = vmatprep.mubr.bf16.mxu0 %v8467_v47  ;;  %9645 = vmatprep.mubr.bf16.mxu1 %v8467_v47 }
 0x750   : > { %v14204_v17 = vadd.f32 %v7714_v15, %v18469_v4  ;;  %v14268_v43 = vadd.f32 %v8100_v52, %v18472_v41  ;;  %v7716_v57 = vpop.f32.mrb[31].mxu0  ;;  %v8102_v14 = vpop.f32.mrb[31].mxu1  ;;  %9260 = vmatmul.mubr.bf16.gmra.mrb[88].mxu0 %v8466_v0  ;;  %9646 = vmatmul.mubr.bf16.gmra.mrb[88].mxu1 %v8466_v0  ;;  %v8241_v60 = vmax.f32 %v14202_v8, 0.0  ;;  %v8243_v19 = vmax.f32 %v14266_v36, 0.0 }
 0x751   : > { %v14205_v18 = vadd.f32 %v7716_v57, %v18475_v34  ;;  %v14269_v32 = vadd.f32 %v8102_v14, %v18478_v21  ;;  %9385 = vmatpush1.bf16.msra.mxu0 %v16359_v42  ;;  %9771 = vmatpush1.bf16.msra.mxu1 %v16380_v44  ;;  %v8242_v28 = vmax.f32 %v14203_v56, 0.0  ;;  %v8244_v40 = vmax.f32 %v14267_v31, 0.0  ;;  %v16388_v42 = vld [vmem:[#allocation10 + $0x3e4] ss:$16 sps:$4 sm:$0xff]   ;;  %v16394_v44 = vld [vmem:[#allocation10 + $0x3ec] ss:$16 sps:$4 sm:$0xff]  }
 0x752   : > { %v8245_v53 = vmax.f32 %v14204_v17, 0.0  ;;  %v8247_v22 = vmax.f32 %v14268_v43, 0.0  ;;  %9386 = vmatprep.subr.bf16.mxu0 %v16370_v2  ;;  %9772 = vmatprep.subr.bf16.mxu1 %v16385_v50  ;;  %v16386_v17 = vld [vmem:[#allocation10 + $0x3e0] ss:$16 sps:$4 sm:$0xff]   ;;  %v16392_v43 = vld [vmem:[#allocation10 + $0x3e8] ss:$16 sps:$4 sm:$0xff]  }
 0x753   : > { %v8246_v35 = vmax.f32 %v14205_v18, 0.0  ;;  %v8248_v5 = vmax.f32 %v14269_v32, 0.0 }
 0x754   : > { %v8470_v38 = vpack.c.bf16 %v8245_v53, %v8241_v60  ;;  %v18572_v30 = vpack.c.bf16 %v8247_v22, %v8243_v19 }
 0x755   : > { %v8471_v61 = vpack.c.bf16 %v8246_v35, %v8242_v28  ;;  %v18574_v29 = vpack.c.bf16 %v8248_v5, %v8244_v40  ;;  %v7720_v63 = vpop.f32.mrb[32].mxu0  ;;  %v8106_v10 = vpop.f32.mrb[32].mxu1  ;;  %9387 = vmatpush1.bf16.msra.mxu0 %v16368_v7  ;;  %9773 = vmatpush1.bf16.msra.mxu1 %v16383_v20 }
 0x756   : > { %v14206_v0 = vadd.f32 %v7720_v63, %v18469_v4  ;;  %v14270_v47 = vadd.f32 %v8106_v10, %v18472_v41  ;;  %v7722_v3 = vpop.f32.mrb[33].mxu0  ;;  %v8108_v46 = vpop.f32.mrb[33].mxu1  ;;  %9388 = vmatprep.subr.bf16.mxu0 %v16379_v54  ;;  %9774 = vmatprep.subr.bf16.mxu1 %v16391_v33 }
 0x757   : > { %v14207_v8 = vadd.f32 %v7722_v3, %v18475_v34  ;;  %v14271_v36 = vadd.f32 %v8108_v46, %v18478_v21  ;;  %v7724_v48 = vpop.f32.mrb[34].mxu0  ;;  %v8110_v11 = vpop.f32.mrb[34].mxu1  ;;  %9269 = vmatprep.mubr.bf16.mxu0 %v8471_v61  ;;  %9655 = vmatprep.mubr.bf16.mxu1 %v8471_v61 }
 0x758   : > { %v14208_v2 = vadd.f32 %v7724_v48, %v18469_v4  ;;  %v14272_v50 = vadd.f32 %v8110_v11, %v18472_v41  ;;  %v7726_v56 = vpop.f32.mrb[35].mxu0  ;;  %v8112_v31 = vpop.f32.mrb[35].mxu1  ;;  %9270 = vmatmul.mubr.bf16.gmra.mrb[92].mxu0 %v8470_v38  ;;  %9656 = vmatmul.mubr.bf16.gmra.mrb[92].mxu1 %v8470_v38  ;;  %v8249_v57 = vmax.f32 %v14206_v0, 0.0  ;;  %v8251_v14 = vmax.f32 %v14270_v47, 0.0 }
 0x759   : > { %v14209_v15 = vadd.f32 %v7726_v56, %v18475_v34  ;;  %v14273_v52 = vadd.f32 %v8112_v31, %v18478_v21  ;;  %9389 = vmatpush1.bf16.msra.mxu0 %v16377_v39  ;;  %9775 = vmatpush1.bf16.msra.mxu1 %v16389_v24  ;;  %v8250_v7 = vmax.f32 %v14207_v8, 0.0  ;;  %v8252_v54 = vmax.f32 %v14271_v36, 0.0 }
 0x75a   : > { %v8253_v18 = vmax.f32 %v14208_v2, 0.0  ;;  %v8255_v32 = vmax.f32 %v14272_v50, 0.0  ;;  %9390 = vmatprep.subr.bf16.mxu0 %v16388_v42  ;;  %9776 = vmatprep.subr.bf16.mxu1 %v16394_v44 }
 0x75b   : > { %v8254_v20 = vmax.f32 %v14209_v15, 0.0  ;;  %v8256_v60 = vmax.f32 %v14273_v52, 0.0 }
 0x75c   : > { %v8474_v19 = vpack.c.bf16 %v8253_v18, %v8249_v57  ;;  %v18584_v53 = vpack.c.bf16 %v8255_v32, %v8251_v14 }
 0x75d   : > { %v8475_v22 = vpack.c.bf16 %v8254_v20, %v8250_v7  ;;  %v18586_v33 = vpack.c.bf16 %v8256_v60, %v8252_v54  ;;  %v7730_v28 = vpop.f32.mrb[36].mxu0  ;;  %v8116_v40 = vpop.f32.mrb[36].mxu1  ;;  %9391 = vmatpush1.bf16.msra.mxu0 %v16386_v17  ;;  %9777 = vmatpush1.bf16.msra.mxu1 %v16392_v43 }
 0x75e   : > { %v14210_v35 = vadd.f32 %v7730_v28, %v18469_v4  ;;  %v14274_v5 = vadd.f32 %v8116_v40, %v18472_v41  ;;  %v7732_v38 = vpop.f32.mrb[37].mxu0  ;;  %v8118_v61 = vpop.f32.mrb[37].mxu1 }
 0x75f   : > { %v14211_v63 = vadd.f32 %v7732_v38, %v18475_v34  ;;  %v14275_v10 = vadd.f32 %v8118_v61, %v18478_v21  ;;  %v7734_v39 = vpop.f32.mrb[38].mxu0  ;;  %v8120_v24 = vpop.f32.mrb[38].mxu1  ;;  %9279 = vmatprep.mubr.bf16.mxu0 %v8475_v22  ;;  %9665 = vmatprep.mubr.bf16.mxu1 %v8475_v22 }
 0x760   : > { %v14212_v0 = vadd.f32 %v7734_v39, %v18469_v4  ;;  %v14276_v47 = vadd.f32 %v8120_v24, %v18472_v41  ;;  %v7736_v3 = vpop.f32.mrb[39].mxu0  ;;  %v8122_v46 = vpop.f32.mrb[39].mxu1  ;;  %9280 = vmatmul.mubr.bf16.gmra.mrb[96].mxu0 %v8474_v19  ;;  %9666 = vmatmul.mubr.bf16.gmra.mrb[96].mxu1 %v8474_v19  ;;  %v8257_v8 = vmax.f32 %v14210_v35, 0.0  ;;  %v8259_v36 = vmax.f32 %v14274_v5, 0.0 }
 0x761   : > { %v14213_v42 = vadd.f32 %v7736_v3, %v18475_v34  ;;  %v14277_v44 = vadd.f32 %v8122_v46, %v18478_v21  ;;  %v8258_v2 = vmax.f32 %v14211_v63, 0.0  ;;  %v8260_v50 = vmax.f32 %v14275_v10, 0.0 }
 0x762   : > { %v8261_v48 = vmax.f32 %v14212_v0, 0.0  ;;  %v8263_v11 = vmax.f32 %v14276_v47, 0.0 }
 0x763   : > { %v8262_v56 = vmax.f32 %v14213_v42, 0.0  ;;  %v8264_v31 = vmax.f32 %v14277_v44, 0.0 }
 0x764   : > { %v8478_v15 = vpack.c.bf16 %v8261_v48, %v8257_v8  ;;  %v18596_v52 = vpack.c.bf16 %v8263_v11, %v8259_v36 }
 0x765   : > { %v8479_v17 = vpack.c.bf16 %v8262_v56, %v8258_v2  ;;  %v18598_v43 = vpack.c.bf16 %v8264_v31, %v8260_v50  ;;  %v7740_v57 = vpop.f32.mrb[40].mxu0  ;;  %v8126_v14 = vpop.f32.mrb[40].mxu1 }
 0x766   : > { %v14214_v18 = vadd.f32 %v7740_v57, %v18469_v4  ;;  %v14278_v32 = vadd.f32 %v8126_v14, %v18472_v41  ;;  %v7742_v7 = vpop.f32.mrb[41].mxu0  ;;  %v8128_v54 = vpop.f32.mrb[41].mxu1 }
 0x767   : > { %v14215_v20 = vadd.f32 %v7742_v7, %v18475_v34  ;;  %v14279_v60 = vadd.f32 %v8128_v54, %v18478_v21  ;;  %v7744_v19 = vpop.f32.mrb[42].mxu0  ;;  %v8130_v22 = vpop.f32.mrb[42].mxu1  ;;  %9289 = vmatprep.mubr.bf16.mxu0 %v8479_v17  ;;  %9675 = vmatprep.mubr.bf16.mxu1 %v8479_v17 }
 0x768   : > { %v14216_v28 = vadd.f32 %v7744_v19, %v18469_v4  ;;  %v14280_v40 = vadd.f32 %v8130_v22, %v18472_v41  ;;  %v7746_v35 = vpop.f32.mrb[43].mxu0  ;;  %v8132_v5 = vpop.f32.mrb[43].mxu1  ;;  %9290 = vmatmul.mubr.bf16.gmra.mrb[100].mxu0 %v8478_v15  ;;  %9676 = vmatmul.mubr.bf16.gmra.mrb[100].mxu1 %v8478_v15  ;;  %v8265_v63 = vmax.f32 %v14214_v18, 0.0  ;;  %v8267_v10 = vmax.f32 %v14278_v32, 0.0 }
 0x769   : > { %v14217_v38 = vadd.f32 %v7746_v35, %v18475_v34  ;;  %v14281_v61 = vadd.f32 %v8132_v5, %v18478_v21  ;;  %v8266_v0 = vmax.f32 %v14215_v20, 0.0  ;;  %v8268_v47 = vmax.f32 %v14279_v60, 0.0 }
 0x76a   : > { %v8269_v39 = vmax.f32 %v14216_v28, 0.0  ;;  %v8271_v24 = vmax.f32 %v14280_v40, 0.0 }
 0x76b   : > { %v8270_v3 = vmax.f32 %v14217_v38, 0.0  ;;  %v8272_v46 = vmax.f32 %v14281_v61, 0.0 }
 0x76c   : > { %v8482_v42 = vpack.c.bf16 %v8269_v39, %v8265_v63  ;;  %v18608_v44 = vpack.c.bf16 %v8271_v24, %v8267_v10 }
 0x76d   : > { %v8483_v8 = vpack.c.bf16 %v8270_v3, %v8266_v0  ;;  %v18610_v36 = vpack.c.bf16 %v8272_v46, %v8268_v47  ;;  %v7750_v48 = vpop.f32.mrb[44].mxu0  ;;  %v8136_v11 = vpop.f32.mrb[44].mxu1 }
 0x76e   : > { %v14218_v2 = vadd.f32 %v7750_v48, %v18469_v4  ;;  %v14282_v50 = vadd.f32 %v8136_v11, %v18472_v41  ;;  %v7752_v56 = vpop.f32.mrb[45].mxu0  ;;  %v8138_v31 = vpop.f32.mrb[45].mxu1 }
 0x76f   : > { %v14219_v15 = vadd.f32 %v7752_v56, %v18475_v34  ;;  %v14283_v17 = vadd.f32 %v8138_v31, %v18478_v21  ;;  %v7754_v57 = vpop.f32.mrb[46].mxu0  ;;  %v8140_v14 = vpop.f32.mrb[46].mxu1  ;;  %9299 = vmatprep.mubr.bf16.mxu0 %v8483_v8  ;;  %9685 = vmatprep.mubr.bf16.mxu1 %v8483_v8 }
 0x770   : > { %v14220_v18 = vadd.f32 %v7754_v57, %v18469_v4  ;;  %v14284_v32 = vadd.f32 %v8140_v14, %v18472_v41  ;;  %v7756_v7 = vpop.f32.mrb[47].mxu0  ;;  %v8142_v54 = vpop.f32.mrb[47].mxu1  ;;  %9300 = vmatmul.mubr.bf16.gmra.mrb[104].mxu0 %v8482_v42  ;;  %9686 = vmatmul.mubr.bf16.gmra.mrb[104].mxu1 %v8482_v42  ;;  %v8273_v19 = vmax.f32 %v14218_v2, 0.0  ;;  %v8275_v22 = vmax.f32 %v14282_v50, 0.0 }
 0x771   : > { %v14221_v20 = vadd.f32 %v7756_v7, %v18475_v34  ;;  %v14285_v60 = vadd.f32 %v8142_v54, %v18478_v21  ;;  %v8274_v35 = vmax.f32 %v14219_v15, 0.0  ;;  %v8276_v5 = vmax.f32 %v14283_v17, 0.0 }
 0x772   : > { %v8277_v28 = vmax.f32 %v14220_v18, 0.0  ;;  %v8279_v40 = vmax.f32 %v14284_v32, 0.0  ;;  %v16397_v18 = vld [vmem:[#allocation11 + $0x4] ss:$16 sps:$4 sm:$0xff]  }
 0x773   : > { %v8278_v38 = vmax.f32 %v14221_v20, 0.0  ;;  %v8280_v61 = vmax.f32 %v14285_v60, 0.0  ;;  %v16400_v60 = vld [vmem:[#allocation11 + $0xc] ss:$16 sps:$4 sm:$0xff]   ;;  %10921 = vmatprep.subr.bf16.mxu0 %v16397_v18 }
 0x774   : > { %v8486_v63 = vpack.c.bf16 %v8277_v28, %v8273_v19  ;;  %v18620_v10 = vpack.c.bf16 %v8279_v40, %v8275_v22  ;;  %11307 = vmatprep.subr.bf16.mxu1 %v16400_v60 }
 0x775   : > { %v8487_v39 = vpack.c.bf16 %v8278_v38, %v8274_v35  ;;  %v18622_v24 = vpack.c.bf16 %v8280_v61, %v8276_v5  ;;  %v7760_v0 = vpop.f32.mrb[48].mxu0  ;;  %v8146_v47 = vpop.f32.mrb[48].mxu1 }
 0x776   : > { %v14222_v3 = vadd.f32 %v7760_v0, %v18469_v4  ;;  %v14286_v46 = vadd.f32 %v8146_v47, %v18472_v41  ;;  %v7762_v42 = vpop.f32.mrb[49].mxu0  ;;  %v8148_v8 = vpop.f32.mrb[49].mxu1 }
 0x777   : > { %v14223_v48 = vadd.f32 %v7762_v42, %v18475_v34  ;;  %v14287_v11 = vadd.f32 %v8148_v8, %v18478_v21  ;;  %v7764_v2 = vpop.f32.mrb[50].mxu0  ;;  %v8150_v50 = vpop.f32.mrb[50].mxu1  ;;  %9309 = vmatprep.mubr.bf16.mxu0 %v8487_v39  ;;  %9695 = vmatprep.mubr.bf16.mxu1 %v8487_v39 }
 0x778   : > { %v14224_v56 = vadd.f32 %v7764_v2, %v18469_v4  ;;  %v14288_v31 = vadd.f32 %v8150_v50, %v18472_v41  ;;  %v7766_v15 = vpop.f32.mrb[51].mxu0  ;;  %v8152_v17 = vpop.f32.mrb[51].mxu1  ;;  %9310 = vmatmul.mubr.bf16.gmra.mrb[108].mxu0 %v8486_v63  ;;  %9696 = vmatmul.mubr.bf16.gmra.mrb[108].mxu1 %v8486_v63  ;;  %v8281_v32 = vmax.f32 %v14222_v3, 0.0  ;;  %v8283_v7 = vmax.f32 %v14286_v46, 0.0 }
 0x779   : > { %v14225_v57 = vadd.f32 %v7766_v15, %v18475_v34  ;;  %v14289_v14 = vadd.f32 %v8152_v17, %v18478_v21  ;;  %v8282_v19 = vmax.f32 %v14223_v48, 0.0  ;;  %v8284_v22 = vmax.f32 %v14287_v11, 0.0 }
 0x77a   : > { %v8285_v54 = vmax.f32 %v14224_v56, 0.0  ;;  %v8287_v20 = vmax.f32 %v14288_v31, 0.0 }
 0x77b   : > { %v8286_v28 = vmax.f32 %v14225_v57, 0.0  ;;  %v8288_v40 = vmax.f32 %v14289_v14, 0.0 }
 0x77c   : > { %v8490_v35 = vpack.c.bf16 %v8285_v54, %v8281_v32  ;;  %v18632_v5 = vpack.c.bf16 %v8287_v20, %v8283_v7 }
 0x77d   : > { %v8491_v38 = vpack.c.bf16 %v8286_v28, %v8282_v19  ;;  %v18634_v61 = vpack.c.bf16 %v8288_v40, %v8284_v22  ;;  %v7770_v63 = vpop.f32.mrb[52].mxu0  ;;  %v8156_v39 = vpop.f32.mrb[52].mxu1 }
 0x77e   : > { %v14226_v0 = vadd.f32 %v7770_v63, %v18469_v4  ;;  %v14290_v47 = vadd.f32 %v8156_v39, %v18472_v41  ;;  %v7772_v3 = vpop.f32.mrb[53].mxu0  ;;  %v8158_v46 = vpop.f32.mrb[53].mxu1 }
 0x77f   : > { %v14227_v42 = vadd.f32 %v7772_v3, %v18475_v34  ;;  %v14291_v8 = vadd.f32 %v8158_v46, %v18478_v21  ;;  %v7774_v48 = vpop.f32.mrb[54].mxu0  ;;  %v8160_v11 = vpop.f32.mrb[54].mxu1  ;;  %9319 = vmatprep.mubr.bf16.mxu0 %v8491_v38  ;;  %9705 = vmatprep.mubr.bf16.mxu1 %v8491_v38 }
 0x780   : > { %v14228_v2 = vadd.f32 %v7774_v48, %v18469_v4  ;;  %v14292_v50 = vadd.f32 %v8160_v11, %v18472_v41  ;;  %v7776_v56 = vpop.f32.mrb[55].mxu0  ;;  %v8162_v31 = vpop.f32.mrb[55].mxu1  ;;  %9320 = vmatmul.mubr.bf16.gmra.mrb[112].mxu0 %v8490_v35  ;;  %9706 = vmatmul.mubr.bf16.gmra.mrb[112].mxu1 %v8490_v35  ;;  %v8289_v57 = vmax.f32 %v14226_v0, 0.0  ;;  %v8291_v14 = vmax.f32 %v14290_v47, 0.0 }
 0x781   : > { %v14229_v15 = vadd.f32 %v7776_v56, %v18475_v34  ;;  %v14293_v17 = vadd.f32 %v8162_v31, %v18478_v21  ;;  %v8290_v7 = vmax.f32 %v14227_v42, 0.0  ;;  %v8292_v54 = vmax.f32 %v14291_v8, 0.0 }
 0x782   : > { %v8293_v18 = vmax.f32 %v14228_v2, 0.0  ;;  %v8295_v32 = vmax.f32 %v14292_v50, 0.0 }
 0x783   : > { %v8294_v20 = vmax.f32 %v14229_v15, 0.0  ;;  %v8296_v60 = vmax.f32 %v14293_v17, 0.0 }
 0x784   : > { %v8494_v19 = vpack.c.bf16 %v8293_v18, %v8289_v57  ;;  %v18644_v22 = vpack.c.bf16 %v8295_v32, %v8291_v14 }
 0x785   : > { %v8495_v28 = vpack.c.bf16 %v8294_v20, %v8290_v7  ;;  %v18646_v40 = vpack.c.bf16 %v8296_v60, %v8292_v54  ;;  %v7780_v38 = vpop.f32.mrb[56].mxu0  ;;  %v8166_v35 = vpop.f32.mrb[56].mxu1 }
 0x786   : > { %v14230_v63 = vadd.f32 %v7780_v38, %v18469_v4  ;;  %v14294_v39 = vadd.f32 %v8166_v35, %v18472_v41  ;;  %v7782_v0 = vpop.f32.mrb[57].mxu0  ;;  %v8168_v47 = vpop.f32.mrb[57].mxu1 }
 0x787   : > { %v14231_v3 = vadd.f32 %v7782_v0, %v18475_v34  ;;  %v14295_v46 = vadd.f32 %v8168_v47, %v18478_v21  ;;  %v7784_v42 = vpop.f32.mrb[58].mxu0  ;;  %v8170_v8 = vpop.f32.mrb[58].mxu1  ;;  %9329 = vmatprep.mubr.bf16.mxu0 %v8495_v28  ;;  %9715 = vmatprep.mubr.bf16.mxu1 %v8495_v28 }
 0x788   : > { %v14232_v48 = vadd.f32 %v7784_v42, %v18469_v4  ;;  %v14296_v11 = vadd.f32 %v8170_v8, %v18472_v41  ;;  %v7786_v2 = vpop.f32.mrb[59].mxu0  ;;  %v8172_v50 = vpop.f32.mrb[59].mxu1  ;;  %9330 = vmatmul.mubr.bf16.gmra.mrb[116].mxu0 %v8494_v19  ;;  %9716 = vmatmul.mubr.bf16.gmra.mrb[116].mxu1 %v8494_v19  ;;  %v8297_v15 = vmax.f32 %v14230_v63, 0.0  ;;  %v8299_v17 = vmax.f32 %v14294_v39, 0.0 }
 0x789   : > { %v14233_v56 = vadd.f32 %v7786_v2, %v18475_v34  ;;  %v14297_v31 = vadd.f32 %v8172_v50, %v18478_v21  ;;  %v8298_v18 = vmax.f32 %v14231_v3, 0.0  ;;  %v8300_v32 = vmax.f32 %v14295_v46, 0.0 }
 0x78a   : > { %v8301_v57 = vmax.f32 %v14232_v48, 0.0  ;;  %v8303_v14 = vmax.f32 %v14296_v11, 0.0 }
 0x78b   : > { %v8302_v7 = vmax.f32 %v14233_v56, 0.0  ;;  %v8304_v54 = vmax.f32 %v14297_v31, 0.0 }
 0x78c   : > { %v8498_v20 = vpack.c.bf16 %v8301_v57, %v8297_v15  ;;  %v18656_v60 = vpack.c.bf16 %v8303_v14, %v8299_v17 }
 0x78d   : > { %v8499_v28 = vpack.c.bf16 %v8302_v7, %v8298_v18  ;;  %v18658_v38 = vpack.c.bf16 %v8304_v54, %v8300_v32  ;;  %v7790_v35 = vpop.f32.mrb[60].mxu0  ;;  %v8176_v19 = vpop.f32.mrb[60].mxu1 }
 0x78e   : > { %v14234_v0 = vadd.f32 %v7790_v35, %v18469_v4  ;;  %v14298_v47 = vadd.f32 %v8176_v19, %v18472_v41  ;;  %v7792_v63 = vpop.f32.mrb[61].mxu0  ;;  %v8178_v39 = vpop.f32.mrb[61].mxu1  ;;  %v16406_v19 = vld [vmem:[#allocation11 + $0x2c] ss:$16 sps:$4 sm:$0xff]  }
 0x78f   : > { %v14235_v42 = vadd.f32 %v7792_v63, %v18475_v34  ;;  %v14299_v3 = vadd.f32 %v8178_v39, %v18478_v21  ;;  %v7794_v46 = vpop.f32.mrb[62].mxu0  ;;  %v8180_v8 = vpop.f32.mrb[62].mxu1  ;;  %9339 = vmatprep.mubr.bf16.mxu0 %v8499_v28  ;;  %9725 = vmatprep.mubr.bf16.mxu1 %v8499_v28  ;;  %v16409_v63 = vld [vmem:[#allocation11 + $0x44] ss:$16 sps:$4 sm:$0xff]   ;;  %v16407_v39 = vld [vmem:[#allocation11 + $0x40] ss:$16 sps:$4 sm:$0xff]  }
 0x790   : > { %v14236_v48 = vadd.f32 %v7794_v46, %v18469_v4  ;;  %v14300_v11 = vadd.f32 %v8180_v8, %v18472_v41  ;;  %v7796_v2 = vpop.f32.mrb[63].mxu0  ;;  %v8182_v50 = vpop.f32.mrb[63].mxu1  ;;  %9340 = vmatmul.mubr.bf16.gmra.mrb[120].mxu0 %v8498_v20  ;;  %9726 = vmatmul.mubr.bf16.gmra.mrb[120].mxu1 %v8498_v20  ;;  %v8305_v15 = vmax.f32 %v14234_v0, 0.0  ;;  %v8307_v17 = vmax.f32 %v14298_v47, 0.0  ;;  %v16403_v20 = vld [vmem:[#allocation11 + $0x24] ss:$16 sps:$4 sm:$0xff]  }
 0x791   : > { %v14237_v56 = vadd.f32 %v7796_v2, %v18475_v34  ;;  %v14301_v31 = vadd.f32 %v8182_v50, %v18478_v21  ;;  %v8306_v18 = vmax.f32 %v14235_v42, 0.0  ;;  %v8308_v32 = vmax.f32 %v14299_v3, 0.0  ;;  %v16395_v34 = vld [vmem:[#allocation11] ss:$16 sps:$4 sm:$0xff]   ;;  %v16398_v21 = vld [vmem:[#allocation11 + $0x8] ss:$16 sps:$4 sm:$0xff]  }
 0x792   : > { %v8309_v57 = vmax.f32 %v14236_v48, 0.0  ;;  %v8311_v14 = vmax.f32 %v14300_v11, 0.0  ;;  %v16401_v0 = vld [vmem:[#allocation11 + $0x20] ss:$16 sps:$4 sm:$0xff]   ;;  %v16404_v47 = vld [vmem:[#allocation11 + $0x28] ss:$16 sps:$4 sm:$0xff]  }
 0x793   : > { %v8310_v7 = vmax.f32 %v14237_v56, 0.0  ;;  %v8312_v54 = vmax.f32 %v14301_v31, 0.0  ;;  %v16410_v42 = vld [vmem:[#allocation11 + $0x48] ss:$16 sps:$4 sm:$0xff]   ;;  %v16415_v3 = vld [vmem:[#allocation11 + $0x64] ss:$16 sps:$4 sm:$0xff]  }
 0x794   : > { %v8502_v28 = vpack.c.bf16 %v8309_v57, %v8305_v15  ;;  %v18668_v4 = vpack.c.bf16 %v8311_v14, %v8307_v17  ;;  %v16416_v46 = vld [vmem:[#allocation11 + $0x68] ss:$16 sps:$4 sm:$0xff]   ;;  %v16421_v8 = vld [vmem:[#allocation11 + $0x84] ss:$16 sps:$4 sm:$0xff]   ;;  %v16424_v48 = vld [vmem:[#allocation11 + $0x8c] ss:$16 sps:$4 sm:$0xff]  }
 0x795   : > { %v8503_v41 = vpack.c.bf16 %v8310_v7, %v8306_v18  ;;  %v18670_v35 = vpack.c.bf16 %v8312_v54, %v8308_v32  ;;  %v16419_v11 = vld [vmem:[#allocation11 + $0x80] ss:$16 sps:$4 sm:$0xff]   ;;  %v16422_v2 = vld [vmem:[#allocation11 + $0x88] ss:$16 sps:$4 sm:$0xff]   ;;  %v16427_v50 = vld [vmem:[#allocation11 + $0xa4] ss:$16 sps:$4 sm:$0xff]  }
 0x796   : > { %v16428_v56 = vld [vmem:[#allocation11 + $0xa8] ss:$16 sps:$4 sm:$0xff]   ;;  %v16433_v31 = vld [vmem:[#allocation11 + $0xc4] ss:$16 sps:$4 sm:$0xff]   ;;  %v16436_v15 = vld [vmem:[#allocation11 + $0xcc] ss:$16 sps:$4 sm:$0xff]  }
 0x797   : > { %9349 = vmatprep.mubr.bf16.mxu0 %v8503_v41  ;;  %9735 = vmatprep.mubr.bf16.mxu1 %v8503_v41  ;;  %v16431_v17 = vld [vmem:[#allocation11 + $0xc0] ss:$16 sps:$4 sm:$0xff]   ;;  %v16434_v57 = vld [vmem:[#allocation11 + $0xc8] ss:$16 sps:$4 sm:$0xff]   ;;  %v16439_v14 = vld [vmem:[#allocation11 + $0xe4] ss:$16 sps:$4 sm:$0xff]  }
 0x798   : > { %9350 = vmatmul.mubr.bf16.gmra.mrb[124].mxu0 %v8502_v28  ;;  %9736 = vmatmul.mubr.bf16.gmra.mrb[124].mxu1 %v8502_v28  ;;  %v16440_v18 = vld [vmem:[#allocation11 + $0xe8] ss:$16 sps:$4 sm:$0xff]   ;;  %v16445_v32 = vld [vmem:[#allocation11 + $0x104] ss:$16 sps:$4 sm:$0xff]   ;;  %v16448_v7 = vld [vmem:[#allocation11 + $0x10c] ss:$16 sps:$4 sm:$0xff]  }
 0x799   : > { %9392 = vmatprep.mubr.bf16.mxu0 %v18490_v37  ;;  %9778 = vmatprep.mubr.bf16.mxu1 %v18490_v37  ;;  %v16412_v37 = vld [vmem:[#allocation11 + $0x4c] ss:$16 sps:$4 sm:$0xff]   ;;  %v16443_v54 = vld [vmem:[#allocation11 + $0x100] ss:$16 sps:$4 sm:$0xff]   ;;  %v16446_v28 = vld [vmem:[#allocation11 + $0x108] ss:$16 sps:$4 sm:$0xff]  }
 0x79a   : > { %v16451_v41 = vld [vmem:[#allocation11 + $0x124] ss:$16 sps:$4 sm:$0xff]  }
 0x7a0   : > { %9393 = vmatmul.mubr.bf16.vlgmr.msra.gmra.mrb[64].mxu0 %v18488_v51  ;;  %9779 = vmatmul.mubr.bf16.vlgmr.msra.gmra.mrb[64].mxu1 %v18488_v51  ;;  %v16418_v51 = vld [vmem:[#allocation11 + $0x6c] ss:$16 sps:$4 sm:$0xff]  }
 0x7a1   : > { %9402 = vmatprep.mubr.bf16.mxu0 %v18502_v45  ;;  %9788 = vmatprep.mubr.bf16.mxu1 %v18502_v45  ;;  %v16413_v45 = vld [vmem:[#allocation11 + $0x60] ss:$16 sps:$4 sm:$0xff]  }
 0x7a2   : > { %10922 = vmatpush1.bf16.msra.mxu0 %v16395_v34  ;;  %11308 = vmatpush1.bf16.msra.mxu1 %v16398_v21  ;;  %v16452_v34 = vld [vmem:[#allocation11 + $0x128] ss:$16 sps:$4 sm:$0xff]   ;;  %v16457_v21 = vld [vmem:[#allocation11 + $0x144] ss:$16 sps:$4 sm:$0xff]  }
 0x7a3   : > { %10923 = vmatprep.subr.bf16.mxu0 %v16403_v20  ;;  %11309 = vmatprep.subr.bf16.mxu1 %v16406_v19  ;;  %v16460_v20 = vld [vmem:[#allocation11 + $0x14c] ss:$16 sps:$4 sm:$0xff]   ;;  %v16455_v19 = vld [vmem:[#allocation11 + $0x140] ss:$16 sps:$4 sm:$0xff]  }
 0x7a6   : > { %10924 = vmatpush1.bf16.msra.mxu0 %v16401_v0  ;;  %11310 = vmatpush1.bf16.msra.mxu1 %v16404_v47  ;;  %v16458_v0 = vld [vmem:[#allocation11 + $0x148] ss:$16 sps:$4 sm:$0xff]   ;;  %v16463_v47 = vld [vmem:[#allocation11 + $0x164] ss:$16 sps:$4 sm:$0xff]  }
 0x7a7   : > { %10925 = vmatprep.subr.bf16.mxu0 %v16409_v63  ;;  %11311 = vmatprep.subr.bf16.mxu1 %v16412_v37  ;;  %v16464_v63 = vld [vmem:[#allocation11 + $0x168] ss:$16 sps:$4 sm:$0xff]   ;;  %v16469_v37 = vld [vmem:[#allocation11 + $0x184] ss:$16 sps:$4 sm:$0xff]  }
 0x7a8   : > { %9403 = vmatmul.mubr.bf16.gmra.mrb[68].mxu0 %v18500_v49  ;;  %9789 = vmatmul.mubr.bf16.gmra.mrb[68].mxu1 %v18500_v49  ;;  %v16430_v49 = vld [vmem:[#allocation11 + $0xac] ss:$16 sps:$4 sm:$0xff]  }
 0x7a9   : > { %9412 = vmatprep.mubr.bf16.mxu0 %v18514_v55  ;;  %9798 = vmatprep.mubr.bf16.mxu1 %v18514_v55  ;;  %v16425_v55 = vld [vmem:[#allocation11 + $0xa0] ss:$16 sps:$4 sm:$0xff]  }
 0x7aa   : > { %10926 = vmatpush1.bf16.msra.mxu0 %v16407_v39  ;;  %11312 = vmatpush1.bf16.msra.mxu1 %v16410_v42  ;;  %v16472_v39 = vld [vmem:[#allocation11 + $0x18c] ss:$16 sps:$4 sm:$0xff]   ;;  %v16467_v42 = vld [vmem:[#allocation11 + $0x180] ss:$16 sps:$4 sm:$0xff]  }
 0x7ab   : > { %10927 = vmatprep.subr.bf16.mxu0 %v16415_v3  ;;  %11313 = vmatprep.subr.bf16.mxu1 %v16418_v51  ;;  %v16470_v3 = vld [vmem:[#allocation11 + $0x188] ss:$16 sps:$4 sm:$0xff]   ;;  %v16475_v51 = vld [vmem:[#allocation11 + $0x1a4] ss:$16 sps:$4 sm:$0xff]  }
 0x7ae   : > { %10928 = vmatpush1.bf16.msra.mxu0 %v16413_v45  ;;  %11314 = vmatpush1.bf16.msra.mxu1 %v16416_v46  ;;  %v16476_v45 = vld [vmem:[#allocation11 + $0x1a8] ss:$16 sps:$4 sm:$0xff]   ;;  %v16481_v46 = vld [vmem:[#allocation11 + $0x1c4] ss:$16 sps:$4 sm:$0xff]  }
 0x7af   : > { %10929 = vmatprep.subr.bf16.mxu0 %v16421_v8  ;;  %11315 = vmatprep.subr.bf16.mxu1 %v16424_v48  ;;  %v16484_v8 = vld [vmem:[#allocation11 + $0x1cc] ss:$16 sps:$4 sm:$0xff]   ;;  %v16479_v48 = vld [vmem:[#allocation11 + $0x1c0] ss:$16 sps:$4 sm:$0xff]  }
 0x7b0   : > { %9413 = vmatmul.mubr.bf16.gmra.mrb[72].mxu0 %v18512_v27  ;;  %9799 = vmatmul.mubr.bf16.gmra.mrb[72].mxu1 %v18512_v27  ;;  %v16442_v27 = vld [vmem:[#allocation11 + $0xec] ss:$16 sps:$4 sm:$0xff]  }
 0x7b1   : > { %9422 = vmatprep.mubr.bf16.mxu0 %v18526_v12  ;;  %9808 = vmatprep.mubr.bf16.mxu1 %v18526_v12  ;;  %v16437_v12 = vld [vmem:[#allocation11 + $0xe0] ss:$16 sps:$4 sm:$0xff]  }
 0x7b2   : > { %10930 = vmatpush1.bf16.msra.mxu0 %v16419_v11  ;;  %11316 = vmatpush1.bf16.msra.mxu1 %v16422_v2  ;;  %v16482_v11 = vld [vmem:[#allocation11 + $0x1c8] ss:$16 sps:$4 sm:$0xff]  }
 0x7b3   : > { %10931 = vmatprep.subr.bf16.mxu0 %v16427_v50  ;;  %11317 = vmatprep.subr.bf16.mxu1 %v16430_v49 }
 0x7b6   : > { %10932 = vmatpush1.bf16.msra.mxu0 %v16425_v55  ;;  %11318 = vmatpush1.bf16.msra.mxu1 %v16428_v56 }
 0x7b7   : > { %10933 = vmatprep.subr.bf16.mxu0 %v16433_v31  ;;  %11319 = vmatprep.subr.bf16.mxu1 %v16436_v15 }
 0x7b8   : > { %9423 = vmatmul.mubr.bf16.gmra.mrb[76].mxu0 %v18524_v59  ;;  %9809 = vmatmul.mubr.bf16.gmra.mrb[76].mxu1 %v18524_v59  ;;  %v16454_v59 = vld [vmem:[#allocation11 + $0x12c] ss:$16 sps:$4 sm:$0xff]  }
 0x7b9   : > { %9432 = vmatprep.mubr.bf16.mxu0 %v18538_v23  ;;  %9818 = vmatprep.mubr.bf16.mxu1 %v18538_v23  ;;  %v16449_v23 = vld [vmem:[#allocation11 + $0x120] ss:$16 sps:$4 sm:$0xff]  }
 0x7ba   : > { %10934 = vmatpush1.bf16.msra.mxu0 %v16431_v17  ;;  %11320 = vmatpush1.bf16.msra.mxu1 %v16434_v57 }
 0x7bb   : > { %10935 = vmatprep.subr.bf16.mxu0 %v16439_v14  ;;  %11321 = vmatprep.subr.bf16.mxu1 %v16442_v27 }
 0x7be   : > { %10936 = vmatpush1.bf16.msra.mxu0 %v16437_v12  ;;  %11322 = vmatpush1.bf16.msra.mxu1 %v16440_v18 }
 0x7bf   : > { %10937 = vmatprep.subr.bf16.mxu0 %v16445_v32  ;;  %11323 = vmatprep.subr.bf16.mxu1 %v16448_v7 }
 0x7c0   : > { %9433 = vmatmul.mubr.bf16.gmra.mrb[80].mxu0 %v18536_v25  ;;  %9819 = vmatmul.mubr.bf16.gmra.mrb[80].mxu1 %v18536_v25  ;;  %v16466_v25 = vld [vmem:[#allocation11 + $0x16c] ss:$16 sps:$4 sm:$0xff]  }
 0x7c1   : > { %9442 = vmatprep.mubr.bf16.mxu0 %v18550_v58  ;;  %9828 = vmatprep.mubr.bf16.mxu1 %v18550_v58  ;;  %v16461_v58 = vld [vmem:[#allocation11 + $0x160] ss:$16 sps:$4 sm:$0xff]  }
 0x7c2   : > { %10938 = vmatpush1.bf16.msra.mxu0 %v16443_v54  ;;  %11324 = vmatpush1.bf16.msra.mxu1 %v16446_v28 }
 0x7c3   : > { %10939 = vmatprep.subr.bf16.mxu0 %v16451_v41  ;;  %11325 = vmatprep.subr.bf16.mxu1 %v16454_v59 }
 0x7c6   : > { %10940 = vmatpush1.bf16.msra.mxu0 %v16449_v23  ;;  %11326 = vmatpush1.bf16.msra.mxu1 %v16452_v34 }
 0x7c7   : > { %10941 = vmatprep.subr.bf16.mxu0 %v16457_v21  ;;  %11327 = vmatprep.subr.bf16.mxu1 %v16460_v20  ;;  %v16491_v20 = vld [vmem:[#allocation11 + $0x200] ss:$16 sps:$4 sm:$0xff]  }
 0x7c8   : > { %9443 = vmatmul.mubr.bf16.gmra.mrb[84].mxu0 %v18548_v16  ;;  %9829 = vmatmul.mubr.bf16.gmra.mrb[84].mxu1 %v18548_v16  ;;  %v16478_v16 = vld [vmem:[#allocation11 + $0x1ac] ss:$16 sps:$4 sm:$0xff]  }
 0x7c9   : > { %9452 = vmatprep.mubr.bf16.mxu0 %v18562_v26  ;;  %9838 = vmatprep.mubr.bf16.mxu1 %v18562_v26  ;;  %v16473_v26 = vld [vmem:[#allocation11 + $0x1a0] ss:$16 sps:$4 sm:$0xff]  }
 0x7ca   : > { %10942 = vmatpush1.bf16.msra.mxu0 %v16455_v19  ;;  %11328 = vmatpush1.bf16.msra.mxu1 %v16458_v0  ;;  %v16494_v19 = vld [vmem:[#allocation11 + $0x208] ss:$16 sps:$4 sm:$0xff]  }
 0x7cb   : > { %10943 = vmatprep.subr.bf16.mxu0 %v16463_v47  ;;  %11329 = vmatprep.subr.bf16.mxu1 %v16466_v25 }
 0x7ce   : > { %10944 = vmatpush1.bf16.msra.mxu0 %v16461_v58  ;;  %11330 = vmatpush1.bf16.msra.mxu1 %v16464_v63  ;;  %v16499_v63 = vld [vmem:[#allocation11 + $0x224] ss:$16 sps:$4 sm:$0xff]  }
 0x7cf   : > { %10945 = vmatprep.subr.bf16.mxu0 %v16469_v37  ;;  %11331 = vmatprep.subr.bf16.mxu1 %v16472_v39  ;;  %v16502_v37 = vld [vmem:[#allocation11 + $0x22c] ss:$16 sps:$4 sm:$0xff]  }
 0x7d0   : > { %9453 = vmatmul.mubr.bf16.gmra.mrb[88].mxu0 %v18560_v13  ;;  %9839 = vmatmul.mubr.bf16.gmra.mrb[88].mxu1 %v18560_v13  ;;  %v16487_v13 = vld [vmem:[#allocation11 + $0x1e4] ss:$16 sps:$4 sm:$0xff]  }
 0x7d1   : > { %9462 = vmatprep.mubr.bf16.mxu0 %v18574_v29  ;;  %9848 = vmatprep.mubr.bf16.mxu1 %v18574_v29  ;;  %v16485_v29 = vld [vmem:[#allocation11 + $0x1e0] ss:$16 sps:$4 sm:$0xff]  }
 0x7d2   : > { %10946 = vmatpush1.bf16.msra.mxu0 %v16467_v42  ;;  %11332 = vmatpush1.bf16.msra.mxu1 %v16470_v3 }
 0x7d3   : > { %10947 = vmatprep.subr.bf16.mxu0 %v16475_v51  ;;  %11333 = vmatprep.subr.bf16.mxu1 %v16478_v16 }
 0x7d6   : > { %10948 = vmatpush1.bf16.msra.mxu0 %v16473_v26  ;;  %11334 = vmatpush1.bf16.msra.mxu1 %v16476_v45 }
 0x7d7   : > { %10949 = vmatprep.subr.bf16.mxu0 %v16481_v46  ;;  %11335 = vmatprep.subr.bf16.mxu1 %v16484_v8 }
 0x7d8   : > { %9463 = vmatmul.mubr.bf16.gmra.mrb[92].mxu0 %v18572_v30  ;;  %9849 = vmatmul.mubr.bf16.gmra.mrb[92].mxu1 %v18572_v30  ;;  %v16490_v30 = vld [vmem:[#allocation11 + $0x1ec] ss:$16 sps:$4 sm:$0xff]  }
 0x7d9   : > { %9472 = vmatprep.mubr.bf16.mxu0 %v18586_v33  ;;  %9858 = vmatprep.mubr.bf16.mxu1 %v18586_v33  ;;  %v16493_v33 = vld [vmem:[#allocation11 + $0x204] ss:$16 sps:$4 sm:$0xff]  }
 0x7da   : > { %10950 = vmatpush1.bf16.msra.mxu0 %v16479_v48  ;;  %11336 = vmatpush1.bf16.msra.mxu1 %v16482_v11  ;;  %v16497_v11 = vld [vmem:[#allocation11 + $0x220] ss:$16 sps:$4 sm:$0xff]  }
 0x7db   : > { %10951 = vmatprep.subr.bf16.mxu0 %v16487_v13  ;;  %11337 = vmatprep.subr.bf16.mxu1 %v16490_v30  ;;  %v16500_v13 = vld [vmem:[#allocation11 + $0x228] ss:$16 sps:$4 sm:$0xff]   ;;  %v16505_v30 = vld [vmem:[#allocation11 + $0x244] ss:$16 sps:$4 sm:$0xff]  }
 0x7de   : > { %10952 = vmatpush1.bf16.msra.mxu0 %v16485_v29 }
 0x7df   : > { %11114 = vmatprep.subr.bf16.mxu0 %v16493_v33 }
 0x7e0   : > { %9473 = vmatmul.mubr.bf16.gmra.mrb[96].mxu0 %v18584_v53  ;;  %9859 = vmatmul.mubr.bf16.gmra.mrb[96].mxu1 %v18584_v53  ;;  %v16488_v53 = vld [vmem:[#allocation11 + $0x1e8] ss:$16 sps:$4 sm:$0xff]  }
 0x7e1   : > { %9482 = vmatprep.mubr.bf16.mxu0 %v18598_v43  ;;  %9868 = vmatprep.mubr.bf16.mxu1 %v18598_v43  ;;  %v8441_v43 = vld [vmem:[%s19384_s12] sm:$0xf] }
 0x7e2   : > { %11338 = vmatpush1.bf16.msra.mxu1 %v16488_v53 }
 0x7e8   : > { %9483 = vmatmul.mubr.bf16.gmra.mrb[100].mxu0 %v18596_v52  ;;  %9869 = vmatmul.mubr.bf16.gmra.mrb[100].mxu1 %v18596_v52  ;;  %v16496_v52 = vld [vmem:[#allocation11 + $0x20c] ss:$16 sps:$4 sm:$0xff]  }
 0x7e9   : > { %9492 = vmatprep.mubr.bf16.mxu0 %v18610_v36  ;;  %9878 = vmatprep.mubr.bf16.mxu1 %v18610_v36  ;;  %v18743_v36 = vrot.slane %v8441_v43, %v17387_v6 }
 0x7ea   : > { %11500 = vmatprep.subr.bf16.mxu1 %v16496_v52 }
 0x7f0   : > { %9493 = vmatmul.mubr.bf16.gmra.mrb[104].mxu0 %v18608_v44  ;;  %9879 = vmatmul.mubr.bf16.gmra.mrb[104].mxu1 %v18608_v44  ;;  %v18740_v44 = vrot.slane %v8441_v43, %v17373_v62 }
 0x7f1   : > { %9502 = vmatprep.mubr.bf16.mxu0 %v18622_v24  ;;  %9888 = vmatprep.mubr.bf16.mxu1 %v18622_v24  ;;  %v18749_v24 = vrot.slane %v8441_v43, %v17390_v9 }
 0x7f8   : > { %9503 = vmatmul.mubr.bf16.gmra.mrb[108].mxu0 %v18620_v10  ;;  %9889 = vmatmul.mubr.bf16.gmra.mrb[108].mxu1 %v18620_v10  ;;  %v18746_v10 = vrot.slane %v8441_v43, %v17378_v1  ;;  %v16508_v43 = vld [vmem:[#allocation11 + $0x24c] ss:$16 sps:$4 sm:$0xff]  }
 0x7f9   : > { %9512 = vmatprep.mubr.bf16.mxu0 %v18634_v61  ;;  %9898 = vmatprep.mubr.bf16.mxu1 %v18634_v61 }
 0x800   : > { %9513 = vmatmul.mubr.bf16.gmra.mrb[112].mxu0 %v18632_v5  ;;  %9899 = vmatmul.mubr.bf16.gmra.mrb[112].mxu1 %v18632_v5 }
 0x801   : > { %9522 = vmatprep.mubr.bf16.mxu0 %v18646_v40  ;;  %9908 = vmatprep.mubr.bf16.mxu1 %v18646_v40 }
 0x808   : > { %9523 = vmatmul.mubr.bf16.gmra.mrb[116].mxu0 %v18644_v22  ;;  %9909 = vmatmul.mubr.bf16.gmra.mrb[116].mxu1 %v18644_v22 }
 0x809   : > { %9532 = vmatprep.mubr.bf16.mxu0 %v18658_v38  ;;  %9918 = vmatprep.mubr.bf16.mxu1 %v18658_v38 }
 0x810   : > { %9533 = vmatmul.mubr.bf16.gmra.mrb[120].mxu0 %v18656_v60  ;;  %9919 = vmatmul.mubr.bf16.gmra.mrb[120].mxu1 %v18656_v60 }
 0x811   : > { %9542 = vmatprep.mubr.bf16.mxu0 %v18670_v35  ;;  %9928 = vmatprep.mubr.bf16.mxu1 %v18670_v35 }
 0x818   : > { %9543 = vmatmul.mubr.bf16.gmra.mrb[124].mxu0 %v18668_v4  ;;  %9929 = vmatmul.mubr.bf16.gmra.mrb[124].mxu1 %v18668_v4 }
 0x873   : > { %v9394_v5 = vpop.f32.mrb[64].mxu0  ;;  %v9780_v61 = vpop.f32.mrb[64].mxu1 }
 0x874   : > { %v14302_v22 = vadd.f32 %v9394_v5, %v18740_v44  ;;  %v14366_v40 = vadd.f32 %v9780_v61, %v18743_v36  ;;  %v9396_v60 = vpop.f32.mrb[65].mxu0  ;;  %v9782_v38 = vpop.f32.mrb[65].mxu1 }
 0x875   : > { %v14303_v4 = vadd.f32 %v9396_v60, %v18746_v10  ;;  %v14367_v35 = vadd.f32 %v9782_v38, %v18749_v24  ;;  %v9398_v2 = vpop.f32.mrb[66].mxu0  ;;  %v9784_v50 = vpop.f32.mrb[66].mxu1 }
 0x876   : > { %v14304_v49 = vadd.f32 %v9398_v2, %v18740_v44  ;;  %v14368_v55 = vadd.f32 %v9784_v50, %v18743_v36  ;;  %v9400_v56 = vpop.f32.mrb[67].mxu0  ;;  %v9786_v31 = vpop.f32.mrb[67].mxu1  ;;  %v9939_v57 = vmax.f32 %v14302_v22, 0.0  ;;  %v9941_v14 = vmax.f32 %v14366_v40, 0.0 }
 0x877   : > { %v14305_v15 = vadd.f32 %v9400_v56, %v18746_v10  ;;  %v14369_v17 = vadd.f32 %v9786_v31, %v18749_v24  ;;  %v9940_v18 = vmax.f32 %v14303_v4, 0.0  ;;  %v9942_v32 = vmax.f32 %v14367_v35, 0.0 }
 0x878   : > { %v9943_v27 = vmax.f32 %v14304_v49, 0.0  ;;  %v9945_v12 = vmax.f32 %v14368_v55, 0.0  ;;  %v16503_v49 = vld [vmem:[#allocation11 + $0x240] ss:$16 sps:$4 sm:$0xff]   ;;  %v16506_v55 = vld [vmem:[#allocation11 + $0x248] ss:$16 sps:$4 sm:$0xff]  }
 0x879   : > { %v9944_v7 = vmax.f32 %v14305_v15, 0.0  ;;  %v9946_v54 = vmax.f32 %v14369_v17, 0.0 }
 0x87a   : > { %v10196_v28 = vpack.c.bf16 %v9943_v27, %v9939_v57  ;;  %v18759_v41 = vpack.c.bf16 %v9945_v12, %v9941_v14  ;;  %v16511_v57 = vld [vmem:[#allocation11 + $0x264] ss:$16 sps:$4 sm:$0xff]   ;;  %v16514_v14 = vld [vmem:[#allocation11 + $0x26c] ss:$16 sps:$4 sm:$0xff]  }
 0x87b   : > { %v10197_v59 = vpack.c.bf16 %v9944_v7, %v9940_v18  ;;  %v18761_v23 = vpack.c.bf16 %v9946_v54, %v9942_v32  ;;  %v9404_v34 = vpop.f32.mrb[68].mxu0  ;;  %v9790_v21 = vpop.f32.mrb[68].mxu1 }
 0x87c   : > { %v14306_v0 = vadd.f32 %v9404_v34, %v18740_v44  ;;  %v14370_v47 = vadd.f32 %v9790_v21, %v18743_v36  ;;  %v9406_v25 = vpop.f32.mrb[69].mxu0  ;;  %v9792_v58 = vpop.f32.mrb[69].mxu1 }
 0x87d   : > { %v14307_v39 = vadd.f32 %v9406_v25, %v18746_v10  ;;  %v14371_v42 = vadd.f32 %v9792_v58, %v18749_v24  ;;  %v9408_v3 = vpop.f32.mrb[70].mxu0  ;;  %v9794_v51 = vpop.f32.mrb[70].mxu1  ;;  %10953 = vmatprep.mubr.bf16.mxu0 %v10197_v59  ;;  %11339 = vmatprep.mubr.bf16.mxu1 %v10197_v59 }
 0x87e   : > { %v14308_v16 = vadd.f32 %v9408_v3, %v18740_v44  ;;  %v14372_v26 = vadd.f32 %v9794_v51, %v18743_v36  ;;  %v9410_v45 = vpop.f32.mrb[71].mxu0  ;;  %v9796_v46 = vpop.f32.mrb[71].mxu1  ;;  %10954 = vmatmul.mubr.bf16.vlgmr.msra.gmra.mrb[128].mxu0 %v10196_v28  ;;  %11340 = vmatmul.mubr.bf16.vlgmr.msra.gmra.mrb[128].mxu1 %v10196_v28  ;;  %v9947_v29 = vmax.f32 %v14306_v0, 0.0  ;;  %v9949_v53 = vmax.f32 %v14370_v47, 0.0  ;;  %v16517_v0 = vld [vmem:[#allocation11 + $0x284] ss:$16 sps:$4 sm:$0xff]  }
 0x87f   : > { %v14309_v8 = vadd.f32 %v9410_v45, %v18746_v10  ;;  %v14373_v48 = vadd.f32 %v9796_v46, %v18749_v24  ;;  %11115 = vmatpush1.bf16.msra.mxu0 %v16491_v20  ;;  %11501 = vmatpush1.bf16.msra.mxu1 %v16494_v19  ;;  %v9948_v5 = vmax.f32 %v14307_v39, 0.0  ;;  %v9950_v61 = vmax.f32 %v14371_v42, 0.0  ;;  %v16509_v20 = vld [vmem:[#allocation11 + $0x260] ss:$16 sps:$4 sm:$0xff]   ;;  %v16512_v19 = vld [vmem:[#allocation11 + $0x268] ss:$16 sps:$4 sm:$0xff]  }
 0x880   : > { %v9951_v33 = vmax.f32 %v14308_v16, 0.0  ;;  %v9953_v52 = vmax.f32 %v14372_v26, 0.0  ;;  %11116 = vmatprep.subr.bf16.mxu0 %v16499_v63  ;;  %11502 = vmatprep.subr.bf16.mxu1 %v16502_v37  ;;  %v16520_v37 = vld [vmem:[#allocation11 + $0x28c] ss:$16 sps:$4 sm:$0xff]  }
 0x881   : > { %v9952_v22 = vmax.f32 %v14309_v8, 0.0  ;;  %v9954_v40 = vmax.f32 %v14373_v48, 0.0 }
 0x882   : > { %v10200_v60 = vpack.c.bf16 %v9951_v33, %v9947_v29  ;;  %v18771_v38 = vpack.c.bf16 %v9953_v52, %v9949_v53  ;;  %v16523_v52 = vld [vmem:[#allocation11 + $0x2a4] ss:$16 sps:$4 sm:$0xff]  }
 0x883   : > { %v10201_v4 = vpack.c.bf16 %v9952_v22, %v9948_v5  ;;  %v18773_v35 = vpack.c.bf16 %v9954_v40, %v9950_v61  ;;  %v9414_v2 = vpop.f32.mrb[72].mxu0  ;;  %v9800_v50 = vpop.f32.mrb[72].mxu1  ;;  %11117 = vmatpush1.bf16.msra.mxu0 %v16497_v11  ;;  %11503 = vmatpush1.bf16.msra.mxu1 %v16500_v13  ;;  %v16515_v11 = vld [vmem:[#allocation11 + $0x280] ss:$16 sps:$4 sm:$0xff]   ;;  %v16518_v13 = vld [vmem:[#allocation11 + $0x288] ss:$16 sps:$4 sm:$0xff]  }
 0x884   : > { %v14310_v56 = vadd.f32 %v9414_v2, %v18740_v44  ;;  %v14374_v31 = vadd.f32 %v9800_v50, %v18743_v36  ;;  %v9416_v15 = vpop.f32.mrb[73].mxu0  ;;  %v9802_v17 = vpop.f32.mrb[73].mxu1  ;;  %11118 = vmatprep.subr.bf16.mxu0 %v16505_v30  ;;  %11504 = vmatprep.subr.bf16.mxu1 %v16508_v43  ;;  %v16526_v43 = vld [vmem:[#allocation11 + $0x2ac] ss:$16 sps:$4 sm:$0xff]  }
 0x885   : > { %v14311_v27 = vadd.f32 %v9416_v15, %v18746_v10  ;;  %v14375_v12 = vadd.f32 %v9802_v17, %v18749_v24  ;;  %v9418_v18 = vpop.f32.mrb[74].mxu0  ;;  %v9804_v32 = vpop.f32.mrb[74].mxu1  ;;  %10963 = vmatprep.mubr.bf16.mxu0 %v10201_v4  ;;  %11349 = vmatprep.mubr.bf16.mxu1 %v10201_v4  ;;  %v16529_v15 = vld [vmem:[#allocation11 + $0x2c4] ss:$16 sps:$4 sm:$0xff]  }
 0x886   : > { %v14312_v7 = vadd.f32 %v9418_v18, %v18740_v44  ;;  %v14376_v54 = vadd.f32 %v9804_v32, %v18743_v36  ;;  %v9420_v28 = vpop.f32.mrb[75].mxu0  ;;  %v9806_v59 = vpop.f32.mrb[75].mxu1  ;;  %10964 = vmatmul.mubr.bf16.gmra.mrb[132].mxu0 %v10200_v60  ;;  %11350 = vmatmul.mubr.bf16.gmra.mrb[132].mxu1 %v10200_v60  ;;  %v9955_v47 = vmax.f32 %v14310_v56, 0.0  ;;  %v9957_v25 = vmax.f32 %v14374_v31, 0.0  ;;  %v16521_v56 = vld [vmem:[#allocation11 + $0x2a0] ss:$16 sps:$4 sm:$0xff]  }
 0x887   : > { %v14313_v34 = vadd.f32 %v9420_v28, %v18746_v10  ;;  %v14377_v21 = vadd.f32 %v9806_v59, %v18749_v24  ;;  %11119 = vmatpush1.bf16.msra.mxu0 %v16503_v49  ;;  %11505 = vmatpush1.bf16.msra.mxu1 %v16506_v55  ;;  %v9956_v39 = vmax.f32 %v14311_v27, 0.0  ;;  %v9958_v42 = vmax.f32 %v14375_v12, 0.0  ;;  %v16524_v31 = vld [vmem:[#allocation11 + $0x2a8] ss:$16 sps:$4 sm:$0xff]   ;;  %v16532_v12 = vld [vmem:[#allocation11 + $0x2cc] ss:$16 sps:$4 sm:$0xff]  }
 0x888   : > { %v9959_v58 = vmax.f32 %v14312_v7, 0.0  ;;  %v9961_v63 = vmax.f32 %v14376_v54, 0.0  ;;  %11120 = vmatprep.subr.bf16.mxu0 %v16511_v57  ;;  %11506 = vmatprep.subr.bf16.mxu1 %v16514_v14 }
 0x889   : > { %v9960_v3 = vmax.f32 %v14313_v34, 0.0  ;;  %v9962_v51 = vmax.f32 %v14377_v21, 0.0 }
 0x88a   : > { %v10204_v16 = vpack.c.bf16 %v9959_v58, %v9955_v47  ;;  %v18783_v26 = vpack.c.bf16 %v9961_v63, %v9957_v25  ;;  %v16530_v47 = vld [vmem:[#allocation11 + $0x2c8] ss:$16 sps:$4 sm:$0xff]  }
 0x88b   : > { %v10205_v45 = vpack.c.bf16 %v9960_v3, %v9956_v39  ;;  %v18785_v46 = vpack.c.bf16 %v9962_v51, %v9958_v42  ;;  %v9424_v8 = vpop.f32.mrb[76].mxu0  ;;  %v9810_v48 = vpop.f32.mrb[76].mxu1  ;;  %11121 = vmatpush1.bf16.msra.mxu0 %v16509_v20  ;;  %11507 = vmatpush1.bf16.msra.mxu1 %v16512_v19  ;;  %v16535_v39 = vld [vmem:[#allocation11 + $0x2e4] ss:$16 sps:$4 sm:$0xff]   ;;  %v16538_v42 = vld [vmem:[#allocation11 + $0x2ec] ss:$16 sps:$4 sm:$0xff]  }
 0x88c   : > { %v14314_v30 = vadd.f32 %v9424_v8, %v18740_v44  ;;  %v14378_v29 = vadd.f32 %v9810_v48, %v18743_v36  ;;  %v9426_v53 = vpop.f32.mrb[77].mxu0  ;;  %v9812_v33 = vpop.f32.mrb[77].mxu1  ;;  %11122 = vmatprep.subr.bf16.mxu0 %v16517_v0  ;;  %11508 = vmatprep.subr.bf16.mxu1 %v16520_v37  ;;  %v16527_v0 = vld [vmem:[#allocation11 + $0x2c0] ss:$16 sps:$4 sm:$0xff]  }
 0x88d   : > { %v14315_v5 = vadd.f32 %v9426_v53, %v18746_v10  ;;  %v14379_v61 = vadd.f32 %v9812_v33, %v18749_v24  ;;  %v9428_v22 = vpop.f32.mrb[78].mxu0  ;;  %v9814_v40 = vpop.f32.mrb[78].mxu1  ;;  %10973 = vmatprep.mubr.bf16.mxu0 %v10205_v45  ;;  %11359 = vmatprep.mubr.bf16.mxu1 %v10205_v45  ;;  %v16533_v53 = vld [vmem:[#allocation11 + $0x2e0] ss:$16 sps:$4 sm:$0xff]   ;;  %v16536_v33 = vld [vmem:[#allocation11 + $0x2e8] ss:$16 sps:$4 sm:$0xff]  }
 0x88e   : > { %v14316_v60 = vadd.f32 %v9428_v22, %v18740_v44  ;;  %v14380_v4 = vadd.f32 %v9814_v40, %v18743_v36  ;;  %v9430_v2 = vpop.f32.mrb[79].mxu0  ;;  %v9816_v50 = vpop.f32.mrb[79].mxu1  ;;  %10974 = vmatmul.mubr.bf16.gmra.mrb[136].mxu0 %v10204_v16  ;;  %11360 = vmatmul.mubr.bf16.gmra.mrb[136].mxu1 %v10204_v16  ;;  %v9963_v17 = vmax.f32 %v14314_v30, 0.0  ;;  %v9965_v57 = vmax.f32 %v14378_v29, 0.0  ;;  %v16544_v40 = vld [vmem:[#allocation11 + $0x30c] ss:$16 sps:$4 sm:$0xff]  }
 0x88f   : > { %v14317_v49 = vadd.f32 %v9430_v2, %v18746_v10  ;;  %v14381_v55 = vadd.f32 %v9816_v50, %v18749_v24  ;;  %11123 = vmatpush1.bf16.msra.mxu0 %v16515_v11  ;;  %11509 = vmatpush1.bf16.msra.mxu1 %v16518_v13  ;;  %v9964_v18 = vmax.f32 %v14315_v5, 0.0  ;;  %v9966_v32 = vmax.f32 %v14379_v61, 0.0 }
 0x890   : > { %v9967_v14 = vmax.f32 %v14316_v60, 0.0  ;;  %v9969_v27 = vmax.f32 %v14380_v4, 0.0  ;;  %11124 = vmatprep.subr.bf16.mxu0 %v16523_v52  ;;  %11510 = vmatprep.subr.bf16.mxu1 %v16526_v43  ;;  %v16541_v52 = vld [vmem:[#allocation11 + $0x304] ss:$16 sps:$4 sm:$0xff]  }
 0x891   : > { %v9968_v7 = vmax.f32 %v14317_v49, 0.0  ;;  %v9970_v54 = vmax.f32 %v14381_v55, 0.0 }
 0x892   : > { %v10208_v28 = vpack.c.bf16 %v9967_v14, %v9963_v17  ;;  %v18795_v59 = vpack.c.bf16 %v9969_v27, %v9965_v57  ;;  %v16539_v57 = vld [vmem:[#allocation11 + $0x300] ss:$16 sps:$4 sm:$0xff]   ;;  %v16542_v14 = vld [vmem:[#allocation11 + $0x308] ss:$16 sps:$4 sm:$0xff]  }
 0x893   : > { %v10209_v34 = vpack.c.bf16 %v9968_v7, %v9964_v18  ;;  %v18797_v21 = vpack.c.bf16 %v9970_v54, %v9966_v32  ;;  %v9434_v20 = vpop.f32.mrb[80].mxu0  ;;  %v9820_v19 = vpop.f32.mrb[80].mxu1  ;;  %11125 = vmatpush1.bf16.msra.mxu0 %v16521_v56  ;;  %11511 = vmatpush1.bf16.msra.mxu1 %v16524_v31  ;;  %v16547_v7 = vld [vmem:[#allocation11 + $0x324] ss:$16 sps:$4 sm:$0xff]   ;;  %v16550_v54 = vld [vmem:[#allocation11 + $0x32c] ss:$16 sps:$4 sm:$0xff]  }
 0x894   : > { %v14318_v25 = vadd.f32 %v9434_v20, %v18740_v44  ;;  %v14382_v58 = vadd.f32 %v9820_v19, %v18743_v36  ;;  %v9436_v63 = vpop.f32.mrb[81].mxu0  ;;  %v9822_v37 = vpop.f32.mrb[81].mxu1  ;;  %11126 = vmatprep.subr.bf16.mxu0 %v16529_v15  ;;  %11512 = vmatprep.subr.bf16.mxu1 %v16532_v12 }
 0x895   : > { %v14319_v3 = vadd.f32 %v9436_v63, %v18746_v10  ;;  %v14383_v51 = vadd.f32 %v9822_v37, %v18749_v24  ;;  %v9438_v16 = vpop.f32.mrb[82].mxu0  ;;  %v9824_v45 = vpop.f32.mrb[82].mxu1  ;;  %10983 = vmatprep.mubr.bf16.mxu0 %v10209_v34  ;;  %11369 = vmatprep.mubr.bf16.mxu1 %v10209_v34 }
 0x896   : > { %v14320_v8 = vadd.f32 %v9438_v16, %v18740_v44  ;;  %v14384_v48 = vadd.f32 %v9824_v45, %v18743_v36  ;;  %v9440_v11 = vpop.f32.mrb[83].mxu0  ;;  %v9826_v13 = vpop.f32.mrb[83].mxu1  ;;  %10984 = vmatmul.mubr.bf16.gmra.mrb[140].mxu0 %v10208_v28  ;;  %11370 = vmatmul.mubr.bf16.gmra.mrb[140].mxu1 %v10208_v28  ;;  %v9971_v43 = vmax.f32 %v14318_v25, 0.0  ;;  %v9973_v5 = vmax.f32 %v14382_v58, 0.0 }
 0x897   : > { %v14321_v30 = vadd.f32 %v9440_v11, %v18746_v10  ;;  %v14385_v29 = vadd.f32 %v9826_v13, %v18749_v24  ;;  %11127 = vmatpush1.bf16.msra.mxu0 %v16527_v0  ;;  %11513 = vmatpush1.bf16.msra.mxu1 %v16530_v47  ;;  %v9972_v60 = vmax.f32 %v14319_v3, 0.0  ;;  %v9974_v4 = vmax.f32 %v14383_v51, 0.0  ;;  %v16553_v3 = vld [vmem:[#allocation11 + $0x344] ss:$16 sps:$4 sm:$0xff]  }
 0x898   : > { %v9975_v61 = vmax.f32 %v14320_v8, 0.0  ;;  %v9977_v22 = vmax.f32 %v14384_v48, 0.0  ;;  %11128 = vmatprep.subr.bf16.mxu0 %v16535_v39  ;;  %11514 = vmatprep.subr.bf16.mxu1 %v16538_v42  ;;  %v16545_v39 = vld [vmem:[#allocation11 + $0x320] ss:$16 sps:$4 sm:$0xff]   ;;  %v16548_v42 = vld [vmem:[#allocation11 + $0x328] ss:$16 sps:$4 sm:$0xff]  }
 0x899   : > { %v9976_v2 = vmax.f32 %v14321_v30, 0.0  ;;  %v9978_v50 = vmax.f32 %v14385_v29, 0.0  ;;  %v16556_v48 = vld [vmem:[#allocation11 + $0x34c] ss:$16 sps:$4 sm:$0xff]  }
 0x89a   : > { %v10212_v49 = vpack.c.bf16 %v9975_v61, %v9971_v43  ;;  %v18807_v55 = vpack.c.bf16 %v9977_v22, %v9973_v5  ;;  %v16551_v22 = vld [vmem:[#allocation11 + $0x340] ss:$16 sps:$4 sm:$0xff]  }
 0x89b   : > { %v10213_v56 = vpack.c.bf16 %v9976_v2, %v9972_v60  ;;  %v18809_v31 = vpack.c.bf16 %v9978_v50, %v9974_v4  ;;  %v9444_v15 = vpop.f32.mrb[84].mxu0  ;;  %v9830_v17 = vpop.f32.mrb[84].mxu1  ;;  %11129 = vmatpush1.bf16.msra.mxu0 %v16533_v53  ;;  %11515 = vmatpush1.bf16.msra.mxu1 %v16536_v33 }
 0x89c   : > { %v14322_v27 = vadd.f32 %v9444_v15, %v18740_v44  ;;  %v14386_v12 = vadd.f32 %v9830_v17, %v18743_v36  ;;  %v9446_v18 = vpop.f32.mrb[85].mxu0  ;;  %v9832_v32 = vpop.f32.mrb[85].mxu1  ;;  %11130 = vmatprep.subr.bf16.mxu0 %v16541_v52  ;;  %11516 = vmatprep.subr.bf16.mxu1 %v16544_v40  ;;  %v16554_v40 = vld [vmem:[#allocation11 + $0x348] ss:$16 sps:$4 sm:$0xff]  }
 0x89d   : > { %v14323_v28 = vadd.f32 %v9446_v18, %v18746_v10  ;;  %v14387_v34 = vadd.f32 %v9832_v32, %v18749_v24  ;;  %v9448_v20 = vpop.f32.mrb[86].mxu0  ;;  %v9834_v19 = vpop.f32.mrb[86].mxu1  ;;  %10993 = vmatprep.mubr.bf16.mxu0 %v10213_v56  ;;  %11379 = vmatprep.mubr.bf16.mxu1 %v10213_v56  ;;  %v16562_v56 = vld [vmem:[#allocation11 + $0x36c] ss:$16 sps:$4 sm:$0xff]  }
 0x89e   : > { %v14324_v0 = vadd.f32 %v9448_v20, %v18740_v44  ;;  %v14388_v47 = vadd.f32 %v9834_v19, %v18743_v36  ;;  %v9450_v25 = vpop.f32.mrb[87].mxu0  ;;  %v9836_v58 = vpop.f32.mrb[87].mxu1  ;;  %10994 = vmatmul.mubr.bf16.gmra.mrb[144].mxu0 %v10212_v49  ;;  %11380 = vmatmul.mubr.bf16.gmra.mrb[144].mxu1 %v10212_v49  ;;  %v9979_v51 = vmax.f32 %v14322_v27, 0.0  ;;  %v9981_v16 = vmax.f32 %v14386_v12, 0.0  ;;  %v16559_v49 = vld [vmem:[#allocation11 + $0x364] ss:$16 sps:$4 sm:$0xff]  }
 0x89f   : > { %v14325_v63 = vadd.f32 %v9450_v25, %v18746_v10  ;;  %v14389_v37 = vadd.f32 %v9836_v58, %v18749_v24  ;;  %11131 = vmatpush1.bf16.msra.mxu0 %v16539_v57  ;;  %11517 = vmatpush1.bf16.msra.mxu1 %v16542_v14  ;;  %v9980_v11 = vmax.f32 %v14323_v28, 0.0  ;;  %v9982_v13 = vmax.f32 %v14387_v34, 0.0  ;;  %v16557_v28 = vld [vmem:[#allocation11 + $0x360] ss:$16 sps:$4 sm:$0xff]   ;;  %v16560_v34 = vld [vmem:[#allocation11 + $0x368] ss:$16 sps:$4 sm:$0xff]  }
 0x8a0   : > { %v9983_v45 = vmax.f32 %v14324_v0, 0.0  ;;  %v9985_v8 = vmax.f32 %v14388_v47, 0.0  ;;  %11132 = vmatprep.subr.bf16.mxu0 %v16547_v7  ;;  %11518 = vmatprep.subr.bf16.mxu1 %v16550_v54  ;;  %v16565_v20 = vld [vmem:[#allocation11 + $0x384] ss:$16 sps:$4 sm:$0xff]   ;;  %v16568_v58 = vld [vmem:[#allocation11 + $0x38c] ss:$16 sps:$4 sm:$0xff]  }
 0x8a1   : > { %v9984_v30 = vmax.f32 %v14325_v63, 0.0  ;;  %v9986_v29 = vmax.f32 %v14389_v37, 0.0 }
 0x8a2   : > { %v10216_v53 = vpack.c.bf16 %v9983_v45, %v9979_v51  ;;  %v18819_v33 = vpack.c.bf16 %v9985_v8, %v9981_v16 }
 0x8a3   : > { %v10217_v52 = vpack.c.bf16 %v9984_v30, %v9980_v11  ;;  %v18821_v43 = vpack.c.bf16 %v9986_v29, %v9982_v13  ;;  %v9454_v5 = vpop.f32.mrb[88].mxu0  ;;  %v9840_v61 = vpop.f32.mrb[88].mxu1  ;;  %11133 = vmatpush1.bf16.msra.mxu0 %v16545_v39  ;;  %11519 = vmatpush1.bf16.msra.mxu1 %v16548_v42  ;;  %v16563_v11 = vld [vmem:[#allocation11 + $0x380] ss:$16 sps:$4 sm:$0xff]   ;;  %v16566_v13 = vld [vmem:[#allocation11 + $0x388] ss:$16 sps:$4 sm:$0xff]  }
 0x8a4   : > { %v14326_v60 = vadd.f32 %v9454_v5, %v18740_v44  ;;  %v14390_v4 = vadd.f32 %v9840_v61, %v18743_v36  ;;  %v9456_v2 = vpop.f32.mrb[89].mxu0  ;;  %v9842_v50 = vpop.f32.mrb[89].mxu1  ;;  %11134 = vmatprep.subr.bf16.mxu0 %v16553_v3  ;;  %11520 = vmatprep.subr.bf16.mxu1 %v16556_v48  ;;  %v16571_v5 = vld [vmem:[#allocation11 + $0x3a4] ss:$16 sps:$4 sm:$0xff]   ;;  %v16574_v61 = vld [vmem:[#allocation11 + $0x3ac] ss:$16 sps:$4 sm:$0xff]  }
 0x8a5   : > { %v14327_v15 = vadd.f32 %v9456_v2, %v18746_v10  ;;  %v14391_v17 = vadd.f32 %v9842_v50, %v18749_v24  ;;  %v9458_v57 = vpop.f32.mrb[90].mxu0  ;;  %v9844_v14 = vpop.f32.mrb[90].mxu1  ;;  %11003 = vmatprep.mubr.bf16.mxu0 %v10217_v52  ;;  %11389 = vmatprep.mubr.bf16.mxu1 %v10217_v52 }
 0x8a6   : > { %v14328_v27 = vadd.f32 %v9458_v57, %v18740_v44  ;;  %v14392_v12 = vadd.f32 %v9844_v14, %v18743_v36  ;;  %v9460_v18 = vpop.f32.mrb[91].mxu0  ;;  %v9846_v32 = vpop.f32.mrb[91].mxu1  ;;  %11004 = vmatmul.mubr.bf16.gmra.mrb[148].mxu0 %v10216_v53  ;;  %11390 = vmatmul.mubr.bf16.gmra.mrb[148].mxu1 %v10216_v53  ;;  %v9987_v19 = vmax.f32 %v14326_v60, 0.0  ;;  %v9989_v0 = vmax.f32 %v14390_v4, 0.0  ;;  %v16569_v57 = vld [vmem:[#allocation11 + $0x3a0] ss:$16 sps:$4 sm:$0xff]  }
 0x8a7   : > { %v14329_v7 = vadd.f32 %v9460_v18, %v18746_v10  ;;  %v14393_v54 = vadd.f32 %v9846_v32, %v18749_v24  ;;  %11135 = vmatpush1.bf16.msra.mxu0 %v16551_v22  ;;  %11521 = vmatpush1.bf16.msra.mxu1 %v16554_v40  ;;  %v9988_v63 = vmax.f32 %v14327_v15, 0.0  ;;  %v9990_v37 = vmax.f32 %v14391_v17, 0.0  ;;  %v16572_v14 = vld [vmem:[#allocation11 + $0x3a8] ss:$16 sps:$4 sm:$0xff]  }
 0x8a8   : > { %v9991_v47 = vmax.f32 %v14328_v27, 0.0  ;;  %v9993_v25 = vmax.f32 %v14392_v12, 0.0  ;;  %11136 = vmatprep.subr.bf16.mxu0 %v16559_v49  ;;  %11522 = vmatprep.subr.bf16.mxu1 %v16562_v56  ;;  %v16577_v27 = vld [vmem:[#allocation11 + $0x3c4] ss:$16 sps:$4 sm:$0xff]  }
 0x8a9   : > { %v9992_v39 = vmax.f32 %v14329_v7, 0.0  ;;  %v9994_v42 = vmax.f32 %v14393_v54, 0.0  ;;  %v16580_v54 = vld [vmem:[#allocation11 + $0x3cc] ss:$16 sps:$4 sm:$0xff]  }
 0x8aa   : > { %v10220_v3 = vpack.c.bf16 %v9991_v47, %v9987_v19  ;;  %v18831_v51 = vpack.c.bf16 %v9993_v25, %v9989_v0 }
 0x8ab   : > { %v10221_v16 = vpack.c.bf16 %v9992_v39, %v9988_v63  ;;  %v18833_v45 = vpack.c.bf16 %v9994_v42, %v9990_v37  ;;  %v9464_v8 = vpop.f32.mrb[92].mxu0  ;;  %v9850_v48 = vpop.f32.mrb[92].mxu1  ;;  %11137 = vmatpush1.bf16.msra.mxu0 %v16557_v28  ;;  %11523 = vmatpush1.bf16.msra.mxu1 %v16560_v34  ;;  %v16575_v39 = vld [vmem:[#allocation11 + $0x3c0] ss:$16 sps:$4 sm:$0xff]   ;;  %v16578_v42 = vld [vmem:[#allocation11 + $0x3c8] ss:$16 sps:$4 sm:$0xff]  }
 0x8ac   : > { %v14330_v30 = vadd.f32 %v9464_v8, %v18740_v44  ;;  %v14394_v29 = vadd.f32 %v9850_v48, %v18743_v36  ;;  %v9466_v53 = vpop.f32.mrb[93].mxu0  ;;  %v9852_v52 = vpop.f32.mrb[93].mxu1  ;;  %11138 = vmatprep.subr.bf16.mxu0 %v16565_v20  ;;  %11524 = vmatprep.subr.bf16.mxu1 %v16568_v58 }
 0x8ad   : > { %v14331_v22 = vadd.f32 %v9466_v53, %v18746_v10  ;;  %v14395_v40 = vadd.f32 %v9852_v52, %v18749_v24  ;;  %v9468_v60 = vpop.f32.mrb[94].mxu0  ;;  %v9854_v4 = vpop.f32.mrb[94].mxu1  ;;  %11013 = vmatprep.mubr.bf16.mxu0 %v10221_v16  ;;  %11399 = vmatprep.mubr.bf16.mxu1 %v10221_v16 }
 0x8ae   : > { %v14332_v2 = vadd.f32 %v9468_v60, %v18740_v44  ;;  %v14396_v50 = vadd.f32 %v9854_v4, %v18743_v36  ;;  %v9470_v49 = vpop.f32.mrb[95].mxu0  ;;  %v9856_v56 = vpop.f32.mrb[95].mxu1  ;;  %11014 = vmatmul.mubr.bf16.gmra.mrb[152].mxu0 %v10220_v3  ;;  %11400 = vmatmul.mubr.bf16.gmra.mrb[152].mxu1 %v10220_v3  ;;  %v9995_v12 = vmax.f32 %v14330_v30, 0.0  ;;  %v9997_v18 = vmax.f32 %v14394_v29, 0.0 }
 0x8af   : > { %v14333_v15 = vadd.f32 %v9470_v49, %v18746_v10  ;;  %v14397_v17 = vadd.f32 %v9856_v56, %v18749_v24  ;;  %11139 = vmatpush1.bf16.msra.mxu0 %v16563_v11  ;;  %11525 = vmatpush1.bf16.msra.mxu1 %v16566_v13  ;;  %v9996_v28 = vmax.f32 %v14331_v22, 0.0  ;;  %v9998_v34 = vmax.f32 %v14395_v40, 0.0  ;;  %v16583_v11 = vld [vmem:[#allocation11 + $0x3e4] ss:$16 sps:$4 sm:$0xff]   ;;  %v16586_v13 = vld [vmem:[#allocation11 + $0x3ec] ss:$16 sps:$4 sm:$0xff]  }
 0x8b0   : > { %v9999_v32 = vmax.f32 %v14332_v2, 0.0  ;;  %v10001_v7 = vmax.f32 %v14396_v50, 0.0  ;;  %11140 = vmatprep.subr.bf16.mxu0 %v16571_v5  ;;  %11526 = vmatprep.subr.bf16.mxu1 %v16574_v61  ;;  %v16581_v2 = vld [vmem:[#allocation11 + $0x3e0] ss:$16 sps:$4 sm:$0xff]   ;;  %v16584_v50 = vld [vmem:[#allocation11 + $0x3e8] ss:$16 sps:$4 sm:$0xff]  }
 0x8b1   : > { %v10000_v20 = vmax.f32 %v14333_v15, 0.0  ;;  %v10002_v19 = vmax.f32 %v14397_v17, 0.0 }
 0x8b2   : > { %v10224_v0 = vpack.c.bf16 %v9999_v32, %v9995_v12  ;;  %v18843_v47 = vpack.c.bf16 %v10001_v7, %v9997_v18 }
 0x8b3   : > { %v10225_v25 = vpack.c.bf16 %v10000_v20, %v9996_v28  ;;  %v18845_v58 = vpack.c.bf16 %v10002_v19, %v9998_v34  ;;  %v9474_v63 = vpop.f32.mrb[96].mxu0  ;;  %v9860_v37 = vpop.f32.mrb[96].mxu1  ;;  %11141 = vmatpush1.bf16.msra.mxu0 %v16569_v57  ;;  %11527 = vmatpush1.bf16.msra.mxu1 %v16572_v14 }
 0x8b4   : > { %v14334_v3 = vadd.f32 %v9474_v63, %v18740_v44  ;;  %v14398_v16 = vadd.f32 %v9860_v37, %v18743_v36  ;;  %v9476_v8 = vpop.f32.mrb[97].mxu0  ;;  %v9862_v48 = vpop.f32.mrb[97].mxu1  ;;  %11142 = vmatprep.subr.bf16.mxu0 %v16577_v27  ;;  %11528 = vmatprep.subr.bf16.mxu1 %v16580_v54 }
 0x8b5   : > { %v14335_v30 = vadd.f32 %v9476_v8, %v18746_v10  ;;  %v14399_v29 = vadd.f32 %v9862_v48, %v18749_v24  ;;  %v9478_v53 = vpop.f32.mrb[98].mxu0  ;;  %v9864_v52 = vpop.f32.mrb[98].mxu1  ;;  %11023 = vmatprep.mubr.bf16.mxu0 %v10225_v25  ;;  %11409 = vmatprep.mubr.bf16.mxu1 %v10225_v25 }
 0x8b6   : > { %v14336_v5 = vadd.f32 %v9478_v53, %v18740_v44  ;;  %v14400_v61 = vadd.f32 %v9864_v52, %v18743_v36  ;;  %v9480_v22 = vpop.f32.mrb[99].mxu0  ;;  %v9866_v40 = vpop.f32.mrb[99].mxu1  ;;  %11024 = vmatmul.mubr.bf16.gmra.mrb[156].mxu0 %v10224_v0  ;;  %11410 = vmatmul.mubr.bf16.gmra.mrb[156].mxu1 %v10224_v0  ;;  %v10003_v49 = vmax.f32 %v14334_v3, 0.0  ;;  %v10005_v56 = vmax.f32 %v14398_v16, 0.0 }
 0x8b7   : > { %v14337_v60 = vadd.f32 %v9480_v22, %v18746_v10  ;;  %v14401_v4 = vadd.f32 %v9866_v40, %v18749_v24  ;;  %11143 = vmatpush1.bf16.msra.mxu0 %v16575_v39  ;;  %11529 = vmatpush1.bf16.msra.mxu1 %v16578_v42  ;;  %v10004_v57 = vmax.f32 %v14335_v30, 0.0  ;;  %v10006_v14 = vmax.f32 %v14399_v29, 0.0 }
 0x8b8   : > { %v10007_v15 = vmax.f32 %v14336_v5, 0.0  ;;  %v10009_v17 = vmax.f32 %v14400_v61, 0.0  ;;  %11144 = vmatprep.subr.bf16.mxu0 %v16583_v11  ;;  %11530 = vmatprep.subr.bf16.mxu1 %v16586_v13 }
 0x8b9   : > { %v10008_v27 = vmax.f32 %v14337_v60, 0.0  ;;  %v10010_v12 = vmax.f32 %v14401_v4, 0.0 }
 0x8ba   : > { %v10228_v18 = vpack.c.bf16 %v10007_v15, %v10003_v49  ;;  %v18855_v32 = vpack.c.bf16 %v10009_v17, %v10005_v56 }
 0x8bb   : > { %v10229_v7 = vpack.c.bf16 %v10008_v27, %v10004_v57  ;;  %v18857_v54 = vpack.c.bf16 %v10010_v12, %v10006_v14  ;;  %v9484_v28 = vpop.f32.mrb[100].mxu0  ;;  %v9870_v34 = vpop.f32.mrb[100].mxu1  ;;  %11145 = vmatpush1.bf16.msra.mxu0 %v16581_v2  ;;  %11531 = vmatpush1.bf16.msra.mxu1 %v16584_v50 }
 0x8bc   : > { %v14338_v20 = vadd.f32 %v9484_v28, %v18740_v44  ;;  %v14402_v19 = vadd.f32 %v9870_v34, %v18743_v36  ;;  %v9486_v0 = vpop.f32.mrb[101].mxu0  ;;  %v9872_v25 = vpop.f32.mrb[101].mxu1 }
 0x8bd   : > { %v14339_v63 = vadd.f32 %v9486_v0, %v18746_v10  ;;  %v14403_v37 = vadd.f32 %v9872_v25, %v18749_v24  ;;  %v9488_v39 = vpop.f32.mrb[102].mxu0  ;;  %v9874_v42 = vpop.f32.mrb[102].mxu1  ;;  %11033 = vmatprep.mubr.bf16.mxu0 %v10229_v7  ;;  %11419 = vmatprep.mubr.bf16.mxu1 %v10229_v7 }
 0x8be   : > { %v14340_v3 = vadd.f32 %v9488_v39, %v18740_v44  ;;  %v14404_v16 = vadd.f32 %v9874_v42, %v18743_v36  ;;  %v9490_v8 = vpop.f32.mrb[103].mxu0  ;;  %v9876_v48 = vpop.f32.mrb[103].mxu1  ;;  %11034 = vmatmul.mubr.bf16.gmra.mrb[160].mxu0 %v10228_v18  ;;  %11420 = vmatmul.mubr.bf16.gmra.mrb[160].mxu1 %v10228_v18  ;;  %v10011_v30 = vmax.f32 %v14338_v20, 0.0  ;;  %v10013_v29 = vmax.f32 %v14402_v19, 0.0 }
 0x8bf   : > { %v14341_v11 = vadd.f32 %v9490_v8, %v18746_v10  ;;  %v14405_v13 = vadd.f32 %v9876_v48, %v18749_v24  ;;  %v10012_v5 = vmax.f32 %v14339_v63, 0.0  ;;  %v10014_v61 = vmax.f32 %v14403_v37, 0.0 }
 0x8c0   : > { %v10015_v53 = vmax.f32 %v14340_v3, 0.0  ;;  %v10017_v52 = vmax.f32 %v14404_v16, 0.0 }
 0x8c1   : > { %v10016_v22 = vmax.f32 %v14341_v11, 0.0  ;;  %v10018_v40 = vmax.f32 %v14405_v13, 0.0 }
 0x8c2   : > { %v10232_v60 = vpack.c.bf16 %v10015_v53, %v10011_v30  ;;  %v18867_v4 = vpack.c.bf16 %v10017_v52, %v10013_v29 }
 0x8c3   : > { %v10233_v2 = vpack.c.bf16 %v10016_v22, %v10012_v5  ;;  %v18869_v50 = vpack.c.bf16 %v10018_v40, %v10014_v61  ;;  %v9494_v49 = vpop.f32.mrb[104].mxu0  ;;  %v9880_v56 = vpop.f32.mrb[104].mxu1 }
 0x8c4   : > { %v14342_v15 = vadd.f32 %v9494_v49, %v18740_v44  ;;  %v14406_v17 = vadd.f32 %v9880_v56, %v18743_v36  ;;  %v9496_v57 = vpop.f32.mrb[105].mxu0  ;;  %v9882_v14 = vpop.f32.mrb[105].mxu1 }
 0x8c5   : > { %v14343_v27 = vadd.f32 %v9496_v57, %v18746_v10  ;;  %v14407_v12 = vadd.f32 %v9882_v14, %v18749_v24  ;;  %v9498_v18 = vpop.f32.mrb[106].mxu0  ;;  %v9884_v7 = vpop.f32.mrb[106].mxu1  ;;  %11043 = vmatprep.mubr.bf16.mxu0 %v10233_v2  ;;  %11429 = vmatprep.mubr.bf16.mxu1 %v10233_v2 }
 0x8c6   : > { %v14344_v28 = vadd.f32 %v9498_v18, %v18740_v44  ;;  %v14408_v34 = vadd.f32 %v9884_v7, %v18743_v36  ;;  %v9500_v20 = vpop.f32.mrb[107].mxu0  ;;  %v9886_v19 = vpop.f32.mrb[107].mxu1  ;;  %11044 = vmatmul.mubr.bf16.gmra.mrb[164].mxu0 %v10232_v60  ;;  %11430 = vmatmul.mubr.bf16.gmra.mrb[164].mxu1 %v10232_v60  ;;  %v10019_v63 = vmax.f32 %v14342_v15, 0.0  ;;  %v10021_v37 = vmax.f32 %v14406_v17, 0.0 }
 0x8c7   : > { %v14345_v0 = vadd.f32 %v9500_v20, %v18746_v10  ;;  %v14409_v25 = vadd.f32 %v9886_v19, %v18749_v24  ;;  %v10020_v3 = vmax.f32 %v14343_v27, 0.0  ;;  %v10022_v16 = vmax.f32 %v14407_v12, 0.0 }
 0x8c8   : > { %v10023_v39 = vmax.f32 %v14344_v28, 0.0  ;;  %v10025_v42 = vmax.f32 %v14408_v34, 0.0 }
 0x8c9   : > { %v10024_v8 = vmax.f32 %v14345_v0, 0.0  ;;  %v10026_v48 = vmax.f32 %v14409_v25, 0.0 }
 0x8ca   : > { %v10236_v11 = vpack.c.bf16 %v10023_v39, %v10019_v63  ;;  %v18879_v13 = vpack.c.bf16 %v10025_v42, %v10021_v37 }
 0x8cb   : > { %v10237_v30 = vpack.c.bf16 %v10024_v8, %v10020_v3  ;;  %v18881_v29 = vpack.c.bf16 %v10026_v48, %v10022_v16  ;;  %v9504_v53 = vpop.f32.mrb[108].mxu0  ;;  %v9890_v52 = vpop.f32.mrb[108].mxu1 }
 0x8cc   : > { %v14346_v5 = vadd.f32 %v9504_v53, %v18740_v44  ;;  %v14410_v61 = vadd.f32 %v9890_v52, %v18743_v36  ;;  %v9506_v22 = vpop.f32.mrb[109].mxu0  ;;  %v9892_v40 = vpop.f32.mrb[109].mxu1 }
 0x8cd   : > { %v14347_v60 = vadd.f32 %v9506_v22, %v18746_v10  ;;  %v14411_v2 = vadd.f32 %v9892_v40, %v18749_v24  ;;  %v9508_v49 = vpop.f32.mrb[110].mxu0  ;;  %v9894_v56 = vpop.f32.mrb[110].mxu1  ;;  %11053 = vmatprep.mubr.bf16.mxu0 %v10237_v30  ;;  %11439 = vmatprep.mubr.bf16.mxu1 %v10237_v30 }
 0x8ce   : > { %v14348_v15 = vadd.f32 %v9508_v49, %v18740_v44  ;;  %v14412_v17 = vadd.f32 %v9894_v56, %v18743_v36  ;;  %v9510_v57 = vpop.f32.mrb[111].mxu0  ;;  %v9896_v14 = vpop.f32.mrb[111].mxu1  ;;  %11054 = vmatmul.mubr.bf16.gmra.mrb[168].mxu0 %v10236_v11  ;;  %11440 = vmatmul.mubr.bf16.gmra.mrb[168].mxu1 %v10236_v11  ;;  %v10027_v18 = vmax.f32 %v14346_v5, 0.0  ;;  %v10029_v7 = vmax.f32 %v14410_v61, 0.0 }
 0x8cf   : > { %v14349_v27 = vadd.f32 %v9510_v57, %v18746_v10  ;;  %v14413_v12 = vadd.f32 %v9896_v14, %v18749_v24  ;;  %v10028_v20 = vmax.f32 %v14347_v60, 0.0  ;;  %v10030_v19 = vmax.f32 %v14411_v2, 0.0 }
 0x8d0   : > { %v10031_v28 = vmax.f32 %v14348_v15, 0.0  ;;  %v10033_v34 = vmax.f32 %v14412_v17, 0.0  ;;  %v16587_v15 = vld [vmem:[%s19387_s15 + $0x40] sm:$0xff]  }
 0x8d1   : > { %v10032_v0 = vmax.f32 %v14349_v27, 0.0  ;;  %v10034_v25 = vmax.f32 %v14413_v12, 0.0  ;;  %v16589_v17 = vld [vmem:[%s19387_s15 + $0xc0] sm:$0xff]   ;;  %13566 = vmatprep.subr.bf16.mxu0 %v16587_v15 }
 0x8d2   : > { %v10240_v63 = vpack.c.bf16 %v10031_v28, %v10027_v18  ;;  %v18891_v37 = vpack.c.bf16 %v10033_v34, %v10029_v7  ;;  %13678 = vmatprep.subr.bf16.mxu1 %v16589_v17 }
 0x8d3   : > { %v10241_v39 = vpack.c.bf16 %v10032_v0, %v10028_v20  ;;  %v18893_v42 = vpack.c.bf16 %v10034_v25, %v10030_v19  ;;  %v9514_v3 = vpop.f32.mrb[112].mxu0  ;;  %v9900_v16 = vpop.f32.mrb[112].mxu1 }
 0x8d4   : > { %v14350_v8 = vadd.f32 %v9514_v3, %v18740_v44  ;;  %v14414_v48 = vadd.f32 %v9900_v16, %v18743_v36  ;;  %v9516_v11 = vpop.f32.mrb[113].mxu0  ;;  %v9902_v30 = vpop.f32.mrb[113].mxu1 }
 0x8d5   : > { %v14351_v53 = vadd.f32 %v9516_v11, %v18746_v10  ;;  %v14415_v52 = vadd.f32 %v9902_v30, %v18749_v24  ;;  %v9518_v5 = vpop.f32.mrb[114].mxu0  ;;  %v9904_v61 = vpop.f32.mrb[114].mxu1  ;;  %11063 = vmatprep.mubr.bf16.mxu0 %v10241_v39  ;;  %11449 = vmatprep.mubr.bf16.mxu1 %v10241_v39 }
 0x8d6   : > { %v14352_v22 = vadd.f32 %v9518_v5, %v18740_v44  ;;  %v14416_v40 = vadd.f32 %v9904_v61, %v18743_v36  ;;  %v9520_v60 = vpop.f32.mrb[115].mxu0  ;;  %v9906_v2 = vpop.f32.mrb[115].mxu1  ;;  %11064 = vmatmul.mubr.bf16.gmra.mrb[172].mxu0 %v10240_v63  ;;  %11450 = vmatmul.mubr.bf16.gmra.mrb[172].mxu1 %v10240_v63  ;;  %v10035_v57 = vmax.f32 %v14350_v8, 0.0  ;;  %v10037_v14 = vmax.f32 %v14414_v48, 0.0 }
 0x8d7   : > { %v14353_v49 = vadd.f32 %v9520_v60, %v18746_v10  ;;  %v14417_v56 = vadd.f32 %v9906_v2, %v18749_v24  ;;  %v10036_v18 = vmax.f32 %v14351_v53, 0.0  ;;  %v10038_v7 = vmax.f32 %v14415_v52, 0.0 }
 0x8d8   : > { %v10039_v27 = vmax.f32 %v14352_v22, 0.0  ;;  %v10041_v12 = vmax.f32 %v14416_v40, 0.0 }
 0x8d9   : > { %v10040_v28 = vmax.f32 %v14353_v49, 0.0  ;;  %v10042_v34 = vmax.f32 %v14417_v56, 0.0 }
 0x8da   : > { %v10244_v20 = vpack.c.bf16 %v10039_v27, %v10035_v57  ;;  %v18909_v19 = vpack.c.bf16 %v10041_v12, %v10037_v14 }
 0x8db   : > { %v10245_v0 = vpack.c.bf16 %v10040_v28, %v10036_v18  ;;  %v18911_v25 = vpack.c.bf16 %v10042_v34, %v10038_v7  ;;  %v9524_v63 = vpop.f32.mrb[116].mxu0  ;;  %v9910_v39 = vpop.f32.mrb[116].mxu1 }
 0x8dc   : > { %v14354_v3 = vadd.f32 %v9524_v63, %v18740_v44  ;;  %v14418_v16 = vadd.f32 %v9910_v39, %v18743_v36  ;;  %v9526_v8 = vpop.f32.mrb[117].mxu0  ;;  %v9912_v48 = vpop.f32.mrb[117].mxu1 }
 0x8dd   : > { %v14355_v11 = vadd.f32 %v9526_v8, %v18746_v10  ;;  %v14419_v30 = vadd.f32 %v9912_v48, %v18749_v24  ;;  %v9528_v53 = vpop.f32.mrb[118].mxu0  ;;  %v9914_v52 = vpop.f32.mrb[118].mxu1  ;;  %11073 = vmatprep.mubr.bf16.mxu0 %v10245_v0  ;;  %11459 = vmatprep.mubr.bf16.mxu1 %v10245_v0 }
 0x8de   : > { %v14356_v5 = vadd.f32 %v9528_v53, %v18740_v44  ;;  %v14420_v61 = vadd.f32 %v9914_v52, %v18743_v36  ;;  %v9530_v22 = vpop.f32.mrb[119].mxu0  ;;  %v9916_v40 = vpop.f32.mrb[119].mxu1  ;;  %11074 = vmatmul.mubr.bf16.gmra.mrb[176].mxu0 %v10244_v20  ;;  %11460 = vmatmul.mubr.bf16.gmra.mrb[176].mxu1 %v10244_v20  ;;  %v10043_v49 = vmax.f32 %v14354_v3, 0.0  ;;  %v10045_v56 = vmax.f32 %v14418_v16, 0.0 }
 0x8df   : > { %v14357_v60 = vadd.f32 %v9530_v22, %v18746_v10  ;;  %v14421_v2 = vadd.f32 %v9916_v40, %v18749_v24  ;;  %v10044_v57 = vmax.f32 %v14355_v11, 0.0  ;;  %v10046_v14 = vmax.f32 %v14419_v30, 0.0 }
 0x8e0   : > { %v10047_v15 = vmax.f32 %v14356_v5, 0.0  ;;  %v10049_v17 = vmax.f32 %v14420_v61, 0.0 }
 0x8e1   : > { %v10048_v27 = vmax.f32 %v14357_v60, 0.0  ;;  %v10050_v12 = vmax.f32 %v14421_v2, 0.0 }
 0x8e2   : > { %v10248_v18 = vpack.c.bf16 %v10047_v15, %v10043_v49  ;;  %v18921_v7 = vpack.c.bf16 %v10049_v17, %v10045_v56 }
 0x8e3   : > { %v10249_v28 = vpack.c.bf16 %v10048_v27, %v10044_v57  ;;  %v18923_v34 = vpack.c.bf16 %v10050_v12, %v10046_v14  ;;  %v9534_v0 = vpop.f32.mrb[120].mxu0  ;;  %v9920_v20 = vpop.f32.mrb[120].mxu1 }
 0x8e4   : > { %v14358_v63 = vadd.f32 %v9534_v0, %v18740_v44  ;;  %v14422_v39 = vadd.f32 %v9920_v20, %v18743_v36  ;;  %v9536_v3 = vpop.f32.mrb[121].mxu0  ;;  %v9922_v16 = vpop.f32.mrb[121].mxu1 }
 0x8e5   : > { %v14359_v8 = vadd.f32 %v9536_v3, %v18746_v10  ;;  %v14423_v48 = vadd.f32 %v9922_v16, %v18749_v24  ;;  %v9538_v11 = vpop.f32.mrb[122].mxu0  ;;  %v9924_v30 = vpop.f32.mrb[122].mxu1  ;;  %11083 = vmatprep.mubr.bf16.mxu0 %v10249_v28  ;;  %11469 = vmatprep.mubr.bf16.mxu1 %v10249_v28 }
 0x8e6   : > { %v14360_v53 = vadd.f32 %v9538_v11, %v18740_v44  ;;  %v14424_v52 = vadd.f32 %v9924_v30, %v18743_v36  ;;  %v9540_v5 = vpop.f32.mrb[123].mxu0  ;;  %v9926_v61 = vpop.f32.mrb[123].mxu1  ;;  %11084 = vmatmul.mubr.bf16.gmra.mrb[180].mxu0 %v10248_v18  ;;  %11470 = vmatmul.mubr.bf16.gmra.mrb[180].mxu1 %v10248_v18  ;;  %v10051_v60 = vmax.f32 %v14358_v63, 0.0  ;;  %v10053_v2 = vmax.f32 %v14422_v39, 0.0 }
 0x8e7   : > { %v14361_v22 = vadd.f32 %v9540_v5, %v18746_v10  ;;  %v14425_v40 = vadd.f32 %v9926_v61, %v18749_v24  ;;  %v10052_v15 = vmax.f32 %v14359_v8, 0.0  ;;  %v10054_v17 = vmax.f32 %v14423_v48, 0.0 }
 0x8e8   : > { %v10055_v49 = vmax.f32 %v14360_v53, 0.0  ;;  %v10057_v56 = vmax.f32 %v14424_v52, 0.0 }
 0x8e9   : > { %v10056_v57 = vmax.f32 %v14361_v22, 0.0  ;;  %v10058_v14 = vmax.f32 %v14425_v40, 0.0 }
 0x8ea   : > { %v10252_v27 = vpack.c.bf16 %v10055_v49, %v10051_v60  ;;  %v18933_v12 = vpack.c.bf16 %v10057_v56, %v10053_v2 }
 0x8eb   : > { %v10253_v28 = vpack.c.bf16 %v10056_v57, %v10052_v15  ;;  %v18935_v0 = vpack.c.bf16 %v10058_v14, %v10054_v17  ;;  %v9544_v20 = vpop.f32.mrb[124].mxu0  ;;  %v9930_v18 = vpop.f32.mrb[124].mxu1 }
 0x8ec   : > { %v14362_v3 = vadd.f32 %v9544_v20, %v18740_v44  ;;  %v14426_v16 = vadd.f32 %v9930_v18, %v18743_v36  ;;  %v9546_v63 = vpop.f32.mrb[125].mxu0  ;;  %v9932_v39 = vpop.f32.mrb[125].mxu1  ;;  %v16593_v18 = vld [vmem:[%s19387_s15 + $0xc8] sm:$0xff]  }
 0x8ed   : > { %v14363_v11 = vadd.f32 %v9546_v63, %v18746_v10  ;;  %v14427_v8 = vadd.f32 %v9932_v39, %v18749_v24  ;;  %v9548_v48 = vpop.f32.mrb[126].mxu0  ;;  %v9934_v30 = vpop.f32.mrb[126].mxu1  ;;  %11093 = vmatprep.mubr.bf16.mxu0 %v10253_v28  ;;  %11479 = vmatprep.mubr.bf16.mxu1 %v10253_v28  ;;  %v16598_v63 = vld [vmem:[%s19387_s15 + $0x90] sm:$0xff]   ;;  %v16599_v39 = vld [vmem:[%s19387_s15 + $0x58] sm:$0xff]  }
 0x8ee   : > { %v14364_v53 = vadd.f32 %v9548_v48, %v18740_v44  ;;  %v14428_v52 = vadd.f32 %v9934_v30, %v18743_v36  ;;  %v9550_v5 = vpop.f32.mrb[127].mxu0  ;;  %v9936_v61 = vpop.f32.mrb[127].mxu1  ;;  %11094 = vmatmul.mubr.bf16.gmra.mrb[184].mxu0 %v10252_v27  ;;  %11480 = vmatmul.mubr.bf16.gmra.mrb[184].mxu1 %v10252_v27  ;;  %v10059_v60 = vmax.f32 %v14362_v3, 0.0  ;;  %v10061_v2 = vmax.f32 %v14426_v16, 0.0  ;;  %v16591_v27 = vld [vmem:[%s19387_s15 + $0x48] sm:$0xff]   ;;  %v16596_v16 = vld [vmem:[%s19387_s15 + $0x10] sm:$0xff]  }
 0x8ef   : > { %v14365_v22 = vadd.f32 %v9550_v5, %v18746_v10  ;;  %v14429_v40 = vadd.f32 %v9936_v61, %v18749_v24  ;;  %v10060_v15 = vmax.f32 %v14363_v11, 0.0  ;;  %v10062_v17 = vmax.f32 %v14427_v8, 0.0  ;;  %v16588_v10 = vld [vmem:[%s19387_s15] sm:$0xff]   ;;  %v16594_v3 = vld [vmem:[%s19387_s15 + $0x88] sm:$0xff]   ;;  %v16601_v11 = vld [vmem:[%s19387_s15 + $0xd8] sm:$0xff]  }
 0x8f0   : > { %v10063_v49 = vmax.f32 %v14364_v53, 0.0  ;;  %v10065_v56 = vmax.f32 %v14428_v52, 0.0  ;;  %v16590_v24 = vld [vmem:[%s19387_s15 + $0x80] sm:$0xff]   ;;  %v16600_v8 = vld [vmem:[%s19387_s15 + $0x18] sm:$0xff]   ;;  %v16607_v52 = vld [vmem:[%s19387_s15 + $0x68] sm:$0xff]  }
 0x8f1   : > { %v10064_v57 = vmax.f32 %v14365_v22, 0.0  ;;  %v10066_v14 = vmax.f32 %v14429_v40, 0.0  ;;  %v16602_v48 = vld [vmem:[%s19387_s15 + $0x98] sm:$0xff]   ;;  %v16604_v30 = vld [vmem:[%s19387_s15 + $0x20] sm:$0xff]   ;;  %v16609_v5 = vld [vmem:[%s19387_s15 + $0xe8] sm:$0xff]  }
 0x8f2   : > { %v10256_v28 = vpack.c.bf16 %v10063_v49, %v10059_v60  ;;  %v18945_v44 = vpack.c.bf16 %v10065_v56, %v10061_v2  ;;  %v16606_v53 = vld [vmem:[%s19387_s15 + $0xa0] sm:$0xff]   ;;  %v16608_v61 = vld [vmem:[%s19387_s15 + $0x28] sm:$0xff]   ;;  %v16612_v40 = vld [vmem:[%s19387_s15 + $0x30] sm:$0xff]  }
 0x8f3   : > { %v10257_v36 = vpack.c.bf16 %v10064_v57, %v10060_v15  ;;  %v18947_v20 = vpack.c.bf16 %v10066_v14, %v10062_v17  ;;  %v16610_v22 = vld [vmem:[%s19387_s15 + $0xa8] sm:$0xff]   ;;  %v16614_v60 = vld [vmem:[%s19387_s15 + $0xb0] sm:$0xff]   ;;  %v16615_v2 = vld [vmem:[%s19387_s15 + $0x78] sm:$0xff]  }
 0x8f4   : > { %v16617_v49 = vld [vmem:[%s19387_s15 + $0xf8] sm:$0xff]  }
 0x8f5   : > { %11103 = vmatprep.mubr.bf16.mxu0 %v10257_v36  ;;  %11489 = vmatprep.mubr.bf16.mxu1 %v10257_v36  ;;  %v16616_v56 = vld [vmem:[%s19387_s15 + $0x38] sm:$0xff]  }
 0x8f6   : > { %11104 = vmatmul.mubr.bf16.gmra.mrb[188].mxu0 %v10256_v28  ;;  %11490 = vmatmul.mubr.bf16.gmra.mrb[188].mxu1 %v10256_v28  ;;  %v16618_v15 = vld [vmem:[%s19387_s15 + $0xb8] sm:$0xff]  }
 0x8f7   : > { %11146 = vmatprep.mubr.bf16.mxu0 %v18761_v23  ;;  %11532 = vmatprep.mubr.bf16.mxu1 %v18761_v23  ;;  %v16592_v23 = vld [vmem:[%s19387_s15 + $0x8] sm:$0xff]  }
 0x8fe   : > { %11147 = vmatmul.mubr.bf16.vlgmr.msra.gmra.mrb[128].mxu0 %v18759_v41  ;;  %11533 = vmatmul.mubr.bf16.vlgmr.msra.gmra.mrb[128].mxu1 %v18759_v41  ;;  %v16595_v41 = vld [vmem:[%s19387_s15 + $0x50] sm:$0xff]  }
 0x8ff   : > { %11156 = vmatprep.mubr.bf16.mxu0 %v18773_v35  ;;  %11542 = vmatprep.mubr.bf16.mxu1 %v18773_v35  ;;  %v16597_v35 = vld [vmem:[%s19387_s15 + $0xd0] sm:$0xff]  }
 0x900   : > { %13567 = vmatpush3.bf16.msra.mxu0 %v16588_v10  ;;  %13679 = vmatpush3.bf16.msra.mxu1 %v16590_v24 }
 0x901   : > { %13568 = vmatprep.subr.bf16.mxu0 %v16591_v27  ;;  %13680 = vmatprep.subr.bf16.mxu1 %v16593_v18 }
 0x904   : > { %13569 = vmatpush3.bf16.msra.mxu0 %v16592_v23  ;;  %13681 = vmatpush3.bf16.msra.mxu1 %v16594_v3 }
 0x905   : > { %13570 = vmatprep.subr.bf16.mxu0 %v16595_v41  ;;  %13682 = vmatprep.subr.bf16.mxu1 %v16597_v35 }
 0x906   : > { %11157 = vmatmul.mubr.bf16.gmra.mrb[132].mxu0 %v18771_v38  ;;  %11543 = vmatmul.mubr.bf16.gmra.mrb[132].mxu1 %v18771_v38  ;;  %v16603_v38 = vld [vmem:[%s19387_s15 + $0x60] sm:$0xff]  }
 0x907   : > { %11166 = vmatprep.mubr.bf16.mxu0 %v18785_v46  ;;  %11552 = vmatprep.mubr.bf16.mxu1 %v18785_v46  ;;  %v16605_v46 = vld [vmem:[%s19387_s15 + $0xe0] sm:$0xff]  }
 0x908   : > { %13571 = vmatpush3.bf16.msra.mxu0 %v16596_v16  ;;  %13683 = vmatpush3.bf16.msra.mxu1 %v16598_v63 }
 0x909   : > { %13572 = vmatprep.subr.bf16.mxu0 %v16599_v39  ;;  %13684 = vmatprep.subr.bf16.mxu1 %v16601_v11 }
 0x90c   : > { %13573 = vmatpush3.bf16.msra.mxu0 %v16600_v8  ;;  %13685 = vmatpush3.bf16.msra.mxu1 %v16602_v48 }
 0x90d   : > { %13574 = vmatprep.subr.bf16.mxu0 %v16603_v38  ;;  %13686 = vmatprep.subr.bf16.mxu1 %v16605_v46 }
 0x90e   : > { %11167 = vmatmul.mubr.bf16.gmra.mrb[136].mxu0 %v18783_v26  ;;  %11553 = vmatmul.mubr.bf16.gmra.mrb[136].mxu1 %v18783_v26  ;;  %v16611_v26 = vld [vmem:[%s19387_s15 + $0x70] sm:$0xff]  }
 0x90f   : > { %11176 = vmatprep.mubr.bf16.mxu0 %v18797_v21  ;;  %11562 = vmatprep.mubr.bf16.mxu1 %v18797_v21  ;;  %v16613_v21 = vld [vmem:[%s19387_s15 + $0xf0] sm:$0xff]  }
 0x910   : > { %13575 = vmatpush3.bf16.msra.mxu0 %v16604_v30  ;;  %13687 = vmatpush3.bf16.msra.mxu1 %v16606_v53 }
 0x911   : > { %13576 = vmatprep.subr.bf16.mxu0 %v16607_v52  ;;  %13688 = vmatprep.subr.bf16.mxu1 %v16609_v5 }
 0x914   : > { %13577 = vmatpush3.bf16.msra.mxu0 %v16608_v61  ;;  %13689 = vmatpush3.bf16.msra.mxu1 %v16610_v22 }
 0x915   : > { %13578 = vmatprep.subr.bf16.mxu0 %v16611_v26  ;;  %13690 = vmatprep.subr.bf16.mxu1 %v16613_v21 }
 0x916   : > { %11177 = vmatmul.mubr.bf16.gmra.mrb[140].mxu0 %v18795_v59  ;;  %11563 = vmatmul.mubr.bf16.gmra.mrb[140].mxu1 %v18795_v59  ;;  %v10195_v59 = vld [vmem:[%s19436_s0] sm:$0xf]  ;;  %s16851_s0 = scalar_lea.vmem %s19325_s23, 4096 }
 0x917   : > { %11186 = vmatprep.mubr.bf16.mxu0 %v18809_v31  ;;  %11572 = vmatprep.mubr.bf16.mxu1 %v18809_v31  ;;  %v19110_v31 = vrot.slane %v10195_v59, %v17387_v6  ;;  %p16852_p13 = scmp.ne.s32.totalorder %s19325_s23, %s16851_s0  ;;  %p16859_p0 = scmp.lt.s32.totalorder %s16857_s26, %s16851_s0 }
 0x918   : > { %13579 = vmatpush3.bf16.msra.mxu0 %v16612_v40  ;;  %13691 = vmatpush3.bf16.msra.mxu1 %v16614_v60 }
 0x919   : > { %13580 = vmatprep.subr.bf16.mxu0 %v16615_v2  ;;  %13692 = vmatprep.subr.bf16.mxu1 %v16617_v49  ;;  %p16853_p6 = pnand %p16852_p13, %p19442_p1  ;;  %p16860_p10 = por %p16859_p0, %p16858_p5 }
 0x91b   : > { %p16854_p9 = pneg %p16853_p6 }
 0x91c   : > { %13581 = vmatpush3.bf16.msra.mxu0 %v16616_v56  ;;  %13693 = vmatpush3.bf16.msra.mxu1 %v16618_v15 }
 0x91d   : > { %p16861_p2 = pnand %p16860_p10, %p16854_p9 }
 0x91e   : > { %11187 = vmatmul.mubr.bf16.gmra.mrb[144].mxu0 %v18807_v55  ;;  %11573 = vmatmul.mubr.bf16.gmra.mrb[144].mxu1 %v18807_v55  ;;  %v19107_v55 = vrot.slane %v10195_v59, %v17373_v62 }
 0x91f   : > { %11196 = vmatprep.mubr.bf16.mxu0 %v18821_v43  ;;  %11582 = vmatprep.mubr.bf16.mxu1 %v18821_v43  ;;  %v19116_v43 = vrot.slane %v10195_v59, %v17390_v9 }
 0x926   : > { %11197 = vmatmul.mubr.bf16.gmra.mrb[148].mxu0 %v18819_v33  ;;  %11583 = vmatmul.mubr.bf16.gmra.mrb[148].mxu1 %v18819_v33  ;;  %v19113_v33 = vrot.slane %v10195_v59, %v17378_v1 }
 0x927   : > { %11206 = vmatprep.mubr.bf16.mxu0 %v18833_v45  ;;  %11592 = vmatprep.mubr.bf16.mxu1 %v18833_v45 }
 0x92e   : > { %11207 = vmatmul.mubr.bf16.gmra.mrb[152].mxu0 %v18831_v51  ;;  %11593 = vmatmul.mubr.bf16.gmra.mrb[152].mxu1 %v18831_v51 }
 0x92f   : > { %11216 = vmatprep.mubr.bf16.mxu0 %v18845_v58  ;;  %11602 = vmatprep.mubr.bf16.mxu1 %v18845_v58 }
 0x936   : > { %11217 = vmatmul.mubr.bf16.gmra.mrb[156].mxu0 %v18843_v47  ;;  %11603 = vmatmul.mubr.bf16.gmra.mrb[156].mxu1 %v18843_v47 }
 0x937   : > { %11226 = vmatprep.mubr.bf16.mxu0 %v18857_v54  ;;  %11612 = vmatprep.mubr.bf16.mxu1 %v18857_v54 }
 0x93e   : > { %11227 = vmatmul.mubr.bf16.gmra.mrb[160].mxu0 %v18855_v32  ;;  %11613 = vmatmul.mubr.bf16.gmra.mrb[160].mxu1 %v18855_v32 }
 0x93f   : > { %11236 = vmatprep.mubr.bf16.mxu0 %v18869_v50  ;;  %11622 = vmatprep.mubr.bf16.mxu1 %v18869_v50 }
 0x946   : > { %11237 = vmatmul.mubr.bf16.gmra.mrb[164].mxu0 %v18867_v4  ;;  %11623 = vmatmul.mubr.bf16.gmra.mrb[164].mxu1 %v18867_v4 }
 0x947   : > { %11246 = vmatprep.mubr.bf16.mxu0 %v18881_v29  ;;  %11632 = vmatprep.mubr.bf16.mxu1 %v18881_v29 }
 0x94e   : > { %11247 = vmatmul.mubr.bf16.gmra.mrb[168].mxu0 %v18879_v13  ;;  %11633 = vmatmul.mubr.bf16.gmra.mrb[168].mxu1 %v18879_v13 }
 0x94f   : > { %11256 = vmatprep.mubr.bf16.mxu0 %v18893_v42  ;;  %11642 = vmatprep.mubr.bf16.mxu1 %v18893_v42 }
 0x956   : > { %11257 = vmatmul.mubr.bf16.gmra.mrb[172].mxu0 %v18891_v37  ;;  %11643 = vmatmul.mubr.bf16.gmra.mrb[172].mxu1 %v18891_v37 }
 0x957   : > { %11266 = vmatprep.mubr.bf16.mxu0 %v18911_v25  ;;  %11652 = vmatprep.mubr.bf16.mxu1 %v18911_v25 }
 0x95e   : > { %11267 = vmatmul.mubr.bf16.gmra.mrb[176].mxu0 %v18909_v19  ;;  %11653 = vmatmul.mubr.bf16.gmra.mrb[176].mxu1 %v18909_v19 }
 0x95f   : > { %11276 = vmatprep.mubr.bf16.mxu0 %v18923_v34  ;;  %11662 = vmatprep.mubr.bf16.mxu1 %v18923_v34 }
 0x966   : > { %11277 = vmatmul.mubr.bf16.gmra.mrb[180].mxu0 %v18921_v7  ;;  %11663 = vmatmul.mubr.bf16.gmra.mrb[180].mxu1 %v18921_v7 }
 0x967   : > { %11286 = vmatprep.mubr.bf16.mxu0 %v18935_v0  ;;  %11672 = vmatprep.mubr.bf16.mxu1 %v18935_v0 }
 0x96e   : > { %11287 = vmatmul.mubr.bf16.gmra.mrb[184].mxu0 %v18933_v12  ;;  %11673 = vmatmul.mubr.bf16.gmra.mrb[184].mxu1 %v18933_v12 }
 0x96f   : > { %11296 = vmatprep.mubr.bf16.mxu0 %v18947_v20  ;;  %11682 = vmatprep.mubr.bf16.mxu1 %v18947_v20 }
 0x976   : > { %11297 = vmatmul.mubr.bf16.gmra.mrb[188].mxu0 %v18945_v44  ;;  %11683 = vmatmul.mubr.bf16.gmra.mrb[188].mxu1 %v18945_v44 }
 0x9d1   : > { %v11148_v51 = vpop.f32.mrb[128].mxu0  ;;  %v11534_v45 = vpop.f32.mrb[128].mxu1 }
 0x9d2   : > { %v14430_v47 = vadd.f32 %v11148_v51, %v19107_v55  ;;  %v14494_v58 = vadd.f32 %v11534_v45, %v19110_v31  ;;  %v11150_v32 = vpop.f32.mrb[129].mxu0  ;;  %v11536_v54 = vpop.f32.mrb[129].mxu1 }
 0x9d3   : > { %v14431_v62 = vadd.f32 %v11150_v32, %v19113_v33  ;;  %v14495_v4 = vadd.f32 %v11536_v54, %v19116_v43  ;;  %v11152_v6 = vpop.f32.mrb[130].mxu0  ;;  %v11538_v50 = vpop.f32.mrb[130].mxu1 }
 0x9d4   : > { %v14432_v1 = vadd.f32 %v11152_v6, %v19107_v55  ;;  %v14496_v13 = vadd.f32 %v11538_v50, %v19110_v31  ;;  %v11154_v9 = vpop.f32.mrb[131].mxu0  ;;  %v11540_v29 = vpop.f32.mrb[131].mxu1  ;;  %v11693_v19 = vmax.f32 %v14430_v47, 0.0  ;;  %v11695_v25 = vmax.f32 %v14494_v58, 0.0 }
 0x9d5   : > { %v14433_v37 = vadd.f32 %v11154_v9, %v19113_v33  ;;  %v14497_v42 = vadd.f32 %v11540_v29, %v19116_v43  ;;  %v11694_v12 = vmax.f32 %v14431_v62, 0.0  ;;  %v11696_v0 = vmax.f32 %v14495_v4, 0.0 }
 0x9d6   : > { %v11697_v7 = vmax.f32 %v14432_v1, 0.0  ;;  %v11699_v34 = vmax.f32 %v14496_v13, 0.0 }
 0x9d7   : > { %v11698_v17 = vmax.f32 %v14433_v37, 0.0  ;;  %v11700_v57 = vmax.f32 %v14497_v42, 0.0 }
 0x9d8   : > { %v11886_v14 = vpack.c.bf16 %v11697_v7, %v11693_v19  ;;  %v11888_v28 = vpack.c.bf16 %v11699_v34, %v11695_v25 }
 0x9d9   : > { %v11887_v44 = vpack.c.bf16 %v11698_v17, %v11694_v12  ;;  %v11889_v36 = vpack.c.bf16 %v11700_v57, %v11696_v0  ;;  %v11158_v20 = vpop.f32.mrb[132].mxu0  ;;  %v11544_v10 = vpop.f32.mrb[132].mxu1 }
 0x9da   : > { %v14434_v24 = vadd.f32 %v11158_v20, %v19107_v55  ;;  %v14498_v27 = vadd.f32 %v11544_v10, %v19110_v31  ;;  %v11160_v18 = vpop.f32.mrb[133].mxu0  ;;  %v11546_v23 = vpop.f32.mrb[133].mxu1 }
 0x9db   : > { %v14435_v3 = vadd.f32 %v11160_v18, %v19113_v33  ;;  %v14499_v41 = vadd.f32 %v11546_v23, %v19116_v43  ;;  %v11162_v35 = vpop.f32.mrb[134].mxu0  ;;  %v11548_v16 = vpop.f32.mrb[134].mxu1  ;;  %12180 = vmatprep.mubr.bf16.mxu0 %v11887_v44  ;;  %12341 = vmatprep.mubr.bf16.mxu1 %v11889_v36 }
 0x9dc   : > { %v14436_v63 = vadd.f32 %v11162_v35, %v19107_v55  ;;  %v14500_v39 = vadd.f32 %v11548_v16, %v19110_v31  ;;  %v11164_v11 = vpop.f32.mrb[135].mxu0  ;;  %v11550_v8 = vpop.f32.mrb[135].mxu1  ;;  %12181 = vmatmul.mubr.bf16.vlgmr.msra.gmra.mrb[192].mxu0 %v11886_v14  ;;  %12342 = vmatmul.mubr.bf16.vlgmr.msra.gmra.mrb[192].mxu1 %v11888_v28  ;;  %v11701_v46 = vmax.f32 %v14434_v24, 0.0  ;;  %v11703_v30 = vmax.f32 %v14498_v27, 0.0 }
 0x9dd   : > { %v14437_v48 = vadd.f32 %v11164_v11, %v19113_v33  ;;  %v14501_v38 = vadd.f32 %v11550_v8, %v19116_v43  ;;  %v11702_v5 = vmax.f32 %v14435_v3, 0.0  ;;  %v11704_v61 = vmax.f32 %v14499_v41, 0.0 }
 0x9de   : > { %v11705_v53 = vmax.f32 %v14436_v63, 0.0  ;;  %v11707_v52 = vmax.f32 %v14500_v39, 0.0 }
 0x9df   : > { %v11706_v22 = vmax.f32 %v14437_v48, 0.0  ;;  %v11708_v26 = vmax.f32 %v14501_v38, 0.0 }
 0x9e0   : > { %v11890_v21 = vpack.c.bf16 %v11705_v53, %v11701_v46  ;;  %v11892_v40 = vpack.c.bf16 %v11707_v52, %v11703_v30 }
 0x9e1   : > { %v11891_v60 = vpack.c.bf16 %v11706_v22, %v11702_v5  ;;  %v11893_v2 = vpack.c.bf16 %v11708_v26, %v11704_v61  ;;  %v11168_v49 = vpop.f32.mrb[136].mxu0  ;;  %v11554_v56 = vpop.f32.mrb[136].mxu1 }
 0x9e2   : > { %v14438_v15 = vadd.f32 %v11168_v49, %v19107_v55  ;;  %v14502_v59 = vadd.f32 %v11554_v56, %v19110_v31  ;;  %v11170_v51 = vpop.f32.mrb[137].mxu0  ;;  %v11556_v45 = vpop.f32.mrb[137].mxu1 }
 0x9e3   : > { %v14439_v47 = vadd.f32 %v11170_v51, %v19113_v33  ;;  %v14503_v58 = vadd.f32 %v11556_v45, %v19116_v43  ;;  %v11172_v32 = vpop.f32.mrb[138].mxu0  ;;  %v11558_v54 = vpop.f32.mrb[138].mxu1  ;;  %12188 = vmatprep.mubr.bf16.mxu0 %v11891_v60  ;;  %12349 = vmatprep.mubr.bf16.mxu1 %v11893_v2 }
 0x9e4   : > { %v14440_v62 = vadd.f32 %v11172_v32, %v19107_v55  ;;  %v14504_v4 = vadd.f32 %v11558_v54, %v19110_v31  ;;  %v11174_v6 = vpop.f32.mrb[139].mxu0  ;;  %v11560_v50 = vpop.f32.mrb[139].mxu1  ;;  %12189 = vmatmul.mubr.bf16.gmra.mrb[196].mxu0 %v11890_v21  ;;  %12350 = vmatmul.mubr.bf16.gmra.mrb[196].mxu1 %v11892_v40  ;;  %v11709_v9 = vmax.f32 %v14438_v15, 0.0  ;;  %v11711_v29 = vmax.f32 %v14502_v59, 0.0 }
 0x9e5   : > { %v14441_v1 = vadd.f32 %v11174_v6, %v19113_v33  ;;  %v14505_v13 = vadd.f32 %v11560_v50, %v19116_v43  ;;  %v11710_v19 = vmax.f32 %v14439_v47, 0.0  ;;  %v11712_v25 = vmax.f32 %v14503_v58, 0.0 }
 0x9e6   : > { %v11713_v37 = vmax.f32 %v14440_v62, 0.0  ;;  %v11715_v42 = vmax.f32 %v14504_v4, 0.0 }
 0x9e7   : > { %v11714_v7 = vmax.f32 %v14441_v1, 0.0  ;;  %v11716_v34 = vmax.f32 %v14505_v13, 0.0 }
 0x9e8   : > { %v11894_v12 = vpack.c.bf16 %v11713_v37, %v11709_v9  ;;  %v11896_v0 = vpack.c.bf16 %v11715_v42, %v11711_v29 }
 0x9e9   : > { %v11895_v17 = vpack.c.bf16 %v11714_v7, %v11710_v19  ;;  %v11897_v57 = vpack.c.bf16 %v11716_v34, %v11712_v25  ;;  %v11178_v14 = vpop.f32.mrb[140].mxu0  ;;  %v11564_v28 = vpop.f32.mrb[140].mxu1 }
 0x9ea   : > { %v14442_v44 = vadd.f32 %v11178_v14, %v19107_v55  ;;  %v14506_v36 = vadd.f32 %v11564_v28, %v19110_v31  ;;  %v11180_v20 = vpop.f32.mrb[141].mxu0  ;;  %v11566_v10 = vpop.f32.mrb[141].mxu1 }
 0x9eb   : > { %v14443_v24 = vadd.f32 %v11180_v20, %v19113_v33  ;;  %v14507_v27 = vadd.f32 %v11566_v10, %v19116_v43  ;;  %v11182_v18 = vpop.f32.mrb[142].mxu0  ;;  %v11568_v23 = vpop.f32.mrb[142].mxu1  ;;  %12196 = vmatprep.mubr.bf16.mxu0 %v11895_v17  ;;  %12357 = vmatprep.mubr.bf16.mxu1 %v11897_v57 }
 0x9ec   : > { %v14444_v3 = vadd.f32 %v11182_v18, %v19107_v55  ;;  %v14508_v41 = vadd.f32 %v11568_v23, %v19110_v31  ;;  %v11184_v35 = vpop.f32.mrb[143].mxu0  ;;  %v11570_v16 = vpop.f32.mrb[143].mxu1  ;;  %12197 = vmatmul.mubr.bf16.gmra.mrb[200].mxu0 %v11894_v12  ;;  %12358 = vmatmul.mubr.bf16.gmra.mrb[200].mxu1 %v11896_v0  ;;  %v11717_v11 = vmax.f32 %v14442_v44, 0.0  ;;  %v11719_v8 = vmax.f32 %v14506_v36, 0.0 }
 0x9ed   : > { %v14445_v63 = vadd.f32 %v11184_v35, %v19113_v33  ;;  %v14509_v39 = vadd.f32 %v11570_v16, %v19116_v43  ;;  %v11718_v46 = vmax.f32 %v14443_v24, 0.0  ;;  %v11720_v30 = vmax.f32 %v14507_v27, 0.0 }
 0x9ee   : > { %v11721_v48 = vmax.f32 %v14444_v3, 0.0  ;;  %v11723_v38 = vmax.f32 %v14508_v41, 0.0 }
 0x9ef   : > { %v11722_v53 = vmax.f32 %v14445_v63, 0.0  ;;  %v11724_v52 = vmax.f32 %v14509_v39, 0.0 }
 0x9f0   : > { %v11898_v5 = vpack.c.bf16 %v11721_v48, %v11717_v11  ;;  %v11900_v61 = vpack.c.bf16 %v11723_v38, %v11719_v8 }
 0x9f1   : > { %v11899_v22 = vpack.c.bf16 %v11722_v53, %v11718_v46  ;;  %v11901_v26 = vpack.c.bf16 %v11724_v52, %v11720_v30  ;;  %v11188_v21 = vpop.f32.mrb[144].mxu0  ;;  %v11574_v40 = vpop.f32.mrb[144].mxu1 }
 0x9f2   : > { %v14446_v60 = vadd.f32 %v11188_v21, %v19107_v55  ;;  %v14510_v2 = vadd.f32 %v11574_v40, %v19110_v31  ;;  %v11190_v49 = vpop.f32.mrb[145].mxu0  ;;  %v11576_v56 = vpop.f32.mrb[145].mxu1 }
 0x9f3   : > { %v14447_v15 = vadd.f32 %v11190_v49, %v19113_v33  ;;  %v14511_v59 = vadd.f32 %v11576_v56, %v19116_v43  ;;  %v11192_v51 = vpop.f32.mrb[146].mxu0  ;;  %v11578_v45 = vpop.f32.mrb[146].mxu1  ;;  %12204 = vmatprep.mubr.bf16.mxu0 %v11899_v22  ;;  %12365 = vmatprep.mubr.bf16.mxu1 %v11901_v26 }
 0x9f4   : > { %v14448_v47 = vadd.f32 %v11192_v51, %v19107_v55  ;;  %v14512_v58 = vadd.f32 %v11578_v45, %v19110_v31  ;;  %v11194_v32 = vpop.f32.mrb[147].mxu0  ;;  %v11580_v54 = vpop.f32.mrb[147].mxu1  ;;  %12205 = vmatmul.mubr.bf16.gmra.mrb[204].mxu0 %v11898_v5  ;;  %12366 = vmatmul.mubr.bf16.gmra.mrb[204].mxu1 %v11900_v61  ;;  %v11725_v6 = vmax.f32 %v14446_v60, 0.0  ;;  %v11727_v50 = vmax.f32 %v14510_v2, 0.0 }
 0x9f5   : > { %v14449_v62 = vadd.f32 %v11194_v32, %v19113_v33  ;;  %v14513_v4 = vadd.f32 %v11580_v54, %v19116_v43  ;;  %v11726_v9 = vmax.f32 %v14447_v15, 0.0  ;;  %v11728_v29 = vmax.f32 %v14511_v59, 0.0 }
 0x9f6   : > { %v11729_v1 = vmax.f32 %v14448_v47, 0.0  ;;  %v11731_v13 = vmax.f32 %v14512_v58, 0.0 }
 0x9f7   : > { %v11730_v37 = vmax.f32 %v14449_v62, 0.0  ;;  %v11732_v42 = vmax.f32 %v14513_v4, 0.0 }
 0x9f8   : > { %v11902_v19 = vpack.c.bf16 %v11729_v1, %v11725_v6  ;;  %v11904_v25 = vpack.c.bf16 %v11731_v13, %v11727_v50 }
 0x9f9   : > { %v11903_v7 = vpack.c.bf16 %v11730_v37, %v11726_v9  ;;  %v11905_v34 = vpack.c.bf16 %v11732_v42, %v11728_v29  ;;  %v11198_v12 = vpop.f32.mrb[148].mxu0  ;;  %v11584_v0 = vpop.f32.mrb[148].mxu1 }
 0x9fa   : > { %v14450_v17 = vadd.f32 %v11198_v12, %v19107_v55  ;;  %v14514_v57 = vadd.f32 %v11584_v0, %v19110_v31  ;;  %v11200_v14 = vpop.f32.mrb[149].mxu0  ;;  %v11586_v28 = vpop.f32.mrb[149].mxu1 }
 0x9fb   : > { %v14451_v44 = vadd.f32 %v11200_v14, %v19113_v33  ;;  %v14515_v36 = vadd.f32 %v11586_v28, %v19116_v43  ;;  %v11202_v20 = vpop.f32.mrb[150].mxu0  ;;  %v11588_v10 = vpop.f32.mrb[150].mxu1  ;;  %12212 = vmatprep.mubr.bf16.mxu0 %v11903_v7  ;;  %12373 = vmatprep.mubr.bf16.mxu1 %v11905_v34 }
 0x9fc   : > { %v14452_v24 = vadd.f32 %v11202_v20, %v19107_v55  ;;  %v14516_v27 = vadd.f32 %v11588_v10, %v19110_v31  ;;  %v11204_v18 = vpop.f32.mrb[151].mxu0  ;;  %v11590_v23 = vpop.f32.mrb[151].mxu1  ;;  %12213 = vmatmul.mubr.bf16.gmra.mrb[208].mxu0 %v11902_v19  ;;  %12374 = vmatmul.mubr.bf16.gmra.mrb[208].mxu1 %v11904_v25  ;;  %v11733_v35 = vmax.f32 %v14450_v17, 0.0  ;;  %v11735_v16 = vmax.f32 %v14514_v57, 0.0 }
 0x9fd   : > { %v14453_v3 = vadd.f32 %v11204_v18, %v19113_v33  ;;  %v14517_v41 = vadd.f32 %v11590_v23, %v19116_v43  ;;  %v11734_v11 = vmax.f32 %v14451_v44, 0.0  ;;  %v11736_v8 = vmax.f32 %v14515_v36, 0.0 }
 0x9fe   : > { %v11737_v63 = vmax.f32 %v14452_v24, 0.0  ;;  %v11739_v39 = vmax.f32 %v14516_v27, 0.0 }
 0x9ff   : > { %v11738_v48 = vmax.f32 %v14453_v3, 0.0  ;;  %v11740_v38 = vmax.f32 %v14517_v41, 0.0 }
 0xa00   : > { %v11906_v46 = vpack.c.bf16 %v11737_v63, %v11733_v35  ;;  %v11908_v30 = vpack.c.bf16 %v11739_v39, %v11735_v16 }
 0xa01   : > { %v11907_v53 = vpack.c.bf16 %v11738_v48, %v11734_v11  ;;  %v11909_v52 = vpack.c.bf16 %v11740_v38, %v11736_v8  ;;  %v11208_v5 = vpop.f32.mrb[152].mxu0  ;;  %v11594_v61 = vpop.f32.mrb[152].mxu1 }
 0xa02   : > { %v14454_v22 = vadd.f32 %v11208_v5, %v19107_v55  ;;  %v14518_v26 = vadd.f32 %v11594_v61, %v19110_v31  ;;  %v11210_v21 = vpop.f32.mrb[153].mxu0  ;;  %v11596_v40 = vpop.f32.mrb[153].mxu1 }
 0xa03   : > { %v14455_v60 = vadd.f32 %v11210_v21, %v19113_v33  ;;  %v14519_v2 = vadd.f32 %v11596_v40, %v19116_v43  ;;  %v11212_v49 = vpop.f32.mrb[154].mxu0  ;;  %v11598_v56 = vpop.f32.mrb[154].mxu1  ;;  %12220 = vmatprep.mubr.bf16.mxu0 %v11907_v53  ;;  %12381 = vmatprep.mubr.bf16.mxu1 %v11909_v52 }
 0xa04   : > { %v14456_v15 = vadd.f32 %v11212_v49, %v19107_v55  ;;  %v14520_v59 = vadd.f32 %v11598_v56, %v19110_v31  ;;  %v11214_v51 = vpop.f32.mrb[155].mxu0  ;;  %v11600_v45 = vpop.f32.mrb[155].mxu1  ;;  %12221 = vmatmul.mubr.bf16.gmra.mrb[212].mxu0 %v11906_v46  ;;  %12382 = vmatmul.mubr.bf16.gmra.mrb[212].mxu1 %v11908_v30  ;;  %v11741_v32 = vmax.f32 %v14454_v22, 0.0  ;;  %v11743_v54 = vmax.f32 %v14518_v26, 0.0 }
 0xa05   : > { %v14457_v47 = vadd.f32 %v11214_v51, %v19113_v33  ;;  %v14521_v58 = vadd.f32 %v11600_v45, %v19116_v43  ;;  %v11742_v6 = vmax.f32 %v14455_v60, 0.0  ;;  %v11744_v50 = vmax.f32 %v14519_v2, 0.0 }
 0xa06   : > { %v11745_v62 = vmax.f32 %v14456_v15, 0.0  ;;  %v11747_v4 = vmax.f32 %v14520_v59, 0.0 }
 0xa07   : > { %v11746_v1 = vmax.f32 %v14457_v47, 0.0  ;;  %v11748_v13 = vmax.f32 %v14521_v58, 0.0 }
 0xa08   : > { %v11910_v9 = vpack.c.bf16 %v11745_v62, %v11741_v32  ;;  %v11912_v29 = vpack.c.bf16 %v11747_v4, %v11743_v54 }
 0xa09   : > { %v11911_v37 = vpack.c.bf16 %v11746_v1, %v11742_v6  ;;  %v11913_v42 = vpack.c.bf16 %v11748_v13, %v11744_v50  ;;  %v11218_v19 = vpop.f32.mrb[156].mxu0  ;;  %v11604_v25 = vpop.f32.mrb[156].mxu1 }
 0xa0a   : > { %v14458_v7 = vadd.f32 %v11218_v19, %v19107_v55  ;;  %v14522_v34 = vadd.f32 %v11604_v25, %v19110_v31  ;;  %v11220_v12 = vpop.f32.mrb[157].mxu0  ;;  %v11606_v0 = vpop.f32.mrb[157].mxu1 }
 0xa0b   : > { %v14459_v17 = vadd.f32 %v11220_v12, %v19113_v33  ;;  %v14523_v57 = vadd.f32 %v11606_v0, %v19116_v43  ;;  %v11222_v14 = vpop.f32.mrb[158].mxu0  ;;  %v11608_v28 = vpop.f32.mrb[158].mxu1  ;;  %12228 = vmatprep.mubr.bf16.mxu0 %v11911_v37  ;;  %12389 = vmatprep.mubr.bf16.mxu1 %v11913_v42 }
 0xa0c   : > { %v14460_v44 = vadd.f32 %v11222_v14, %v19107_v55  ;;  %v14524_v36 = vadd.f32 %v11608_v28, %v19110_v31  ;;  %v11224_v20 = vpop.f32.mrb[159].mxu0  ;;  %v11610_v10 = vpop.f32.mrb[159].mxu1  ;;  %12229 = vmatmul.mubr.bf16.gmra.mrb[216].mxu0 %v11910_v9  ;;  %12390 = vmatmul.mubr.bf16.gmra.mrb[216].mxu1 %v11912_v29  ;;  %v11749_v18 = vmax.f32 %v14458_v7, 0.0  ;;  %v11751_v23 = vmax.f32 %v14522_v34, 0.0 }
 0xa0d   : > { %v14461_v24 = vadd.f32 %v11224_v20, %v19113_v33  ;;  %v14525_v27 = vadd.f32 %v11610_v10, %v19116_v43  ;;  %v11750_v35 = vmax.f32 %v14459_v17, 0.0  ;;  %v11752_v16 = vmax.f32 %v14523_v57, 0.0 }
 0xa0e   : > { %v11753_v3 = vmax.f32 %v14460_v44, 0.0  ;;  %v11755_v41 = vmax.f32 %v14524_v36, 0.0 }
 0xa0f   : > { %v11754_v63 = vmax.f32 %v14461_v24, 0.0  ;;  %v11756_v39 = vmax.f32 %v14525_v27, 0.0 }
 0xa10   : > { %v11914_v11 = vpack.c.bf16 %v11753_v3, %v11749_v18  ;;  %v11916_v8 = vpack.c.bf16 %v11755_v41, %v11751_v23 }
 0xa11   : > { %v11915_v48 = vpack.c.bf16 %v11754_v63, %v11750_v35  ;;  %v11917_v38 = vpack.c.bf16 %v11756_v39, %v11752_v16  ;;  %v11228_v46 = vpop.f32.mrb[160].mxu0  ;;  %v11614_v30 = vpop.f32.mrb[160].mxu1 }
 0xa12   : > { %v14462_v53 = vadd.f32 %v11228_v46, %v19107_v55  ;;  %v14526_v52 = vadd.f32 %v11614_v30, %v19110_v31  ;;  %v11230_v5 = vpop.f32.mrb[161].mxu0  ;;  %v11616_v61 = vpop.f32.mrb[161].mxu1 }
 0xa13   : > { %v14463_v22 = vadd.f32 %v11230_v5, %v19113_v33  ;;  %v14527_v26 = vadd.f32 %v11616_v61, %v19116_v43  ;;  %v11232_v21 = vpop.f32.mrb[162].mxu0  ;;  %v11618_v40 = vpop.f32.mrb[162].mxu1  ;;  %12236 = vmatprep.mubr.bf16.mxu0 %v11915_v48  ;;  %12397 = vmatprep.mubr.bf16.mxu1 %v11917_v38 }
 0xa14   : > { %v14464_v60 = vadd.f32 %v11232_v21, %v19107_v55  ;;  %v14528_v2 = vadd.f32 %v11618_v40, %v19110_v31  ;;  %v11234_v49 = vpop.f32.mrb[163].mxu0  ;;  %v11620_v56 = vpop.f32.mrb[163].mxu1  ;;  %12237 = vmatmul.mubr.bf16.gmra.mrb[220].mxu0 %v11914_v11  ;;  %12398 = vmatmul.mubr.bf16.gmra.mrb[220].mxu1 %v11916_v8  ;;  %v11757_v51 = vmax.f32 %v14462_v53, 0.0  ;;  %v11759_v45 = vmax.f32 %v14526_v52, 0.0 }
 0xa15   : > { %v14465_v15 = vadd.f32 %v11234_v49, %v19113_v33  ;;  %v14529_v59 = vadd.f32 %v11620_v56, %v19116_v43  ;;  %v11758_v32 = vmax.f32 %v14463_v22, 0.0  ;;  %v11760_v54 = vmax.f32 %v14527_v26, 0.0 }
 0xa16   : > { %v11761_v47 = vmax.f32 %v14464_v60, 0.0  ;;  %v11763_v58 = vmax.f32 %v14528_v2, 0.0 }
 0xa17   : > { %v11762_v62 = vmax.f32 %v14465_v15, 0.0  ;;  %v11764_v4 = vmax.f32 %v14529_v59, 0.0 }
 0xa18   : > { %v11918_v6 = vpack.c.bf16 %v11761_v47, %v11757_v51  ;;  %v11920_v50 = vpack.c.bf16 %v11763_v58, %v11759_v45 }
 0xa19   : > { %v11919_v1 = vpack.c.bf16 %v11762_v62, %v11758_v32  ;;  %v11921_v13 = vpack.c.bf16 %v11764_v4, %v11760_v54  ;;  %v11238_v9 = vpop.f32.mrb[164].mxu0  ;;  %v11624_v29 = vpop.f32.mrb[164].mxu1 }
 0xa1a   : > { %v14466_v37 = vadd.f32 %v11238_v9, %v19107_v55  ;;  %v14530_v42 = vadd.f32 %v11624_v29, %v19110_v31  ;;  %v11240_v19 = vpop.f32.mrb[165].mxu0  ;;  %v11626_v25 = vpop.f32.mrb[165].mxu1 }
 0xa1b   : > { %v14467_v7 = vadd.f32 %v11240_v19, %v19113_v33  ;;  %v14531_v34 = vadd.f32 %v11626_v25, %v19116_v43  ;;  %v11242_v12 = vpop.f32.mrb[166].mxu0  ;;  %v11628_v0 = vpop.f32.mrb[166].mxu1  ;;  %12244 = vmatprep.mubr.bf16.mxu0 %v11919_v1  ;;  %12405 = vmatprep.mubr.bf16.mxu1 %v11921_v13 }
 0xa1c   : > { %v14468_v17 = vadd.f32 %v11242_v12, %v19107_v55  ;;  %v14532_v57 = vadd.f32 %v11628_v0, %v19110_v31  ;;  %v11244_v14 = vpop.f32.mrb[167].mxu0  ;;  %v11630_v28 = vpop.f32.mrb[167].mxu1  ;;  %12245 = vmatmul.mubr.bf16.gmra.mrb[224].mxu0 %v11918_v6  ;;  %12406 = vmatmul.mubr.bf16.gmra.mrb[224].mxu1 %v11920_v50  ;;  %v11765_v20 = vmax.f32 %v14466_v37, 0.0  ;;  %v11767_v10 = vmax.f32 %v14530_v42, 0.0 }
 0xa1d   : > { %v14469_v44 = vadd.f32 %v11244_v14, %v19113_v33  ;;  %v14533_v36 = vadd.f32 %v11630_v28, %v19116_v43  ;;  %v11766_v18 = vmax.f32 %v14467_v7, 0.0  ;;  %v11768_v23 = vmax.f32 %v14531_v34, 0.0 }
 0xa1e   : > { %v11769_v24 = vmax.f32 %v14468_v17, 0.0  ;;  %v11771_v27 = vmax.f32 %v14532_v57, 0.0 }
 0xa1f   : > { %v11770_v3 = vmax.f32 %v14469_v44, 0.0  ;;  %v11772_v41 = vmax.f32 %v14533_v36, 0.0 }
 0xa20   : > { %v11922_v35 = vpack.c.bf16 %v11769_v24, %v11765_v20  ;;  %v11924_v16 = vpack.c.bf16 %v11771_v27, %v11767_v10 }
 0xa21   : > { %v11923_v63 = vpack.c.bf16 %v11770_v3, %v11766_v18  ;;  %v11925_v39 = vpack.c.bf16 %v11772_v41, %v11768_v23  ;;  %v11248_v11 = vpop.f32.mrb[168].mxu0  ;;  %v11634_v8 = vpop.f32.mrb[168].mxu1 }
 0xa22   : > { %v14470_v48 = vadd.f32 %v11248_v11, %v19107_v55  ;;  %v14534_v38 = vadd.f32 %v11634_v8, %v19110_v31  ;;  %v11250_v46 = vpop.f32.mrb[169].mxu0  ;;  %v11636_v30 = vpop.f32.mrb[169].mxu1 }
 0xa23   : > { %v14471_v53 = vadd.f32 %v11250_v46, %v19113_v33  ;;  %v14535_v52 = vadd.f32 %v11636_v30, %v19116_v43  ;;  %v11252_v5 = vpop.f32.mrb[170].mxu0  ;;  %v11638_v61 = vpop.f32.mrb[170].mxu1  ;;  %12252 = vmatprep.mubr.bf16.mxu0 %v11923_v63  ;;  %12413 = vmatprep.mubr.bf16.mxu1 %v11925_v39 }
 0xa24   : > { %v14472_v22 = vadd.f32 %v11252_v5, %v19107_v55  ;;  %v14536_v26 = vadd.f32 %v11638_v61, %v19110_v31  ;;  %v11254_v21 = vpop.f32.mrb[171].mxu0  ;;  %v11640_v40 = vpop.f32.mrb[171].mxu1  ;;  %12253 = vmatmul.mubr.bf16.gmra.mrb[228].mxu0 %v11922_v35  ;;  %12414 = vmatmul.mubr.bf16.gmra.mrb[228].mxu1 %v11924_v16  ;;  %v11773_v49 = vmax.f32 %v14470_v48, 0.0  ;;  %v11775_v56 = vmax.f32 %v14534_v38, 0.0 }
 0xa25   : > { %v14473_v60 = vadd.f32 %v11254_v21, %v19113_v33  ;;  %v14537_v2 = vadd.f32 %v11640_v40, %v19116_v43  ;;  %v11774_v51 = vmax.f32 %v14471_v53, 0.0  ;;  %v11776_v45 = vmax.f32 %v14535_v52, 0.0 }
 0xa26   : > { %v11777_v15 = vmax.f32 %v14472_v22, 0.0  ;;  %v11779_v59 = vmax.f32 %v14536_v26, 0.0 }
 0xa27   : > { %v11778_v47 = vmax.f32 %v14473_v60, 0.0  ;;  %v11780_v58 = vmax.f32 %v14537_v2, 0.0 }
 0xa28   : > { %v11926_v32 = vpack.c.bf16 %v11777_v15, %v11773_v49  ;;  %v11928_v54 = vpack.c.bf16 %v11779_v59, %v11775_v56 }
 0xa29   : > { %v11927_v62 = vpack.c.bf16 %v11778_v47, %v11774_v51  ;;  %v11929_v4 = vpack.c.bf16 %v11780_v58, %v11776_v45  ;;  %v11258_v6 = vpop.f32.mrb[172].mxu0  ;;  %v11644_v50 = vpop.f32.mrb[172].mxu1 }
 0xa2a   : > { %v14474_v1 = vadd.f32 %v11258_v6, %v19107_v55  ;;  %v14538_v13 = vadd.f32 %v11644_v50, %v19110_v31  ;;  %v11260_v9 = vpop.f32.mrb[173].mxu0  ;;  %v11646_v29 = vpop.f32.mrb[173].mxu1 }
 0xa2b   : > { %v14475_v37 = vadd.f32 %v11260_v9, %v19113_v33  ;;  %v14539_v42 = vadd.f32 %v11646_v29, %v19116_v43  ;;  %v11262_v19 = vpop.f32.mrb[174].mxu0  ;;  %v11648_v25 = vpop.f32.mrb[174].mxu1  ;;  %12260 = vmatprep.mubr.bf16.mxu0 %v11927_v62  ;;  %12421 = vmatprep.mubr.bf16.mxu1 %v11929_v4 }
 0xa2c   : > { %v14476_v7 = vadd.f32 %v11262_v19, %v19107_v55  ;;  %v14540_v34 = vadd.f32 %v11648_v25, %v19110_v31  ;;  %v11264_v12 = vpop.f32.mrb[175].mxu0  ;;  %v11650_v0 = vpop.f32.mrb[175].mxu1  ;;  %12261 = vmatmul.mubr.bf16.gmra.mrb[232].mxu0 %v11926_v32  ;;  %12422 = vmatmul.mubr.bf16.gmra.mrb[232].mxu1 %v11928_v54  ;;  %v11781_v14 = vmax.f32 %v14474_v1, 0.0  ;;  %v11783_v28 = vmax.f32 %v14538_v13, 0.0 }
 0xa2d   : > { %v14477_v17 = vadd.f32 %v11264_v12, %v19113_v33  ;;  %v14541_v57 = vadd.f32 %v11650_v0, %v19116_v43  ;;  %v11782_v20 = vmax.f32 %v14475_v37, 0.0  ;;  %v11784_v10 = vmax.f32 %v14539_v42, 0.0 }
 0xa2e   : > { %v11785_v44 = vmax.f32 %v14476_v7, 0.0  ;;  %v11787_v36 = vmax.f32 %v14540_v34, 0.0 }
 0xa2f   : > { %v11786_v24 = vmax.f32 %v14477_v17, 0.0  ;;  %v11788_v27 = vmax.f32 %v14541_v57, 0.0 }
 0xa30   : > { %v11930_v18 = vpack.c.bf16 %v11785_v44, %v11781_v14  ;;  %v11932_v23 = vpack.c.bf16 %v11787_v36, %v11783_v28 }
 0xa31   : > { %v11931_v3 = vpack.c.bf16 %v11786_v24, %v11782_v20  ;;  %v11933_v41 = vpack.c.bf16 %v11788_v27, %v11784_v10  ;;  %v11268_v35 = vpop.f32.mrb[176].mxu0  ;;  %v11654_v16 = vpop.f32.mrb[176].mxu1 }
 0xa32   : > { %v14478_v63 = vadd.f32 %v11268_v35, %v19107_v55  ;;  %v14542_v39 = vadd.f32 %v11654_v16, %v19110_v31  ;;  %v11270_v11 = vpop.f32.mrb[177].mxu0  ;;  %v11656_v8 = vpop.f32.mrb[177].mxu1 }
 0xa33   : > { %v14479_v48 = vadd.f32 %v11270_v11, %v19113_v33  ;;  %v14543_v38 = vadd.f32 %v11656_v8, %v19116_v43  ;;  %v11272_v46 = vpop.f32.mrb[178].mxu0  ;;  %v11658_v30 = vpop.f32.mrb[178].mxu1  ;;  %12268 = vmatprep.mubr.bf16.mxu0 %v11931_v3  ;;  %12429 = vmatprep.mubr.bf16.mxu1 %v11933_v41 }
 0xa34   : > { %v14480_v53 = vadd.f32 %v11272_v46, %v19107_v55  ;;  %v14544_v52 = vadd.f32 %v11658_v30, %v19110_v31  ;;  %v11274_v5 = vpop.f32.mrb[179].mxu0  ;;  %v11660_v61 = vpop.f32.mrb[179].mxu1  ;;  %12269 = vmatmul.mubr.bf16.gmra.mrb[236].mxu0 %v11930_v18  ;;  %12430 = vmatmul.mubr.bf16.gmra.mrb[236].mxu1 %v11932_v23  ;;  %v11789_v21 = vmax.f32 %v14478_v63, 0.0  ;;  %v11791_v40 = vmax.f32 %v14542_v39, 0.0 }
 0xa35   : > { %v14481_v22 = vadd.f32 %v11274_v5, %v19113_v33  ;;  %v14545_v26 = vadd.f32 %v11660_v61, %v19116_v43  ;;  %v11790_v49 = vmax.f32 %v14479_v48, 0.0  ;;  %v11792_v56 = vmax.f32 %v14543_v38, 0.0 }
 0xa36   : > { %v11793_v60 = vmax.f32 %v14480_v53, 0.0  ;;  %v11795_v2 = vmax.f32 %v14544_v52, 0.0 }
 0xa37   : > { %v11794_v15 = vmax.f32 %v14481_v22, 0.0  ;;  %v11796_v59 = vmax.f32 %v14545_v26, 0.0 }
 0xa38   : > { %v11934_v51 = vpack.c.bf16 %v11793_v60, %v11789_v21  ;;  %v11936_v45 = vpack.c.bf16 %v11795_v2, %v11791_v40 }
 0xa39   : > { %v11935_v47 = vpack.c.bf16 %v11794_v15, %v11790_v49  ;;  %v11937_v58 = vpack.c.bf16 %v11796_v59, %v11792_v56  ;;  %v11278_v32 = vpop.f32.mrb[180].mxu0  ;;  %v11664_v54 = vpop.f32.mrb[180].mxu1 }
 0xa3a   : > { %v14482_v62 = vadd.f32 %v11278_v32, %v19107_v55  ;;  %v14546_v4 = vadd.f32 %v11664_v54, %v19110_v31  ;;  %v11280_v6 = vpop.f32.mrb[181].mxu0  ;;  %v11666_v50 = vpop.f32.mrb[181].mxu1 }
 0xa3b   : > { %v14483_v1 = vadd.f32 %v11280_v6, %v19113_v33  ;;  %v14547_v13 = vadd.f32 %v11666_v50, %v19116_v43  ;;  %v11282_v9 = vpop.f32.mrb[182].mxu0  ;;  %v11668_v29 = vpop.f32.mrb[182].mxu1  ;;  %12276 = vmatprep.mubr.bf16.mxu0 %v11935_v47  ;;  %12437 = vmatprep.mubr.bf16.mxu1 %v11937_v58 }
 0xa3c   : > { %v14484_v37 = vadd.f32 %v11282_v9, %v19107_v55  ;;  %v14548_v42 = vadd.f32 %v11668_v29, %v19110_v31  ;;  %v11284_v19 = vpop.f32.mrb[183].mxu0  ;;  %v11670_v25 = vpop.f32.mrb[183].mxu1  ;;  %12277 = vmatmul.mubr.bf16.gmra.mrb[240].mxu0 %v11934_v51  ;;  %12438 = vmatmul.mubr.bf16.gmra.mrb[240].mxu1 %v11936_v45  ;;  %v11797_v12 = vmax.f32 %v14482_v62, 0.0  ;;  %v11799_v0 = vmax.f32 %v14546_v4, 0.0 }
 0xa3d   : > { %v14485_v7 = vadd.f32 %v11284_v19, %v19113_v33  ;;  %v14549_v34 = vadd.f32 %v11670_v25, %v19116_v43  ;;  %v11798_v14 = vmax.f32 %v14483_v1, 0.0  ;;  %v11800_v28 = vmax.f32 %v14547_v13, 0.0 }
 0xa3e   : > { %v11801_v17 = vmax.f32 %v14484_v37, 0.0  ;;  %v11803_v57 = vmax.f32 %v14548_v42, 0.0 }
 0xa3f   : > { %v11802_v44 = vmax.f32 %v14485_v7, 0.0  ;;  %v11804_v36 = vmax.f32 %v14549_v34, 0.0 }
 0xa40   : > { %v11938_v20 = vpack.c.bf16 %v11801_v17, %v11797_v12  ;;  %v11940_v10 = vpack.c.bf16 %v11803_v57, %v11799_v0 }
 0xa41   : > { %v11939_v24 = vpack.c.bf16 %v11802_v44, %v11798_v14  ;;  %v11941_v27 = vpack.c.bf16 %v11804_v36, %v11800_v28  ;;  %v11288_v18 = vpop.f32.mrb[184].mxu0  ;;  %v11674_v23 = vpop.f32.mrb[184].mxu1 }
 0xa42   : > { %v14486_v3 = vadd.f32 %v11288_v18, %v19107_v55  ;;  %v14550_v41 = vadd.f32 %v11674_v23, %v19110_v31  ;;  %v11290_v35 = vpop.f32.mrb[185].mxu0  ;;  %v11676_v16 = vpop.f32.mrb[185].mxu1 }
 0xa43   : > { %v14487_v63 = vadd.f32 %v11290_v35, %v19113_v33  ;;  %v14551_v39 = vadd.f32 %v11676_v16, %v19116_v43  ;;  %v11292_v11 = vpop.f32.mrb[186].mxu0  ;;  %v11678_v8 = vpop.f32.mrb[186].mxu1  ;;  %12284 = vmatprep.mubr.bf16.mxu0 %v11939_v24  ;;  %12445 = vmatprep.mubr.bf16.mxu1 %v11941_v27 }
 0xa44   : > { %v14488_v48 = vadd.f32 %v11292_v11, %v19107_v55  ;;  %v14552_v38 = vadd.f32 %v11678_v8, %v19110_v31  ;;  %v11294_v46 = vpop.f32.mrb[187].mxu0  ;;  %v11680_v30 = vpop.f32.mrb[187].mxu1  ;;  %12285 = vmatmul.mubr.bf16.gmra.mrb[244].mxu0 %v11938_v20  ;;  %12446 = vmatmul.mubr.bf16.gmra.mrb[244].mxu1 %v11940_v10  ;;  %v11805_v5 = vmax.f32 %v14486_v3, 0.0  ;;  %v11807_v61 = vmax.f32 %v14550_v41, 0.0 }
 0xa45   : > { %v14489_v53 = vadd.f32 %v11294_v46, %v19113_v33  ;;  %v14553_v52 = vadd.f32 %v11680_v30, %v19116_v43  ;;  %v11806_v21 = vmax.f32 %v14487_v63, 0.0  ;;  %v11808_v40 = vmax.f32 %v14551_v39, 0.0 }
 0xa46   : > { %v11809_v22 = vmax.f32 %v14488_v48, 0.0  ;;  %v11811_v26 = vmax.f32 %v14552_v38, 0.0 }
 0xa47   : > { %v11810_v60 = vmax.f32 %v14489_v53, 0.0  ;;  %v11812_v2 = vmax.f32 %v14553_v52, 0.0 }
 0xa48   : > { %v11942_v49 = vpack.c.bf16 %v11809_v22, %v11805_v5  ;;  %v11944_v56 = vpack.c.bf16 %v11811_v26, %v11807_v61 }
 0xa49   : > { %v11943_v15 = vpack.c.bf16 %v11810_v60, %v11806_v21  ;;  %v11945_v59 = vpack.c.bf16 %v11812_v2, %v11808_v40  ;;  %v11298_v51 = vpop.f32.mrb[188].mxu0  ;;  %v11684_v45 = vpop.f32.mrb[188].mxu1 }
 0xa4a   : > { %v14490_v47 = vadd.f32 %v11298_v51, %v19107_v55  ;;  %v14554_v58 = vadd.f32 %v11684_v45, %v19110_v31  ;;  %v11300_v32 = vpop.f32.mrb[189].mxu0  ;;  %v11686_v54 = vpop.f32.mrb[189].mxu1 }
 0xa4b   : > { %v14491_v62 = vadd.f32 %v11300_v32, %v19113_v33  ;;  %v14555_v4 = vadd.f32 %v11686_v54, %v19116_v43  ;;  %v11302_v6 = vpop.f32.mrb[190].mxu0  ;;  %v11688_v50 = vpop.f32.mrb[190].mxu1  ;;  %12292 = vmatprep.mubr.bf16.mxu0 %v11943_v15  ;;  %12453 = vmatprep.mubr.bf16.mxu1 %v11945_v59 }
 0xa4c   : > { %v14492_v1 = vadd.f32 %v11302_v6, %v19107_v55  ;;  %v14556_v13 = vadd.f32 %v11688_v50, %v19110_v31  ;;  %v11304_v9 = vpop.f32.mrb[191].mxu0  ;;  %v11690_v29 = vpop.f32.mrb[191].mxu1  ;;  %12293 = vmatmul.mubr.bf16.gmra.mrb[248].mxu0 %v11942_v49  ;;  %12454 = vmatmul.mubr.bf16.gmra.mrb[248].mxu1 %v11944_v56  ;;  %v11813_v19 = vmax.f32 %v14490_v47, 0.0  ;;  %v11815_v25 = vmax.f32 %v14554_v58, 0.0 }
 0xa4d   : > { %v14493_v37 = vadd.f32 %v11304_v9, %v19113_v33  ;;  %v14557_v42 = vadd.f32 %v11690_v29, %v19116_v43  ;;  %v11814_v12 = vmax.f32 %v14491_v62, 0.0  ;;  %v11816_v0 = vmax.f32 %v14555_v4, 0.0  ;;  %v19249_v43 = vld [vmem:[%s19437_s5] ss:$0 sm:$0xff] }
 0xa4e   : > { %v11817_v7 = vmax.f32 %v14492_v1, 0.0  ;;  %v11819_v34 = vmax.f32 %v14556_v13, 0.0 }
 0xa4f   : > { %v11818_v17 = vmax.f32 %v14493_v37, 0.0  ;;  %v11820_v57 = vmax.f32 %v14557_v42, 0.0 }
 0xa50   : > { %v11946_v14 = vpack.c.bf16 %v11817_v7, %v11813_v19  ;;  %v11948_v55 = vpack.c.bf16 %v11819_v34, %v11815_v25 }
 0xa51   : > { %v11947_v28 = vpack.c.bf16 %v11818_v17, %v11814_v12  ;;  %v11949_v31 = vpack.c.bf16 %v11820_v57, %v11816_v0 }
 0xa53   : > { %12300 = vmatprep.mubr.bf16.mxu0 %v11947_v28  ;;  %12461 = vmatprep.mubr.bf16.mxu1 %v11949_v31 }
 0xa54   : > { %12301 = vmatmul.mubr.bf16.gmra.mrb[252].mxu0 %v11946_v14  ;;  %12462 = vmatmul.mubr.bf16.gmra.mrb[252].mxu1 %v11948_v55 }
 0xaaf   : > { %v13582_v44 = vpop.f32.mrb[192].mxu0  ;;  %v13694_v33 = vpop.f32.mrb[192].mxu1 }
 0xab0   : > { %v13583_v36 = vpop.f32.mrb[193].mxu0  ;;  %v13695_v20 = vpop.f32.mrb[193].mxu1 }
 0xab1   : > { %v13584_v10 = vadd.f32 %v13583_v36, %v13582_v44  ;;  %v13696_v24 = vadd.f32 %v13695_v20, %v13694_v33  ;;  %v13585_v27 = vpop.f32.mrb[194].mxu0  ;;  %v13697_v18 = vpop.f32.mrb[194].mxu1 }
 0xab2   : > { %v13586_v23 = vpop.f32.mrb[195].mxu0  ;;  %v13698_v3 = vpop.f32.mrb[195].mxu1 }
 0xab3   : > { %v12183_v41 = vadd.f32 %v13584_v10, %v19249_v43  ;;  %v13587_v35 = vadd.f32 %v13586_v23, %v13585_v27  ;;  %v13699_v16 = vadd.f32 %v13698_v3, %v13697_v18 }
 0xab5   : > { %v12344_v63 = vadd.f32 %v13696_v24, %v12183_v41  ;;  %v12186_v39 = vadd.f32 %v13587_v35, %v19249_v43 }
 0xab7   : > { %v12470_v11 = vmax.f32 %v12344_v63, 0.0  ;;  %v12347_v8 = vadd.f32 %v13699_v16, %v12186_v39  ;;  %v13588_v48 = vpop.f32.mrb[196].mxu0  ;;  %v13700_v38 = vpop.f32.mrb[196].mxu1 }
 0xab8   : > { %v13589_v46 = vpop.f32.mrb[197].mxu0  ;;  %v13701_v30 = vpop.f32.mrb[197].mxu1 }
 0xab9   : > { %16619 = vtanh.f32 %v12470_v11  ;;  %v12471_v53 = vmax.f32 %v12347_v8, 0.0  ;;  %v13590_v52 = vadd.f32 %v13589_v46, %v13588_v48  ;;  %v13702_v5 = vadd.f32 %v13701_v30, %v13700_v38  ;;  %v13591_v61 = vpop.f32.mrb[198].mxu0  ;;  %v13703_v22 = vpop.f32.mrb[198].mxu1 }
 0xaba   : > { %v13592_v26 = vpop.f32.mrb[199].mxu0  ;;  %v13704_v21 = vpop.f32.mrb[199].mxu1 }
 0xabb   : > { %16621 = vtanh.f32 %v12471_v53  ;;  %v12191_v40 = vadd.f32 %v13590_v52, %v19249_v43  ;;  %v13593_v60 = vadd.f32 %v13592_v26, %v13591_v61  ;;  %v13705_v2 = vadd.f32 %v13704_v21, %v13703_v22 }
 0xabd   : > { %v12352_v49 = vadd.f32 %v13702_v5, %v12191_v40  ;;  %v12194_v56 = vadd.f32 %v13593_v60, %v19249_v43 }
 0xabf   : > { %v12472_v15 = vmax.f32 %v12352_v49, 0.0  ;;  %v12355_v59 = vadd.f32 %v13705_v2, %v12194_v56  ;;  %v13594_v51 = vpop.f32.mrb[200].mxu0  ;;  %v13706_v45 = vpop.f32.mrb[200].mxu1 }
 0xac0   : > { %v13595_v47 = vpop.f32.mrb[201].mxu0  ;;  %v13707_v58 = vpop.f32.mrb[201].mxu1 }
 0xac1   : > { %16623 = vtanh.f32 %v12472_v15  ;;  %v12473_v32 = vmax.f32 %v12355_v59, 0.0  ;;  %v13596_v54 = vadd.f32 %v13595_v47, %v13594_v51  ;;  %v13708_v62 = vadd.f32 %v13707_v58, %v13706_v45  ;;  %v13597_v4 = vpop.f32.mrb[202].mxu0  ;;  %v13709_v6 = vpop.f32.mrb[202].mxu1 }
 0xac2   : > { %v13598_v50 = vpop.f32.mrb[203].mxu0  ;;  %v13710_v1 = vpop.f32.mrb[203].mxu1 }
 0xac3   : > { %v16620_v13 = vpop.eup %16619  ;;  %16625 = vtanh.f32 %v12473_v32  ;;  %v12199_v9 = vadd.f32 %v13596_v54, %v19249_v43  ;;  %v13599_v29 = vadd.f32 %v13598_v50, %v13597_v4  ;;  %v13711_v37 = vadd.f32 %v13710_v1, %v13709_v6 }
 0xac4   : > { %12534 = vst [vmem:[%s19259_s30] sm:$0xff] %v16620_v13 }
 0xac5   : > { %v16622_v42 = vpop.eup %16621  ;;  %v12360_v19 = vadd.f32 %v13708_v62, %v12199_v9  ;;  %v12202_v25 = vadd.f32 %v13599_v29, %v19249_v43 }
 0xac6   : > { %12535 = vst [vmem:[%s19259_s30 + $0x8] sm:$0xff] %v16622_v42 }
 0xac7   : > { %v12474_v7 = vmax.f32 %v12360_v19, 0.0  ;;  %v12363_v34 = vadd.f32 %v13711_v37, %v12202_v25  ;;  %v13600_v12 = vpop.f32.mrb[204].mxu0  ;;  %v13712_v0 = vpop.f32.mrb[204].mxu1 }
 0xac8   : > { %v13601_v17 = vpop.f32.mrb[205].mxu0  ;;  %v13713_v57 = vpop.f32.mrb[205].mxu1 }
 0xac9   : > { %16627 = vtanh.f32 %v12474_v7  ;;  %v12475_v14 = vmax.f32 %v12363_v34, 0.0  ;;  %v13602_v55 = vadd.f32 %v13601_v17, %v13600_v12  ;;  %v13714_v28 = vadd.f32 %v13713_v57, %v13712_v0  ;;  %v13603_v31 = vpop.f32.mrb[206].mxu0  ;;  %v13715_v44 = vpop.f32.mrb[206].mxu1 }
 0xaca   : > { %v13604_v33 = vpop.f32.mrb[207].mxu0  ;;  %v13716_v36 = vpop.f32.mrb[207].mxu1 }
 0xacb   : > { %v16624_v20 = vpop.eup %16623  ;;  %16629 = vtanh.f32 %v12475_v14  ;;  %v12207_v10 = vadd.f32 %v13602_v55, %v19249_v43  ;;  %v13605_v24 = vadd.f32 %v13604_v33, %v13603_v31  ;;  %v13717_v27 = vadd.f32 %v13716_v36, %v13715_v44 }
 0xacc   : > { %12536 = vst [vmem:[%s19259_s30 + $0x10] sm:$0xff] %v16624_v20 }
 0xacd   : > { %v16626_v18 = vpop.eup %16625  ;;  %v12368_v23 = vadd.f32 %v13714_v28, %v12207_v10  ;;  %v12210_v3 = vadd.f32 %v13605_v24, %v19249_v43 }
 0xace   : > { %12537 = vst [vmem:[%s19259_s30 + $0x18] sm:$0xff] %v16626_v18 }
 0xacf   : > { %v12476_v41 = vmax.f32 %v12368_v23, 0.0  ;;  %v12371_v35 = vadd.f32 %v13717_v27, %v12210_v3  ;;  %v13606_v16 = vpop.f32.mrb[208].mxu0  ;;  %v13718_v63 = vpop.f32.mrb[208].mxu1 }
 0xad0   : > { %v13607_v39 = vpop.f32.mrb[209].mxu0  ;;  %v13719_v11 = vpop.f32.mrb[209].mxu1 }
 0xad1   : > { %16631 = vtanh.f32 %v12476_v41  ;;  %v12477_v8 = vmax.f32 %v12371_v35, 0.0  ;;  %v13608_v48 = vadd.f32 %v13607_v39, %v13606_v16  ;;  %v13720_v38 = vadd.f32 %v13719_v11, %v13718_v63  ;;  %v13609_v46 = vpop.f32.mrb[210].mxu0  ;;  %v13721_v30 = vpop.f32.mrb[210].mxu1 }
 0xad2   : > { %v13610_v53 = vpop.f32.mrb[211].mxu0  ;;  %v13722_v52 = vpop.f32.mrb[211].mxu1 }
 0xad3   : > { %v16628_v5 = vpop.eup %16627  ;;  %16633 = vtanh.f32 %v12477_v8  ;;  %v12215_v61 = vadd.f32 %v13608_v48, %v19249_v43  ;;  %v13611_v22 = vadd.f32 %v13610_v53, %v13609_v46  ;;  %v13723_v26 = vadd.f32 %v13722_v52, %v13721_v30 }
 0xad4   : > { %12538 = vst [vmem:[%s19259_s30 + $0x20] sm:$0xff] %v16628_v5 }
 0xad5   : > { %v16630_v21 = vpop.eup %16629  ;;  %v12376_v40 = vadd.f32 %v13720_v38, %v12215_v61  ;;  %v12218_v60 = vadd.f32 %v13611_v22, %v19249_v43 }
 0xad6   : > { %12539 = vst [vmem:[%s19259_s30 + $0x28] sm:$0xff] %v16630_v21 }
 0xad7   : > { %v12478_v2 = vmax.f32 %v12376_v40, 0.0  ;;  %v12379_v49 = vadd.f32 %v13723_v26, %v12218_v60  ;;  %v13612_v56 = vpop.f32.mrb[212].mxu0  ;;  %v13724_v15 = vpop.f32.mrb[212].mxu1 }
 0xad8   : > { %v13613_v59 = vpop.f32.mrb[213].mxu0  ;;  %v13725_v51 = vpop.f32.mrb[213].mxu1 }
 0xad9   : > { %16635 = vtanh.f32 %v12478_v2  ;;  %v12479_v45 = vmax.f32 %v12379_v49, 0.0  ;;  %v13614_v47 = vadd.f32 %v13613_v59, %v13612_v56  ;;  %v13726_v58 = vadd.f32 %v13725_v51, %v13724_v15  ;;  %v13615_v32 = vpop.f32.mrb[214].mxu0  ;;  %v13727_v54 = vpop.f32.mrb[214].mxu1 }
 0xada   : > { %v13616_v62 = vpop.f32.mrb[215].mxu0  ;;  %v13728_v4 = vpop.f32.mrb[215].mxu1 }
 0xadb   : > { %v16632_v6 = vpop.eup %16631  ;;  %16637 = vtanh.f32 %v12479_v45  ;;  %v12223_v50 = vadd.f32 %v13614_v47, %v19249_v43  ;;  %v13617_v1 = vadd.f32 %v13616_v62, %v13615_v32  ;;  %v13729_v13 = vadd.f32 %v13728_v4, %v13727_v54 }
 0xadc   : > { %12540 = vst [vmem:[%s19259_s30 + $0x30] sm:$0xff] %v16632_v6 }
 0xadd   : > { %v16634_v9 = vpop.eup %16633  ;;  %v12384_v29 = vadd.f32 %v13726_v58, %v12223_v50  ;;  %v12226_v37 = vadd.f32 %v13617_v1, %v19249_v43 }
 0xade   : > { %12541 = vst [vmem:[%s19259_s30 + $0x38] sm:$0xff] %v16634_v9 }
 0xadf   : > { %v12480_v42 = vmax.f32 %v12384_v29, 0.0  ;;  %v12387_v19 = vadd.f32 %v13729_v13, %v12226_v37  ;;  %v13618_v25 = vpop.f32.mrb[216].mxu0  ;;  %v13730_v7 = vpop.f32.mrb[216].mxu1 }
 0xae0   : > { %v13619_v34 = vpop.f32.mrb[217].mxu0  ;;  %v13731_v12 = vpop.f32.mrb[217].mxu1 }
 0xae1   : > { %16639 = vtanh.f32 %v12480_v42  ;;  %v12481_v0 = vmax.f32 %v12387_v19, 0.0  ;;  %v13620_v17 = vadd.f32 %v13619_v34, %v13618_v25  ;;  %v13732_v57 = vadd.f32 %v13731_v12, %v13730_v7  ;;  %v13621_v14 = vpop.f32.mrb[218].mxu0  ;;  %v13733_v55 = vpop.f32.mrb[218].mxu1 }
 0xae2   : > { %v13622_v28 = vpop.f32.mrb[219].mxu0  ;;  %v13734_v31 = vpop.f32.mrb[219].mxu1 }
 0xae3   : > { %v16636_v44 = vpop.eup %16635  ;;  %16641 = vtanh.f32 %v12481_v0  ;;  %v12231_v33 = vadd.f32 %v13620_v17, %v19249_v43  ;;  %v13623_v36 = vadd.f32 %v13622_v28, %v13621_v14  ;;  %v13735_v20 = vadd.f32 %v13734_v31, %v13733_v55 }
 0xae4   : > { %12542 = vst [vmem:[%s19259_s30 + $0x40] sm:$0xff] %v16636_v44 }
 0xae5   : > { %v16638_v10 = vpop.eup %16637  ;;  %v12392_v24 = vadd.f32 %v13732_v57, %v12231_v33  ;;  %v12234_v27 = vadd.f32 %v13623_v36, %v19249_v43 }
 0xae6   : > { %12543 = vst [vmem:[%s19259_s30 + $0x48] sm:$0xff] %v16638_v10 }
 0xae7   : > { %v12482_v18 = vmax.f32 %v12392_v24, 0.0  ;;  %v12395_v23 = vadd.f32 %v13735_v20, %v12234_v27  ;;  %v13624_v3 = vpop.f32.mrb[220].mxu0  ;;  %v13736_v41 = vpop.f32.mrb[220].mxu1 }
 0xae8   : > { %v13625_v35 = vpop.f32.mrb[221].mxu0  ;;  %v13737_v16 = vpop.f32.mrb[221].mxu1 }
 0xae9   : > { %16643 = vtanh.f32 %v12482_v18  ;;  %v12483_v63 = vmax.f32 %v12395_v23, 0.0  ;;  %v13626_v39 = vadd.f32 %v13625_v35, %v13624_v3  ;;  %v13738_v11 = vadd.f32 %v13737_v16, %v13736_v41  ;;  %v13627_v8 = vpop.f32.mrb[222].mxu0  ;;  %v13739_v48 = vpop.f32.mrb[222].mxu1 }
 0xaea   : > { %v13628_v38 = vpop.f32.mrb[223].mxu0  ;;  %v13740_v46 = vpop.f32.mrb[223].mxu1 }
 0xaeb   : > { %v16640_v30 = vpop.eup %16639  ;;  %16645 = vtanh.f32 %v12483_v63  ;;  %v12239_v53 = vadd.f32 %v13626_v39, %v19249_v43  ;;  %v13629_v52 = vadd.f32 %v13628_v38, %v13627_v8  ;;  %v13741_v5 = vadd.f32 %v13740_v46, %v13739_v48 }
 0xaec   : > { %12544 = vst [vmem:[%s19259_s30 + $0x50] sm:$0xff] %v16640_v30 }
 0xaed   : > { %v16642_v61 = vpop.eup %16641  ;;  %v12400_v22 = vadd.f32 %v13738_v11, %v12239_v53  ;;  %v12242_v26 = vadd.f32 %v13629_v52, %v19249_v43 }
 0xaee   : > { %12545 = vst [vmem:[%s19259_s30 + $0x58] sm:$0xff] %v16642_v61 }
 0xaef   : > { %v12484_v21 = vmax.f32 %v12400_v22, 0.0  ;;  %v12403_v40 = vadd.f32 %v13741_v5, %v12242_v26  ;;  %v13630_v60 = vpop.f32.mrb[224].mxu0  ;;  %v13742_v2 = vpop.f32.mrb[224].mxu1 }
 0xaf0   : > { %v13631_v49 = vpop.f32.mrb[225].mxu0  ;;  %v13743_v56 = vpop.f32.mrb[225].mxu1 }
 0xaf1   : > { %16647 = vtanh.f32 %v12484_v21  ;;  %v12485_v15 = vmax.f32 %v12403_v40, 0.0  ;;  %v13632_v59 = vadd.f32 %v13631_v49, %v13630_v60  ;;  %v13744_v51 = vadd.f32 %v13743_v56, %v13742_v2  ;;  %v13633_v45 = vpop.f32.mrb[226].mxu0  ;;  %v13745_v47 = vpop.f32.mrb[226].mxu1 }
 0xaf2   : > { %v13634_v58 = vpop.f32.mrb[227].mxu0  ;;  %v13746_v32 = vpop.f32.mrb[227].mxu1 }
 0xaf3   : > { %v16644_v54 = vpop.eup %16643  ;;  %16649 = vtanh.f32 %v12485_v15  ;;  %v12247_v62 = vadd.f32 %v13632_v59, %v19249_v43  ;;  %v13635_v4 = vadd.f32 %v13634_v58, %v13633_v45  ;;  %v13747_v6 = vadd.f32 %v13746_v32, %v13745_v47 }
 0xaf4   : > { %12546 = vst [vmem:[%s19259_s30 + $0x60] sm:$0xff] %v16644_v54 }
 0xaf5   : > { %v16646_v50 = vpop.eup %16645  ;;  %v12408_v1 = vadd.f32 %v13744_v51, %v12247_v62  ;;  %v12250_v13 = vadd.f32 %v13635_v4, %v19249_v43 }
 0xaf6   : > { %12547 = vst [vmem:[%s19259_s30 + $0x68] sm:$0xff] %v16646_v50 }
 0xaf7   : > { %v12486_v9 = vmax.f32 %v12408_v1, 0.0  ;;  %v12411_v29 = vadd.f32 %v13747_v6, %v12250_v13  ;;  %v13636_v37 = vpop.f32.mrb[228].mxu0  ;;  %v13748_v42 = vpop.f32.mrb[228].mxu1 }
 0xaf8   : > { %v13637_v19 = vpop.f32.mrb[229].mxu0  ;;  %v13749_v25 = vpop.f32.mrb[229].mxu1 }
 0xaf9   : > { %16651 = vtanh.f32 %v12486_v9  ;;  %v12487_v7 = vmax.f32 %v12411_v29, 0.0  ;;  %v13638_v34 = vadd.f32 %v13637_v19, %v13636_v37  ;;  %v13750_v12 = vadd.f32 %v13749_v25, %v13748_v42  ;;  %v13639_v0 = vpop.f32.mrb[230].mxu0  ;;  %v13751_v17 = vpop.f32.mrb[230].mxu1 }
 0xafa   : > { %v13640_v57 = vpop.f32.mrb[231].mxu0  ;;  %v13752_v14 = vpop.f32.mrb[231].mxu1 }
 0xafb   : > { %v16648_v55 = vpop.eup %16647  ;;  %16653 = vtanh.f32 %v12487_v7  ;;  %v12255_v28 = vadd.f32 %v13638_v34, %v19249_v43  ;;  %v13641_v31 = vadd.f32 %v13640_v57, %v13639_v0  ;;  %v13753_v44 = vadd.f32 %v13752_v14, %v13751_v17 }
 0xafc   : > { %12548 = vst [vmem:[%s19259_s30 + $0x70] sm:$0xff] %v16648_v55 }
 0xafd   : > { %v16650_v33 = vpop.eup %16649  ;;  %v12416_v36 = vadd.f32 %v13750_v12, %v12255_v28  ;;  %v12258_v20 = vadd.f32 %v13641_v31, %v19249_v43 }
 0xafe   : > { %12549 = vst [vmem:[%s19259_s30 + $0x78] sm:$0xff] %v16650_v33 }
 0xaff   : > { %v12488_v10 = vmax.f32 %v12416_v36, 0.0  ;;  %v12419_v24 = vadd.f32 %v13753_v44, %v12258_v20  ;;  %v13642_v27 = vpop.f32.mrb[232].mxu0  ;;  %v13754_v18 = vpop.f32.mrb[232].mxu1 }
 0xb00   : > { %v13643_v23 = vpop.f32.mrb[233].mxu0  ;;  %v13755_v3 = vpop.f32.mrb[233].mxu1 }
 0xb01   : > { %16655 = vtanh.f32 %v12488_v10  ;;  %v12489_v41 = vmax.f32 %v12419_v24, 0.0  ;;  %v13644_v35 = vadd.f32 %v13643_v23, %v13642_v27  ;;  %v13756_v16 = vadd.f32 %v13755_v3, %v13754_v18  ;;  %v13645_v63 = vpop.f32.mrb[234].mxu0  ;;  %v13757_v39 = vpop.f32.mrb[234].mxu1 }
 0xb02   : > { %v13646_v11 = vpop.f32.mrb[235].mxu0  ;;  %v13758_v8 = vpop.f32.mrb[235].mxu1 }
 0xb03   : > { %v16652_v48 = vpop.eup %16651  ;;  %16657 = vtanh.f32 %v12489_v41  ;;  %v12263_v38 = vadd.f32 %v13644_v35, %v19249_v43  ;;  %v13647_v46 = vadd.f32 %v13646_v11, %v13645_v63  ;;  %v13759_v30 = vadd.f32 %v13758_v8, %v13757_v39 }
 0xb04   : > { %12550 = vst [vmem:[%s19259_s30 + $0x80] sm:$0xff] %v16652_v48 }
 0xb05   : > { %v16654_v53 = vpop.eup %16653  ;;  %v12424_v52 = vadd.f32 %v13756_v16, %v12263_v38  ;;  %v12266_v5 = vadd.f32 %v13647_v46, %v19249_v43 }
 0xb06   : > { %12551 = vst [vmem:[%s19259_s30 + $0x88] sm:$0xff] %v16654_v53 }
 0xb07   : > { %v12490_v61 = vmax.f32 %v12424_v52, 0.0  ;;  %v12427_v22 = vadd.f32 %v13759_v30, %v12266_v5  ;;  %v13648_v26 = vpop.f32.mrb[236].mxu0  ;;  %v13760_v21 = vpop.f32.mrb[236].mxu1 }
 0xb08   : > { %v13649_v40 = vpop.f32.mrb[237].mxu0  ;;  %v13761_v60 = vpop.f32.mrb[237].mxu1 }
 0xb09   : > { %16659 = vtanh.f32 %v12490_v61  ;;  %v12491_v2 = vmax.f32 %v12427_v22, 0.0  ;;  %v13650_v49 = vadd.f32 %v13649_v40, %v13648_v26  ;;  %v13762_v56 = vadd.f32 %v13761_v60, %v13760_v21  ;;  %v13651_v15 = vpop.f32.mrb[238].mxu0  ;;  %v13763_v59 = vpop.f32.mrb[238].mxu1 }
 0xb0a   : > { %v13652_v51 = vpop.f32.mrb[239].mxu0  ;;  %v13764_v45 = vpop.f32.mrb[239].mxu1 }
 0xb0b   : > { %v16656_v47 = vpop.eup %16655  ;;  %16661 = vtanh.f32 %v12491_v2  ;;  %v12271_v58 = vadd.f32 %v13650_v49, %v19249_v43  ;;  %v13653_v32 = vadd.f32 %v13652_v51, %v13651_v15  ;;  %v13765_v54 = vadd.f32 %v13764_v45, %v13763_v59 }
 0xb0c   : > { %12552 = vst [vmem:[%s19259_s30 + $0x90] sm:$0xff] %v16656_v47 }
 0xb0d   : > { %v16658_v62 = vpop.eup %16657  ;;  %v12432_v4 = vadd.f32 %v13762_v56, %v12271_v58  ;;  %v12274_v6 = vadd.f32 %v13653_v32, %v19249_v43 }
 0xb0e   : > { %12553 = vst [vmem:[%s19259_s30 + $0x98] sm:$0xff] %v16658_v62 }
 0xb0f   : > { %v12492_v50 = vmax.f32 %v12432_v4, 0.0  ;;  %v12435_v1 = vadd.f32 %v13765_v54, %v12274_v6  ;;  %v13654_v13 = vpop.f32.mrb[240].mxu0  ;;  %v13766_v9 = vpop.f32.mrb[240].mxu1 }
 0xb10   : > { %v13655_v29 = vpop.f32.mrb[241].mxu0  ;;  %v13767_v37 = vpop.f32.mrb[241].mxu1 }
 0xb11   : > { %16663 = vtanh.f32 %v12492_v50  ;;  %v12493_v42 = vmax.f32 %v12435_v1, 0.0  ;;  %v13656_v19 = vadd.f32 %v13655_v29, %v13654_v13  ;;  %v13768_v25 = vadd.f32 %v13767_v37, %v13766_v9  ;;  %v13657_v7 = vpop.f32.mrb[242].mxu0  ;;  %v13769_v34 = vpop.f32.mrb[242].mxu1 }
 0xb12   : > { %v13658_v12 = vpop.f32.mrb[243].mxu0  ;;  %v13770_v0 = vpop.f32.mrb[243].mxu1 }
 0xb13   : > { %v16660_v17 = vpop.eup %16659  ;;  %16665 = vtanh.f32 %v12493_v42  ;;  %v12279_v57 = vadd.f32 %v13656_v19, %v19249_v43  ;;  %v13659_v14 = vadd.f32 %v13658_v12, %v13657_v7  ;;  %v13771_v55 = vadd.f32 %v13770_v0, %v13769_v34 }
 0xb14   : > { %12554 = vst [vmem:[%s19259_s30 + $0xa0] sm:$0xff] %v16660_v17 }
 0xb15   : > { %v16662_v28 = vpop.eup %16661  ;;  %v12440_v31 = vadd.f32 %v13768_v25, %v12279_v57  ;;  %v12282_v44 = vadd.f32 %v13659_v14, %v19249_v43 }
 0xb16   : > { %12555 = vst [vmem:[%s19259_s30 + $0xa8] sm:$0xff] %v16662_v28 }
 0xb17   : > { %v12494_v33 = vmax.f32 %v12440_v31, 0.0  ;;  %v12443_v36 = vadd.f32 %v13771_v55, %v12282_v44  ;;  %v13660_v20 = vpop.f32.mrb[244].mxu0  ;;  %v13772_v10 = vpop.f32.mrb[244].mxu1 }
 0xb18   : > { %v13661_v24 = vpop.f32.mrb[245].mxu0  ;;  %v13773_v27 = vpop.f32.mrb[245].mxu1 }
 0xb19   : > { %16667 = vtanh.f32 %v12494_v33  ;;  %v12495_v18 = vmax.f32 %v12443_v36, 0.0  ;;  %v13662_v23 = vadd.f32 %v13661_v24, %v13660_v20  ;;  %v13774_v3 = vadd.f32 %v13773_v27, %v13772_v10  ;;  %v13663_v41 = vpop.f32.mrb[246].mxu0  ;;  %v13775_v35 = vpop.f32.mrb[246].mxu1 }
 0xb1a   : > { %v13664_v16 = vpop.f32.mrb[247].mxu0  ;;  %v13776_v63 = vpop.f32.mrb[247].mxu1 }
 0xb1b   : > { %v16664_v39 = vpop.eup %16663  ;;  %16669 = vtanh.f32 %v12495_v18  ;;  %v12287_v11 = vadd.f32 %v13662_v23, %v19249_v43  ;;  %v13665_v8 = vadd.f32 %v13664_v16, %v13663_v41  ;;  %v13777_v48 = vadd.f32 %v13776_v63, %v13775_v35 }
 0xb1c   : > { %12556 = vst [vmem:[%s19259_s30 + $0xb0] sm:$0xff] %v16664_v39 }
 0xb1d   : > { %v16666_v38 = vpop.eup %16665  ;;  %v12448_v46 = vadd.f32 %v13774_v3, %v12287_v11  ;;  %v12290_v30 = vadd.f32 %v13665_v8, %v19249_v43 }
 0xb1e   : > { %12557 = vst [vmem:[%s19259_s30 + $0xb8] sm:$0xff] %v16666_v38 }
 0xb1f   : > { %v12496_v53 = vmax.f32 %v12448_v46, 0.0  ;;  %v12451_v52 = vadd.f32 %v13777_v48, %v12290_v30  ;;  %v13666_v5 = vpop.f32.mrb[248].mxu0  ;;  %v13778_v61 = vpop.f32.mrb[248].mxu1 }
 0xb20   : > { %v13667_v22 = vpop.f32.mrb[249].mxu0  ;;  %v13779_v26 = vpop.f32.mrb[249].mxu1 }
 0xb21   : > { %16671 = vtanh.f32 %v12496_v53  ;;  %v12497_v21 = vmax.f32 %v12451_v52, 0.0  ;;  %v13668_v40 = vadd.f32 %v13667_v22, %v13666_v5  ;;  %v13780_v60 = vadd.f32 %v13779_v26, %v13778_v61  ;;  %v13669_v2 = vpop.f32.mrb[250].mxu0  ;;  %v13781_v49 = vpop.f32.mrb[250].mxu1 }
 0xb22   : > { %v13670_v56 = vpop.f32.mrb[251].mxu0  ;;  %v13782_v15 = vpop.f32.mrb[251].mxu1 }
 0xb23   : > { %v16668_v59 = vpop.eup %16667  ;;  %16673 = vtanh.f32 %v12497_v21  ;;  %v12295_v51 = vadd.f32 %v13668_v40, %v19249_v43  ;;  %v13671_v45 = vadd.f32 %v13670_v56, %v13669_v2  ;;  %v13783_v47 = vadd.f32 %v13782_v15, %v13781_v49 }
 0xb24   : > { %12558 = vst [vmem:[%s19259_s30 + $0xc0] sm:$0xff] %v16668_v59 }
 0xb25   : > { %v16670_v58 = vpop.eup %16669  ;;  %v12456_v32 = vadd.f32 %v13780_v60, %v12295_v51  ;;  %v12298_v54 = vadd.f32 %v13671_v45, %v19249_v43 }
 0xb26   : > { %12559 = vst [vmem:[%s19259_s30 + $0xc8] sm:$0xff] %v16670_v58 }
 0xb27   : > { %v12498_v62 = vmax.f32 %v12456_v32, 0.0  ;;  %v12459_v4 = vadd.f32 %v13783_v47, %v12298_v54  ;;  %v13672_v6 = vpop.f32.mrb[252].mxu0  ;;  %v13784_v50 = vpop.f32.mrb[252].mxu1 }
 0xb28   : > { %v13673_v1 = vpop.f32.mrb[253].mxu0  ;;  %v13785_v13 = vpop.f32.mrb[253].mxu1 }
 0xb29   : > { %16675 = vtanh.f32 %v12498_v62  ;;  %v12499_v9 = vmax.f32 %v12459_v4, 0.0  ;;  %v13674_v29 = vadd.f32 %v13673_v1, %v13672_v6  ;;  %v13786_v37 = vadd.f32 %v13785_v13, %v13784_v50  ;;  %v13675_v42 = vpop.f32.mrb[254].mxu0  ;;  %v13787_v19 = vpop.f32.mrb[254].mxu1 }
 0xb2a   : > { %v13676_v25 = vpop.f32.mrb[255].mxu0  ;;  %v13788_v7 = vpop.f32.mrb[255].mxu1 }
 0xb2b   : > { %v16672_v34 = vpop.eup %16671  ;;  %16677 = vtanh.f32 %v12499_v9  ;;  %v12303_v12 = vadd.f32 %v13674_v29, %v19249_v43  ;;  %v13677_v0 = vadd.f32 %v13676_v25, %v13675_v42  ;;  %v13789_v17 = vadd.f32 %v13788_v7, %v13787_v19 }
 0xb2c   : > { %12560 = vst [vmem:[%s19259_s30 + $0xd0] sm:$0xff] %v16672_v34 }
 0xb2d   : > { %v16674_v57 = vpop.eup %16673  ;;  %v12464_v14 = vadd.f32 %v13786_v37, %v12303_v12  ;;  %v12306_v55 = vadd.f32 %v13677_v0, %v19249_v43 }
 0xb2e   : > { %12561 = vst [vmem:[%s19259_s30 + $0xd8] sm:$0xff] %v16674_v57 }
 0xb2f   : > { %v12500_v28 = vmax.f32 %v12464_v14, 0.0  ;;  %v12467_v31 = vadd.f32 %v13789_v17, %v12306_v55 }
 0xb31   : > { %16679 = vtanh.f32 %v12500_v28  ;;  %v12501_v44 = vmax.f32 %v12467_v31, 0.0 }
 0xb33   : > { %v16676_v33 = vpop.eup %16675  ;;  %16681 = vtanh.f32 %v12501_v44 }
 0xb34   : > { %12562 = vst [vmem:[%s19259_s30 + $0xe0] sm:$0xff] %v16676_v33 }
 0xb35   : > { %v16678_v36 = vpop.eup %16677 }
 0xb36   : > { %12563 = vst [vmem:[%s19259_s30 + $0xe8] sm:$0xff] %v16678_v36 }
 0xb3b   : > { %v16680_v20 = vpop.eup %16679 }
 0xb3c   : > { %12564 = vst [vmem:[%s19259_s30 + $0xf0] sm:$0xff] %v16680_v20 }
 0xb3d   : > { %v16682_v43 = vpop.eup %16681 }
 0xb3e   : > { %12565 = vst [vmem:[%s19259_s30 + $0xf8] sm:$0xff] %v16682_v43 }
 0xb3f   : > { %16864 = shalt.err (!%p16861_p2)
}
 0xb40   : > { %s16865_s5 = scalar_lea.hbm %s19323_s21, 4096  ;;  %s16869_s22 = scalar_lea.hbm %s19441_s17, 8192 }
 0xb41   : > { %p16866_p3 = scmp.ne.s32.totalorder %s19323_s21, %s16865_s5  ;;  %p16870_p7 = scmp.lt.u32.totalorder %s19323_s21, %s19441_s17 }
 0xb42   : > { %p16871_p8 = scmp.lt.u32.totalorder %s16869_s22, %s16865_s5  ;;  %p16873_p13 = scmp.lt.u32.totalorder %s16865_s5, %s19323_s21 }
 0xb43   : > { %p16867_p4 = pnand %p16866_p3, %p19442_p1 }
 0xb44   : > { %p16872_p11 = por %p16871_p8, %p16870_p7 }
 0xb45   : > { %p16868_p12 = pneg %p16867_p4 }
 0xb46   : > { %p16874_p6 = por %p16873_p13, %p16872_p11 }
 0xb48   : > { %p16875_p9 = pnand %p16874_p6, %p16868_p12 }
 0xb4a   : > { %16878 = shalt.err (!%p16875_p9)
}
 0xb4b   : > { %s16941_s20 = smov 128   ;;  %s16942_s18 = smov 8  }
 0xb4c   : > { %15350 = dma.vmem_to_hbm [thread:$0]  (%p19442_p1), %s19325_s23, 4096, %s19323_s21, %s19331_s29, %s16941_s20, %s16941_s20, %s16942_s18  }
 0xb4d PF: > { %s19443_s25 = sld [smem:[#allocation22_spill]]  ;;  %s19444_s0 = sld [smem:[#allocation19_spill]] }
 0xb4e   : > { %s19445_s28 = sld [smem:[#allocation26_spill]] }
 0xb53   : > { %p15387_p5 = scmp.ge.s32.totalorder %s19443_s25, 2  ;;  %s12595_s24 = sand.u32 1, %s19444_s0  }
 0xb54   : > { %p19446_p0 = scmp.ne.s32.totalorder %s19445_s28, 0  ;;  %s12596_s26 = scalar_lea.sflag [#allocation4], %s12595_s24 }
 0xb56   : > { %p15372_p10 = pnand %p15387_p5, %p19446_p0 }
 0xb58   : > { %16912 = dma.done.wait (!%p15372_p10), %s12596_s26, 4096  }
 0xb59   : > { %16914 = vsyncadd (!%p15372_p10), %s12596_s26, 4294963200  ;;  %s19447_s27 = sld [smem:[#allocation23_spill]]  ;;  %s19448_s24 = sld [smem:[#allocation20_spill]] }
 0xb5a   : > { %s19449_s25 = sld [smem:[#allocation21_spill]]  ;;  %s19450_s26 = sld [smem:[#allocation24_spill]] }
 0xb5f   : > { %p31_p2 = scmp.ge.s32.totalorder %s19447_s27, 4  }
 0xb61   :  { %33 = sbr.rel (!%p31_p2) target bundleno = 14 (0xe), region = 148 }
 0xb68   :  { %12601 = vsyncpa [#allocation3], 1 }
 0xb69   :  { %12603 = vsyncpa [#allocation3 + $0x1], 1 }
 0xb6a   :  { %12604 = vsyncpa [#allocation6], 1 }
 0xb6b   :  { %12605 = vsyncpa [#allocation9], 1 }
 0xb6c   :  { %12606 = vsyncpa [#allocation12], 1 }
 0xb6d   :  { %12607 = vsyncpa [#allocation4], 1 }
 0xb6e   :  { %12609 = vsyncpa [#allocation4 + $0x1], 1 }

</bundles_post_ra>
